<compile_context>
chip_gen: v6e
topology: v6e:2x2x1
jax: 0.10.0
libtpu: 0.0.40
codegen_flags: <defaults>
</compile_context>

<pallas_src>
import functools

import jax
import jax.numpy as jnp
from jax.experimental import pallas as pl
from jax.experimental.pallas import tpu as pltpu


# ----------------------------- helpers ---------------------------------------

def _round_up(x, m):
    return (x + m - 1) // m * m


def _pick_tile(dim, candidates):
    for c in candidates:
        if dim % c == 0:
            return c
    return dim


# ----------------------------- Pallas kernels --------------------------------

def _mm_bn_kernel(x_ref, w_ref, sh_ref, o_ref, acc_ref, *, relu):
    k = pl.program_id(2)

    @pl.when(k == 0)
    def _():
        acc_ref[...] = jnp.zeros_like(acc_ref)

    acc_ref[...] += jnp.dot(x_ref[...], w_ref[...],
                            preferred_element_type=jnp.float32)

    @pl.when(k == pl.num_programs(2) - 1)
    def _():
        out = acc_ref[...] + sh_ref[...]
        if relu:
            out = jnp.maximum(out, 0.0)
        o_ref[...] = out.astype(o_ref.dtype)


def _mm_bn_res_kernel(x_ref, w_ref, sh_ref, r_ref, o_ref, acc_ref, *, relu):
    k = pl.program_id(2)

    @pl.when(k == 0)
    def _():
        acc_ref[...] = jnp.zeros_like(acc_ref)

    acc_ref[...] += jnp.dot(x_ref[...], w_ref[...],
                            preferred_element_type=jnp.float32)

    @pl.when(k == pl.num_programs(2) - 1)
    def _():
        out = acc_ref[...] + sh_ref[...] + r_ref[...].astype(jnp.float32)
        if relu:
            out = jnp.maximum(out, 0.0)
        o_ref[...] = out.astype(o_ref.dtype)


def fused_matmul_bn(a, b, shift, residual, relu, out_dtype=jnp.bfloat16):
    """out = relu?((a @ b) + shift (+ residual)); BN scale is pre-folded in b.

    a: (M, K) bf16, b: (K, N) bf16, shift: (1, N) f32,
    residual: (M, N) bf16 or None.  K is a multiple of 128 (weights are
    pre-padded, activations padded by the caller when needed).
    """
    M, K = a.shape
    Kb, N = b.shape
    assert K == Kb, (K, Kb)

    # --- tile selection (bounded so double-buffered tiles stay well inside
    #     a 48 MiB VMEM budget on every TPU generation) ----------------------
    Mp = _round_up(M, 8)
    tm = _pick_tile(Mp, (256, 128, 64, 32, 16, 8))
    tk = _pick_tile(K, (512, 256, 128)) if K % 128 == 0 else K
    tn = _pick_tile(N, (512, 256, 128)) if N % 128 == 0 else N

    if Mp != M:
        a = jnp.pad(a, ((0, Mp - M), (0, 0)))
        if residual is not None:
            residual = jnp.pad(residual, ((0, Mp - M), (0, 0)))

    grid = (Mp // tm, N // tn, K // tk)

    in_specs = [
        pl.BlockSpec((tm, tk), lambda i, j, k: (i, k)),
        pl.BlockSpec((tk, tn), lambda i, j, k: (k, j)),
        pl.BlockSpec((1, tn), lambda i, j, k: (0, j)),
    ]
    args = [a, b, shift]
    if residual is not None:
        in_specs.append(pl.BlockSpec((tm, tn), lambda i, j, k: (i, j)))
        args.append(residual)
        kernel = functools.partial(_mm_bn_res_kernel, relu=relu)
    else:
        kernel = functools.partial(_mm_bn_kernel, relu=relu)

    out = pl.pallas_call(
        kernel,
        grid_spec=pltpu.PrefetchScalarGridSpec(
            num_scalar_prefetch=0,
            grid=grid,
            in_specs=in_specs,
            out_specs=pl.BlockSpec((tm, tn), lambda i, j, k: (i, j)),
            scratch_shapes=[pltpu.VMEM((tm, tn), jnp.float32)],
        ),
        out_shape=jax.ShapeDtypeStruct((Mp, N), out_dtype),
        compiler_params=pltpu.CompilerParams(
            dimension_semantics=("parallel", "parallel", "arbitrary"),
            vmem_limit_bytes=48 * 1024 * 1024,
        ),
    )(*args)

    if Mp != M:
        out = out[:M]
    return out


# ------------------------------ JAX glue --------------------------------------

def im2col(x_nhwc, kh, kw, stride, padding):
    """Extract conv patches. Returns (N*Ho*Wo, kh*kw*C), Ho, Wo."""
    N, H, W, C = x_nhwc.shape
    if padding > 0:
        x_nhwc = jnp.pad(
            x_nhwc, ((0, 0), (padding, padding), (padding, padding), (0, 0)))
    Hp = H + 2 * padding
    Wp = W + 2 * padding
    Ho = (Hp - kh) // stride + 1
    Wo = (Wp - kw) // stride + 1
    patches = []
    for i in range(kh):
        for j in range(kw):
            patches.append(
                x_nhwc[:, i:i + stride * (Ho - 1) + 1:stride,
                       j:j + stride * (Wo - 1) + 1:stride, :])
    cols = jnp.concatenate(patches, axis=-1)  # (N, Ho, Wo, kh*kw*C)
    return cols.reshape(N * Ho * Wo, kh * kw * C), Ho, Wo


def conv_bn(x_nhwc, layer, *, stride, padding, relu, residual=None):
    """Conv2d(bias=False) + BatchNorm (+residual) (+ReLU) via fused Pallas GEMM.

    x_nhwc: bf16 activations in NHWC.  `layer` carries the pre-transposed,
    BN-scale-folded, K-padded bf16 weight matrix and the f32 BN shift.
    """
    kh, kw, cin, cout = layer["kh"], layer["kw"], layer["cin"], layer["cout"]
    N = x_nhwc.shape[0]

    if kh == 1 and kw == 1:
        # 1x1 conv: pure channel GEMM, optionally spatially strided -- no
        # im2col materialization at all.
        if stride > 1:
            x_nhwc = x_nhwc[:, ::stride, ::stride, :]
        _, Ho, Wo, _ = x_nhwc.shape
        a = x_nhwc.reshape(N * Ho * Wo, cin)
    else:
        # TODO(synk): kh>1 convs still materialize im2col patches in HBM
        # (9x/49x read amplification); a tap-accumulating grid axis reading
        # shifted windows of the raw NHWC tensor would remove this.
        a, Ho, Wo = im2col(x_nhwc, kh, kw, stride, padding)

    Kp = layer["w"].shape[0]
    if a.shape[1] != Kp:  # pad K only for the few non-128-aligned early layers
        a = jnp.pad(a, ((0, 0), (0, Kp - a.shape[1])))

    res2d = None
    if residual is not None:
        res2d = residual.reshape(N * Ho * Wo, cout)

    out2d = fused_matmul_bn(a, layer["w"], layer["shift"], res2d, relu)
    return out2d.reshape(N, Ho, Wo, cout)


# --------------------------- parameter construction ---------------------------

def init_conv(key, cout, cin, kh, kw):
    # kaiming_normal_(mode='fan_out', nonlinearity='relu')
    fan_out = cout * kh * kw
    std = (2.0 / fan_out) ** 0.5
    return std * jax.random.normal(key, (cout, cin, kh, kw), dtype=jnp.float32)


def make_conv_bn(key, cin, cout, kh, kw, eps=1e-5):
    """Build conv weight + inference-mode BN, folded for the fused kernel."""
    w = init_conv(key, cout, cin, kh, kw)
    gamma = jnp.ones((cout,), jnp.float32)
    beta = jnp.zeros((cout,), jnp.float32)
    running_mean = jnp.zeros((cout,), jnp.float32)
    running_var = jnp.ones((cout,), jnp.float32)
    scale = gamma / jnp.sqrt(running_var + eps)
    shift = beta - running_mean * scale

    # (cout, cin, kh, kw) -> (kh, kw, cin, cout) -> (kh*kw*cin, cout),
    # fold BN scale into the weight, pad K to a 128 multiple, cast to bf16.
    K = kh * kw * cin
    wmat = jnp.transpose(w, (2, 3, 1, 0)).reshape(K, cout) * scale[None, :]
    Kp = _round_up(K, 128)
    if Kp != K:
        wmat = jnp.pad(wmat, ((0, Kp - K), (0, 0)))
    return {
        "w": wmat.astype(jnp.bfloat16),
        "shift": shift.reshape(1, -1).astype(jnp.float32),
        "kh": kh, "kw": kw, "cin": cin, "cout": cout,
    }


def build_resnet50_params(key, layers=(3, 4, 6), cfg=(64, 128, 256)):
    kit = iter(jax.random.split(key, 256))
    params = {"conv1": make_conv_bn(next(kit), 3, cfg[0], 7, 7)}
    inplanes = cfg[0]
    strides = (2, 2, 1)
    stages = []
    for planes, blocks, stage_stride in zip(cfg, layers, strides):
        stage = []
        for b in range(blocks):
            s = stage_stride if b == 0 else 1
            block = {
                "conv1": make_conv_bn(next(kit), inplanes, planes, 1, 1),
                "conv2": make_conv_bn(next(kit), planes, planes, 3, 3),
                "conv3": make_conv_bn(next(kit), planes, planes * 4, 1, 1),
                "stride": s,
                "ds": None,
            }
            if b == 0 and (stage_stride != 1 or inplanes != planes * 4):
                block["ds"] = make_conv_bn(next(kit), inplanes, planes * 4, 1, 1)
                block["ds_stride"] = stage_stride
            stage.append(block)
            inplanes = planes * 4
        stages.append(stage)
    params["stages"] = stages
    return params


# ------------------------------- forward pass ---------------------------------

def bottleneck_forward(x_nhwc, block):
    out = conv_bn(x_nhwc, block["conv1"], stride=1, padding=0, relu=True)
    out = conv_bn(out, block["conv2"], stride=block["stride"], padding=1,
                  relu=True)
    if block["ds"] is not None:
        residual = conv_bn(x_nhwc, block["ds"], stride=block["ds_stride"],
                           padding=0, relu=False)
    else:
        residual = x_nhwc
    # conv3 + bn3 + residual add + final relu, fused in one kernel
    out = conv_bn(out, block["conv3"], stride=1, padding=0, relu=True,
                  residual=residual)
    return out


def resnet50_forward(x_nchw, params):
    # NCHW -> NHWC (channels on the 128-lane axis), bf16 activations
    x = jnp.transpose(x_nchw, (0, 2, 3, 1)).astype(jnp.bfloat16)
    x = conv_bn(x, params["conv1"], stride=2, padding=3, relu=True)
    for stage in params["stages"]:
        for block in stage:
            x = bottleneck_forward(x, block)
    # NHWC -> NCHW, back to f32 to match the PyTorch output convention
    return jnp.transpose(x, (0, 3, 1, 2)).astype(jnp.float32)


# ----------------------------------- main --------------------------------------

if __name__ == "__main__":
    key = jax.random.PRNGKey(0)
    k_params, k_input = jax.random.split(key)

    params = build_resnet50_params(k_params)

    # small NCHW input, consistent with conv1 (3 -> 64, 7x7, stride 2)
    x = jax.random.normal(k_input, (2, 3, 16, 16), dtype=jnp.float32)

    fwd = jax.jit(lambda inp: resnet50_forward(inp, params))
    out = jax.block_until_ready(fwd(x))

    # 16 -> /2 (conv1) -> /2 (layer1) -> /2 (layer2) -> x1 (layer3)
    assert out.shape == (2, 1024, 2, 2), out.shape
    assert bool(jnp.all(jnp.isfinite(out)))
    print("KERNEL_OK")
</pallas_src>

<mosaic_0001>
module attributes {stable_mosaic.version = 11 : i64} {
  func.func @_mm_bn_kernel(%arg0: i32, %arg1: i32, %arg2: i32, %arg3: memref<128x128xbf16, #tpu.memory_space<vmem>>, %arg4: memref<128x64xbf16, #tpu.memory_space<vmem>>, %arg5: memref<1x64xf32, #tpu.memory_space<vmem>>, %arg6: memref<128x64xbf16, #tpu.memory_space<vmem>>, %arg7: memref<128x64xf32, #tpu.memory_space<vmem>>) attributes {dimension_semantics = [#tpu.dimension_semantics<parallel>, #tpu.dimension_semantics<parallel>, #tpu.dimension_semantics<arbitrary>], iteration_bounds = array<i64: 1, 1, 1>, scalar_prefetch = 0 : i64, scratch_operands = 1 : i64, tpu.core_type = #tpu.core_type<tc>, window_params = [{transform_indices = @transform_0, window_bounds = array<i64: 128, 128>}, {transform_indices = @transform_1, window_bounds = array<i64: 128, 64>}, {transform_indices = @transform_2, window_bounds = array<i64: 1, 64>}, {transform_indices = @transform_3, window_bounds = array<i64: 128, 64>}]} {
    %c0_i32 = arith.constant 0 : i32
    %0 = arith.cmpi eq, %arg2, %c0_i32 : i32
    %1 = arith.extui %0 : i1 to i32
    %c0_i32_0 = arith.constant 0 : i32
    %2 = arith.cmpi ne, %1, %c0_i32_0 : i32
    scf.if %2 {
      %cst_10 = arith.constant 0.000000e+00 : f32
      %12 = vector.broadcast %cst_10 : f32 to vector<128x64xf32>
      %c0_11 = arith.constant 0 : index
      %c0_12 = arith.constant 0 : index
      %13 = vector.load %arg7[%c0_11, %c0_12] : memref<128x64xf32, #tpu.memory_space<vmem>>, vector<128x64xf32>
      tpu.vector_store %arg7[%c0_11, %c0_12], %12 {strides = array<i32>} : memref<128x64xf32, #tpu.memory_space<vmem>>, vector<128x64xf32>,
    } else {
    }
    %c0 = arith.constant 0 : index
    %c0_1 = arith.constant 0 : index
    %3 = vector.load %arg7[%c0, %c0_1] : memref<128x64xf32, #tpu.memory_space<vmem>>, vector<128x64xf32>
    %c0_2 = arith.constant 0 : index
    %c0_3 = arith.constant 0 : index
    %4 = vector.load %arg3[%c0_2, %c0_3] : memref<128x128xbf16, #tpu.memory_space<vmem>>, vector<128x128xbf16>
    %c0_4 = arith.constant 0 : index
    %c0_5 = arith.constant 0 : index
    %5 = vector.load %arg4[%c0_4, %c0_5] : memref<128x64xbf16, #tpu.memory_space<vmem>>, vector<128x64xbf16>
    %cst = arith.constant dense<0.000000e+00> : vector<128x64xf32>
    %6 = tpu.matmul %4, %5, %cst {dimension_numbers = #tpu.dot_dimension_numbers<[1], [0], [0], [1], [0, 0, 1, 1], [], []>} : vector<128x128xbf16>, vector<128x64xbf16>, vector<128x64xf32> -> vector<128x64xf32>
    %7 = arith.addf %3, %6 : vector<128x64xf32>
    %c0_6 = arith.constant 0 : index
    %c0_7 = arith.constant 0 : index
    %8 = vector.load %arg7[%c0_6, %c0_7] : memref<128x64xf32, #tpu.memory_space<vmem>>, vector<128x64xf32>
    tpu.vector_store %arg7[%c0_6, %c0_7], %7 {strides = array<i32>} : memref<128x64xf32, #tpu.memory_space<vmem>>, vector<128x64xf32>,
    %c0_i32_8 = arith.constant 0 : i32
    %9 = arith.cmpi eq, %arg2, %c0_i32_8 : i32
    %10 = arith.extui %9 : i1 to i32
    %c0_i32_9 = arith.constant 0 : i32
    %11 = arith.cmpi ne, %10, %c0_i32_9 : i32
    scf.if %11 {
      %c0_10 = arith.constant 0 : index
      %c0_11 = arith.constant 0 : index
      %12 = vector.load %arg7[%c0_10, %c0_11] : memref<128x64xf32, #tpu.memory_space<vmem>>, vector<128x64xf32>
      %c0_12 = arith.constant 0 : index
      %c0_13 = arith.constant 0 : index
      %13 = vector.load %arg5[%c0_12, %c0_13] : memref<1x64xf32, #tpu.memory_space<vmem>>, vector<1x64xf32>
      %14 = vector.broadcast %13 : vector<1x64xf32> to vector<128x64xf32>
      %15 = arith.addf %12, %14 : vector<128x64xf32>
      %cst_14 = arith.constant 0.000000e+00 : f32
      %16 = vector.broadcast %cst_14 : f32 to vector<128x64xf32>
      %17 = arith.maximumf %15, %16 : vector<128x64xf32>
      %18 = arith.truncf %17 : vector<128x64xf32> to vector<128x64xbf16>
      %c0_15 = arith.constant 0 : index
      %c0_16 = arith.constant 0 : index
      %19 = vector.load %arg6[%c0_15, %c0_16] : memref<128x64xbf16, #tpu.memory_space<vmem>>, vector<128x64xbf16>
      tpu.vector_store %arg6[%c0_15, %c0_16], %18 {strides = array<i32>} : memref<128x64xbf16, #tpu.memory_space<vmem>>, vector<128x64xbf16>,
    } else {
    }
    return
  }
  func.func @transform_0(%arg0: i32, %arg1: i32, %arg2: i32) -> (i32, i32) {
    %c0_i32 = arith.constant 0 : i32
    return %arg0, %arg2 : i32, i32
  }
  func.func @transform_1(%arg0: i32, %arg1: i32, %arg2: i32) -> (i32, i32) {
    %c0_i32 = arith.constant 0 : i32
    return %arg2, %arg1 : i32, i32
  }
  func.func @transform_2(%arg0: i32, %arg1: i32, %arg2: i32) -> (i32, i32) {
    %c0_i32 = arith.constant 0 : i32
    %c0_i32_0 = arith.constant 0 : i32
    return %c0_i32, %arg1 : i32, i32
  }
  func.func @transform_3(%arg0: i32, %arg1: i32, %arg2: i32) -> (i32, i32) {
    %c0_i32 = arith.constant 0 : i32
    return %arg0, %arg1 : i32, i32
  }
}

module attributes {stable_mosaic.version = 11 : i64} {
  func.func @_mm_bn_kernel(%arg0: i32, %arg1: i32, %arg2: i32, %arg3: memref<128x256xbf16, #tpu.memory_space<vmem>>, %arg4: memref<256x64xbf16, #tpu.memory_space<vmem>>, %arg5: memref<1x64xf32, #tpu.memory_space<vmem>>, %arg6: memref<128x64xbf16, #tpu.memory_space<vmem>>, %arg7: memref<128x64xf32, #tpu.memory_space<vmem>>) attributes {dimension_semantics = [#tpu.dimension_semantics<parallel>, #tpu.dimension_semantics<parallel>, #tpu.dimension_semantics<arbitrary>], iteration_bounds = array<i64: 1, 1, 1>, scalar_prefetch = 0 : i64, scratch_operands = 1 : i64, tpu.core_type = #tpu.core_type<tc>, window_params = [{transform_indices = @transform_0, window_bounds = array<i64: 128, 256>}, {transform_indices = @transform_1, window_bounds = array<i64: 256, 64>}, {transform_indices = @transform_2, window_bounds = array<i64: 1, 64>}, {transform_indices = @transform_3, window_bounds = array<i64: 128, 64>}]} {
    %c0_i32 = arith.constant 0 : i32
    %0 = arith.cmpi eq, %arg2, %c0_i32 : i32
    %1 = arith.extui %0 : i1 to i32
    %c0_i32_0 = arith.constant 0 : i32
    %2 = arith.cmpi ne, %1, %c0_i32_0 : i32
    scf.if %2 {
      %cst_10 = arith.constant 0.000000e+00 : f32
      %12 = vector.broadcast %cst_10 : f32 to vector<128x64xf32>
      %c0_11 = arith.constant 0 : index
      %c0_12 = arith.constant 0 : index
      %13 = vector.load %arg7[%c0_11, %c0_12] : memref<128x64xf32, #tpu.memory_space<vmem>>, vector<128x64xf32>
      tpu.vector_store %arg7[%c0_11, %c0_12], %12 {strides = array<i32>} : memref<128x64xf32, #tpu.memory_space<vmem>>, vector<128x64xf32>,
    } else {
    }
    %c0 = arith.constant 0 : index
    %c0_1 = arith.constant 0 : index
    %3 = vector.load %arg7[%c0, %c0_1] : memref<128x64xf32, #tpu.memory_space<vmem>>, vector<128x64xf32>
    %c0_2 = arith.constant 0 : index
    %c0_3 = arith.constant 0 : index
    %4 = vector.load %arg3[%c0_2, %c0_3] : memref<128x256xbf16, #tpu.memory_space<vmem>>, vector<128x256xbf16>
    %c0_4 = arith.constant 0 : index
    %c0_5 = arith.constant 0 : index
    %5 = vector.load %arg4[%c0_4, %c0_5] : memref<256x64xbf16, #tpu.memory_space<vmem>>, vector<256x64xbf16>
    %cst = arith.constant dense<0.000000e+00> : vector<128x64xf32>
    %6 = tpu.matmul %4, %5, %cst {dimension_numbers = #tpu.dot_dimension_numbers<[1], [0], [0], [1], [0, 0, 1, 1], [], []>} : vector<128x256xbf16>, vector<256x64xbf16>, vector<128x64xf32> -> vector<128x64xf32>
    %7 = arith.addf %3, %6 : vector<128x64xf32>
    %c0_6 = arith.constant 0 : index
    %c0_7 = arith.constant 0 : index
    %8 = vector.load %arg7[%c0_6, %c0_7] : memref<128x64xf32, #tpu.memory_space<vmem>>, vector<128x64xf32>
    tpu.vector_store %arg7[%c0_6, %c0_7], %7 {strides = array<i32>} : memref<128x64xf32, #tpu.memory_space<vmem>>, vector<128x64xf32>,
    %c0_i32_8 = arith.constant 0 : i32
    %9 = arith.cmpi eq, %arg2, %c0_i32_8 : i32
    %10 = arith.extui %9 : i1 to i32
    %c0_i32_9 = arith.constant 0 : i32
    %11 = arith.cmpi ne, %10, %c0_i32_9 : i32
    scf.if %11 {
      %c0_10 = arith.constant 0 : index
      %c0_11 = arith.constant 0 : index
      %12 = vector.load %arg7[%c0_10, %c0_11] : memref<128x64xf32, #tpu.memory_space<vmem>>, vector<128x64xf32>
      %c0_12 = arith.constant 0 : index
      %c0_13 = arith.constant 0 : index
      %13 = vector.load %arg5[%c0_12, %c0_13] : memref<1x64xf32, #tpu.memory_space<vmem>>, vector<1x64xf32>
      %14 = vector.broadcast %13 : vector<1x64xf32> to vector<128x64xf32>
      %15 = arith.addf %12, %14 : vector<128x64xf32>
      %cst_14 = arith.constant 0.000000e+00 : f32
      %16 = vector.broadcast %cst_14 : f32 to vector<128x64xf32>
      %17 = arith.maximumf %15, %16 : vector<128x64xf32>
      %18 = arith.truncf %17 : vector<128x64xf32> to vector<128x64xbf16>
      %c0_15 = arith.constant 0 : index
      %c0_16 = arith.constant 0 : index
      %19 = vector.load %arg6[%c0_15, %c0_16] : memref<128x64xbf16, #tpu.memory_space<vmem>>, vector<128x64xbf16>
      tpu.vector_store %arg6[%c0_15, %c0_16], %18 {strides = array<i32>} : memref<128x64xbf16, #tpu.memory_space<vmem>>, vector<128x64xbf16>,
    } else {
    }
    return
  }
  func.func @transform_0(%arg0: i32, %arg1: i32, %arg2: i32) -> (i32, i32) {
    %c0_i32 = arith.constant 0 : i32
    return %arg0, %arg2 : i32, i32
  }
  func.func @transform_1(%arg0: i32, %arg1: i32, %arg2: i32) -> (i32, i32) {
    %c0_i32 = arith.constant 0 : i32
    return %arg2, %arg1 : i32, i32
  }
  func.func @transform_2(%arg0: i32, %arg1: i32, %arg2: i32) -> (i32, i32) {
    %c0_i32 = arith.constant 0 : i32
    %c0_i32_0 = arith.constant 0 : i32
    return %c0_i32, %arg1 : i32, i32
  }
  func.func @transform_3(%arg0: i32, %arg1: i32, %arg2: i32) -> (i32, i32) {
    %c0_i32 = arith.constant 0 : i32
    return %arg0, %arg1 : i32, i32
  }
}

module attributes {stable_mosaic.version = 11 : i64} {
  func.func @_mm_bn_kernel(%arg0: i32, %arg1: i32, %arg2: i32, %arg3: memref<32x128xbf16, #tpu.memory_space<vmem>>, %arg4: memref<128x64xbf16, #tpu.memory_space<vmem>>, %arg5: memref<1x64xf32, #tpu.memory_space<vmem>>, %arg6: memref<32x64xbf16, #tpu.memory_space<vmem>>, %arg7: memref<32x64xf32, #tpu.memory_space<vmem>>) attributes {dimension_semantics = [#tpu.dimension_semantics<parallel>, #tpu.dimension_semantics<parallel>, #tpu.dimension_semantics<arbitrary>], iteration_bounds = array<i64: 1, 1, 5>, scalar_prefetch = 0 : i64, scratch_operands = 1 : i64, tpu.core_type = #tpu.core_type<tc>, window_params = [{transform_indices = @transform_0, window_bounds = array<i64: 32, 128>}, {transform_indices = @transform_1, window_bounds = array<i64: 128, 64>}, {transform_indices = @transform_2, window_bounds = array<i64: 1, 64>}, {transform_indices = @transform_3, window_bounds = array<i64: 32, 64>}]} {
    %c0_i32 = arith.constant 0 : i32
    %0 = arith.cmpi eq, %arg2, %c0_i32 : i32
    %1 = arith.extui %0 : i1 to i32
    %c0_i32_0 = arith.constant 0 : i32
    %2 = arith.cmpi ne, %1, %c0_i32_0 : i32
    scf.if %2 {
      %cst_9 = arith.constant 0.000000e+00 : f32
      %12 = vector.broadcast %cst_9 : f32 to vector<32x64xf32>
      %c0_10 = arith.constant 0 : index
      %c0_11 = arith.constant 0 : index
      %13 = vector.load %arg7[%c0_10, %c0_11] : memref<32x64xf32, #tpu.memory_space<vmem>>, vector<32x64xf32>
      tpu.vector_store %arg7[%c0_10, %c0_11], %12 {strides = array<i32>} : memref<32x64xf32, #tpu.memory_space<vmem>>, vector<32x64xf32>,
    } else {
    }
    %c0 = arith.constant 0 : index
    %c0_1 = arith.constant 0 : index
    %3 = vector.load %arg7[%c0, %c0_1] : memref<32x64xf32, #tpu.memory_space<vmem>>, vector<32x64xf32>
    %c0_2 = arith.constant 0 : index
    %c0_3 = arith.constant 0 : index
    %4 = vector.load %arg3[%c0_2, %c0_3] : memref<32x128xbf16, #tpu.memory_space<vmem>>, vector<32x128xbf16>
    %c0_4 = arith.constant 0 : index
    %c0_5 = arith.constant 0 : index
    %5 = vector.load %arg4[%c0_4, %c0_5] : memref<128x64xbf16, #tpu.memory_space<vmem>>, vector<128x64xbf16>
    %cst = arith.constant dense<0.000000e+00> : vector<32x64xf32>
    %6 = tpu.matmul %4, %5, %cst {dimension_numbers = #tpu.dot_dimension_numbers<[1], [0], [0], [1], [0, 0, 1, 1], [], []>} : vector<32x128xbf16>, vector<128x64xbf16>, vector<32x64xf32> -> vector<32x64xf32>
    %7 = arith.addf %3, %6 : vector<32x64xf32>
    %c0_6 = arith.constant 0 : index
    %c0_7 = arith.constant 0 : index
    %8 = vector.load %arg7[%c0_6, %c0_7] : memref<32x64xf32, #tpu.memory_space<vmem>>, vector<32x64xf32>
    tpu.vector_store %arg7[%c0_6, %c0_7], %7 {strides = array<i32>} : memref<32x64xf32, #tpu.memory_space<vmem>>, vector<32x64xf32>,
    %c4_i32 = arith.constant 4 : i32
    %9 = arith.cmpi eq, %arg2, %c4_i32 : i32
    %10 = arith.extui %9 : i1 to i32
    %c0_i32_8 = arith.constant 0 : i32
    %11 = arith.cmpi ne, %10, %c0_i32_8 : i32
    scf.if %11 {
      %c0_9 = arith.constant 0 : index
      %c0_10 = arith.constant 0 : index
      %12 = vector.load %arg7[%c0_9, %c0_10] : memref<32x64xf32, #tpu.memory_space<vmem>>, vector<32x64xf32>
      %c0_11 = arith.constant 0 : index
      %c0_12 = arith.constant 0 : index
      %13 = vector.load %arg5[%c0_11, %c0_12] : memref<1x64xf32, #tpu.memory_space<vmem>>, vector<1x64xf32>
      %14 = vector.broadcast %13 : vector<1x64xf32> to vector<32x64xf32>
      %15 = arith.addf %12, %14 : vector<32x64xf32>
      %cst_13 = arith.constant 0.000000e+00 : f32
      %16 = vector.broadcast %cst_13 : f32 to vector<32x64xf32>
      %17 = arith.maximumf %15, %16 : vector<32x64xf32>
      %18 = arith.truncf %17 : vector<32x64xf32> to vector<32x64xbf16>
      %c0_14 = arith.constant 0 : index
      %c0_15 = arith.constant 0 : index
      %19 = vector.load %arg6[%c0_14, %c0_15] : memref<32x64xbf16, #tpu.memory_space<vmem>>, vector<32x64xbf16>
      tpu.vector_store %arg6[%c0_14, %c0_15], %18 {strides = array<i32>} : memref<32x64xbf16, #tpu.memory_space<vmem>>, vector<32x64xbf16>,
    } else {
    }
    return
  }
  func.func @transform_0(%arg0: i32, %arg1: i32, %arg2: i32) -> (i32, i32) {
    %c0_i32 = arith.constant 0 : i32
    return %arg0, %arg2 : i32, i32
  }
  func.func @transform_1(%arg0: i32, %arg1: i32, %arg2: i32) -> (i32, i32) {
    %c0_i32 = arith.constant 0 : i32
    return %arg2, %arg1 : i32, i32
  }
  func.func @transform_2(%arg0: i32, %arg1: i32, %arg2: i32) -> (i32, i32) {
    %c0_i32 = arith.constant 0 : i32
    %c0_i32_0 = arith.constant 0 : i32
    return %c0_i32, %arg1 : i32, i32
  }
  func.func @transform_3(%arg0: i32, %arg1: i32, %arg2: i32) -> (i32, i32) {
    %c0_i32 = arith.constant 0 : i32
    return %arg0, %arg1 : i32, i32
  }
}

module attributes {stable_mosaic.version = 11 : i64} {
  func.func @_mm_bn_kernel(%arg0: i32, %arg1: i32, %arg2: i32, %arg3: memref<32x128xbf16, #tpu.memory_space<vmem>>, %arg4: memref<128x256xbf16, #tpu.memory_space<vmem>>, %arg5: memref<1x256xf32, #tpu.memory_space<vmem>>, %arg6: memref<32x256xbf16, #tpu.memory_space<vmem>>, %arg7: memref<32x256xf32, #tpu.memory_space<vmem>>) attributes {dimension_semantics = [#tpu.dimension_semantics<parallel>, #tpu.dimension_semantics<parallel>, #tpu.dimension_semantics<arbitrary>], iteration_bounds = array<i64: 1, 1, 1>, scalar_prefetch = 0 : i64, scratch_operands = 1 : i64, tpu.core_type = #tpu.core_type<tc>, window_params = [{transform_indices = @transform_0, window_bounds = array<i64: 32, 128>}, {transform_indices = @transform_1, window_bounds = array<i64: 128, 256>}, {transform_indices = @transform_2, window_bounds = array<i64: 1, 256>}, {transform_indices = @transform_3, window_bounds = array<i64: 32, 256>}]} {
    %c0_i32 = arith.constant 0 : i32
    %0 = arith.cmpi eq, %arg2, %c0_i32 : i32
    %1 = arith.extui %0 : i1 to i32
    %c0_i32_0 = arith.constant 0 : i32
    %2 = arith.cmpi ne, %1, %c0_i32_0 : i32
    scf.if %2 {
      %cst_10 = arith.constant 0.000000e+00 : f32
      %12 = vector.broadcast %cst_10 : f32 to vector<32x256xf32>
      %c0_11 = arith.constant 0 : index
      %c0_12 = arith.constant 0 : index
      %13 = vector.load %arg7[%c0_11, %c0_12] : memref<32x256xf32, #tpu.memory_space<vmem>>, vector<32x256xf32>
      tpu.vector_store %arg7[%c0_11, %c0_12], %12 {strides = array<i32>} : memref<32x256xf32, #tpu.memory_space<vmem>>, vector<32x256xf32>,
    } else {
    }
    %c0 = arith.constant 0 : index
    %c0_1 = arith.constant 0 : index
    %3 = vector.load %arg7[%c0, %c0_1] : memref<32x256xf32, #tpu.memory_space<vmem>>, vector<32x256xf32>
    %c0_2 = arith.constant 0 : index
    %c0_3 = arith.constant 0 : index
    %4 = vector.load %arg3[%c0_2, %c0_3] : memref<32x128xbf16, #tpu.memory_space<vmem>>, vector<32x128xbf16>
    %c0_4 = arith.constant 0 : index
    %c0_5 = arith.constant 0 : index
    %5 = vector.load %arg4[%c0_4, %c0_5] : memref<128x256xbf16, #tpu.memory_space<vmem>>, vector<128x256xbf16>
    %cst = arith.constant dense<0.000000e+00> : vector<32x256xf32>
    %6 = tpu.matmul %4, %5, %cst {dimension_numbers = #tpu.dot_dimension_numbers<[1], [0], [0], [1], [0, 0, 1, 1], [], []>} : vector<32x128xbf16>, vector<128x256xbf16>, vector<32x256xf32> -> vector<32x256xf32>
    %7 = arith.addf %3, %6 : vector<32x256xf32>
    %c0_6 = arith.constant 0 : index
    %c0_7 = arith.constant 0 : index
    %8 = vector.load %arg7[%c0_6, %c0_7] : memref<32x256xf32, #tpu.memory_space<vmem>>, vector<32x256xf32>
    tpu.vector_store %arg7[%c0_6, %c0_7], %7 {strides = array<i32>} : memref<32x256xf32, #tpu.memory_space<vmem>>, vector<32x256xf32>,
    %c0_i32_8 = arith.constant 0 : i32
    %9 = arith.cmpi eq, %arg2, %c0_i32_8 : i32
    %10 = arith.extui %9 : i1 to i32
    %c0_i32_9 = arith.constant 0 : i32
    %11 = arith.cmpi ne, %10, %c0_i32_9 : i32
    scf.if %11 {
      %c0_10 = arith.constant 0 : index
      %c0_11 = arith.constant 0 : index
      %12 = vector.load %arg7[%c0_10, %c0_11] : memref<32x256xf32, #tpu.memory_space<vmem>>, vector<32x256xf32>
      %c0_12 = arith.constant 0 : index
      %c0_13 = arith.constant 0 : index
      %13 = vector.load %arg5[%c0_12, %c0_13] : memref<1x256xf32, #tpu.memory_space<vmem>>, vector<1x256xf32>
      %14 = vector.broadcast %13 : vector<1x256xf32> to vector<32x256xf32>
      %15 = arith.addf %12, %14 : vector<32x256xf32>
      %16 = arith.truncf %15 : vector<32x256xf32> to vector<32x256xbf16>
      %c0_14 = arith.constant 0 : index
      %c0_15 = arith.constant 0 : index
      %17 = vector.load %arg6[%c0_14, %c0_15] : memref<32x256xbf16, #tpu.memory_space<vmem>>, vector<32x256xbf16>
      tpu.vector_store %arg6[%c0_14, %c0_15], %16 {strides = array<i32>} : memref<32x256xbf16, #tpu.memory_space<vmem>>, vector<32x256xbf16>,
    } else {
    }
    return
  }
  func.func @transform_0(%arg0: i32, %arg1: i32, %arg2: i32) -> (i32, i32) {
    %c0_i32 = arith.constant 0 : i32
    return %arg0, %arg2 : i32, i32
  }
  func.func @transform_1(%arg0: i32, %arg1: i32, %arg2: i32) -> (i32, i32) {
    %c0_i32 = arith.constant 0 : i32
    return %arg2, %arg1 : i32, i32
  }
  func.func @transform_2(%arg0: i32, %arg1: i32, %arg2: i32) -> (i32, i32) {
    %c0_i32 = arith.constant 0 : i32
    %c0_i32_0 = arith.constant 0 : i32
    return %c0_i32, %arg1 : i32, i32
  }
  func.func @transform_3(%arg0: i32, %arg1: i32, %arg2: i32) -> (i32, i32) {
    %c0_i32 = arith.constant 0 : i32
    return %arg0, %arg1 : i32, i32
  }
}

module attributes {stable_mosaic.version = 11 : i64} {
  func.func @_mm_bn_res_kernel(%arg0: i32, %arg1: i32, %arg2: i32, %arg3: memref<32x128xbf16, #tpu.memory_space<vmem>>, %arg4: memref<128x256xbf16, #tpu.memory_space<vmem>>, %arg5: memref<1x256xf32, #tpu.memory_space<vmem>>, %arg6: memref<32x256xbf16, #tpu.memory_space<vmem>>, %arg7: memref<32x256xbf16, #tpu.memory_space<vmem>>, %arg8: memref<32x256xf32, #tpu.memory_space<vmem>>) attributes {dimension_semantics = [#tpu.dimension_semantics<parallel>, #tpu.dimension_semantics<parallel>, #tpu.dimension_semantics<arbitrary>], iteration_bounds = array<i64: 1, 1, 1>, scalar_prefetch = 0 : i64, scratch_operands = 1 : i64, tpu.core_type = #tpu.core_type<tc>, window_params = [{transform_indices = @transform_0, window_bounds = array<i64: 32, 128>}, {transform_indices = @transform_1, window_bounds = array<i64: 128, 256>}, {transform_indices = @transform_2, window_bounds = array<i64: 1, 256>}, {transform_indices = @transform_3, window_bounds = array<i64: 32, 256>}, {transform_indices = @transform_4, window_bounds = array<i64: 32, 256>}]} {
    %c0_i32 = arith.constant 0 : i32
    %0 = arith.cmpi eq, %arg2, %c0_i32 : i32
    %1 = arith.extui %0 : i1 to i32
    %c0_i32_0 = arith.constant 0 : i32
    %2 = arith.cmpi ne, %1, %c0_i32_0 : i32
    scf.if %2 {
      %cst_10 = arith.constant 0.000000e+00 : f32
      %12 = vector.broadcast %cst_10 : f32 to vector<32x256xf32>
      %c0_11 = arith.constant 0 : index
      %c0_12 = arith.constant 0 : index
      %13 = vector.load %arg8[%c0_11, %c0_12] : memref<32x256xf32, #tpu.memory_space<vmem>>, vector<32x256xf32>
      tpu.vector_store %arg8[%c0_11, %c0_12], %12 {strides = array<i32>} : memref<32x256xf32, #tpu.memory_space<vmem>>, vector<32x256xf32>,
    } else {
    }
    %c0 = arith.constant 0 : index
    %c0_1 = arith.constant 0 : index
    %3 = vector.load %arg8[%c0, %c0_1] : memref<32x256xf32, #tpu.memory_space<vmem>>, vector<32x256xf32>
    %c0_2 = arith.constant 0 : index
    %c0_3 = arith.constant 0 : index
    %4 = vector.load %arg3[%c0_2, %c0_3] : memref<32x128xbf16, #tpu.memory_space<vmem>>, vector<32x128xbf16>
    %c0_4 = arith.constant 0 : index
    %c0_5 = arith.constant 0 : index
    %5 = vector.load %arg4[%c0_4, %c0_5] : memref<128x256xbf16, #tpu.memory_space<vmem>>, vector<128x256xbf16>
    %cst = arith.constant dense<0.000000e+00> : vector<32x256xf32>
    %6 = tpu.matmul %4, %5, %cst {dimension_numbers = #tpu.dot_dimension_numbers<[1], [0], [0], [1], [0, 0, 1, 1], [], []>} : vector<32x128xbf16>, vector<128x256xbf16>, vector<32x256xf32> -> vector<32x256xf32>
    %7 = arith.addf %3, %6 : vector<32x256xf32>
    %c0_6 = arith.constant 0 : index
    %c0_7 = arith.constant 0 : index
    %8 = vector.load %arg8[%c0_6, %c0_7] : memref<32x256xf32, #tpu.memory_space<vmem>>, vector<32x256xf32>
    tpu.vector_store %arg8[%c0_6, %c0_7], %7 {strides = array<i32>} : memref<32x256xf32, #tpu.memory_space<vmem>>, vector<32x256xf32>,
    %c0_i32_8 = arith.constant 0 : i32
    %9 = arith.cmpi eq, %arg2, %c0_i32_8 : i32
    %10 = arith.extui %9 : i1 to i32
    %c0_i32_9 = arith.constant 0 : i32
    %11 = arith.cmpi ne, %10, %c0_i32_9 : i32
    scf.if %11 {
      %c0_10 = arith.constant 0 : index
      %c0_11 = arith.constant 0 : index
      %12 = vector.load %arg8[%c0_10, %c0_11] : memref<32x256xf32, #tpu.memory_space<vmem>>, vector<32x256xf32>
      %c0_12 = arith.constant 0 : index
      %c0_13 = arith.constant 0 : index
      %13 = vector.load %arg5[%c0_12, %c0_13] : memref<1x256xf32, #tpu.memory_space<vmem>>, vector<1x256xf32>
      %14 = vector.broadcast %13 : vector<1x256xf32> to vector<32x256xf32>
      %15 = arith.addf %12, %14 : vector<32x256xf32>
      %c0_14 = arith.constant 0 : index
      %c0_15 = arith.constant 0 : index
      %16 = vector.load %arg6[%c0_14, %c0_15] : memref<32x256xbf16, #tpu.memory_space<vmem>>, vector<32x256xbf16>
      %17 = arith.extf %16 : vector<32x256xbf16> to vector<32x256xf32>
      %18 = arith.addf %15, %17 : vector<32x256xf32>
      %cst_16 = arith.constant 0.000000e+00 : f32
      %19 = vector.broadcast %cst_16 : f32 to vector<32x256xf32>
      %20 = arith.maximumf %18, %19 : vector<32x256xf32>
      %21 = arith.truncf %20 : vector<32x256xf32> to vector<32x256xbf16>
      %c0_17 = arith.constant 0 : index
      %c0_18 = arith.constant 0 : index
      %22 = vector.load %arg7[%c0_17, %c0_18] : memref<32x256xbf16, #tpu.memory_space<vmem>>, vector<32x256xbf16>
      tpu.vector_store %arg7[%c0_17, %c0_18], %21 {strides = array<i32>} : memref<32x256xbf16, #tpu.memory_space<vmem>>, vector<32x256xbf16>,
    } else {
    }
    return
  }
  func.func @transform_0(%arg0: i32, %arg1: i32, %arg2: i32) -> (i32, i32) {
    %c0_i32 = arith.constant 0 : i32
    return %arg0, %arg2 : i32, i32
  }
  func.func @transform_1(%arg0: i32, %arg1: i32, %arg2: i32) -> (i32, i32) {
    %c0_i32 = arith.constant 0 : i32
    return %arg2, %arg1 : i32, i32
  }
  func.func @transform_2(%arg0: i32, %arg1: i32, %arg2: i32) -> (i32, i32) {
    %c0_i32 = arith.constant 0 : i32
    %c0_i32_0 = arith.constant 0 : i32
    return %c0_i32, %arg1 : i32, i32
  }
  func.func @transform_3(%arg0: i32, %arg1: i32, %arg2: i32) -> (i32, i32) {
    %c0_i32 = arith.constant 0 : i32
    return %arg0, %arg1 : i32, i32
  }
  func.func @transform_4(%arg0: i32, %arg1: i32, %arg2: i32) -> (i32, i32) {
    %c0_i32 = arith.constant 0 : i32
    return %arg0, %arg1 : i32, i32
  }
}

module attributes {stable_mosaic.version = 11 : i64} {
  func.func @_mm_bn_kernel(%arg0: i32, %arg1: i32, %arg2: i32, %arg3: memref<32x256xbf16, #tpu.memory_space<vmem>>, %arg4: memref<256x64xbf16, #tpu.memory_space<vmem>>, %arg5: memref<1x64xf32, #tpu.memory_space<vmem>>, %arg6: memref<32x64xbf16, #tpu.memory_space<vmem>>, %arg7: memref<32x64xf32, #tpu.memory_space<vmem>>) attributes {dimension_semantics = [#tpu.dimension_semantics<parallel>, #tpu.dimension_semantics<parallel>, #tpu.dimension_semantics<arbitrary>], iteration_bounds = array<i64: 1, 1, 1>, scalar_prefetch = 0 : i64, scratch_operands = 1 : i64, tpu.core_type = #tpu.core_type<tc>, window_params = [{transform_indices = @transform_0, window_bounds = array<i64: 32, 256>}, {transform_indices = @transform_1, window_bounds = array<i64: 256, 64>}, {transform_indices = @transform_2, window_bounds = array<i64: 1, 64>}, {transform_indices = @transform_3, window_bounds = array<i64: 32, 64>}]} {
    %c0_i32 = arith.constant 0 : i32
    %0 = arith.cmpi eq, %arg2, %c0_i32 : i32
    %1 = arith.extui %0 : i1 to i32
    %c0_i32_0 = arith.constant 0 : i32
    %2 = arith.cmpi ne, %1, %c0_i32_0 : i32
    scf.if %2 {
      %cst_10 = arith.constant 0.000000e+00 : f32
      %12 = vector.broadcast %cst_10 : f32 to vector<32x64xf32>
      %c0_11 = arith.constant 0 : index
      %c0_12 = arith.constant 0 : index
      %13 = vector.load %arg7[%c0_11, %c0_12] : memref<32x64xf32, #tpu.memory_space<vmem>>, vector<32x64xf32>
      tpu.vector_store %arg7[%c0_11, %c0_12], %12 {strides = array<i32>} : memref<32x64xf32, #tpu.memory_space<vmem>>, vector<32x64xf32>,
    } else {
    }
    %c0 = arith.constant 0 : index
    %c0_1 = arith.constant 0 : index
    %3 = vector.load %arg7[%c0, %c0_1] : memref<32x64xf32, #tpu.memory_space<vmem>>, vector<32x64xf32>
    %c0_2 = arith.constant 0 : index
    %c0_3 = arith.constant 0 : index
    %4 = vector.load %arg3[%c0_2, %c0_3] : memref<32x256xbf16, #tpu.memory_space<vmem>>, vector<32x256xbf16>
    %c0_4 = arith.constant 0 : index
    %c0_5 = arith.constant 0 : index
    %5 = vector.load %arg4[%c0_4, %c0_5] : memref<256x64xbf16, #tpu.memory_space<vmem>>, vector<256x64xbf16>
    %cst = arith.constant dense<0.000000e+00> : vector<32x64xf32>
    %6 = tpu.matmul %4, %5, %cst {dimension_numbers = #tpu.dot_dimension_numbers<[1], [0], [0], [1], [0, 0, 1, 1], [], []>} : vector<32x256xbf16>, vector<256x64xbf16>, vector<32x64xf32> -> vector<32x64xf32>
    %7 = arith.addf %3, %6 : vector<32x64xf32>
    %c0_6 = arith.constant 0 : index
    %c0_7 = arith.constant 0 : index
    %8 = vector.load %arg7[%c0_6, %c0_7] : memref<32x64xf32, #tpu.memory_space<vmem>>, vector<32x64xf32>
    tpu.vector_store %arg7[%c0_6, %c0_7], %7 {strides = array<i32>} : memref<32x64xf32, #tpu.memory_space<vmem>>, vector<32x64xf32>,
    %c0_i32_8 = arith.constant 0 : i32
    %9 = arith.cmpi eq, %arg2, %c0_i32_8 : i32
    %10 = arith.extui %9 : i1 to i32
    %c0_i32_9 = arith.constant 0 : i32
    %11 = arith.cmpi ne, %10, %c0_i32_9 : i32
    scf.if %11 {
      %c0_10 = arith.constant 0 : index
      %c0_11 = arith.constant 0 : index
      %12 = vector.load %arg7[%c0_10, %c0_11] : memref<32x64xf32, #tpu.memory_space<vmem>>, vector<32x64xf32>
      %c0_12 = arith.constant 0 : index
      %c0_13 = arith.constant 0 : index
      %13 = vector.load %arg5[%c0_12, %c0_13] : memref<1x64xf32, #tpu.memory_space<vmem>>, vector<1x64xf32>
      %14 = vector.broadcast %13 : vector<1x64xf32> to vector<32x64xf32>
      %15 = arith.addf %12, %14 : vector<32x64xf32>
      %cst_14 = arith.constant 0.000000e+00 : f32
      %16 = vector.broadcast %cst_14 : f32 to vector<32x64xf32>
      %17 = arith.maximumf %15, %16 : vector<32x64xf32>
      %18 = arith.truncf %17 : vector<32x64xf32> to vector<32x64xbf16>
      %c0_15 = arith.constant 0 : index
      %c0_16 = arith.constant 0 : index
      %19 = vector.load %arg6[%c0_15, %c0_16] : memref<32x64xbf16, #tpu.memory_space<vmem>>, vector<32x64xbf16>
      tpu.vector_store %arg6[%c0_15, %c0_16], %18 {strides = array<i32>} : memref<32x64xbf16, #tpu.memory_space<vmem>>, vector<32x64xbf16>,
    } else {
    }
    return
  }
  func.func @transform_0(%arg0: i32, %arg1: i32, %arg2: i32) -> (i32, i32) {
    %c0_i32 = arith.constant 0 : i32
    return %arg0, %arg2 : i32, i32
  }
  func.func @transform_1(%arg0: i32, %arg1: i32, %arg2: i32) -> (i32, i32) {
    %c0_i32 = arith.constant 0 : i32
    return %arg2, %arg1 : i32, i32
  }
  func.func @transform_2(%arg0: i32, %arg1: i32, %arg2: i32) -> (i32, i32) {
    %c0_i32 = arith.constant 0 : i32
    %c0_i32_0 = arith.constant 0 : i32
    return %c0_i32, %arg1 : i32, i32
  }
  func.func @transform_3(%arg0: i32, %arg1: i32, %arg2: i32) -> (i32, i32) {
    %c0_i32 = arith.constant 0 : i32
    return %arg0, %arg1 : i32, i32
  }
}

module attributes {stable_mosaic.version = 11 : i64} {
  func.func @_mm_bn_kernel(%arg0: i32, %arg1: i32, %arg2: i32, %arg3: memref<32x256xbf16, #tpu.memory_space<vmem>>, %arg4: memref<256x128xbf16, #tpu.memory_space<vmem>>, %arg5: memref<1x128xf32, #tpu.memory_space<vmem>>, %arg6: memref<32x128xbf16, #tpu.memory_space<vmem>>, %arg7: memref<32x128xf32, #tpu.memory_space<vmem>>) attributes {dimension_semantics = [#tpu.dimension_semantics<parallel>, #tpu.dimension_semantics<parallel>, #tpu.dimension_semantics<arbitrary>], iteration_bounds = array<i64: 1, 1, 1>, scalar_prefetch = 0 : i64, scratch_operands = 1 : i64, tpu.core_type = #tpu.core_type<tc>, window_params = [{transform_indices = @transform_0, window_bounds = array<i64: 32, 256>}, {transform_indices = @transform_1, window_bounds = array<i64: 256, 128>}, {transform_indices = @transform_2, window_bounds = array<i64: 1, 128>}, {transform_indices = @transform_3, window_bounds = array<i64: 32, 128>}]} {
    %c0_i32 = arith.constant 0 : i32
    %0 = arith.cmpi eq, %arg2, %c0_i32 : i32
    %1 = arith.extui %0 : i1 to i32
    %c0_i32_0 = arith.constant 0 : i32
    %2 = arith.cmpi ne, %1, %c0_i32_0 : i32
    scf.if %2 {
      %cst_10 = arith.constant 0.000000e+00 : f32
      %12 = vector.broadcast %cst_10 : f32 to vector<32x128xf32>
      %c0_11 = arith.constant 0 : index
      %c0_12 = arith.constant 0 : index
      %13 = vector.load %arg7[%c0_11, %c0_12] : memref<32x128xf32, #tpu.memory_space<vmem>>, vector<32x128xf32>
      tpu.vector_store %arg7[%c0_11, %c0_12], %12 {strides = array<i32>} : memref<32x128xf32, #tpu.memory_space<vmem>>, vector<32x128xf32>,
    } else {
    }
    %c0 = arith.constant 0 : index
    %c0_1 = arith.constant 0 : index
    %3 = vector.load %arg7[%c0, %c0_1] : memref<32x128xf32, #tpu.memory_space<vmem>>, vector<32x128xf32>
    %c0_2 = arith.constant 0 : index
    %c0_3 = arith.constant 0 : index
    %4 = vector.load %arg3[%c0_2, %c0_3] : memref<32x256xbf16, #tpu.memory_space<vmem>>, vector<32x256xbf16>
    %c0_4 = arith.constant 0 : index
    %c0_5 = arith.constant 0 : index
    %5 = vector.load %arg4[%c0_4, %c0_5] : memref<256x128xbf16, #tpu.memory_space<vmem>>, vector<256x128xbf16>
    %cst = arith.constant dense<0.000000e+00> : vector<32x128xf32>
    %6 = tpu.matmul %4, %5, %cst {dimension_numbers = #tpu.dot_dimension_numbers<[1], [0], [0], [1], [0, 0, 1, 1], [], []>} : vector<32x256xbf16>, vector<256x128xbf16>, vector<32x128xf32> -> vector<32x128xf32>
    %7 = arith.addf %3, %6 : vector<32x128xf32>
    %c0_6 = arith.constant 0 : index
    %c0_7 = arith.constant 0 : index
    %8 = vector.load %arg7[%c0_6, %c0_7] : memref<32x128xf32, #tpu.memory_space<vmem>>, vector<32x128xf32>
    tpu.vector_store %arg7[%c0_6, %c0_7], %7 {strides = array<i32>} : memref<32x128xf32, #tpu.memory_space<vmem>>, vector<32x128xf32>,
    %c0_i32_8 = arith.constant 0 : i32
    %9 = arith.cmpi eq, %arg2, %c0_i32_8 : i32
    %10 = arith.extui %9 : i1 to i32
    %c0_i32_9 = arith.constant 0 : i32
    %11 = arith.cmpi ne, %10, %c0_i32_9 : i32
    scf.if %11 {
      %c0_10 = arith.constant 0 : index
      %c0_11 = arith.constant 0 : index
      %12 = vector.load %arg7[%c0_10, %c0_11] : memref<32x128xf32, #tpu.memory_space<vmem>>, vector<32x128xf32>
      %c0_12 = arith.constant 0 : index
      %c0_13 = arith.constant 0 : index
      %13 = vector.load %arg5[%c0_12, %c0_13] : memref<1x128xf32, #tpu.memory_space<vmem>>, vector<1x128xf32>
      %14 = vector.broadcast %13 : vector<1x128xf32> to vector<32x128xf32>
      %15 = arith.addf %12, %14 : vector<32x128xf32>
      %cst_14 = arith.constant 0.000000e+00 : f32
      %16 = vector.broadcast %cst_14 : f32 to vector<32x128xf32>
      %17 = arith.maximumf %15, %16 : vector<32x128xf32>
      %18 = arith.truncf %17 : vector<32x128xf32> to vector<32x128xbf16>
      %c0_15 = arith.constant 0 : index
      %c0_16 = arith.constant 0 : index
      %19 = vector.load %arg6[%c0_15, %c0_16] : memref<32x128xbf16, #tpu.memory_space<vmem>>, vector<32x128xbf16>
      tpu.vector_store %arg6[%c0_15, %c0_16], %18 {strides = array<i32>} : memref<32x128xbf16, #tpu.memory_space<vmem>>, vector<32x128xbf16>,
    } else {
    }
    return
  }
  func.func @transform_0(%arg0: i32, %arg1: i32, %arg2: i32) -> (i32, i32) {
    %c0_i32 = arith.constant 0 : i32
    return %arg0, %arg2 : i32, i32
  }
  func.func @transform_1(%arg0: i32, %arg1: i32, %arg2: i32) -> (i32, i32) {
    %c0_i32 = arith.constant 0 : i32
    return %arg2, %arg1 : i32, i32
  }
  func.func @transform_2(%arg0: i32, %arg1: i32, %arg2: i32) -> (i32, i32) {
    %c0_i32 = arith.constant 0 : i32
    %c0_i32_0 = arith.constant 0 : i32
    return %c0_i32, %arg1 : i32, i32
  }
  func.func @transform_3(%arg0: i32, %arg1: i32, %arg2: i32) -> (i32, i32) {
    %c0_i32 = arith.constant 0 : i32
    return %arg0, %arg1 : i32, i32
  }
}

module attributes {stable_mosaic.version = 11 : i64} {
  func.func @_mm_bn_kernel(%arg0: i32, %arg1: i32, %arg2: i32, %arg3: memref<8x128xbf16, #tpu.memory_space<vmem>>, %arg4: memref<128x128xbf16, #tpu.memory_space<vmem>>, %arg5: memref<1x128xf32, #tpu.memory_space<vmem>>, %arg6: memref<8x128xbf16, #tpu.memory_space<vmem>>, %arg7: memref<8x128xf32, #tpu.memory_space<vmem>>) attributes {dimension_semantics = [#tpu.dimension_semantics<parallel>, #tpu.dimension_semantics<parallel>, #tpu.dimension_semantics<arbitrary>], iteration_bounds = array<i64: 1, 1, 9>, scalar_prefetch = 0 : i64, scratch_operands = 1 : i64, tpu.core_type = #tpu.core_type<tc>, window_params = [{transform_indices = @transform_0, window_bounds = array<i64: 8, 128>}, {transform_indices = @transform_1, window_bounds = array<i64: 128, 128>}, {transform_indices = @transform_2, window_bounds = array<i64: 1, 128>}, {transform_indices = @transform_3, window_bounds = array<i64: 8, 128>}]} {
    %c0_i32 = arith.constant 0 : i32
    %0 = arith.cmpi eq, %arg2, %c0_i32 : i32
    %1 = arith.extui %0 : i1 to i32
    %c0_i32_0 = arith.constant 0 : i32
    %2 = arith.cmpi ne, %1, %c0_i32_0 : i32
    scf.if %2 {
      %cst_9 = arith.constant 0.000000e+00 : f32
      %12 = vector.broadcast %cst_9 : f32 to vector<8x128xf32>
      %c0_10 = arith.constant 0 : index
      %c0_11 = arith.constant 0 : index
      %13 = vector.load %arg7[%c0_10, %c0_11] : memref<8x128xf32, #tpu.memory_space<vmem>>, vector<8x128xf32>
      tpu.vector_store %arg7[%c0_10, %c0_11], %12 {strides = array<i32>} : memref<8x128xf32, #tpu.memory_space<vmem>>, vector<8x128xf32>,
    } else {
    }
    %c0 = arith.constant 0 : index
    %c0_1 = arith.constant 0 : index
    %3 = vector.load %arg7[%c0, %c0_1] : memref<8x128xf32, #tpu.memory_space<vmem>>, vector<8x128xf32>
    %c0_2 = arith.constant 0 : index
    %c0_3 = arith.constant 0 : index
    %4 = vector.load %arg3[%c0_2, %c0_3] : memref<8x128xbf16, #tpu.memory_space<vmem>>, vector<8x128xbf16>
    %c0_4 = arith.constant 0 : index
    %c0_5 = arith.constant 0 : index
    %5 = vector.load %arg4[%c0_4, %c0_5] : memref<128x128xbf16, #tpu.memory_space<vmem>>, vector<128x128xbf16>
    %cst = arith.constant dense<0.000000e+00> : vector<8x128xf32>
    %6 = tpu.matmul %4, %5, %cst {dimension_numbers = #tpu.dot_dimension_numbers<[1], [0], [0], [1], [0, 0, 1, 1], [], []>} : vector<8x128xbf16>, vector<128x128xbf16>, vector<8x128xf32> -> vector<8x128xf32>
    %7 = arith.addf %3, %6 : vector<8x128xf32>
    %c0_6 = arith.constant 0 : index
    %c0_7 = arith.constant 0 : index
    %8 = vector.load %arg7[%c0_6, %c0_7] : memref<8x128xf32, #tpu.memory_space<vmem>>, vector<8x128xf32>
    tpu.vector_store %arg7[%c0_6, %c0_7], %7 {strides = array<i32>} : memref<8x128xf32, #tpu.memory_space<vmem>>, vector<8x128xf32>,
    %c8_i32 = arith.constant 8 : i32
    %9 = arith.cmpi eq, %arg2, %c8_i32 : i32
    %10 = arith.extui %9 : i1 to i32
    %c0_i32_8 = arith.constant 0 : i32
    %11 = arith.cmpi ne, %10, %c0_i32_8 : i32
    scf.if %11 {
      %c0_9 = arith.constant 0 : index
      %c0_10 = arith.constant 0 : index
      %12 = vector.load %arg7[%c0_9, %c0_10] : memref<8x128xf32, #tpu.memory_space<vmem>>, vector<8x128xf32>
      %c0_11 = arith.constant 0 : index
      %c0_12 = arith.constant 0 : index
      %13 = vector.load %arg5[%c0_11, %c0_12] : memref<1x128xf32, #tpu.memory_space<vmem>>, vector<1x128xf32>
      %14 = vector.broadcast %13 : vector<1x128xf32> to vector<8x128xf32>
      %15 = arith.addf %12, %14 : vector<8x128xf32>
      %cst_13 = arith.constant 0.000000e+00 : f32
      %16 = vector.broadcast %cst_13 : f32 to vector<8x128xf32>
      %17 = arith.maximumf %15, %16 : vector<8x128xf32>
      %18 = arith.truncf %17 : vector<8x128xf32> to vector<8x128xbf16>
      %c0_14 = arith.constant 0 : index
      %c0_15 = arith.constant 0 : index
      %19 = vector.load %arg6[%c0_14, %c0_15] : memref<8x128xbf16, #tpu.memory_space<vmem>>, vector<8x128xbf16>
      tpu.vector_store %arg6[%c0_14, %c0_15], %18 {strides = array<i32>} : memref<8x128xbf16, #tpu.memory_space<vmem>>, vector<8x128xbf16>,
    } else {
    }
    return
  }
  func.func @transform_0(%arg0: i32, %arg1: i32, %arg2: i32) -> (i32, i32) {
    %c0_i32 = arith.constant 0 : i32
    return %arg0, %arg2 : i32, i32
  }
  func.func @transform_1(%arg0: i32, %arg1: i32, %arg2: i32) -> (i32, i32) {
    %c0_i32 = arith.constant 0 : i32
    return %arg2, %arg1 : i32, i32
  }
  func.func @transform_2(%arg0: i32, %arg1: i32, %arg2: i32) -> (i32, i32) {
    %c0_i32 = arith.constant 0 : i32
    %c0_i32_0 = arith.constant 0 : i32
    return %c0_i32, %arg1 : i32, i32
  }
  func.func @transform_3(%arg0: i32, %arg1: i32, %arg2: i32) -> (i32, i32) {
    %c0_i32 = arith.constant 0 : i32
    return %arg0, %arg1 : i32, i32
  }
}

module attributes {stable_mosaic.version = 11 : i64} {
  func.func @_mm_bn_kernel(%arg0: i32, %arg1: i32, %arg2: i32, %arg3: memref<8x256xbf16, #tpu.memory_space<vmem>>, %arg4: memref<256x512xbf16, #tpu.memory_space<vmem>>, %arg5: memref<1x512xf32, #tpu.memory_space<vmem>>, %arg6: memref<8x512xbf16, #tpu.memory_space<vmem>>, %arg7: memref<8x512xf32, #tpu.memory_space<vmem>>) attributes {dimension_semantics = [#tpu.dimension_semantics<parallel>, #tpu.dimension_semantics<parallel>, #tpu.dimension_semantics<arbitrary>], iteration_bounds = array<i64: 1, 1, 1>, scalar_prefetch = 0 : i64, scratch_operands = 1 : i64, tpu.core_type = #tpu.core_type<tc>, window_params = [{transform_indices = @transform_0, window_bounds = array<i64: 8, 256>}, {transform_indices = @transform_1, window_bounds = array<i64: 256, 512>}, {transform_indices = @transform_2, window_bounds = array<i64: 1, 512>}, {transform_indices = @transform_3, window_bounds = array<i64: 8, 512>}]} {
    %c0_i32 = arith.constant 0 : i32
    %0 = arith.cmpi eq, %arg2, %c0_i32 : i32
    %1 = arith.extui %0 : i1 to i32
    %c0_i32_0 = arith.constant 0 : i32
    %2 = arith.cmpi ne, %1, %c0_i32_0 : i32
    scf.if %2 {
      %cst_10 = arith.constant 0.000000e+00 : f32
      %12 = vector.broadcast %cst_10 : f32 to vector<8x512xf32>
      %c0_11 = arith.constant 0 : index
      %c0_12 = arith.constant 0 : index
      %13 = vector.load %arg7[%c0_11, %c0_12] : memref<8x512xf32, #tpu.memory_space<vmem>>, vector<8x512xf32>
      tpu.vector_store %arg7[%c0_11, %c0_12], %12 {strides = array<i32>} : memref<8x512xf32, #tpu.memory_space<vmem>>, vector<8x512xf32>,
    } else {
    }
    %c0 = arith.constant 0 : index
    %c0_1 = arith.constant 0 : index
    %3 = vector.load %arg7[%c0, %c0_1] : memref<8x512xf32, #tpu.memory_space<vmem>>, vector<8x512xf32>
    %c0_2 = arith.constant 0 : index
    %c0_3 = arith.constant 0 : index
    %4 = vector.load %arg3[%c0_2, %c0_3] : memref<8x256xbf16, #tpu.memory_space<vmem>>, vector<8x256xbf16>
    %c0_4 = arith.constant 0 : index
    %c0_5 = arith.constant 0 : index
    %5 = vector.load %arg4[%c0_4, %c0_5] : memref<256x512xbf16, #tpu.memory_space<vmem>>, vector<256x512xbf16>
    %cst = arith.constant dense<0.000000e+00> : vector<8x512xf32>
    %6 = tpu.matmul %4, %5, %cst {dimension_numbers = #tpu.dot_dimension_numbers<[1], [0], [0], [1], [0, 0, 1, 1], [], []>} : vector<8x256xbf16>, vector<256x512xbf16>, vector<8x512xf32> -> vector<8x512xf32>
    %7 = arith.addf %3, %6 : vector<8x512xf32>
    %c0_6 = arith.constant 0 : index
    %c0_7 = arith.constant 0 : index
    %8 = vector.load %arg7[%c0_6, %c0_7] : memref<8x512xf32, #tpu.memory_space<vmem>>, vector<8x512xf32>
    tpu.vector_store %arg7[%c0_6, %c0_7], %7 {strides = array<i32>} : memref<8x512xf32, #tpu.memory_space<vmem>>, vector<8x512xf32>,
    %c0_i32_8 = arith.constant 0 : i32
    %9 = arith.cmpi eq, %arg2, %c0_i32_8 : i32
    %10 = arith.extui %9 : i1 to i32
    %c0_i32_9 = arith.constant 0 : i32
    %11 = arith.cmpi ne, %10, %c0_i32_9 : i32
    scf.if %11 {
      %c0_10 = arith.constant 0 : index
      %c0_11 = arith.constant 0 : index
      %12 = vector.load %arg7[%c0_10, %c0_11] : memref<8x512xf32, #tpu.memory_space<vmem>>, vector<8x512xf32>
      %c0_12 = arith.constant 0 : index
      %c0_13 = arith.constant 0 : index
      %13 = vector.load %arg5[%c0_12, %c0_13] : memref<1x512xf32, #tpu.memory_space<vmem>>, vector<1x512xf32>
      %14 = vector.broadcast %13 : vector<1x512xf32> to vector<8x512xf32>
      %15 = arith.addf %12, %14 : vector<8x512xf32>
      %16 = arith.truncf %15 : vector<8x512xf32> to vector<8x512xbf16>
      %c0_14 = arith.constant 0 : index
      %c0_15 = arith.constant 0 : index
      %17 = vector.load %arg6[%c0_14, %c0_15] : memref<8x512xbf16, #tpu.memory_space<vmem>>, vector<8x512xbf16>
      tpu.vector_store %arg6[%c0_14, %c0_15], %16 {strides = array<i32>} : memref<8x512xbf16, #tpu.memory_space<vmem>>, vector<8x512xbf16>,
    } else {
    }
    return
  }
  func.func @transform_0(%arg0: i32, %arg1: i32, %arg2: i32) -> (i32, i32) {
    %c0_i32 = arith.constant 0 : i32
    return %arg0, %arg2 : i32, i32
  }
  func.func @transform_1(%arg0: i32, %arg1: i32, %arg2: i32) -> (i32, i32) {
    %c0_i32 = arith.constant 0 : i32
    return %arg2, %arg1 : i32, i32
  }
  func.func @transform_2(%arg0: i32, %arg1: i32, %arg2: i32) -> (i32, i32) {
    %c0_i32 = arith.constant 0 : i32
    %c0_i32_0 = arith.constant 0 : i32
    return %c0_i32, %arg1 : i32, i32
  }
  func.func @transform_3(%arg0: i32, %arg1: i32, %arg2: i32) -> (i32, i32) {
    %c0_i32 = arith.constant 0 : i32
    return %arg0, %arg1 : i32, i32
  }
}

module attributes {stable_mosaic.version = 11 : i64} {
  func.func @_mm_bn_res_kernel(%arg0: i32, %arg1: i32, %arg2: i32, %arg3: memref<8x128xbf16, #tpu.memory_space<vmem>>, %arg4: memref<128x512xbf16, #tpu.memory_space<vmem>>, %arg5: memref<1x512xf32, #tpu.memory_space<vmem>>, %arg6: memref<8x512xbf16, #tpu.memory_space<vmem>>, %arg7: memref<8x512xbf16, #tpu.memory_space<vmem>>, %arg8: memref<8x512xf32, #tpu.memory_space<vmem>>) attributes {dimension_semantics = [#tpu.dimension_semantics<parallel>, #tpu.dimension_semantics<parallel>, #tpu.dimension_semantics<arbitrary>], iteration_bounds = array<i64: 1, 1, 1>, scalar_prefetch = 0 : i64, scratch_operands = 1 : i64, tpu.core_type = #tpu.core_type<tc>, window_params = [{transform_indices = @transform_0, window_bounds = array<i64: 8, 128>}, {transform_indices = @transform_1, window_bounds = array<i64: 128, 512>}, {transform_indices = @transform_2, window_bounds = array<i64: 1, 512>}, {transform_indices = @transform_3, window_bounds = array<i64: 8, 512>}, {transform_indices = @transform_4, window_bounds = array<i64: 8, 512>}]} {
    %c0_i32 = arith.constant 0 : i32
    %0 = arith.cmpi eq, %arg2, %c0_i32 : i32
    %1 = arith.extui %0 : i1 to i32
    %c0_i32_0 = arith.constant 0 : i32
    %2 = arith.cmpi ne, %1, %c0_i32_0 : i32
    scf.if %2 {
      %cst_10 = arith.constant 0.000000e+00 : f32
      %12 = vector.broadcast %cst_10 : f32 to vector<8x512xf32>
      %c0_11 = arith.constant 0 : index
      %c0_12 = arith.constant 0 : index
      %13 = vector.load %arg8[%c0_11, %c0_12] : memref<8x512xf32, #tpu.memory_space<vmem>>, vector<8x512xf32>
      tpu.vector_store %arg8[%c0_11, %c0_12], %12 {strides = array<i32>} : memref<8x512xf32, #tpu.memory_space<vmem>>, vector<8x512xf32>,
    } else {
    }
    %c0 = arith.constant 0 : index
    %c0_1 = arith.constant 0 : index
    %3 = vector.load %arg8[%c0, %c0_1] : memref<8x512xf32, #tpu.memory_space<vmem>>, vector<8x512xf32>
    %c0_2 = arith.constant 0 : index
    %c0_3 = arith.constant 0 : index
    %4 = vector.load %arg3[%c0_2, %c0_3] : memref<8x128xbf16, #tpu.memory_space<vmem>>, vector<8x128xbf16>
    %c0_4 = arith.constant 0 : index
    %c0_5 = arith.constant 0 : index
    %5 = vector.load %arg4[%c0_4, %c0_5] : memref<128x512xbf16, #tpu.memory_space<vmem>>, vector<128x512xbf16>
    %cst = arith.constant dense<0.000000e+00> : vector<8x512xf32>
    %6 = tpu.matmul %4, %5, %cst {dimension_numbers = #tpu.dot_dimension_numbers<[1], [0], [0], [1], [0, 0, 1, 1], [], []>} : vector<8x128xbf16>, vector<128x512xbf16>, vector<8x512xf32> -> vector<8x512xf32>
    %7 = arith.addf %3, %6 : vector<8x512xf32>
    %c0_6 = arith.constant 0 : index
    %c0_7 = arith.constant 0 : index
    %8 = vector.load %arg8[%c0_6, %c0_7] : memref<8x512xf32, #tpu.memory_space<vmem>>, vector<8x512xf32>
    tpu.vector_store %arg8[%c0_6, %c0_7], %7 {strides = array<i32>} : memref<8x512xf32, #tpu.memory_space<vmem>>, vector<8x512xf32>,
    %c0_i32_8 = arith.constant 0 : i32
    %9 = arith.cmpi eq, %arg2, %c0_i32_8 : i32
    %10 = arith.extui %9 : i1 to i32
    %c0_i32_9 = arith.constant 0 : i32
    %11 = arith.cmpi ne, %10, %c0_i32_9 : i32
    scf.if %11 {
      %c0_10 = arith.constant 0 : index
      %c0_11 = arith.constant 0 : index
      %12 = vector.load %arg8[%c0_10, %c0_11] : memref<8x512xf32, #tpu.memory_space<vmem>>, vector<8x512xf32>
      %c0_12 = arith.constant 0 : index
      %c0_13 = arith.constant 0 : index
      %13 = vector.load %arg5[%c0_12, %c0_13] : memref<1x512xf32, #tpu.memory_space<vmem>>, vector<1x512xf32>
      %14 = vector.broadcast %13 : vector<1x512xf32> to vector<8x512xf32>
      %15 = arith.addf %12, %14 : vector<8x512xf32>
      %c0_14 = arith.constant 0 : index
      %c0_15 = arith.constant 0 : index
      %16 = vector.load %arg6[%c0_14, %c0_15] : memref<8x512xbf16, #tpu.memory_space<vmem>>, vector<8x512xbf16>
      %17 = arith.extf %16 : vector<8x512xbf16> to vector<8x512xf32>
      %18 = arith.addf %15, %17 : vector<8x512xf32>
      %cst_16 = arith.constant 0.000000e+00 : f32
      %19 = vector.broadcast %cst_16 : f32 to vector<8x512xf32>
      %20 = arith.maximumf %18, %19 : vector<8x512xf32>
      %21 = arith.truncf %20 : vector<8x512xf32> to vector<8x512xbf16>
      %c0_17 = arith.constant 0 : index
      %c0_18 = arith.constant 0 : index
      %22 = vector.load %arg7[%c0_17, %c0_18] : memref<8x512xbf16, #tpu.memory_space<vmem>>, vector<8x512xbf16>
      tpu.vector_store %arg7[%c0_17, %c0_18], %21 {strides = array<i32>} : memref<8x512xbf16, #tpu.memory_space<vmem>>, vector<8x512xbf16>,
    } else {
    }
    return
  }
  func.func @transform_0(%arg0: i32, %arg1: i32, %arg2: i32) -> (i32, i32) {
    %c0_i32 = arith.constant 0 : i32
    return %arg0, %arg2 : i32, i32
  }
  func.func @transform_1(%arg0: i32, %arg1: i32, %arg2: i32) -> (i32, i32) {
    %c0_i32 = arith.constant 0 : i32
    return %arg2, %arg1 : i32, i32
  }
  func.func @transform_2(%arg0: i32, %arg1: i32, %arg2: i32) -> (i32, i32) {
    %c0_i32 = arith.constant 0 : i32
    %c0_i32_0 = arith.constant 0 : i32
    return %c0_i32, %arg1 : i32, i32
  }
  func.func @transform_3(%arg0: i32, %arg1: i32, %arg2: i32) -> (i32, i32) {
    %c0_i32 = arith.constant 0 : i32
    return %arg0, %arg1 : i32, i32
  }
  func.func @transform_4(%arg0: i32, %arg1: i32, %arg2: i32) -> (i32, i32) {
    %c0_i32 = arith.constant 0 : i32
    return %arg0, %arg1 : i32, i32
  }
}

module attributes {stable_mosaic.version = 11 : i64} {
  func.func @_mm_bn_kernel(%arg0: i32, %arg1: i32, %arg2: i32, %arg3: memref<8x512xbf16, #tpu.memory_space<vmem>>, %arg4: memref<512x128xbf16, #tpu.memory_space<vmem>>, %arg5: memref<1x128xf32, #tpu.memory_space<vmem>>, %arg6: memref<8x128xbf16, #tpu.memory_space<vmem>>, %arg7: memref<8x128xf32, #tpu.memory_space<vmem>>) attributes {dimension_semantics = [#tpu.dimension_semantics<parallel>, #tpu.dimension_semantics<parallel>, #tpu.dimension_semantics<arbitrary>], iteration_bounds = array<i64: 1, 1, 1>, scalar_prefetch = 0 : i64, scratch_operands = 1 : i64, tpu.core_type = #tpu.core_type<tc>, window_params = [{transform_indices = @transform_0, window_bounds = array<i64: 8, 512>}, {transform_indices = @transform_1, window_bounds = array<i64: 512, 128>}, {transform_indices = @transform_2, window_bounds = array<i64: 1, 128>}, {transform_indices = @transform_3, window_bounds = array<i64: 8, 128>}]} {
    %c0_i32 = arith.constant 0 : i32
    %0 = arith.cmpi eq, %arg2, %c0_i32 : i32
    %1 = arith.extui %0 : i1 to i32
    %c0_i32_0 = arith.constant 0 : i32
    %2 = arith.cmpi ne, %1, %c0_i32_0 : i32
    scf.if %2 {
      %cst_10 = arith.constant 0.000000e+00 : f32
      %12 = vector.broadcast %cst_10 : f32 to vector<8x128xf32>
      %c0_11 = arith.constant 0 : index
      %c0_12 = arith.constant 0 : index
      %13 = vector.load %arg7[%c0_11, %c0_12] : memref<8x128xf32, #tpu.memory_space<vmem>>, vector<8x128xf32>
      tpu.vector_store %arg7[%c0_11, %c0_12], %12 {strides = array<i32>} : memref<8x128xf32, #tpu.memory_space<vmem>>, vector<8x128xf32>,
    } else {
    }
    %c0 = arith.constant 0 : index
    %c0_1 = arith.constant 0 : index
    %3 = vector.load %arg7[%c0, %c0_1] : memref<8x128xf32, #tpu.memory_space<vmem>>, vector<8x128xf32>
    %c0_2 = arith.constant 0 : index
    %c0_3 = arith.constant 0 : index
    %4 = vector.load %arg3[%c0_2, %c0_3] : memref<8x512xbf16, #tpu.memory_space<vmem>>, vector<8x512xbf16>
    %c0_4 = arith.constant 0 : index
    %c0_5 = arith.constant 0 : index
    %5 = vector.load %arg4[%c0_4, %c0_5] : memref<512x128xbf16, #tpu.memory_space<vmem>>, vector<512x128xbf16>
    %cst = arith.constant dense<0.000000e+00> : vector<8x128xf32>
    %6 = tpu.matmul %4, %5, %cst {dimension_numbers = #tpu.dot_dimension_numbers<[1], [0], [0], [1], [0, 0, 1, 1], [], []>} : vector<8x512xbf16>, vector<512x128xbf16>, vector<8x128xf32> -> vector<8x128xf32>
    %7 = arith.addf %3, %6 : vector<8x128xf32>
    %c0_6 = arith.constant 0 : index
    %c0_7 = arith.constant 0 : index
    %8 = vector.load %arg7[%c0_6, %c0_7] : memref<8x128xf32, #tpu.memory_space<vmem>>, vector<8x128xf32>
    tpu.vector_store %arg7[%c0_6, %c0_7], %7 {strides = array<i32>} : memref<8x128xf32, #tpu.memory_space<vmem>>, vector<8x128xf32>,
    %c0_i32_8 = arith.constant 0 : i32
    %9 = arith.cmpi eq, %arg2, %c0_i32_8 : i32
    %10 = arith.extui %9 : i1 to i32
    %c0_i32_9 = arith.constant 0 : i32
    %11 = arith.cmpi ne, %10, %c0_i32_9 : i32
    scf.if %11 {
      %c0_10 = arith.constant 0 : index
      %c0_11 = arith.constant 0 : index
      %12 = vector.load %arg7[%c0_10, %c0_11] : memref<8x128xf32, #tpu.memory_space<vmem>>, vector<8x128xf32>
      %c0_12 = arith.constant 0 : index
      %c0_13 = arith.constant 0 : index
      %13 = vector.load %arg5[%c0_12, %c0_13] : memref<1x128xf32, #tpu.memory_space<vmem>>, vector<1x128xf32>
      %14 = vector.broadcast %13 : vector<1x128xf32> to vector<8x128xf32>
      %15 = arith.addf %12, %14 : vector<8x128xf32>
      %cst_14 = arith.constant 0.000000e+00 : f32
      %16 = vector.broadcast %cst_14 : f32 to vector<8x128xf32>
      %17 = arith.maximumf %15, %16 : vector<8x128xf32>
      %18 = arith.truncf %17 : vector<8x128xf32> to vector<8x128xbf16>
      %c0_15 = arith.constant 0 : index
      %c0_16 = arith.constant 0 : index
      %19 = vector.load %arg6[%c0_15, %c0_16] : memref<8x128xbf16, #tpu.memory_space<vmem>>, vector<8x128xbf16>
      tpu.vector_store %arg6[%c0_15, %c0_16], %18 {strides = array<i32>} : memref<8x128xbf16, #tpu.memory_space<vmem>>, vector<8x128xbf16>,
    } else {
    }
    return
  }
  func.func @transform_0(%arg0: i32, %arg1: i32, %arg2: i32) -> (i32, i32) {
    %c0_i32 = arith.constant 0 : i32
    return %arg0, %arg2 : i32, i32
  }
  func.func @transform_1(%arg0: i32, %arg1: i32, %arg2: i32) -> (i32, i32) {
    %c0_i32 = arith.constant 0 : i32
    return %arg2, %arg1 : i32, i32
  }
  func.func @transform_2(%arg0: i32, %arg1: i32, %arg2: i32) -> (i32, i32) {
    %c0_i32 = arith.constant 0 : i32
    %c0_i32_0 = arith.constant 0 : i32
    return %c0_i32, %arg1 : i32, i32
  }
  func.func @transform_3(%arg0: i32, %arg1: i32, %arg2: i32) -> (i32, i32) {
    %c0_i32 = arith.constant 0 : i32
    return %arg0, %arg1 : i32, i32
  }
}

module attributes {stable_mosaic.version = 11 : i64} {
  func.func @_mm_bn_kernel(%arg0: i32, %arg1: i32, %arg2: i32, %arg3: memref<8x512xbf16, #tpu.memory_space<vmem>>, %arg4: memref<512x256xbf16, #tpu.memory_space<vmem>>, %arg5: memref<1x256xf32, #tpu.memory_space<vmem>>, %arg6: memref<8x256xbf16, #tpu.memory_space<vmem>>, %arg7: memref<8x256xf32, #tpu.memory_space<vmem>>) attributes {dimension_semantics = [#tpu.dimension_semantics<parallel>, #tpu.dimension_semantics<parallel>, #tpu.dimension_semantics<arbitrary>], iteration_bounds = array<i64: 1, 1, 1>, scalar_prefetch = 0 : i64, scratch_operands = 1 : i64, tpu.core_type = #tpu.core_type<tc>, window_params = [{transform_indices = @transform_0, window_bounds = array<i64: 8, 512>}, {transform_indices = @transform_1, window_bounds = array<i64: 512, 256>}, {transform_indices = @transform_2, window_bounds = array<i64: 1, 256>}, {transform_indices = @transform_3, window_bounds = array<i64: 8, 256>}]} {
    %c0_i32 = arith.constant 0 : i32
    %0 = arith.cmpi eq, %arg2, %c0_i32 : i32
    %1 = arith.extui %0 : i1 to i32
    %c0_i32_0 = arith.constant 0 : i32
    %2 = arith.cmpi ne, %1, %c0_i32_0 : i32
    scf.if %2 {
      %cst_10 = arith.constant 0.000000e+00 : f32
      %12 = vector.broadcast %cst_10 : f32 to vector<8x256xf32>
      %c0_11 = arith.constant 0 : index
      %c0_12 = arith.constant 0 : index
      %13 = vector.load %arg7[%c0_11, %c0_12] : memref<8x256xf32, #tpu.memory_space<vmem>>, vector<8x256xf32>
      tpu.vector_store %arg7[%c0_11, %c0_12], %12 {strides = array<i32>} : memref<8x256xf32, #tpu.memory_space<vmem>>, vector<8x256xf32>,
    } else {
    }
    %c0 = arith.constant 0 : index
    %c0_1 = arith.constant 0 : index
    %3 = vector.load %arg7[%c0, %c0_1] : memref<8x256xf32, #tpu.memory_space<vmem>>, vector<8x256xf32>
    %c0_2 = arith.constant 0 : index
    %c0_3 = arith.constant 0 : index
    %4 = vector.load %arg3[%c0_2, %c0_3] : memref<8x512xbf16, #tpu.memory_space<vmem>>, vector<8x512xbf16>
    %c0_4 = arith.constant 0 : index
    %c0_5 = arith.constant 0 : index
    %5 = vector.load %arg4[%c0_4, %c0_5] : memref<512x256xbf16, #tpu.memory_space<vmem>>, vector<512x256xbf16>
    %cst = arith.constant dense<0.000000e+00> : vector<8x256xf32>
    %6 = tpu.matmul %4, %5, %cst {dimension_numbers = #tpu.dot_dimension_numbers<[1], [0], [0], [1], [0, 0, 1, 1], [], []>} : vector<8x512xbf16>, vector<512x256xbf16>, vector<8x256xf32> -> vector<8x256xf32>
    %7 = arith.addf %3, %6 : vector<8x256xf32>
    %c0_6 = arith.constant 0 : index
    %c0_7 = arith.constant 0 : index
    %8 = vector.load %arg7[%c0_6, %c0_7] : memref<8x256xf32, #tpu.memory_space<vmem>>, vector<8x256xf32>
    tpu.vector_store %arg7[%c0_6, %c0_7], %7 {strides = array<i32>} : memref<8x256xf32, #tpu.memory_space<vmem>>, vector<8x256xf32>,
    %c0_i32_8 = arith.constant 0 : i32
    %9 = arith.cmpi eq, %arg2, %c0_i32_8 : i32
    %10 = arith.extui %9 : i1 to i32
    %c0_i32_9 = arith.constant 0 : i32
    %11 = arith.cmpi ne, %10, %c0_i32_9 : i32
    scf.if %11 {
      %c0_10 = arith.constant 0 : index
      %c0_11 = arith.constant 0 : index
      %12 = vector.load %arg7[%c0_10, %c0_11] : memref<8x256xf32, #tpu.memory_space<vmem>>, vector<8x256xf32>
      %c0_12 = arith.constant 0 : index
      %c0_13 = arith.constant 0 : index
      %13 = vector.load %arg5[%c0_12, %c0_13] : memref<1x256xf32, #tpu.memory_space<vmem>>, vector<1x256xf32>
      %14 = vector.broadcast %13 : vector<1x256xf32> to vector<8x256xf32>
      %15 = arith.addf %12, %14 : vector<8x256xf32>
      %cst_14 = arith.constant 0.000000e+00 : f32
      %16 = vector.broadcast %cst_14 : f32 to vector<8x256xf32>
      %17 = arith.maximumf %15, %16 : vector<8x256xf32>
      %18 = arith.truncf %17 : vector<8x256xf32> to vector<8x256xbf16>
      %c0_15 = arith.constant 0 : index
      %c0_16 = arith.constant 0 : index
      %19 = vector.load %arg6[%c0_15, %c0_16] : memref<8x256xbf16, #tpu.memory_space<vmem>>, vector<8x256xbf16>
      tpu.vector_store %arg6[%c0_15, %c0_16], %18 {strides = array<i32>} : memref<8x256xbf16, #tpu.memory_space<vmem>>, vector<8x256xbf16>,
    } else {
    }
    return
  }
  func.func @transform_0(%arg0: i32, %arg1: i32, %arg2: i32) -> (i32, i32) {
    %c0_i32 = arith.constant 0 : i32
    return %arg0, %arg2 : i32, i32
  }
  func.func @transform_1(%arg0: i32, %arg1: i32, %arg2: i32) -> (i32, i32) {
    %c0_i32 = arith.constant 0 : i32
    return %arg2, %arg1 : i32, i32
  }
  func.func @transform_2(%arg0: i32, %arg1: i32, %arg2: i32) -> (i32, i32) {
    %c0_i32 = arith.constant 0 : i32
    %c0_i32_0 = arith.constant 0 : i32
    return %c0_i32, %arg1 : i32, i32
  }
  func.func @transform_3(%arg0: i32, %arg1: i32, %arg2: i32) -> (i32, i32) {
    %c0_i32 = arith.constant 0 : i32
    return %arg0, %arg1 : i32, i32
  }
}

module attributes {stable_mosaic.version = 11 : i64} {
  func.func @_mm_bn_kernel(%arg0: i32, %arg1: i32, %arg2: i32, %arg3: memref<8x512xbf16, #tpu.memory_space<vmem>>, %arg4: memref<512x512xbf16, #tpu.memory_space<vmem>>, %arg5: memref<1x512xf32, #tpu.memory_space<vmem>>, %arg6: memref<8x512xbf16, #tpu.memory_space<vmem>>, %arg7: memref<8x512xf32, #tpu.memory_space<vmem>>) attributes {dimension_semantics = [#tpu.dimension_semantics<parallel>, #tpu.dimension_semantics<parallel>, #tpu.dimension_semantics<arbitrary>], iteration_bounds = array<i64: 1, 2, 1>, scalar_prefetch = 0 : i64, scratch_operands = 1 : i64, tpu.core_type = #tpu.core_type<tc>, window_params = [{transform_indices = @transform_0, window_bounds = array<i64: 8, 512>}, {transform_indices = @transform_1, window_bounds = array<i64: 512, 512>}, {transform_indices = @transform_2, window_bounds = array<i64: 1, 512>}, {transform_indices = @transform_3, window_bounds = array<i64: 8, 512>}]} {
    %c0_i32 = arith.constant 0 : i32
    %0 = arith.cmpi eq, %arg2, %c0_i32 : i32
    %1 = arith.extui %0 : i1 to i32
    %c0_i32_0 = arith.constant 0 : i32
    %2 = arith.cmpi ne, %1, %c0_i32_0 : i32
    scf.if %2 {
      %cst_10 = arith.constant 0.000000e+00 : f32
      %12 = vector.broadcast %cst_10 : f32 to vector<8x512xf32>
      %c0_11 = arith.constant 0 : index
      %c0_12 = arith.constant 0 : index
      %13 = vector.load %arg7[%c0_11, %c0_12] : memref<8x512xf32, #tpu.memory_space<vmem>>, vector<8x512xf32>
      tpu.vector_store %arg7[%c0_11, %c0_12], %12 {strides = array<i32>} : memref<8x512xf32, #tpu.memory_space<vmem>>, vector<8x512xf32>,
    } else {
    }
    %c0 = arith.constant 0 : index
    %c0_1 = arith.constant 0 : index
    %3 = vector.load %arg7[%c0, %c0_1] : memref<8x512xf32, #tpu.memory_space<vmem>>, vector<8x512xf32>
    %c0_2 = arith.constant 0 : index
    %c0_3 = arith.constant 0 : index
    %4 = vector.load %arg3[%c0_2, %c0_3] : memref<8x512xbf16, #tpu.memory_space<vmem>>, vector<8x512xbf16>
    %c0_4 = arith.constant 0 : index
    %c0_5 = arith.constant 0 : index
    %5 = vector.load %arg4[%c0_4, %c0_5] : memref<512x512xbf16, #tpu.memory_space<vmem>>, vector<512x512xbf16>
    %cst = arith.constant dense<0.000000e+00> : vector<8x512xf32>
    %6 = tpu.matmul %4, %5, %cst {dimension_numbers = #tpu.dot_dimension_numbers<[1], [0], [0], [1], [0, 0, 1, 1], [], []>} : vector<8x512xbf16>, vector<512x512xbf16>, vector<8x512xf32> -> vector<8x512xf32>
    %7 = arith.addf %3, %6 : vector<8x512xf32>
    %c0_6 = arith.constant 0 : index
    %c0_7 = arith.constant 0 : index
    %8 = vector.load %arg7[%c0_6, %c0_7] : memref<8x512xf32, #tpu.memory_space<vmem>>, vector<8x512xf32>
    tpu.vector_store %arg7[%c0_6, %c0_7], %7 {strides = array<i32>} : memref<8x512xf32, #tpu.memory_space<vmem>>, vector<8x512xf32>,
    %c0_i32_8 = arith.constant 0 : i32
    %9 = arith.cmpi eq, %arg2, %c0_i32_8 : i32
    %10 = arith.extui %9 : i1 to i32
    %c0_i32_9 = arith.constant 0 : i32
    %11 = arith.cmpi ne, %10, %c0_i32_9 : i32
    scf.if %11 {
      %c0_10 = arith.constant 0 : index
      %c0_11 = arith.constant 0 : index
      %12 = vector.load %arg7[%c0_10, %c0_11] : memref<8x512xf32, #tpu.memory_space<vmem>>, vector<8x512xf32>
      %c0_12 = arith.constant 0 : index
      %c0_13 = arith.constant 0 : index
      %13 = vector.load %arg5[%c0_12, %c0_13] : memref<1x512xf32, #tpu.memory_space<vmem>>, vector<1x512xf32>
      %14 = vector.broadcast %13 : vector<1x512xf32> to vector<8x512xf32>
      %15 = arith.addf %12, %14 : vector<8x512xf32>
      %16 = arith.truncf %15 : vector<8x512xf32> to vector<8x512xbf16>
      %c0_14 = arith.constant 0 : index
      %c0_15 = arith.constant 0 : index
      %17 = vector.load %arg6[%c0_14, %c0_15] : memref<8x512xbf16, #tpu.memory_space<vmem>>, vector<8x512xbf16>
      tpu.vector_store %arg6[%c0_14, %c0_15], %16 {strides = array<i32>} : memref<8x512xbf16, #tpu.memory_space<vmem>>, vector<8x512xbf16>,
    } else {
    }
    return
  }
  func.func @transform_0(%arg0: i32, %arg1: i32, %arg2: i32) -> (i32, i32) {
    %c0_i32 = arith.constant 0 : i32
    return %arg0, %arg2 : i32, i32
  }
  func.func @transform_1(%arg0: i32, %arg1: i32, %arg2: i32) -> (i32, i32) {
    %c0_i32 = arith.constant 0 : i32
    return %arg2, %arg1 : i32, i32
  }
  func.func @transform_2(%arg0: i32, %arg1: i32, %arg2: i32) -> (i32, i32) {
    %c0_i32 = arith.constant 0 : i32
    %c0_i32_0 = arith.constant 0 : i32
    return %c0_i32, %arg1 : i32, i32
  }
  func.func @transform_3(%arg0: i32, %arg1: i32, %arg2: i32) -> (i32, i32) {
    %c0_i32 = arith.constant 0 : i32
    return %arg0, %arg1 : i32, i32
  }
}

module attributes {stable_mosaic.version = 11 : i64} {
  func.func @_mm_bn_kernel(%arg0: i32, %arg1: i32, %arg2: i32, %arg3: memref<8x256xbf16, #tpu.memory_space<vmem>>, %arg4: memref<256x256xbf16, #tpu.memory_space<vmem>>, %arg5: memref<1x256xf32, #tpu.memory_space<vmem>>, %arg6: memref<8x256xbf16, #tpu.memory_space<vmem>>, %arg7: memref<8x256xf32, #tpu.memory_space<vmem>>) attributes {dimension_semantics = [#tpu.dimension_semantics<parallel>, #tpu.dimension_semantics<parallel>, #tpu.dimension_semantics<arbitrary>], iteration_bounds = array<i64: 1, 1, 9>, scalar_prefetch = 0 : i64, scratch_operands = 1 : i64, tpu.core_type = #tpu.core_type<tc>, window_params = [{transform_indices = @transform_0, window_bounds = array<i64: 8, 256>}, {transform_indices = @transform_1, window_bounds = array<i64: 256, 256>}, {transform_indices = @transform_2, window_bounds = array<i64: 1, 256>}, {transform_indices = @transform_3, window_bounds = array<i64: 8, 256>}]} {
    %c0_i32 = arith.constant 0 : i32
    %0 = arith.cmpi eq, %arg2, %c0_i32 : i32
    %1 = arith.extui %0 : i1 to i32
    %c0_i32_0 = arith.constant 0 : i32
    %2 = arith.cmpi ne, %1, %c0_i32_0 : i32
    scf.if %2 {
      %cst_9 = arith.constant 0.000000e+00 : f32
      %12 = vector.broadcast %cst_9 : f32 to vector<8x256xf32>
      %c0_10 = arith.constant 0 : index
      %c0_11 = arith.constant 0 : index
      %13 = vector.load %arg7[%c0_10, %c0_11] : memref<8x256xf32, #tpu.memory_space<vmem>>, vector<8x256xf32>
      tpu.vector_store %arg7[%c0_10, %c0_11], %12 {strides = array<i32>} : memref<8x256xf32, #tpu.memory_space<vmem>>, vector<8x256xf32>,
    } else {
    }
    %c0 = arith.constant 0 : index
    %c0_1 = arith.constant 0 : index
    %3 = vector.load %arg7[%c0, %c0_1] : memref<8x256xf32, #tpu.memory_space<vmem>>, vector<8x256xf32>
    %c0_2 = arith.constant 0 : index
    %c0_3 = arith.constant 0 : index
    %4 = vector.load %arg3[%c0_2, %c0_3] : memref<8x256xbf16, #tpu.memory_space<vmem>>, vector<8x256xbf16>
    %c0_4 = arith.constant 0 : index
    %c0_5 = arith.constant 0 : index
    %5 = vector.load %arg4[%c0_4, %c0_5] : memref<256x256xbf16, #tpu.memory_space<vmem>>, vector<256x256xbf16>
    %cst = arith.constant dense<0.000000e+00> : vector<8x256xf32>
    %6 = tpu.matmul %4, %5, %cst {dimension_numbers = #tpu.dot_dimension_numbers<[1], [0], [0], [1], [0, 0, 1, 1], [], []>} : vector<8x256xbf16>, vector<256x256xbf16>, vector<8x256xf32> -> vector<8x256xf32>
    %7 = arith.addf %3, %6 : vector<8x256xf32>
    %c0_6 = arith.constant 0 : index
    %c0_7 = arith.constant 0 : index
    %8 = vector.load %arg7[%c0_6, %c0_7] : memref<8x256xf32, #tpu.memory_space<vmem>>, vector<8x256xf32>
    tpu.vector_store %arg7[%c0_6, %c0_7], %7 {strides = array<i32>} : memref<8x256xf32, #tpu.memory_space<vmem>>, vector<8x256xf32>,
    %c8_i32 = arith.constant 8 : i32
    %9 = arith.cmpi eq, %arg2, %c8_i32 : i32
    %10 = arith.extui %9 : i1 to i32
    %c0_i32_8 = arith.constant 0 : i32
    %11 = arith.cmpi ne, %10, %c0_i32_8 : i32
    scf.if %11 {
      %c0_9 = arith.constant 0 : index
      %c0_10 = arith.constant 0 : index
      %12 = vector.load %arg7[%c0_9, %c0_10] : memref<8x256xf32, #tpu.memory_space<vmem>>, vector<8x256xf32>
      %c0_11 = arith.constant 0 : index
      %c0_12 = arith.constant 0 : index
      %13 = vector.load %arg5[%c0_11, %c0_12] : memref<1x256xf32, #tpu.memory_space<vmem>>, vector<1x256xf32>
      %14 = vector.broadcast %13 : vector<1x256xf32> to vector<8x256xf32>
      %15 = arith.addf %12, %14 : vector<8x256xf32>
      %cst_13 = arith.constant 0.000000e+00 : f32
      %16 = vector.broadcast %cst_13 : f32 to vector<8x256xf32>
      %17 = arith.maximumf %15, %16 : vector<8x256xf32>
      %18 = arith.truncf %17 : vector<8x256xf32> to vector<8x256xbf16>
      %c0_14 = arith.constant 0 : index
      %c0_15 = arith.constant 0 : index
      %19 = vector.load %arg6[%c0_14, %c0_15] : memref<8x256xbf16, #tpu.memory_space<vmem>>, vector<8x256xbf16>
      tpu.vector_store %arg6[%c0_14, %c0_15], %18 {strides = array<i32>} : memref<8x256xbf16, #tpu.memory_space<vmem>>, vector<8x256xbf16>,
    } else {
    }
    return
  }
  func.func @transform_0(%arg0: i32, %arg1: i32, %arg2: i32) -> (i32, i32) {
    %c0_i32 = arith.constant 0 : i32
    return %arg0, %arg2 : i32, i32
  }
  func.func @transform_1(%arg0: i32, %arg1: i32, %arg2: i32) -> (i32, i32) {
    %c0_i32 = arith.constant 0 : i32
    return %arg2, %arg1 : i32, i32
  }
  func.func @transform_2(%arg0: i32, %arg1: i32, %arg2: i32) -> (i32, i32) {
    %c0_i32 = arith.constant 0 : i32
    %c0_i32_0 = arith.constant 0 : i32
    return %c0_i32, %arg1 : i32, i32
  }
  func.func @transform_3(%arg0: i32, %arg1: i32, %arg2: i32) -> (i32, i32) {
    %c0_i32 = arith.constant 0 : i32
    return %arg0, %arg1 : i32, i32
  }
}

module attributes {stable_mosaic.version = 11 : i64} {
  func.func @_mm_bn_res_kernel(%arg0: i32, %arg1: i32, %arg2: i32, %arg3: memref<8x256xbf16, #tpu.memory_space<vmem>>, %arg4: memref<256x512xbf16, #tpu.memory_space<vmem>>, %arg5: memref<1x512xf32, #tpu.memory_space<vmem>>, %arg6: memref<8x512xbf16, #tpu.memory_space<vmem>>, %arg7: memref<8x512xbf16, #tpu.memory_space<vmem>>, %arg8: memref<8x512xf32, #tpu.memory_space<vmem>>) attributes {dimension_semantics = [#tpu.dimension_semantics<parallel>, #tpu.dimension_semantics<parallel>, #tpu.dimension_semantics<arbitrary>], iteration_bounds = array<i64: 1, 2, 1>, scalar_prefetch = 0 : i64, scratch_operands = 1 : i64, tpu.core_type = #tpu.core_type<tc>, window_params = [{transform_indices = @transform_0, window_bounds = array<i64: 8, 256>}, {transform_indices = @transform_1, window_bounds = array<i64: 256, 512>}, {transform_indices = @transform_2, window_bounds = array<i64: 1, 512>}, {transform_indices = @transform_3, window_bounds = array<i64: 8, 512>}, {transform_indices = @transform_4, window_bounds = array<i64: 8, 512>}]} {
    %c0_i32 = arith.constant 0 : i32
    %0 = arith.cmpi eq, %arg2, %c0_i32 : i32
    %1 = arith.extui %0 : i1 to i32
    %c0_i32_0 = arith.constant 0 : i32
    %2 = arith.cmpi ne, %1, %c0_i32_0 : i32
    scf.if %2 {
      %cst_10 = arith.constant 0.000000e+00 : f32
      %12 = vector.broadcast %cst_10 : f32 to vector<8x512xf32>
      %c0_11 = arith.constant 0 : index
      %c0_12 = arith.constant 0 : index
      %13 = vector.load %arg8[%c0_11, %c0_12] : memref<8x512xf32, #tpu.memory_space<vmem>>, vector<8x512xf32>
      tpu.vector_store %arg8[%c0_11, %c0_12], %12 {strides = array<i32>} : memref<8x512xf32, #tpu.memory_space<vmem>>, vector<8x512xf32>,
    } else {
    }
    %c0 = arith.constant 0 : index
    %c0_1 = arith.constant 0 : index
    %3 = vector.load %arg8[%c0, %c0_1] : memref<8x512xf32, #tpu.memory_space<vmem>>, vector<8x512xf32>
    %c0_2 = arith.constant 0 : index
    %c0_3 = arith.constant 0 : index
    %4 = vector.load %arg3[%c0_2, %c0_3] : memref<8x256xbf16, #tpu.memory_space<vmem>>, vector<8x256xbf16>
    %c0_4 = arith.constant 0 : index
    %c0_5 = arith.constant 0 : index
    %5 = vector.load %arg4[%c0_4, %c0_5] : memref<256x512xbf16, #tpu.memory_space<vmem>>, vector<256x512xbf16>
    %cst = arith.constant dense<0.000000e+00> : vector<8x512xf32>
    %6 = tpu.matmul %4, %5, %cst {dimension_numbers = #tpu.dot_dimension_numbers<[1], [0], [0], [1], [0, 0, 1, 1], [], []>} : vector<8x256xbf16>, vector<256x512xbf16>, vector<8x512xf32> -> vector<8x512xf32>
    %7 = arith.addf %3, %6 : vector<8x512xf32>
    %c0_6 = arith.constant 0 : index
    %c0_7 = arith.constant 0 : index
    %8 = vector.load %arg8[%c0_6, %c0_7] : memref<8x512xf32, #tpu.memory_space<vmem>>, vector<8x512xf32>
    tpu.vector_store %arg8[%c0_6, %c0_7], %7 {strides = array<i32>} : memref<8x512xf32, #tpu.memory_space<vmem>>, vector<8x512xf32>,
    %c0_i32_8 = arith.constant 0 : i32
    %9 = arith.cmpi eq, %arg2, %c0_i32_8 : i32
    %10 = arith.extui %9 : i1 to i32
    %c0_i32_9 = arith.constant 0 : i32
    %11 = arith.cmpi ne, %10, %c0_i32_9 : i32
    scf.if %11 {
      %c0_10 = arith.constant 0 : index
      %c0_11 = arith.constant 0 : index
      %12 = vector.load %arg8[%c0_10, %c0_11] : memref<8x512xf32, #tpu.memory_space<vmem>>, vector<8x512xf32>
      %c0_12 = arith.constant 0 : index
      %c0_13 = arith.constant 0 : index
      %13 = vector.load %arg5[%c0_12, %c0_13] : memref<1x512xf32, #tpu.memory_space<vmem>>, vector<1x512xf32>
      %14 = vector.broadcast %13 : vector<1x512xf32> to vector<8x512xf32>
      %15 = arith.addf %12, %14 : vector<8x512xf32>
      %c0_14 = arith.constant 0 : index
      %c0_15 = arith.constant 0 : index
      %16 = vector.load %arg6[%c0_14, %c0_15] : memref<8x512xbf16, #tpu.memory_space<vmem>>, vector<8x512xbf16>
      %17 = arith.extf %16 : vector<8x512xbf16> to vector<8x512xf32>
      %18 = arith.addf %15, %17 : vector<8x512xf32>
      %cst_16 = arith.constant 0.000000e+00 : f32
      %19 = vector.broadcast %cst_16 : f32 to vector<8x512xf32>
      %20 = arith.maximumf %18, %19 : vector<8x512xf32>
      %21 = arith.truncf %20 : vector<8x512xf32> to vector<8x512xbf16>
      %c0_17 = arith.constant 0 : index
      %c0_18 = arith.constant 0 : index
      %22 = vector.load %arg7[%c0_17, %c0_18] : memref<8x512xbf16, #tpu.memory_space<vmem>>, vector<8x512xbf16>
      tpu.vector_store %arg7[%c0_17, %c0_18], %21 {strides = array<i32>} : memref<8x512xbf16, #tpu.memory_space<vmem>>, vector<8x512xbf16>,
    } else {
    }
    return
  }
  func.func @transform_0(%arg0: i32, %arg1: i32, %arg2: i32) -> (i32, i32) {
    %c0_i32 = arith.constant 0 : i32
    return %arg0, %arg2 : i32, i32
  }
  func.func @transform_1(%arg0: i32, %arg1: i32, %arg2: i32) -> (i32, i32) {
    %c0_i32 = arith.constant 0 : i32
    return %arg2, %arg1 : i32, i32
  }
  func.func @transform_2(%arg0: i32, %arg1: i32, %arg2: i32) -> (i32, i32) {
    %c0_i32 = arith.constant 0 : i32
    %c0_i32_0 = arith.constant 0 : i32
    return %c0_i32, %arg1 : i32, i32
  }
  func.func @transform_3(%arg0: i32, %arg1: i32, %arg2: i32) -> (i32, i32) {
    %c0_i32 = arith.constant 0 : i32
    return %arg0, %arg1 : i32, i32
  }
  func.func @transform_4(%arg0: i32, %arg1: i32, %arg2: i32) -> (i32, i32) {
    %c0_i32 = arith.constant 0 : i32
    return %arg0, %arg1 : i32, i32
  }
}

module attributes {stable_mosaic.version = 11 : i64} {
  func.func @_mm_bn_kernel(%arg0: i32, %arg1: i32, %arg2: i32, %arg3: memref<8x512xbf16, #tpu.memory_space<vmem>>, %arg4: memref<512x256xbf16, #tpu.memory_space<vmem>>, %arg5: memref<1x256xf32, #tpu.memory_space<vmem>>, %arg6: memref<8x256xbf16, #tpu.memory_space<vmem>>, %arg7: memref<8x256xf32, #tpu.memory_space<vmem>>) attributes {dimension_semantics = [#tpu.dimension_semantics<parallel>, #tpu.dimension_semantics<parallel>, #tpu.dimension_semantics<arbitrary>], iteration_bounds = array<i64: 1, 1, 2>, scalar_prefetch = 0 : i64, scratch_operands = 1 : i64, tpu.core_type = #tpu.core_type<tc>, window_params = [{transform_indices = @transform_0, window_bounds = array<i64: 8, 512>}, {transform_indices = @transform_1, window_bounds = array<i64: 512, 256>}, {transform_indices = @transform_2, window_bounds = array<i64: 1, 256>}, {transform_indices = @transform_3, window_bounds = array<i64: 8, 256>}]} {
    %c0_i32 = arith.constant 0 : i32
    %0 = arith.cmpi eq, %arg2, %c0_i32 : i32
    %1 = arith.extui %0 : i1 to i32
    %c0_i32_0 = arith.constant 0 : i32
    %2 = arith.cmpi ne, %1, %c0_i32_0 : i32
    scf.if %2 {
      %cst_9 = arith.constant 0.000000e+00 : f32
      %12 = vector.broadcast %cst_9 : f32 to vector<8x256xf32>
      %c0_10 = arith.constant 0 : index
      %c0_11 = arith.constant 0 : index
      %13 = vector.load %arg7[%c0_10, %c0_11] : memref<8x256xf32, #tpu.memory_space<vmem>>, vector<8x256xf32>
      tpu.vector_store %arg7[%c0_10, %c0_11], %12 {strides = array<i32>} : memref<8x256xf32, #tpu.memory_space<vmem>>, vector<8x256xf32>,
    } else {
    }
    %c0 = arith.constant 0 : index
    %c0_1 = arith.constant 0 : index
    %3 = vector.load %arg7[%c0, %c0_1] : memref<8x256xf32, #tpu.memory_space<vmem>>, vector<8x256xf32>
    %c0_2 = arith.constant 0 : index
    %c0_3 = arith.constant 0 : index
    %4 = vector.load %arg3[%c0_2, %c0_3] : memref<8x512xbf16, #tpu.memory_space<vmem>>, vector<8x512xbf16>
    %c0_4 = arith.constant 0 : index
    %c0_5 = arith.constant 0 : index
    %5 = vector.load %arg4[%c0_4, %c0_5] : memref<512x256xbf16, #tpu.memory_space<vmem>>, vector<512x256xbf16>
    %cst = arith.constant dense<0.000000e+00> : vector<8x256xf32>
    %6 = tpu.matmul %4, %5, %cst {dimension_numbers = #tpu.dot_dimension_numbers<[1], [0], [0], [1], [0, 0, 1, 1], [], []>} : vector<8x512xbf16>, vector<512x256xbf16>, vector<8x256xf32> -> vector<8x256xf32>
    %7 = arith.addf %3, %6 : vector<8x256xf32>
    %c0_6 = arith.constant 0 : index
    %c0_7 = arith.constant 0 : index
    %8 = vector.load %arg7[%c0_6, %c0_7] : memref<8x256xf32, #tpu.memory_space<vmem>>, vector<8x256xf32>
    tpu.vector_store %arg7[%c0_6, %c0_7], %7 {strides = array<i32>} : memref<8x256xf32, #tpu.memory_space<vmem>>, vector<8x256xf32>,
    %c1_i32 = arith.constant 1 : i32
    %9 = arith.cmpi eq, %arg2, %c1_i32 : i32
    %10 = arith.extui %9 : i1 to i32
    %c0_i32_8 = arith.constant 0 : i32
    %11 = arith.cmpi ne, %10, %c0_i32_8 : i32
    scf.if %11 {
      %c0_9 = arith.constant 0 : index
      %c0_10 = arith.constant 0 : index
      %12 = vector.load %arg7[%c0_9, %c0_10] : memref<8x256xf32, #tpu.memory_space<vmem>>, vector<8x256xf32>
      %c0_11 = arith.constant 0 : index
      %c0_12 = arith.constant 0 : index
      %13 = vector.load %arg5[%c0_11, %c0_12] : memref<1x256xf32, #tpu.memory_space<vmem>>, vector<1x256xf32>
      %14 = vector.broadcast %13 : vector<1x256xf32> to vector<8x256xf32>
      %15 = arith.addf %12, %14 : vector<8x256xf32>
      %cst_13 = arith.constant 0.000000e+00 : f32
      %16 = vector.broadcast %cst_13 : f32 to vector<8x256xf32>
      %17 = arith.maximumf %15, %16 : vector<8x256xf32>
      %18 = arith.truncf %17 : vector<8x256xf32> to vector<8x256xbf16>
      %c0_14 = arith.constant 0 : index
      %c0_15 = arith.constant 0 : index
      %19 = vector.load %arg6[%c0_14, %c0_15] : memref<8x256xbf16, #tpu.memory_space<vmem>>, vector<8x256xbf16>
      tpu.vector_store %arg6[%c0_14, %c0_15], %18 {strides = array<i32>} : memref<8x256xbf16, #tpu.memory_space<vmem>>, vector<8x256xbf16>,
    } else {
    }
    return
  }
  func.func @transform_0(%arg0: i32, %arg1: i32, %arg2: i32) -> (i32, i32) {
    %c0_i32 = arith.constant 0 : i32
    return %arg0, %arg2 : i32, i32
  }
  func.func @transform_1(%arg0: i32, %arg1: i32, %arg2: i32) -> (i32, i32) {
    %c0_i32 = arith.constant 0 : i32
    return %arg2, %arg1 : i32, i32
  }
  func.func @transform_2(%arg0: i32, %arg1: i32, %arg2: i32) -> (i32, i32) {
    %c0_i32 = arith.constant 0 : i32
    %c0_i32_0 = arith.constant 0 : i32
    return %c0_i32, %arg1 : i32, i32
  }
  func.func @transform_3(%arg0: i32, %arg1: i32, %arg2: i32) -> (i32, i32) {
    %c0_i32 = arith.constant 0 : i32
    return %arg0, %arg1 : i32, i32
  }
}

</mosaic_0001>

<bundles_post_ra>
// kernel: _lambda_.43
= control target key start
LH: loop header
LB: loop body
LE: loop exit
PB: predicated region body
PF: predicated region fallthrough
CT: control target
= control target key end

     0   :  { %vm19_vm0 = vcmask 523264   ;;  %v735_v32 = vmov 0.0   ;;  %vm528_vm1 = vcmask 519168   ;;  %s969_s1 = inlined_call_operand.vmem [shape: bf16[256,64], index: 1, kind: input, shape index: {}]   ;;  %s970_s0 = inlined_call_operand.vmem [shape: bf16[128,256], index: 0, kind: input, shape index: {}]   ;;  %s971_s2 = inlined_call_operand.vmem [shape: f32[1,64], index: 2, kind: input, shape index: {}]   ;;  %s972_s3 = inlined_call_operand.vmem [shape: bf16[128,64], index: 3, kind: output, shape index: {}]  }
   0x1   :  { %v695_v0 = vld [vmem:[%s969_s1 + $0x78] sm:$0xff]   ;;  %v697_v2 = vld [vmem:[%s969_s1 + $0x70] sm:$0xff]   ;;  %v699_v4 = vld [vmem:[%s969_s1 + $0x68] sm:$0xff]   ;;  %20 = vst.msk [vmem:[#allocation2] sm:$0xff] %vm19_vm0, %v735_v32 }
   0x2   :  { %v696_v1 = vld [vmem:[%s969_s1 + $0x38] sm:$0xff]   ;;  %614 = vmatprep.subr.bf16.mxu0 %v695_v0  ;;  %678 = vmatprep.subr.bf16.mxu1 %v695_v0  ;;  %v698_v3 = vld [vmem:[%s969_s1 + $0x30] sm:$0xff]   ;;  %v700_v5 = vld [vmem:[%s969_s1 + $0x28] sm:$0xff]   ;;  %21 = vst.msk [vmem:[#allocation2 + $0x8] sm:$0xff] %vm19_vm0, %v735_v32 }
   0x3   :  { %615 = vmatpush3.bf16.msra.mxu0 %v696_v1  ;;  %686 = vmatpush3.bf16.msra.mxu1 %v696_v1  ;;  %v701_v6 = vld [vmem:[%s969_s1 + $0x60] sm:$0xff]   ;;  %v703_v8 = vld [vmem:[%s969_s1 + $0x58] sm:$0xff]   ;;  %v705_v10 = vld [vmem:[%s969_s1 + $0x50] sm:$0xff]   ;;  %22 = vst.msk [vmem:[#allocation2 + $0x10] sm:$0xff] %vm19_vm0, %v735_v32 }
   0x4   :  { %616 = vmatprep.subr.bf16.mxu0 %v697_v2  ;;  %679 = vmatprep.subr.bf16.mxu1 %v697_v2  ;;  %v702_v7 = vld [vmem:[%s969_s1 + $0x20] sm:$0xff]   ;;  %v704_v9 = vld [vmem:[%s969_s1 + $0x18] sm:$0xff]   ;;  %v706_v13 = vld [vmem:[%s969_s1 + $0x10] sm:$0xff]   ;;  %23 = vst.msk [vmem:[#allocation2 + $0x18] sm:$0xff] %vm19_vm0, %v735_v32 }
   0x5   :  { %v713_v11 = vld [vmem:[%s970_s0 + $0x4] ss:$8 sps:$4 sm:$0xff]   ;;  %v711_v18 = vld [vmem:[%s970_s0] ss:$8 sps:$4 sm:$0xff]   ;;  %v717_v20 = vld [vmem:[%s970_s0 + $0x14] ss:$8 sps:$4 sm:$0xff]  }
   0x6   :  { %v716_v12 = vld [vmem:[%s970_s0 + $0x44] ss:$8 sps:$4 sm:$0xff]   ;;  %308 = vmatprep.mubr.bf16.mxu0 %v713_v11  ;;  %v714_v19 = vld [vmem:[%s970_s0 + $0x40] ss:$8 sps:$4 sm:$0xff]   ;;  %v719_v21 = vld [vmem:[%s970_s0 + $0x54] ss:$8 sps:$4 sm:$0xff]  }
   0x7   :  { %617 = vmatpush3.bf16.msra.mxu0 %v698_v3  ;;  %687 = vmatpush3.bf16.msra.mxu1 %v698_v3  ;;  %v707_v14 = vld [vmem:[%s969_s1 + $0x48] sm:$0xff]   ;;  %v709_v16 = vld [vmem:[%s969_s1 + $0x40] sm:$0xff]   ;;  %v721_v22 = vld [vmem:[%s970_s0 + $0x10] ss:$8 sps:$4 sm:$0xff]   ;;  %24 = vst.msk [vmem:[#allocation2 + $0x20] sm:$0xff] %vm19_vm0, %v735_v32 }
   0x8   :  { %618 = vmatprep.subr.bf16.mxu0 %v699_v4  ;;  %680 = vmatprep.subr.bf16.mxu1 %v699_v4  ;;  %v708_v15 = vld [vmem:[%s969_s1 + $0x8] sm:$0xff]   ;;  %v710_v17 = vld [vmem:[%s969_s1] sm:$0xff]   ;;  %v722_v23 = vld [vmem:[%s970_s0 + $0x50] ss:$8 sps:$4 sm:$0xff]   ;;  %25 = vst.msk [vmem:[#allocation2 + $0x28] sm:$0xff] %vm19_vm0, %v735_v32 }
   0x9   :  { %340 = vmatprep.mubr.bf16.mxu1 %v716_v12  ;;  %v723_v24 = vld [vmem:[%s970_s0 + $0x24] ss:$8 sps:$4 sm:$0xff]   ;;  %v727_v26 = vld [vmem:[%s970_s0 + $0x20] ss:$8 sps:$4 sm:$0xff]   ;;  %v729_v28 = vld [vmem:[%s970_s0 + $0x34] ss:$8 sps:$4 sm:$0xff]  }
   0xa   :  { %v725_v25 = vld [vmem:[%s970_s0 + $0x64] ss:$8 sps:$4 sm:$0xff]   ;;  %v728_v27 = vld [vmem:[%s970_s0 + $0x60] ss:$8 sps:$4 sm:$0xff]   ;;  %v731_v29 = vld [vmem:[%s970_s0 + $0x74] ss:$8 sps:$4 sm:$0xff]  }
   0xb   :  { %619 = vmatpush3.bf16.msra.mxu0 %v700_v5  ;;  %688 = vmatpush3.bf16.msra.mxu1 %v700_v5  ;;  %v733_v30 = vld [vmem:[%s970_s0 + $0x30] ss:$8 sps:$4 sm:$0xff]   ;;  %26 = vst.msk [vmem:[#allocation2 + $0x30] sm:$0xff] %vm19_vm0, %v735_v32  ;;  %27 = vst.msk [vmem:[#allocation2 + $0x38] sm:$0xff] %vm19_vm0, %v735_v32  ;;  %v36_v35 = vld [vmem:[#allocation2] sm:$0xff] }
   0xc   :  { %620 = vmatprep.subr.bf16.mxu0 %v701_v6  ;;  %681 = vmatprep.subr.bf16.mxu1 %v701_v6  ;;  %v734_v31 = vld [vmem:[%s970_s0 + $0x70] ss:$8 sps:$4 sm:$0xff]   ;;  %28 = vst.msk [vmem:[#allocation2 + $0x40] sm:$0xff] %vm19_vm0, %v735_v32  ;;  %29 = vst.msk [vmem:[#allocation2 + $0x48] sm:$0xff] %vm19_vm0, %v735_v32  ;;  %v875_v61 = vld [vmem:[%s971_s2] ss:$0 sm:$0xff] }
   0xd   :  { %30 = vst.msk [vmem:[#allocation2 + $0x50] sm:$0xff] %vm19_vm0, %v735_v32  ;;  %31 = vst.msk [vmem:[#allocation2 + $0x58] sm:$0xff] %vm19_vm0, %v735_v32  ;;  %v37_v45 = vld [vmem:[#allocation2 + $0x8] sm:$0xff]  ;;  %v38_v55 = vld [vmem:[#allocation2 + $0x10] sm:$0xff] }
   0xe   :  { %32 = vst.msk [vmem:[#allocation2 + $0x60] sm:$0xff] %vm19_vm0, %v735_v32  ;;  %33 = vst.msk [vmem:[#allocation2 + $0x68] sm:$0xff] %vm19_vm0, %v735_v32  ;;  %v39_v2 = vld [vmem:[#allocation2 + $0x18] sm:$0xff] }
   0xf   :  { %621 = vmatpush3.bf16.msra.mxu0 %v702_v7  ;;  %689 = vmatpush3.bf16.msra.mxu1 %v702_v7  ;;  %34 = vst.msk [vmem:[#allocation2 + $0x70] sm:$0xff] %vm19_vm0, %v735_v32  ;;  %35 = vst.msk [vmem:[#allocation2 + $0x78] sm:$0xff] %vm19_vm0, %v735_v32 }
  0x10   :  { %622 = vmatprep.subr.bf16.mxu0 %v703_v8  ;;  %682 = vmatprep.subr.bf16.mxu1 %v703_v8 }
  0x13   :  { %623 = vmatpush3.bf16.msra.mxu0 %v704_v9  ;;  %690 = vmatpush3.bf16.msra.mxu1 %v704_v9  ;;  %v44_v37 = vld [vmem:[#allocation2 + $0x40] sm:$0xff]  ;;  %v45_v47 = vld [vmem:[#allocation2 + $0x48] sm:$0xff] }
  0x14   :  { %624 = vmatprep.subr.bf16.mxu0 %v705_v10  ;;  %683 = vmatprep.subr.bf16.mxu1 %v705_v10  ;;  %v46_v57 = vld [vmem:[#allocation2 + $0x50] sm:$0xff]  ;;  %v47_v6 = vld [vmem:[#allocation2 + $0x58] sm:$0xff] }
  0x17   :  { %625 = vmatpush3.bf16.msra.mxu0 %v706_v13  ;;  %691 = vmatpush3.bf16.msra.mxu1 %v706_v13 }
  0x18   :  { %626 = vmatprep.subr.bf16.mxu0 %v707_v14  ;;  %684 = vmatprep.subr.bf16.mxu1 %v707_v14 }
  0x1b   :  { %627 = vmatpush3.bf16.msra.mxu0 %v708_v15  ;;  %692 = vmatpush3.bf16.msra.mxu1 %v708_v15 }
  0x1c   :  { %628 = vmatprep.subr.bf16.mxu0 %v709_v16  ;;  %685 = vmatprep.subr.bf16.mxu1 %v709_v16 }
  0x1f   :  { %629 = vmatpush3.bf16.msra.mxu0 %v710_v17  ;;  %693 = vmatpush3.bf16.msra.mxu1 %v710_v17 }
  0x22   :  { %309 = vmatmul.mubr.bf16.vlgmr.msra.gmra.mxu0 %v711_v18  ;;  %341 = vmatmul.mubr.bf16.vlgmr.msra.gmra.mxu1 %v714_v19 }
  0x23   :  { %316 = vmatprep.mubr.bf16.mxu0 %v717_v20  ;;  %348 = vmatprep.mubr.bf16.mxu1 %v719_v21 }
  0x2a   :  { %317 = vmatmul.mubr.bf16.gmra.mxu0 %v721_v22  ;;  %349 = vmatmul.mubr.bf16.gmra.mxu1 %v722_v23 }
  0x2b   :  { %324 = vmatprep.mubr.bf16.mxu0 %v723_v24  ;;  %356 = vmatprep.mubr.bf16.mxu1 %v725_v25 }
  0x32   :  { %325 = vmatmul.mubr.bf16.gmra.mxu0 %v727_v26  ;;  %357 = vmatmul.mubr.bf16.gmra.mxu1 %v728_v27  ;;  %v40_v26 = vld [vmem:[#allocation2 + $0x20] sm:$0xff] }
  0x33   :  { %332 = vmatprep.mubr.bf16.mxu0 %v729_v28  ;;  %364 = vmatprep.mubr.bf16.mxu1 %v731_v29  ;;  %v48_v27 = vld [vmem:[#allocation2 + $0x60] sm:$0xff] }
  0x3a   :  { %333 = vmatmul.mubr.bf16.gmra.mxu0 %v733_v30  ;;  %365 = vmatmul.mubr.bf16.gmra.mxu1 %v734_v31 }
  0xe2   :  { %v630_v33 = vpop.f32.mrf.mxu0  ;;  %v654_v34 = vpop.f32.mrf.mxu1 }
  0xe4   :  { %v631_v36 = vpop.f32.mrf.mxu0  ;;  %v655_v38 = vpop.f32.mrf.mxu1 }
  0xe5   :  { %v632_v39 = vadd.f32 %v631_v36, %v630_v33  ;;  %v656_v40 = vadd.f32 %v655_v38, %v654_v34 }
  0xe6   :  { %v633_v41 = vpop.f32.mrf.mxu0  ;;  %v657_v42 = vpop.f32.mrf.mxu1 }
  0xe7   :  { %v373_v43 = vadd.f32 %v632_v39, %v36_v35  ;;  %v381_v44 = vadd.f32 %v656_v40, %v44_v37 }
  0xe8   :  { %v634_v46 = vpop.f32.mrf.mxu0  ;;  %v658_v48 = vpop.f32.mrf.mxu1 }
  0xe9   :  { %390 = vst.msk [vmem:[#allocation2] sm:$0xff] %vm19_vm0, %v373_v43  ;;  %398 = vst.msk [vmem:[#allocation2 + $0x40] sm:$0xff] %vm19_vm0, %v381_v44  ;;  %v635_v49 = vadd.f32 %v634_v46, %v633_v41  ;;  %v659_v50 = vadd.f32 %v658_v48, %v657_v42  ;;  %v41_v44 = vld [vmem:[#allocation2 + $0x28] sm:$0xff] }
  0xea   :  { %v636_v51 = vpop.f32.mrf.mxu0  ;;  %v660_v52 = vpop.f32.mrf.mxu1 }
  0xeb   :  { %v374_v53 = vadd.f32 %v635_v49, %v37_v45  ;;  %v382_v54 = vadd.f32 %v659_v50, %v45_v47  ;;  %v49_v45 = vld [vmem:[#allocation2 + $0x68] sm:$0xff] }
  0xec   :  { %v637_v56 = vpop.f32.mrf.mxu0  ;;  %v661_v58 = vpop.f32.mrf.mxu1 }
  0xed   :  { %391 = vst.msk [vmem:[#allocation2 + $0x8] sm:$0xff] %vm19_vm0, %v374_v53  ;;  %399 = vst.msk [vmem:[#allocation2 + $0x48] sm:$0xff] %vm19_vm0, %v382_v54  ;;  %v638_v59 = vadd.f32 %v637_v56, %v636_v51  ;;  %v662_v60 = vadd.f32 %v661_v58, %v660_v52 }
  0xee   :  { %v639_v62 = vpop.f32.mrf.mxu0  ;;  %v663_v63 = vpop.f32.mrf.mxu1 }
  0xef   :  { %v375_v0 = vadd.f32 %v638_v59, %v38_v55  ;;  %v383_v1 = vadd.f32 %v662_v60, %v46_v57 }
  0xf0   :  { %v409_v3 = vld [vmem:[#allocation2] sm:$0xff]  ;;  %v640_v5 = vpop.f32.mrf.mxu0  ;;  %v664_v7 = vpop.f32.mrf.mxu1 }
  0xf1   :  { %v417_v4 = vld [vmem:[#allocation2 + $0x40] sm:$0xff]  ;;  %v432_v8 = vadd.f32 %v875_v61, %v409_v3  ;;  %392 = vst.msk [vmem:[#allocation2 + $0x10] sm:$0xff] %vm19_vm0, %v375_v0  ;;  %400 = vst.msk [vmem:[#allocation2 + $0x50] sm:$0xff] %vm19_vm0, %v383_v1  ;;  %v641_v10 = vadd.f32 %v640_v5, %v639_v62  ;;  %v665_v11 = vadd.f32 %v664_v7, %v663_v63  ;;  %v42_v63 = vld [vmem:[#allocation2 + $0x30] sm:$0xff] }
  0xf2   :  { %v440_v9 = vadd.f32 %v875_v61, %v417_v4  ;;  %v642_v12 = vpop.f32.mrf.mxu0  ;;  %v666_v13 = vpop.f32.mrf.mxu1  ;;  %v50_v0 = vld [vmem:[#allocation2 + $0x70] sm:$0xff] }
  0xf3   :  { %v448_v14 = vmax.f32 %v432_v8, 0.0  ;;  %v376_v16 = vadd.f32 %v641_v10, %v39_v2  ;;  %v384_v17 = vadd.f32 %v665_v11, %v47_v6  ;;  %v51_v11 = vld [vmem:[#allocation2 + $0x78] sm:$0xff] }
  0xf4   :  { %v456_v15 = vmax.f32 %v440_v9, 0.0  ;;  %v410_v18 = vld [vmem:[#allocation2 + $0x8] sm:$0xff]  ;;  %v643_v20 = vpop.f32.mrf.mxu0  ;;  %v667_v21 = vpop.f32.mrf.mxu1  ;;  %v43_v9 = vld [vmem:[#allocation2 + $0x38] sm:$0xff] }
  0xf5   :  { %v418_v19 = vld [vmem:[#allocation2 + $0x48] sm:$0xff]  ;;  %v598_v22 = vpack.c.bf16 %v448_v14, %v448_v14  ;;  %v433_v24 = vadd.f32 %v875_v61, %v410_v18  ;;  %393 = vst.msk [vmem:[#allocation2 + $0x18] sm:$0xff] %vm19_vm0, %v376_v16  ;;  %401 = vst.msk [vmem:[#allocation2 + $0x58] sm:$0xff] %vm19_vm0, %v384_v17  ;;  %v644_v28 = vadd.f32 %v643_v20, %v642_v12 }
  0xf6   :  { %v606_v23 = vpack.c.bf16 %v456_v15, %v456_v15  ;;  %v441_v25 = vadd.f32 %v875_v61, %v418_v19  ;;  %v668_v29 = vadd.f32 %v667_v21, %v666_v13  ;;  %v645_v30 = vpop.f32.mrf.mxu0  ;;  %v669_v31 = vpop.f32.mrf.mxu1 }
  0xf7   :  { %529 = vst.msk [vmem:[%s972_s3] sm:$0xf] %vm528_vm1, %v598_v22  ;;  %v449_v32 = vmax.f32 %v433_v24, 0.0  ;;  %v377_v36 = vadd.f32 %v644_v28, %v40_v26 }
  0xf8   :  { %537 = vst.msk [vmem:[%s972_s3 + $0x20] sm:$0xf] %vm528_vm1, %v606_v23  ;;  %v457_v33 = vmax.f32 %v441_v25, 0.0  ;;  %v411_v34 = vld [vmem:[#allocation2 + $0x10] sm:$0xff]  ;;  %v385_v37 = vadd.f32 %v668_v29, %v48_v27  ;;  %v646_v38 = vpop.f32.mrf.mxu0  ;;  %v670_v39 = vpop.f32.mrf.mxu1 }
  0xf9   :  { %v419_v35 = vld [vmem:[#allocation2 + $0x50] sm:$0xff]  ;;  %v599_v40 = vpack.c.bf16 %v449_v32, %v449_v32  ;;  %v434_v42 = vadd.f32 %v875_v61, %v411_v34  ;;  %394 = vst.msk [vmem:[#allocation2 + $0x20] sm:$0xff] %vm19_vm0, %v377_v36  ;;  %v647_v46 = vadd.f32 %v646_v38, %v645_v30  ;;  %v671_v47 = vadd.f32 %v670_v39, %v669_v31 }
  0xfa   :  { %v607_v41 = vpack.c.bf16 %v457_v33, %v457_v33  ;;  %v442_v43 = vadd.f32 %v875_v61, %v419_v35  ;;  %402 = vst.msk [vmem:[#allocation2 + $0x60] sm:$0xff] %vm19_vm0, %v385_v37  ;;  %v648_v48 = vpop.f32.mrf.mxu0  ;;  %v672_v49 = vpop.f32.mrf.mxu1 }
  0xfb   :  { %530 = vst.msk [vmem:[%s972_s3 + $0x4] sm:$0xf] %vm528_vm1, %v599_v40  ;;  %v450_v50 = vmax.f32 %v434_v42, 0.0  ;;  %v378_v54 = vadd.f32 %v647_v46, %v41_v44  ;;  %v386_v55 = vadd.f32 %v671_v47, %v49_v45 }
  0xfc   :  { %538 = vst.msk [vmem:[%s972_s3 + $0x24] sm:$0xf] %vm528_vm1, %v607_v41  ;;  %v458_v51 = vmax.f32 %v442_v43, 0.0  ;;  %v412_v52 = vld [vmem:[#allocation2 + $0x18] sm:$0xff]  ;;  %v649_v56 = vpop.f32.mrf.mxu0  ;;  %v673_v57 = vpop.f32.mrf.mxu1 }
  0xfd   :  { %v420_v53 = vld [vmem:[#allocation2 + $0x58] sm:$0xff]  ;;  %v600_v58 = vpack.c.bf16 %v450_v50, %v450_v50  ;;  %v435_v60 = vadd.f32 %v875_v61, %v412_v52  ;;  %395 = vst.msk [vmem:[#allocation2 + $0x28] sm:$0xff] %vm19_vm0, %v378_v54  ;;  %403 = vst.msk [vmem:[#allocation2 + $0x68] sm:$0xff] %vm19_vm0, %v386_v55  ;;  %v650_v1 = vadd.f32 %v649_v56, %v648_v48 }
  0xfe   :  { %v608_v59 = vpack.c.bf16 %v458_v51, %v458_v51  ;;  %v443_v62 = vadd.f32 %v875_v61, %v420_v53  ;;  %v674_v2 = vadd.f32 %v673_v57, %v672_v49  ;;  %v651_v3 = vpop.f32.mrf.mxu0  ;;  %v675_v4 = vpop.f32.mrf.mxu1 }
  0xff   :  { %531 = vst.msk [vmem:[%s972_s3 + $0x8] sm:$0xf] %vm528_vm1, %v600_v58  ;;  %v451_v5 = vmax.f32 %v435_v60, 0.0  ;;  %v379_v7 = vadd.f32 %v650_v1, %v42_v63 }
 0x100   :  { %539 = vst.msk [vmem:[%s972_s3 + $0x28] sm:$0xf] %vm528_vm1, %v608_v59  ;;  %v459_v6 = vmax.f32 %v443_v62, 0.0  ;;  %v387_v8 = vadd.f32 %v674_v2, %v50_v0  ;;  %v652_v10 = vpop.f32.mrf.mxu0  ;;  %v676_v12 = vpop.f32.mrf.mxu1  ;;  %v413_v15 = vld [vmem:[#allocation2 + $0x20] sm:$0xff] }
 0x101   :  { %v601_v13 = vpack.c.bf16 %v451_v5, %v451_v5  ;;  %v421_v16 = vld [vmem:[#allocation2 + $0x60] sm:$0xff]  ;;  %v653_v17 = vadd.f32 %v652_v10, %v651_v3  ;;  %v677_v18 = vadd.f32 %v676_v12, %v675_v4  ;;  %v436_v19 = vadd.f32 %v875_v61, %v413_v15  ;;  %396 = vst.msk [vmem:[#allocation2 + $0x30] sm:$0xff] %vm19_vm0, %v379_v7 }
 0x102   :  { %v609_v14 = vpack.c.bf16 %v459_v6, %v459_v6  ;;  %v444_v20 = vadd.f32 %v875_v61, %v421_v16  ;;  %404 = vst.msk [vmem:[#allocation2 + $0x70] sm:$0xff] %vm19_vm0, %v387_v8 }
 0x103   :  { %532 = vst.msk [vmem:[%s972_s3 + $0xc] sm:$0xf] %vm528_vm1, %v601_v13  ;;  %v380_v21 = vadd.f32 %v653_v17, %v43_v9  ;;  %v388_v22 = vadd.f32 %v677_v18, %v51_v11  ;;  %v452_v23 = vmax.f32 %v436_v19, 0.0 }
 0x104   :  { %540 = vst.msk [vmem:[%s972_s3 + $0x2c] sm:$0xf] %vm528_vm1, %v609_v14  ;;  %v460_v24 = vmax.f32 %v444_v20, 0.0  ;;  %v414_v25 = vld [vmem:[#allocation2 + $0x28] sm:$0xff] }
 0x105   :  { %v422_v26 = vld [vmem:[#allocation2 + $0x68] sm:$0xff]  ;;  %397 = vst.msk [vmem:[#allocation2 + $0x38] sm:$0xff] %vm19_vm0, %v380_v21  ;;  %405 = vst.msk [vmem:[#allocation2 + $0x78] sm:$0xff] %vm19_vm0, %v388_v22  ;;  %v602_v27 = vpack.c.bf16 %v452_v23, %v452_v23  ;;  %v437_v29 = vadd.f32 %v875_v61, %v414_v25 }
 0x106   :  { %v610_v28 = vpack.c.bf16 %v460_v24, %v460_v24  ;;  %v445_v30 = vadd.f32 %v875_v61, %v422_v26 }
 0x107   :  { %533 = vst.msk [vmem:[%s972_s3 + $0x10] sm:$0xf] %vm528_vm1, %v602_v27  ;;  %v453_v31 = vmax.f32 %v437_v29, 0.0 }
 0x108   :  { %541 = vst.msk [vmem:[%s972_s3 + $0x30] sm:$0xf] %vm528_vm1, %v610_v28  ;;  %v461_v32 = vmax.f32 %v445_v30, 0.0  ;;  %v415_v33 = vld [vmem:[#allocation2 + $0x30] sm:$0xff] }
 0x109   :  { %v423_v34 = vld [vmem:[#allocation2 + $0x70] sm:$0xff]  ;;  %v603_v35 = vpack.c.bf16 %v453_v31, %v453_v31  ;;  %v438_v37 = vadd.f32 %v875_v61, %v415_v33 }
 0x10a   :  { %v611_v36 = vpack.c.bf16 %v461_v32, %v461_v32  ;;  %v446_v38 = vadd.f32 %v875_v61, %v423_v34 }
 0x10b   :  { %534 = vst.msk [vmem:[%s972_s3 + $0x14] sm:$0xf] %vm528_vm1, %v603_v35  ;;  %v454_v39 = vmax.f32 %v438_v37, 0.0 }
 0x10c   :  { %542 = vst.msk [vmem:[%s972_s3 + $0x34] sm:$0xf] %vm528_vm1, %v611_v36  ;;  %v462_v40 = vmax.f32 %v446_v38, 0.0  ;;  %v416_v41 = vld [vmem:[#allocation2 + $0x38] sm:$0xff] }
 0x10d   :  { %v424_v42 = vld [vmem:[#allocation2 + $0x78] sm:$0xff]  ;;  %v439_v43 = vadd.f32 %v875_v61, %v416_v41  ;;  %v604_v45 = vpack.c.bf16 %v454_v39, %v454_v39 }
 0x10e   :  { %v447_v44 = vadd.f32 %v875_v61, %v424_v42  ;;  %v612_v46 = vpack.c.bf16 %v462_v40, %v462_v40 }
 0x10f   :  { %v455_v47 = vmax.f32 %v439_v43, 0.0  ;;  %535 = vst.msk [vmem:[%s972_s3 + $0x18] sm:$0xf] %vm528_vm1, %v604_v45 }
 0x110   :  { %v463_v48 = vmax.f32 %v447_v44, 0.0  ;;  %543 = vst.msk [vmem:[%s972_s3 + $0x38] sm:$0xf] %vm528_vm1, %v612_v46 }
 0x111   :  { %v605_v49 = vpack.c.bf16 %v455_v47, %v455_v47 }
 0x112   :  { %v613_v50 = vpack.c.bf16 %v463_v48, %v463_v48 }
 0x113   :  { %536 = vst.msk [vmem:[%s972_s3 + $0x1c] sm:$0xf] %vm528_vm1, %v605_v49 }
 0x114   :  { %544 = vst.msk [vmem:[%s972_s3 + $0x3c] sm:$0xf] %vm528_vm1, %v613_v50 }

// kernel: _lambda_.44
= control target key start
LH: loop header
LB: loop body
LE: loop exit
PB: predicated region body
PF: predicated region fallthrough
CT: control target
= control target key end

     0   :  { %vm19_vm0 = vcmask 523264   ;;  %v583_v1 = vmov 0.0   ;;  %vm432_vm1 = vcmask 519168   ;;  %s769_s1 = inlined_call_operand.vmem [shape: bf16[128,64], index: 1, kind: input, shape index: {}]   ;;  %s770_s0 = inlined_call_operand.vmem [shape: bf16[128,128], index: 0, kind: input, shape index: {}]   ;;  %s771_s2 = inlined_call_operand.vmem [shape: f32[1,64], index: 2, kind: input, shape index: {}]   ;;  %s772_s3 = inlined_call_operand.vmem [shape: bf16[128,64], index: 3, kind: output, shape index: {}]  }
   0x1   :  { %v567_v0 = vld [vmem:[%s769_s1 + $0x38] sm:$0xff]   ;;  %22 = vst.msk [vmem:[#allocation2 + $0x10] sm:$0xff] %vm19_vm0, %v583_v1  ;;  %20 = vst.msk [vmem:[#allocation2] sm:$0xff] %vm19_vm0, %v583_v1  ;;  %v568_v2 = vld [vmem:[%s769_s1 + $0x30] sm:$0xff]  }
   0x2   :  { %21 = vst.msk [vmem:[#allocation2 + $0x8] sm:$0xff] %vm19_vm0, %v583_v1  ;;  %23 = vst.msk [vmem:[#allocation2 + $0x18] sm:$0xff] %vm19_vm0, %v583_v1  ;;  %518 = vmatprep.subr.bf16.mxu0 %v567_v0  ;;  %550 = vmatprep.subr.bf16.mxu1 %v567_v0  ;;  %v569_v3 = vld [vmem:[%s769_s1 + $0x28] sm:$0xff]   ;;  %v570_v4 = vld [vmem:[%s769_s1 + $0x20] sm:$0xff]  }
   0x3   :  { %24 = vst.msk [vmem:[#allocation2 + $0x20] sm:$0xff] %vm19_vm0, %v583_v1  ;;  %25 = vst.msk [vmem:[#allocation2 + $0x28] sm:$0xff] %vm19_vm0, %v583_v1  ;;  %519 = vmatpush3.bf16.msra.mxu0 %v567_v0  ;;  %558 = vmatpush3.bf16.msra.mxu1 %v567_v0  ;;  %v575_v5 = vld [vmem:[%s770_s0] sm:$0xff]   ;;  %v571_v7 = vld [vmem:[%s769_s1 + $0x18] sm:$0xff]  }
   0x4   :  { %26 = vst.msk [vmem:[#allocation2 + $0x30] sm:$0xff] %vm19_vm0, %v583_v1  ;;  %27 = vst.msk [vmem:[#allocation2 + $0x38] sm:$0xff] %vm19_vm0, %v583_v1  ;;  %520 = vmatprep.subr.bf16.mxu0 %v568_v2  ;;  %551 = vmatprep.subr.bf16.mxu1 %v568_v2  ;;  %v576_v6 = vld [vmem:[%s770_s0 + $0x20] sm:$0xff]   ;;  %v572_v8 = vld [vmem:[%s769_s1 + $0x10] sm:$0xff]  }
   0x5   :  { %28 = vst.msk [vmem:[#allocation2 + $0x40] sm:$0xff] %vm19_vm0, %v583_v1  ;;  %29 = vst.msk [vmem:[#allocation2 + $0x48] sm:$0xff] %vm19_vm0, %v583_v1  ;;  %534 = vmatprep.mubr.bf16.mxu0 %v575_v5  ;;  %542 = vmatprep.mubr.bf16.mxu1 %v576_v6  ;;  %v573_v9 = vld [vmem:[%s769_s1 + $0x8] sm:$0xff]   ;;  %v574_v10 = vld [vmem:[%s769_s1] sm:$0xff]  }
   0x6   :  { %30 = vst.msk [vmem:[#allocation2 + $0x50] sm:$0xff] %vm19_vm0, %v583_v1  ;;  %31 = vst.msk [vmem:[#allocation2 + $0x58] sm:$0xff] %vm19_vm0, %v583_v1  ;;  %v577_v11 = vld [vmem:[%s770_s0 + $0x8] sm:$0xff]   ;;  %v579_v13 = vld [vmem:[%s770_s0 + $0x10] sm:$0xff]  }
   0x7   :  { %32 = vst.msk [vmem:[#allocation2 + $0x60] sm:$0xff] %vm19_vm0, %v583_v1  ;;  %33 = vst.msk [vmem:[#allocation2 + $0x68] sm:$0xff] %vm19_vm0, %v583_v1  ;;  %521 = vmatpush3.bf16.msra.mxu0 %v568_v2  ;;  %559 = vmatpush3.bf16.msra.mxu1 %v568_v2  ;;  %v578_v12 = vld [vmem:[%s770_s0 + $0x28] sm:$0xff]   ;;  %v580_v14 = vld [vmem:[%s770_s0 + $0x30] sm:$0xff]  }
   0x8   :  { %34 = vst.msk [vmem:[#allocation2 + $0x70] sm:$0xff] %vm19_vm0, %v583_v1  ;;  %35 = vst.msk [vmem:[#allocation2 + $0x78] sm:$0xff] %vm19_vm0, %v583_v1  ;;  %522 = vmatprep.subr.bf16.mxu0 %v569_v3  ;;  %552 = vmatprep.subr.bf16.mxu1 %v569_v3  ;;  %v581_v15 = vld [vmem:[%s770_s0 + $0x18] sm:$0xff]   ;;  %v36_v21 = vld [vmem:[#allocation2] sm:$0xff] }
   0x9   :  { %v582_v16 = vld [vmem:[%s770_s0 + $0x38] sm:$0xff]   ;;  %v39_v27 = vld [vmem:[#allocation2 + $0x18] sm:$0xff]  ;;  %v37_v33 = vld [vmem:[#allocation2 + $0x8] sm:$0xff] }
   0xa   :  { %v38_v17 = vld [vmem:[#allocation2 + $0x10] sm:$0xff]  ;;  %v677_v43 = vld [vmem:[%s771_s2] ss:$0 sm:$0xff]  ;;  %v40_v46 = vld [vmem:[#allocation2 + $0x20] sm:$0xff] }
   0xb   :  { %523 = vmatpush3.bf16.msra.mxu0 %v569_v3  ;;  %560 = vmatpush3.bf16.msra.mxu1 %v569_v3  ;;  %v42_v39 = vld [vmem:[#allocation2 + $0x30] sm:$0xff]  ;;  %v43_v58 = vld [vmem:[#allocation2 + $0x38] sm:$0xff] }
   0xc   :  { %524 = vmatprep.subr.bf16.mxu0 %v570_v4  ;;  %553 = vmatprep.subr.bf16.mxu1 %v570_v4  ;;  %v44_v22 = vld [vmem:[#allocation2 + $0x40] sm:$0xff]  ;;  %v45_v34 = vld [vmem:[#allocation2 + $0x48] sm:$0xff] }
   0xd   :  { %v46_v18 = vld [vmem:[#allocation2 + $0x50] sm:$0xff]  ;;  %v47_v28 = vld [vmem:[#allocation2 + $0x58] sm:$0xff] }
   0xe   :  { %v48_v47 = vld [vmem:[#allocation2 + $0x60] sm:$0xff]  ;;  %v49_v5 = vld [vmem:[#allocation2 + $0x68] sm:$0xff] }
   0xf   :  { %525 = vmatpush3.bf16.msra.mxu0 %v570_v4  ;;  %561 = vmatpush3.bf16.msra.mxu1 %v570_v4  ;;  %v50_v40 = vld [vmem:[#allocation2 + $0x70] sm:$0xff]  ;;  %v51_v59 = vld [vmem:[#allocation2 + $0x78] sm:$0xff]  ;;  %v41_v4 = vld [vmem:[#allocation2 + $0x28] sm:$0xff] }
  0x10   :  { %526 = vmatprep.subr.bf16.mxu0 %v571_v7  ;;  %554 = vmatprep.subr.bf16.mxu1 %v571_v7 }
  0x13   :  { %527 = vmatpush3.bf16.msra.mxu0 %v571_v7  ;;  %562 = vmatpush3.bf16.msra.mxu1 %v571_v7 }
  0x14   :  { %528 = vmatprep.subr.bf16.mxu0 %v572_v8  ;;  %555 = vmatprep.subr.bf16.mxu1 %v572_v8 }
  0x17   :  { %529 = vmatpush3.bf16.msra.mxu0 %v572_v8  ;;  %563 = vmatpush3.bf16.msra.mxu1 %v572_v8 }
  0x18   :  { %530 = vmatprep.subr.bf16.mxu0 %v573_v9  ;;  %556 = vmatprep.subr.bf16.mxu1 %v573_v9 }
  0x1b   :  { %531 = vmatpush3.bf16.msra.mxu0 %v573_v9  ;;  %564 = vmatpush3.bf16.msra.mxu1 %v573_v9 }
  0x1c   :  { %532 = vmatprep.subr.bf16.mxu0 %v574_v10  ;;  %557 = vmatprep.subr.bf16.mxu1 %v574_v10 }
  0x1f   :  { %533 = vmatpush3.bf16.msra.mxu0 %v574_v10  ;;  %565 = vmatpush3.bf16.msra.mxu1 %v574_v10 }
  0x22   :  { %535 = vmatmul.mubr.bf16.vlgmr.msra.gmra.mxu0 %v577_v11  ;;  %543 = vmatmul.mubr.bf16.vlgmr.msra.gmra.mxu1 %v578_v12 }
  0x23   :  { %538 = vmatprep.mubr.bf16.mxu0 %v579_v13  ;;  %546 = vmatprep.mubr.bf16.mxu1 %v580_v14 }
  0x2a   :  { %539 = vmatmul.mubr.bf16.gmra.mxu0 %v581_v15  ;;  %547 = vmatmul.mubr.bf16.gmra.mxu1 %v582_v16 }
  0xe2   :  { %v536_v19 = vpop.f32.mrf.mxu0  ;;  %v544_v20 = vpop.f32.mrf.mxu1 }
  0xe3   :  { %v279_v23 = vadd.f32 %v536_v19, %v38_v17  ;;  %v287_v24 = vadd.f32 %v544_v20, %v46_v18 }
  0xe4   :  { %v214_v25 = vpop.f32.mrf.mxu0  ;;  %v246_v26 = vpop.f32.mrf.mxu1 }
  0xe5   :  { %296 = vst.msk [vmem:[#allocation2 + $0x10] sm:$0xff] %vm19_vm0, %v279_v23  ;;  %304 = vst.msk [vmem:[#allocation2 + $0x50] sm:$0xff] %vm19_vm0, %v287_v24  ;;  %v277_v29 = vadd.f32 %v214_v25, %v36_v21  ;;  %v285_v30 = vadd.f32 %v246_v26, %v44_v22 }
  0xe6   :  { %v537_v31 = vpop.f32.mrf.mxu0  ;;  %v545_v32 = vpop.f32.mrf.mxu1 }
  0xe7   :  { %294 = vst.msk [vmem:[#allocation2] sm:$0xff] %vm19_vm0, %v277_v29  ;;  %302 = vst.msk [vmem:[#allocation2 + $0x40] sm:$0xff] %vm19_vm0, %v285_v30  ;;  %v280_v35 = vadd.f32 %v537_v31, %v39_v27  ;;  %v288_v36 = vadd.f32 %v545_v32, %v47_v28 }
  0xe8   :  { %v217_v37 = vpop.f32.mrf.mxu0  ;;  %v249_v38 = vpop.f32.mrf.mxu1 }
  0xe9   :  { %297 = vst.msk [vmem:[#allocation2 + $0x18] sm:$0xff] %vm19_vm0, %v280_v35  ;;  %305 = vst.msk [vmem:[#allocation2 + $0x58] sm:$0xff] %vm19_vm0, %v288_v36  ;;  %v278_v41 = vadd.f32 %v217_v37, %v37_v33  ;;  %v286_v42 = vadd.f32 %v249_v38, %v45_v34 }
  0xea   :  { %v540_v44 = vpop.f32.mrf.mxu0  ;;  %v548_v45 = vpop.f32.mrf.mxu1 }
  0xeb   :  { %295 = vst.msk [vmem:[#allocation2 + $0x8] sm:$0xff] %vm19_vm0, %v278_v41  ;;  %303 = vst.msk [vmem:[#allocation2 + $0x48] sm:$0xff] %vm19_vm0, %v286_v42  ;;  %v283_v48 = vadd.f32 %v540_v44, %v42_v39  ;;  %v291_v49 = vadd.f32 %v548_v45, %v50_v40 }
  0xec   :  { %v315_v50 = vld [vmem:[#allocation2 + $0x10] sm:$0xff]  ;;  %v230_v52 = vpop.f32.mrf.mxu0  ;;  %v262_v53 = vpop.f32.mrf.mxu1 }
  0xed   :  { %v323_v51 = vld [vmem:[#allocation2 + $0x50] sm:$0xff]  ;;  %v338_v54 = vadd.f32 %v677_v43, %v315_v50  ;;  %300 = vst.msk [vmem:[#allocation2 + $0x30] sm:$0xff] %vm19_vm0, %v283_v48  ;;  %308 = vst.msk [vmem:[#allocation2 + $0x70] sm:$0xff] %vm19_vm0, %v291_v49  ;;  %v281_v56 = vadd.f32 %v230_v52, %v40_v46  ;;  %v289_v57 = vadd.f32 %v262_v53, %v48_v47 }
  0xee   :  { %v346_v55 = vadd.f32 %v677_v43, %v323_v51  ;;  %v313_v60 = vld [vmem:[#allocation2] sm:$0xff]  ;;  %v541_v62 = vpop.f32.mrf.mxu0  ;;  %v549_v63 = vpop.f32.mrf.mxu1 }
  0xef   :  { %v321_v61 = vld [vmem:[#allocation2 + $0x40] sm:$0xff]  ;;  %v354_v0 = vmax.f32 %v338_v54, 0.0  ;;  %v336_v2 = vadd.f32 %v677_v43, %v313_v60  ;;  %298 = vst.msk [vmem:[#allocation2 + $0x20] sm:$0xff] %vm19_vm0, %v281_v56  ;;  %306 = vst.msk [vmem:[#allocation2 + $0x60] sm:$0xff] %vm19_vm0, %v289_v57  ;;  %v284_v8 = vadd.f32 %v541_v62, %v43_v58  ;;  %v292_v9 = vadd.f32 %v549_v63, %v51_v59 }
  0xf0   :  { %v362_v1 = vmax.f32 %v346_v55, 0.0  ;;  %v344_v3 = vadd.f32 %v677_v43, %v321_v61  ;;  %v316_v6 = vld [vmem:[#allocation2 + $0x18] sm:$0xff]  ;;  %v233_v10 = vpop.f32.mrf.mxu0  ;;  %v265_v11 = vpop.f32.mrf.mxu1 }
  0xf1   :  { %v324_v7 = vld [vmem:[#allocation2 + $0x58] sm:$0xff]  ;;  %v488_v12 = vpack.c.bf16 %v354_v0, %v354_v0  ;;  %v352_v14 = vmax.f32 %v336_v2, 0.0  ;;  %v339_v16 = vadd.f32 %v677_v43, %v316_v6  ;;  %301 = vst.msk [vmem:[#allocation2 + $0x38] sm:$0xff] %vm19_vm0, %v284_v8  ;;  %309 = vst.msk [vmem:[#allocation2 + $0x78] sm:$0xff] %vm19_vm0, %v292_v9  ;;  %v282_v20 = vadd.f32 %v233_v10, %v41_v4 }
  0xf2   :  { %v496_v13 = vpack.c.bf16 %v362_v1, %v362_v1  ;;  %v360_v15 = vmax.f32 %v344_v3, 0.0  ;;  %v347_v17 = vadd.f32 %v677_v43, %v324_v7  ;;  %v314_v18 = vld [vmem:[#allocation2 + $0x8] sm:$0xff]  ;;  %v290_v21 = vadd.f32 %v265_v11, %v49_v5 }
  0xf3   :  { %v322_v19 = vld [vmem:[#allocation2 + $0x48] sm:$0xff]  ;;  %435 = vst.msk [vmem:[%s772_s3 + $0x8] sm:$0xf] %vm432_vm1, %v488_v12  ;;  %v486_v22 = vpack.c.bf16 %v352_v14, %v352_v14  ;;  %v337_v24 = vadd.f32 %v677_v43, %v314_v18  ;;  %v355_v26 = vmax.f32 %v339_v16, 0.0 }
  0xf4   :  { %443 = vst.msk [vmem:[%s772_s3 + $0x28] sm:$0xf] %vm432_vm1, %v496_v13  ;;  %v494_v23 = vpack.c.bf16 %v360_v15, %v360_v15  ;;  %v345_v25 = vadd.f32 %v677_v43, %v322_v19  ;;  %v363_v27 = vmax.f32 %v347_v17, 0.0  ;;  %v319_v28 = vld [vmem:[#allocation2 + $0x30] sm:$0xff] }
  0xf5   :  { %v327_v29 = vld [vmem:[#allocation2 + $0x70] sm:$0xff]  ;;  %299 = vst.msk [vmem:[#allocation2 + $0x28] sm:$0xff] %vm19_vm0, %v282_v20  ;;  %307 = vst.msk [vmem:[#allocation2 + $0x68] sm:$0xff] %vm19_vm0, %v290_v21  ;;  %v353_v30 = vmax.f32 %v337_v24, 0.0  ;;  %v342_v32 = vadd.f32 %v677_v43, %v319_v28  ;;  %v489_v34 = vpack.c.bf16 %v355_v26, %v355_v26 }
  0xf6   :  { %433 = vst.msk [vmem:[%s772_s3] sm:$0xf] %vm432_vm1, %v486_v22  ;;  %441 = vst.msk [vmem:[%s772_s3 + $0x20] sm:$0xf] %vm432_vm1, %v494_v23  ;;  %v361_v31 = vmax.f32 %v345_v25, 0.0  ;;  %v350_v33 = vadd.f32 %v677_v43, %v327_v29  ;;  %v497_v35 = vpack.c.bf16 %v363_v27, %v363_v27  ;;  %v317_v36 = vld [vmem:[#allocation2 + $0x20] sm:$0xff] }
  0xf7   :  { %v325_v37 = vld [vmem:[#allocation2 + $0x60] sm:$0xff]  ;;  %v487_v38 = vpack.c.bf16 %v353_v30, %v353_v30  ;;  %v358_v40 = vmax.f32 %v342_v32, 0.0  ;;  %436 = vst.msk [vmem:[%s772_s3 + $0xc] sm:$0xf] %vm432_vm1, %v489_v34  ;;  %v340_v42 = vadd.f32 %v677_v43, %v317_v36 }
  0xf8   :  { %v495_v39 = vpack.c.bf16 %v361_v31, %v361_v31  ;;  %v366_v41 = vmax.f32 %v350_v33, 0.0  ;;  %444 = vst.msk [vmem:[%s772_s3 + $0x2c] sm:$0xf] %vm432_vm1, %v497_v35  ;;  %v348_v44 = vadd.f32 %v677_v43, %v325_v37  ;;  %v320_v47 = vld [vmem:[#allocation2 + $0x38] sm:$0xff] }
  0xf9   :  { %434 = vst.msk [vmem:[%s772_s3 + $0x4] sm:$0xf] %vm432_vm1, %v487_v38  ;;  %v492_v45 = vpack.c.bf16 %v358_v40, %v358_v40  ;;  %v328_v48 = vld [vmem:[#allocation2 + $0x78] sm:$0xff]  ;;  %v356_v49 = vmax.f32 %v340_v42, 0.0  ;;  %v343_v51 = vadd.f32 %v677_v43, %v320_v47 }
  0xfa   :  { %442 = vst.msk [vmem:[%s772_s3 + $0x24] sm:$0xf] %vm432_vm1, %v495_v39  ;;  %v500_v46 = vpack.c.bf16 %v366_v41, %v366_v41  ;;  %v364_v50 = vmax.f32 %v348_v44, 0.0  ;;  %v351_v52 = vadd.f32 %v677_v43, %v328_v48 }
  0xfb   :  { %439 = vst.msk [vmem:[%s772_s3 + $0x18] sm:$0xf] %vm432_vm1, %v492_v45  ;;  %v490_v55 = vpack.c.bf16 %v356_v49, %v356_v49  ;;  %v359_v57 = vmax.f32 %v343_v51, 0.0 }
  0xfc   :  { %447 = vst.msk [vmem:[%s772_s3 + $0x38] sm:$0xf] %vm432_vm1, %v500_v46  ;;  %v318_v53 = vld [vmem:[#allocation2 + $0x28] sm:$0xff]  ;;  %v498_v56 = vpack.c.bf16 %v364_v50, %v364_v50  ;;  %v367_v58 = vmax.f32 %v351_v52, 0.0 }
  0xfd   :  { %v326_v54 = vld [vmem:[#allocation2 + $0x68] sm:$0xff]  ;;  %v341_v59 = vadd.f32 %v677_v43, %v318_v53  ;;  %437 = vst.msk [vmem:[%s772_s3 + $0x10] sm:$0xf] %vm432_vm1, %v490_v55  ;;  %v493_v61 = vpack.c.bf16 %v359_v57, %v359_v57 }
  0xfe   :  { %v349_v60 = vadd.f32 %v677_v43, %v326_v54  ;;  %445 = vst.msk [vmem:[%s772_s3 + $0x30] sm:$0xf] %vm432_vm1, %v498_v56  ;;  %v501_v62 = vpack.c.bf16 %v367_v58, %v367_v58 }
  0xff   :  { %v357_v63 = vmax.f32 %v341_v59, 0.0  ;;  %440 = vst.msk [vmem:[%s772_s3 + $0x1c] sm:$0xf] %vm432_vm1, %v493_v61 }
 0x100   :  { %v365_v0 = vmax.f32 %v349_v60, 0.0  ;;  %448 = vst.msk [vmem:[%s772_s3 + $0x3c] sm:$0xf] %vm432_vm1, %v501_v62 }
 0x101   :  { %v491_v43 = vpack.c.bf16 %v357_v63, %v357_v63 }
 0x102   :  { %v499_v1 = vpack.c.bf16 %v365_v0, %v365_v0 }
 0x103   :  { %438 = vst.msk [vmem:[%s772_s3 + $0x14] sm:$0xf] %vm432_vm1, %v491_v43 }
 0x104   :  { %446 = vst.msk [vmem:[%s772_s3 + $0x34] sm:$0xf] %vm432_vm1, %v499_v1 }

// kernel: _lambda_.45
= control target key start
LH: loop header
LB: loop body
LE: loop exit
PB: predicated region body
PF: predicated region fallthrough
CT: control target
= control target key end

     0   :  { %s790_s12 = smov 0   ;;  %s792_s13 = smov 0   ;;  %s889_s0 = inlined_call_operand.vmem [shape: bf16[32,640], index: 0, kind: input, shape index: {}]   ;;  %s890_s1 = inlined_call_operand.vmem [shape: bf16[640,64], index: 1, kind: input, shape index: {}]   ;;  %s891_s2 = inlined_call_operand.vmem [shape: f32[1,64], index: 2, kind: input, shape index: {}]   ;;  %s892_s3 = inlined_call_operand.vmem [shape: bf16[32,64], index: 3, kind: output, shape index: {}]  }
   0x1   :  { %s794_s14 = smov 0   ;;  %s796_s15 = smov 0  }
   0x2   :  { %s798_s16 = smov 0  }
   0x3 LB: > { %s25_s17 = sadd.s32 1, %s763_s15  ;;  %p48_p1 = scmp.ne.s32.totalorder %s755_s13, %s751_s12  ;;  %s767_s16 = sphi %s798_s16, %s13_s16   ;;  %s763_s15 = sphi %s796_s15, %s896_s15   ;;  %s759_s14 = sphi %s794_s14, %s895_s14   ;;  %s755_s13 = sphi %s792_s13, %s894_s13   ;;  %s751_s12 = sphi %s790_s12, %s893_s12  }
   0x4   : > { %p26_p0 = scmp.ge.s32.totalorder %s25_s17, 5  ;;  %p49_p2 = scmp.eq.s32.totalorder %s767_s16, 0 }
   0x5   : > { %s41_s19 = sadd.s32 1, %s755_s13  ;;  %p616_p5 = scmp.ge.s32.totalorder %s767_s16, 5 }
   0x6   : > { %s898_s17 = smov (%p26_p0, %s25_s17), 0  ;;  %p50_p3 = por %p49_p2, %p48_p1 }
   0x7   : > { %s37_s18 = ssub.s32 %s763_s15, %s898_s17  ;;  %162 = sbr.rel (%p616_p5) target bundleno = 18 (0x12), region = 20 }
   0x8   : > { %p39_p4 = scmp.eq.s32.totalorder %s37_s18, 0 }
   0xa   : > { %s825_s20 = scalar_select %p39_p4, %s755_s13, %s41_s19  }
   0xc   : > { %165 = sbr.rel (!%p50_p3) target bundleno = 18 (0x12), region = 24  ;;  %s167_s21 = sand.u32 (%p50_p3), 1, %s755_s13  }
   0xd   : > { %s618_s22 = sshll.u32 (%p50_p3), %s763_s15, 2  ;;  %s617_s23 = sshll.u32 (%p50_p3), %s167_s21, 4 }
   0xe   : > { %s174_s26 = scalar_lea.vmem (%p50_p3), %s889_s0, %s618_s22  ;;  %s169_s27 = scalar_lea.vmem (%p50_p3), [#allocation3], %s617_s23 }
   0xf   : > { %v191_v0 = vld [vmem:[%s174_s26] sm:$0xf] (%p50_p3)  ;;  %v193_v1 = vld [vmem:[%s174_s26 + $0x14] sm:$0xf] (%p50_p3)  ;;  %v195_v2 = vld [vmem:[%s174_s26 + $0x28] sm:$0xf] (%p50_p3) }
  0x10   : > { %192 = vst [vmem:[%s169_s27] sm:$0xf] (%p50_p3), %v191_v0  ;;  %194 = vst [vmem:[%s169_s27 + $0x4] sm:$0xf] (%p50_p3), %v193_v1  ;;  %v197_v3 = vld [vmem:[%s174_s26 + $0x3c] sm:$0xf] (%p50_p3) }
  0x11   : > { %196 = vst [vmem:[%s169_s27 + $0x8] sm:$0xf] %v195_v2  ;;  %198 = vst [vmem:[%s169_s27 + $0xc] sm:$0xf] %v197_v3 }
  0x12 PF: > { %p619_p6 = scmp.ge.s32.totalorder %s767_s16, 1  ;;  %p241_p7 = scmp.lt.s32.totalorder %s767_s16, 6 }
  0x14   : > { %p242_p8 = pnand %p619_p6, %p241_p7 }
  0x15   : > { %s248_s28 = sand.u32 (!%p242_p8), 1, %s751_s12   ;;  %s621_s29 = sshll.u32 (!%p242_p8), %s759_s14, 4 }
  0x16   : > { %245 = sbr.rel (%p242_p8) target bundleno = 284 (0x11c), region = 69  ;;  %s837_s30 = sshll.u32 (!%p242_p8), %s248_s28, 4 }
  0x17   : > { %p287_p9 = scmp.lt.s32.totalorder (!%p242_p8), %s621_s29, 79  ;;  %s250_s8 = scalar_lea.vmem (!%p242_p8), [#allocation3], %s837_s30 }
  0x18   : > { %p623_p10 = scmp.ne.s32.totalorder (!%p242_p8), %s759_s14, 0 }
  0x1b   : > { %s900_s29 = smov (!%p287_p9, %s621_s29), 79  ;;  %311 = sbr.rel (%p623_p10) target bundleno = 35 (0x23), region = 77 }
  0x1c   : > { %s622_s4 = sshll.u32 %s900_s29, 2 }
  0x1d   : > { %s842_s7 = scalar_lea.vmem %s890_s1, %s622_s4 }
  0x20   : > { %vm312_vm0 = vcmask 523264   ;;  %v769_v4 = vmov 0.0  }
  0x21   : > { %313 = vst.msk [vmem:[#allocation2] sm:$0xff] %vm312_vm0, %v769_v4  ;;  %314 = vst.msk [vmem:[#allocation2 + $0x8] sm:$0xff] %vm312_vm0, %v769_v4 }
  0x22   : > { %315 = vst.msk [vmem:[#allocation2 + $0x10] sm:$0xff] %vm312_vm0, %v769_v4  ;;  %316 = vst.msk [vmem:[#allocation2 + $0x18] sm:$0xff] %vm312_vm0, %v769_v4 }
  0x23 PF: > { %v719_v5 = vld [vmem:[%s842_s7 + $0x38] sm:$0xff]   ;;  %v720_v6 = vld [vmem:[%s842_s7 + $0x30] sm:$0xff]   ;;  %v721_v7 = vld [vmem:[%s842_s7 + $0x28] sm:$0xff]   ;;  %vm454_vm1 = vcmask 523264   ;;  %p634_p11 = scmp.ne.s32.totalorder %s759_s14, 4 }
  0x24   : > { %658 = vmatprep.subr.bf16.mxu0 %v719_v5  ;;  %v722_v8 = vld [vmem:[%s842_s7 + $0x20] sm:$0xff]   ;;  %v727_v9 = vld [vmem:[%s250_s8] sm:$0xff]   ;;  %v724_v11 = vld [vmem:[%s842_s7 + $0x10] sm:$0xff]  }
  0x25   : > { %659 = vmatpush3.bf16.msra.mxu0 %v719_v5  ;;  %674 = vmatprep.mubr.bf16.mxu0 %v727_v9  ;;  %v723_v10 = vld [vmem:[%s842_s7 + $0x18] sm:$0xff]   ;;  %v725_v12 = vld [vmem:[%s842_s7 + $0x8] sm:$0xff]   ;;  %v726_v13 = vld [vmem:[%s842_s7] sm:$0xff]  }
  0x26   : > { %660 = vmatprep.subr.bf16.mxu0 %v720_v6  ;;  %v728_v14 = vld [vmem:[%s250_s8 + $0x8] sm:$0xff]  }
  0x28   : > { %v317_v17 = vld [vmem:[#allocation2] sm:$0xff]  ;;  %v318_v23 = vld [vmem:[#allocation2 + $0x8] sm:$0xff] }
  0x29   : > { %661 = vmatpush3.bf16.msra.mxu0 %v720_v6  ;;  %v319_v15 = vld [vmem:[#allocation2 + $0x10] sm:$0xff]  ;;  %v320_v20 = vld [vmem:[#allocation2 + $0x18] sm:$0xff] }
  0x2a   : > { %662 = vmatprep.subr.bf16.mxu0 %v721_v7 }
  0x2d   : > { %663 = vmatpush3.bf16.msra.mxu0 %v721_v7 }
  0x2e   : > { %664 = vmatprep.subr.bf16.mxu0 %v722_v8 }
  0x31   : > { %665 = vmatpush3.bf16.msra.mxu0 %v722_v8 }
  0x32   : > { %666 = vmatprep.subr.bf16.mxu0 %v723_v10 }
  0x35   : > { %667 = vmatpush3.bf16.msra.mxu0 %v723_v10 }
  0x36   : > { %668 = vmatprep.subr.bf16.mxu0 %v724_v11 }
  0x39   : > { %669 = vmatpush3.bf16.msra.mxu0 %v724_v11 }
  0x3a   : > { %670 = vmatprep.subr.bf16.mxu0 %v725_v12 }
  0x3d   : > { %671 = vmatpush3.bf16.msra.mxu0 %v725_v12 }
  0x3e   : > { %672 = vmatprep.subr.bf16.mxu0 %v726_v13 }
  0x41   : > { %673 = vmatpush3.bf16.msra.mxu0 %v726_v13 }
  0x44   : > { %675 = vmatmul.mubr.bf16.vlgmr.msra.gmra.mxu0 %v728_v14 }
 0x104   : > { %v676_v16 = vpop.f32.mrf.mxu0 }
 0x105   : > { %v452_v18 = vadd.f32 %v676_v16, %v319_v15 }
 0x106   : > { %v435_v19 = vpop.f32.mrf.mxu0 }
 0x107   : > { %457 = vst.msk [vmem:[#allocation2 + $0x10] sm:$0xff] %vm454_vm1, %v452_v18  ;;  %v450_v21 = vadd.f32 %v435_v19, %v317_v17 }
 0x108   : > { %v677_v22 = vpop.f32.mrf.mxu0 }
 0x109   : > { %455 = vst.msk [vmem:[#allocation2] sm:$0xff] %vm454_vm1, %v450_v21  ;;  %v453_v24 = vadd.f32 %v677_v22, %v320_v20  ;;  %462 = sbr.rel (%p634_p11) target bundleno = 284 (0x11c), region = 81 }
 0x10a   : > { %v438_v25 = vpop.f32.mrf.mxu0 }
 0x10b   : > { %458 = vst.msk [vmem:[#allocation2 + $0x18] sm:$0xff] %vm454_vm1, %v453_v24  ;;  %v451_v26 = vadd.f32 %v438_v25, %v318_v23 }
 0x10d   : > { %456 = vst.msk [vmem:[#allocation2 + $0x8] sm:$0xff] %vm454_vm1, %v451_v26 }
 0x10e   : > { %v635_v28 = vld [vmem:[%s891_s2] ss:$0 sm:$0xff]  ;;  %v465_v32 = vld [vmem:[#allocation2 + $0x10] sm:$0xff]  ;;  %vm498_vm2 = vcmask 519168  }
 0x10f   : > { %v476_v34 = vadd.f32 %v635_v28, %v465_v32 }
 0x110   : > { %v463_v27 = vld [vmem:[#allocation2] sm:$0xff] }
 0x111   : > { %v474_v30 = vadd.f32 %v635_v28, %v463_v27  ;;  %v480_v38 = vmax.f32 %v476_v34, 0.0 }
 0x112   : > { %v466_v33 = vld [vmem:[#allocation2 + $0x18] sm:$0xff] }
 0x113   : > { %v477_v35 = vadd.f32 %v635_v28, %v466_v33  ;;  %v478_v36 = vmax.f32 %v474_v30, 0.0  ;;  %v646_v42 = vpack.c.bf16 %v480_v38, %v480_v38 }
 0x114   : > { %v464_v29 = vld [vmem:[#allocation2 + $0x8] sm:$0xff] }
 0x115   : > { %v475_v31 = vadd.f32 %v635_v28, %v464_v29  ;;  %v481_v39 = vmax.f32 %v477_v35, 0.0  ;;  %v644_v40 = vpack.c.bf16 %v478_v36, %v478_v36  ;;  %501 = vst.msk [vmem:[%s892_s3 + $0x8] sm:$0xf] %vm498_vm2, %v646_v42 }
 0x117   : > { %v479_v37 = vmax.f32 %v475_v31, 0.0  ;;  %v647_v43 = vpack.c.bf16 %v481_v39, %v481_v39  ;;  %499 = vst.msk [vmem:[%s892_s3] sm:$0xf] %vm498_vm2, %v644_v40 }
 0x119   : > { %v645_v41 = vpack.c.bf16 %v479_v37, %v479_v37  ;;  %502 = vst.msk [vmem:[%s892_s3 + $0xc] sm:$0xf] %vm498_vm2, %v647_v43 }
 0x11b   : > { %500 = vst.msk [vmem:[%s892_s3 + $0x4] sm:$0xf] %vm498_vm2, %v645_v41 }
 0x11c PF: > { %s13_s16 = sadd.s32 1, %s767_s16   ;;  %s893_s12 = smov %s755_s13 }
 0x11d   : > { %p10_p12 = scmp.ge.s32.totalorder %s13_s16, 7   ;;  %s894_s13 = smov %s825_s20 }
 0x11e   : > { %s895_s14 = smov %s763_s15  ;;  %s896_s15 = smov %s898_s17 }
 0x11f   :  { %12 = sbr.rel (!%p10_p12) target bundleno = 3 (0x3), region = 122 }

// kernel: _lambda_.46
= control target key start
LH: loop header
LB: loop body
LE: loop exit
PB: predicated region body
PF: predicated region fallthrough
CT: control target
= control target key end

     0   :  { %v348_v1 = vmov 0   ;;  %v229_v19 = vlaneseq  ;;  %s438_s1 = inlined_call_operand.vmem [shape: bf16[128,256], index: 1, kind: input, shape index: {}]   ;;  %s439_s0 = inlined_call_operand.vmem [shape: bf16[32,128], index: 0, kind: input, shape index: {}]   ;;  %s440_s2 = inlined_call_operand.vmem [shape: f32[1,256], index: 2, kind: input, shape index: {}]   ;;  %s441_s3 = inlined_call_operand.vmem [shape: bf16[32,256], index: 3, kind: output, shape index: {}]  }
   0x1   :  { %v322_v0 = vld [vmem:[%s438_s1 + $0x74] ss:$8 sps:$4 sm:$0xff]   ;;  %179 = vmatprep.mubr.bf16.mxu0 %v348_v1  ;;  %189 = vmatprep.mubr.bf16.mxu1 %v348_v1  ;;  %v324_v2 = vld [vmem:[%s438_s1 + $0x70] ss:$8 sps:$4 sm:$0xff]   ;;  %v325_v3 = vld [vmem:[%s438_s1 + $0x64] ss:$8 sps:$4 sm:$0xff]  }
   0x2   :  { %147 = vmatprep.subr.bf16.mxu0 %v322_v0  ;;  %305 = vmatprep.subr.bf16.mxu1 %v322_v0  ;;  %v327_v4 = vld [vmem:[%s438_s1 + $0x60] ss:$8 sps:$4 sm:$0xff]   ;;  %v328_v5 = vld [vmem:[%s438_s1 + $0x54] ss:$8 sps:$4 sm:$0xff]   ;;  %v330_v6 = vld [vmem:[%s438_s1 + $0x50] ss:$8 sps:$4 sm:$0xff]  }
   0x3   :  { %148 = vmatpush1.bf16.msra.mxu0 %v324_v2  ;;  %313 = vmatpush1.bf16.msra.mxu1 %v324_v2  ;;  %v331_v7 = vld [vmem:[%s438_s1 + $0x44] ss:$8 sps:$4 sm:$0xff]   ;;  %v333_v8 = vld [vmem:[%s438_s1 + $0x40] ss:$8 sps:$4 sm:$0xff]   ;;  %v334_v9 = vld [vmem:[%s438_s1 + $0x34] ss:$8 sps:$4 sm:$0xff]  }
   0x4   :  { %149 = vmatprep.subr.bf16.mxu0 %v325_v3  ;;  %306 = vmatprep.subr.bf16.mxu1 %v325_v3  ;;  %v336_v10 = vld [vmem:[%s438_s1 + $0x30] ss:$8 sps:$4 sm:$0xff]   ;;  %v337_v11 = vld [vmem:[%s438_s1 + $0x24] ss:$8 sps:$4 sm:$0xff]   ;;  %v339_v12 = vld [vmem:[%s438_s1 + $0x20] ss:$8 sps:$4 sm:$0xff]  }
   0x5   :  { %v340_v13 = vld [vmem:[%s438_s1 + $0x14] ss:$8 sps:$4 sm:$0xff]   ;;  %v342_v14 = vld [vmem:[%s438_s1 + $0x10] ss:$8 sps:$4 sm:$0xff]   ;;  %v343_v15 = vld [vmem:[%s438_s1 + $0x4] ss:$8 sps:$4 sm:$0xff]  }
   0x6   :  { %v345_v16 = vld [vmem:[%s438_s1] ss:$8 sps:$4 sm:$0xff]   ;;  %v230_v20 = vshrl.u32 %v229_v19, 7 }
   0x7   :  { %150 = vmatpush1.bf16.msra.mxu0 %v327_v4  ;;  %314 = vmatpush1.bf16.msra.mxu1 %v327_v4  ;;  %v346_v17 = vld [vmem:[%s439_s0] sm:$0xff]   ;;  %v347_v18 = vld [vmem:[%s439_s0 + $0x8] sm:$0xff]  }
   0x8   :  { %151 = vmatprep.subr.bf16.mxu0 %v328_v5  ;;  %307 = vmatprep.subr.bf16.mxu1 %v328_v5  ;;  %v231_v21 = vsub.s32 0, %v230_v20  ;;  %v235_v22 = vsub.s32 1, %v230_v20  ;;  %v227_v23 = vld [vmem:[%s440_s2] sm:$0x3] }
   0xa   :  { %v232_v24 = vrot.slane %v227_v23, %v231_v21  ;;  %v236_v25 = vrot.slane %v227_v23, %v235_v22 }
   0xb   :  { %152 = vmatpush1.bf16.msra.mxu0 %v330_v6  ;;  %315 = vmatpush1.bf16.msra.mxu1 %v330_v6 }
   0xc   :  { %153 = vmatprep.subr.bf16.mxu0 %v331_v7  ;;  %308 = vmatprep.subr.bf16.mxu1 %v331_v7 }
   0xf   :  { %154 = vmatpush1.bf16.msra.mxu0 %v333_v8  ;;  %316 = vmatpush1.bf16.msra.mxu1 %v333_v8 }
  0x10   :  { %155 = vmatprep.subr.bf16.mxu0 %v334_v9  ;;  %309 = vmatprep.subr.bf16.mxu1 %v334_v9 }
  0x13   :  { %156 = vmatpush1.bf16.msra.mxu0 %v336_v10  ;;  %317 = vmatpush1.bf16.msra.mxu1 %v336_v10 }
  0x14   :  { %157 = vmatprep.subr.bf16.mxu0 %v337_v11  ;;  %310 = vmatprep.subr.bf16.mxu1 %v337_v11 }
  0x17   :  { %158 = vmatpush1.bf16.msra.mxu0 %v339_v12  ;;  %318 = vmatpush1.bf16.msra.mxu1 %v339_v12 }
  0x18   :  { %159 = vmatprep.subr.bf16.mxu0 %v340_v13  ;;  %311 = vmatprep.subr.bf16.mxu1 %v340_v13 }
  0x1b   :  { %160 = vmatpush1.bf16.msra.mxu0 %v342_v14  ;;  %319 = vmatpush1.bf16.msra.mxu1 %v342_v14 }
  0x1c   :  { %161 = vmatprep.subr.bf16.mxu0 %v343_v15  ;;  %312 = vmatprep.subr.bf16.mxu1 %v343_v15 }
  0x1f   :  { %162 = vmatpush1.bf16.msra.mxu0 %v345_v16  ;;  %320 = vmatpush1.bf16.msra.mxu1 %v345_v16 }
  0x22   :  { %180 = vmatmul.mubr.bf16.vlgmr.msra.gmra.mxu0 %v346_v17  ;;  %190 = vmatmul.mubr.bf16.vlgmr.msra.gmra.mxu1 %v347_v18 }
  0xe2   :  { %v181_v26 = vpop.f32.mrf.mxu0  ;;  %v191_v27 = vpop.f32.mrf.mxu1 }
  0xe3   :  { %v239_v30 = vadd.f32 %v232_v24, %v181_v26  ;;  %v243_v31 = vadd.f32 %v232_v24, %v191_v27 }
  0xe4   :  { %v183_v28 = vpop.f32.mrf.mxu0  ;;  %v193_v29 = vpop.f32.mrf.mxu1 }
  0xe5   :  { %v240_v32 = vadd.f32 %v236_v25, %v183_v28  ;;  %v244_v33 = vadd.f32 %v236_v25, %v193_v29 }
  0xe6   :  { %v185_v34 = vpop.f32.mrf.mxu0  ;;  %v195_v35 = vpop.f32.mrf.mxu1 }
  0xe7   :  { %v301_v36 = vpack.c.bf16 %v240_v32, %v239_v30  ;;  %v303_v37 = vpack.c.bf16 %v244_v33, %v243_v31  ;;  %v241_v40 = vadd.f32 %v232_v24, %v185_v34  ;;  %v245_v41 = vadd.f32 %v232_v24, %v195_v35 }
  0xe8   :  { %v187_v38 = vpop.f32.mrf.mxu0  ;;  %v197_v39 = vpop.f32.mrf.mxu1 }
  0xe9   :  { %271 = vst [vmem:[%s441_s3] sm:$0xff] %v301_v36  ;;  %273 = vst [vmem:[%s441_s3 + $0x10] sm:$0xff] %v303_v37  ;;  %v242_v42 = vadd.f32 %v236_v25, %v187_v38  ;;  %v246_v43 = vadd.f32 %v236_v25, %v197_v39 }
  0xeb   :  { %v302_v44 = vpack.c.bf16 %v242_v42, %v241_v40  ;;  %v304_v45 = vpack.c.bf16 %v246_v43, %v245_v41 }
  0xed   :  { %272 = vst [vmem:[%s441_s3 + $0x8] sm:$0xff] %v302_v44  ;;  %274 = vst [vmem:[%s441_s3 + $0x18] sm:$0xff] %v304_v45 }

// kernel: _lambda_.47
= control target key start
LH: loop header
LB: loop body
LE: loop exit
PB: predicated region body
PF: predicated region fallthrough
CT: control target
= control target key end

     0   :  { %v379_v1 = vmov 0   ;;  %v232_v19 = vlaneseq  ;;  %s486_s1 = inlined_call_operand.vmem [shape: bf16[128,256], index: 1, kind: input, shape index: {}]   ;;  %s487_s0 = inlined_call_operand.vmem [shape: bf16[32,128], index: 0, kind: input, shape index: {}]   ;;  %s488_s2 = inlined_call_operand.vmem [shape: f32[1,256], index: 2, kind: input, shape index: {}]   ;;  %s489_s3 = inlined_call_operand.vmem [shape: bf16[32,256], index: 3, kind: input, shape index: {}]   ;;  %s490_s4 = inlined_call_operand.vmem [shape: bf16[32,256], index: 4, kind: output, shape index: {}]  }
   0x1   :  { %v353_v0 = vld [vmem:[%s486_s1 + $0x74] ss:$8 sps:$4 sm:$0xff]   ;;  %182 = vmatprep.mubr.bf16.mxu0 %v379_v1  ;;  %192 = vmatprep.mubr.bf16.mxu1 %v379_v1  ;;  %v355_v2 = vld [vmem:[%s486_s1 + $0x70] ss:$8 sps:$4 sm:$0xff]   ;;  %v356_v3 = vld [vmem:[%s486_s1 + $0x64] ss:$8 sps:$4 sm:$0xff]  }
   0x2   :  { %150 = vmatprep.subr.bf16.mxu0 %v353_v0  ;;  %336 = vmatprep.subr.bf16.mxu1 %v353_v0  ;;  %v358_v4 = vld [vmem:[%s486_s1 + $0x60] ss:$8 sps:$4 sm:$0xff]   ;;  %v359_v5 = vld [vmem:[%s486_s1 + $0x54] ss:$8 sps:$4 sm:$0xff]   ;;  %v361_v6 = vld [vmem:[%s486_s1 + $0x50] ss:$8 sps:$4 sm:$0xff]  }
   0x3   :  { %151 = vmatpush1.bf16.msra.mxu0 %v355_v2  ;;  %344 = vmatpush1.bf16.msra.mxu1 %v355_v2  ;;  %v362_v7 = vld [vmem:[%s486_s1 + $0x44] ss:$8 sps:$4 sm:$0xff]   ;;  %v364_v8 = vld [vmem:[%s486_s1 + $0x40] ss:$8 sps:$4 sm:$0xff]   ;;  %v365_v9 = vld [vmem:[%s486_s1 + $0x34] ss:$8 sps:$4 sm:$0xff]  }
   0x4   :  { %152 = vmatprep.subr.bf16.mxu0 %v356_v3  ;;  %337 = vmatprep.subr.bf16.mxu1 %v356_v3  ;;  %v367_v10 = vld [vmem:[%s486_s1 + $0x30] ss:$8 sps:$4 sm:$0xff]   ;;  %v368_v11 = vld [vmem:[%s486_s1 + $0x24] ss:$8 sps:$4 sm:$0xff]   ;;  %v370_v12 = vld [vmem:[%s486_s1 + $0x20] ss:$8 sps:$4 sm:$0xff]  }
   0x5   :  { %v371_v13 = vld [vmem:[%s486_s1 + $0x14] ss:$8 sps:$4 sm:$0xff]   ;;  %v373_v14 = vld [vmem:[%s486_s1 + $0x10] ss:$8 sps:$4 sm:$0xff]   ;;  %v374_v15 = vld [vmem:[%s486_s1 + $0x4] ss:$8 sps:$4 sm:$0xff]  }
   0x6   :  { %v376_v16 = vld [vmem:[%s486_s1] ss:$8 sps:$4 sm:$0xff]   ;;  %v233_v20 = vshrl.u32 %v232_v19, 7  ;;  %v252_v25 = vld [vmem:[%s489_s3 + $0x10] sm:$0xff]  ;;  %v253_v37 = vld [vmem:[%s489_s3 + $0x18] sm:$0xff] }
   0x7   :  { %153 = vmatpush1.bf16.msra.mxu0 %v358_v4  ;;  %345 = vmatpush1.bf16.msra.mxu1 %v358_v4  ;;  %v377_v17 = vld [vmem:[%s487_s0] sm:$0xff]   ;;  %v378_v18 = vld [vmem:[%s487_s0 + $0x8] sm:$0xff]   ;;  %v258_v28 = vunpack.c.l.bf16 %v252_v25  ;;  %v259_v35 = vunpack.c.h.bf16 %v252_v25  ;;  %v260_v47 = vunpack.c.l.bf16 %v253_v37  ;;  %v261_v51 = vunpack.c.h.bf16 %v253_v37 }
   0x8   :  { %154 = vmatprep.subr.bf16.mxu0 %v359_v5  ;;  %338 = vmatprep.subr.bf16.mxu1 %v359_v5  ;;  %v234_v21 = vsub.s32 0, %v233_v20  ;;  %v230_v22 = vld [vmem:[%s488_s2] sm:$0x3]  ;;  %v238_v23 = vsub.s32 1, %v233_v20  ;;  %v251_v36 = vld [vmem:[%s489_s3 + $0x8] sm:$0xff] }
   0x9   :  { %v250_v24 = vld [vmem:[%s489_s3] sm:$0xff]  ;;  %v256_v45 = vunpack.c.l.bf16 %v251_v36  ;;  %v257_v50 = vunpack.c.h.bf16 %v251_v36 }
   0xa   :  { %v235_v26 = vrot.slane %v230_v22, %v234_v21  ;;  %v254_v27 = vunpack.c.l.bf16 %v250_v24  ;;  %v239_v29 = vrot.slane %v230_v22, %v238_v23  ;;  %v255_v34 = vunpack.c.h.bf16 %v250_v24 }
   0xb   :  { %155 = vmatpush1.bf16.msra.mxu0 %v361_v6  ;;  %346 = vmatpush1.bf16.msra.mxu1 %v361_v6 }
   0xc   :  { %156 = vmatprep.subr.bf16.mxu0 %v362_v7  ;;  %339 = vmatprep.subr.bf16.mxu1 %v362_v7 }
   0xf   :  { %157 = vmatpush1.bf16.msra.mxu0 %v364_v8  ;;  %347 = vmatpush1.bf16.msra.mxu1 %v364_v8 }
  0x10   :  { %158 = vmatprep.subr.bf16.mxu0 %v365_v9  ;;  %340 = vmatprep.subr.bf16.mxu1 %v365_v9 }
  0x13   :  { %159 = vmatpush1.bf16.msra.mxu0 %v367_v10  ;;  %348 = vmatpush1.bf16.msra.mxu1 %v367_v10 }
  0x14   :  { %160 = vmatprep.subr.bf16.mxu0 %v368_v11  ;;  %341 = vmatprep.subr.bf16.mxu1 %v368_v11 }
  0x17   :  { %161 = vmatpush1.bf16.msra.mxu0 %v370_v12  ;;  %349 = vmatpush1.bf16.msra.mxu1 %v370_v12 }
  0x18   :  { %162 = vmatprep.subr.bf16.mxu0 %v371_v13  ;;  %342 = vmatprep.subr.bf16.mxu1 %v371_v13 }
  0x1b   :  { %163 = vmatpush1.bf16.msra.mxu0 %v373_v14  ;;  %350 = vmatpush1.bf16.msra.mxu1 %v373_v14 }
  0x1c   :  { %164 = vmatprep.subr.bf16.mxu0 %v374_v15  ;;  %343 = vmatprep.subr.bf16.mxu1 %v374_v15 }
  0x1f   :  { %165 = vmatpush1.bf16.msra.mxu0 %v376_v16  ;;  %351 = vmatpush1.bf16.msra.mxu1 %v376_v16 }
  0x22   :  { %183 = vmatmul.mubr.bf16.vlgmr.msra.gmra.mxu0 %v377_v17  ;;  %193 = vmatmul.mubr.bf16.vlgmr.msra.gmra.mxu1 %v378_v18 }
  0xe2   :  { %v184_v30 = vpop.f32.mrf.mxu0  ;;  %v194_v31 = vpop.f32.mrf.mxu1 }
  0xe3   :  { %v242_v32 = vadd.f32 %v235_v26, %v184_v30  ;;  %v246_v33 = vadd.f32 %v235_v26, %v194_v31 }
  0xe4   :  { %v186_v38 = vpop.f32.mrf.mxu0  ;;  %v196_v39 = vpop.f32.mrf.mxu1 }
  0xe5   :  { %v262_v40 = vadd.f32 %v254_v27, %v242_v32  ;;  %v266_v41 = vadd.f32 %v258_v28, %v246_v33  ;;  %v243_v42 = vadd.f32 %v239_v29, %v186_v38  ;;  %v247_v43 = vadd.f32 %v239_v29, %v196_v39 }
  0xe6   :  { %v188_v44 = vpop.f32.mrf.mxu0  ;;  %v198_v46 = vpop.f32.mrf.mxu1 }
  0xe7   :  { %v263_v48 = vadd.f32 %v255_v34, %v243_v42  ;;  %v267_v49 = vadd.f32 %v259_v35, %v247_v43  ;;  %v270_v52 = vmax.f32 %v262_v40, 0.0  ;;  %v274_v53 = vmax.f32 %v266_v41, 0.0 }
  0xe8   :  { %v244_v54 = vadd.f32 %v235_v26, %v188_v44  ;;  %v248_v55 = vadd.f32 %v235_v26, %v198_v46  ;;  %v190_v56 = vpop.f32.mrf.mxu0  ;;  %v200_v57 = vpop.f32.mrf.mxu1 }
  0xe9   :  { %v271_v58 = vmax.f32 %v263_v48, 0.0  ;;  %v275_v59 = vmax.f32 %v267_v49, 0.0  ;;  %v245_v60 = vadd.f32 %v239_v29, %v190_v56  ;;  %v249_v61 = vadd.f32 %v239_v29, %v200_v57 }
  0xea   :  { %v264_v62 = vadd.f32 %v256_v45, %v244_v54  ;;  %v268_v63 = vadd.f32 %v260_v47, %v248_v55 }
  0xeb   :  { %v332_v0 = vpack.c.bf16 %v271_v58, %v270_v52  ;;  %v334_v1 = vpack.c.bf16 %v275_v59, %v274_v53  ;;  %v265_v2 = vadd.f32 %v257_v50, %v245_v60  ;;  %v269_v3 = vadd.f32 %v261_v51, %v249_v61 }
  0xec   :  { %v272_v4 = vmax.f32 %v264_v62, 0.0  ;;  %v276_v5 = vmax.f32 %v268_v63, 0.0 }
  0xed   :  { %302 = vst [vmem:[%s490_s4] sm:$0xff] %v332_v0  ;;  %304 = vst [vmem:[%s490_s4 + $0x10] sm:$0xff] %v334_v1  ;;  %v273_v6 = vmax.f32 %v265_v2, 0.0  ;;  %v277_v7 = vmax.f32 %v269_v3, 0.0 }
  0xef   :  { %v333_v8 = vpack.c.bf16 %v273_v6, %v272_v4  ;;  %v335_v9 = vpack.c.bf16 %v277_v7, %v276_v5 }
  0xf1   :  { %303 = vst [vmem:[%s490_s4 + $0x8] sm:$0xff] %v333_v8  ;;  %305 = vst [vmem:[%s490_s4 + $0x18] sm:$0xff] %v335_v9 }

// kernel: _lambda_.48
= control target key start
LH: loop header
LB: loop body
LE: loop exit
PB: predicated region body
PF: predicated region fallthrough
CT: control target
= control target key end

     0   :  { %vm19_vm0 = vcmask 523264   ;;  %v381_v20 = vmov 0.0   ;;  %vm276_vm1 = vcmask 519168   ;;  %s485_s1 = inlined_call_operand.vmem [shape: bf16[256,64], index: 1, kind: input, shape index: {}]   ;;  %s486_s0 = inlined_call_operand.vmem [shape: bf16[32,256], index: 0, kind: input, shape index: {}]   ;;  %s487_s2 = inlined_call_operand.vmem [shape: f32[1,64], index: 2, kind: input, shape index: {}]   ;;  %s488_s3 = inlined_call_operand.vmem [shape: bf16[32,64], index: 3, kind: output, shape index: {}]  }
   0x1   :  { %v359_v0 = vld [vmem:[%s485_s1 + $0x78] sm:$0xff]   ;;  %v361_v2 = vld [vmem:[%s485_s1 + $0x70] sm:$0xff]   ;;  %v363_v4 = vld [vmem:[%s485_s1 + $0x68] sm:$0xff]   ;;  %20 = vst.msk [vmem:[#allocation2] sm:$0xff] %vm19_vm0, %v381_v20 }
   0x2   :  { %v360_v1 = vld [vmem:[%s485_s1 + $0x38] sm:$0xff]   ;;  %314 = vmatprep.subr.bf16.mxu0 %v359_v0  ;;  %342 = vmatprep.subr.bf16.mxu1 %v359_v0  ;;  %v362_v3 = vld [vmem:[%s485_s1 + $0x30] sm:$0xff]   ;;  %v364_v5 = vld [vmem:[%s485_s1 + $0x28] sm:$0xff]   ;;  %21 = vst.msk [vmem:[#allocation2 + $0x8] sm:$0xff] %vm19_vm0, %v381_v20 }
   0x3   :  { %315 = vmatpush3.bf16.msra.mxu0 %v360_v1  ;;  %350 = vmatpush3.bf16.msra.mxu1 %v360_v1  ;;  %v365_v6 = vld [vmem:[%s485_s1 + $0x60] sm:$0xff]   ;;  %v367_v8 = vld [vmem:[%s485_s1 + $0x58] sm:$0xff]   ;;  %v369_v10 = vld [vmem:[%s485_s1 + $0x50] sm:$0xff]   ;;  %22 = vst.msk [vmem:[#allocation2 + $0x10] sm:$0xff] %vm19_vm0, %v381_v20 }
   0x4   :  { %316 = vmatprep.subr.bf16.mxu0 %v361_v2  ;;  %343 = vmatprep.subr.bf16.mxu1 %v361_v2  ;;  %v366_v7 = vld [vmem:[%s485_s1 + $0x20] sm:$0xff]   ;;  %v368_v9 = vld [vmem:[%s485_s1 + $0x18] sm:$0xff]   ;;  %v370_v13 = vld [vmem:[%s485_s1 + $0x10] sm:$0xff]   ;;  %23 = vst.msk [vmem:[#allocation2 + $0x18] sm:$0xff] %vm19_vm0, %v381_v20 }
   0x5   :  { %v377_v11 = vld [vmem:[%s486_s0 + $0x4] ss:$8 sps:$4 sm:$0xff]   ;;  %v380_v12 = vld [vmem:[%s486_s0 + $0x14] ss:$8 sps:$4 sm:$0xff]   ;;  %v375_v18 = vld [vmem:[%s486_s0] ss:$8 sps:$4 sm:$0xff]  }
   0x6   :  { %v371_v14 = vld [vmem:[%s485_s1 + $0x48] sm:$0xff]   ;;  %212 = vmatprep.mubr.bf16.mxu0 %v377_v11  ;;  %220 = vmatprep.mubr.bf16.mxu1 %v380_v12  ;;  %v373_v16 = vld [vmem:[%s485_s1 + $0x40] sm:$0xff]   ;;  %v378_v19 = vld [vmem:[%s486_s0 + $0x10] ss:$8 sps:$4 sm:$0xff]  }
   0x7   :  { %317 = vmatpush3.bf16.msra.mxu0 %v362_v3  ;;  %351 = vmatpush3.bf16.msra.mxu1 %v362_v3  ;;  %v372_v15 = vld [vmem:[%s485_s1 + $0x8] sm:$0xff]   ;;  %v374_v17 = vld [vmem:[%s485_s1] sm:$0xff]  }
   0x8   :  { %318 = vmatprep.subr.bf16.mxu0 %v363_v4  ;;  %344 = vmatprep.subr.bf16.mxu1 %v363_v4  ;;  %v24_v23 = vld [vmem:[#allocation2] sm:$0xff]  ;;  %v305_v41 = vld [vmem:[%s487_s2] ss:$0 sm:$0xff] }
   0x9   :  { %v25_v33 = vld [vmem:[#allocation2 + $0x8] sm:$0xff] }
   0xa   :  { %v26_v25 = vld [vmem:[#allocation2 + $0x10] sm:$0xff] }
   0xb   :  { %319 = vmatpush3.bf16.msra.mxu0 %v364_v5  ;;  %352 = vmatpush3.bf16.msra.mxu1 %v364_v5  ;;  %v27_v35 = vld [vmem:[#allocation2 + $0x18] sm:$0xff] }
   0xc   :  { %320 = vmatprep.subr.bf16.mxu0 %v365_v6  ;;  %345 = vmatprep.subr.bf16.mxu1 %v365_v6 }
   0xf   :  { %321 = vmatpush3.bf16.msra.mxu0 %v366_v7  ;;  %353 = vmatpush3.bf16.msra.mxu1 %v366_v7 }
  0x10   :  { %322 = vmatprep.subr.bf16.mxu0 %v367_v8  ;;  %346 = vmatprep.subr.bf16.mxu1 %v367_v8 }
  0x13   :  { %323 = vmatpush3.bf16.msra.mxu0 %v368_v9  ;;  %354 = vmatpush3.bf16.msra.mxu1 %v368_v9 }
  0x14   :  { %324 = vmatprep.subr.bf16.mxu0 %v369_v10  ;;  %347 = vmatprep.subr.bf16.mxu1 %v369_v10 }
  0x17   :  { %325 = vmatpush3.bf16.msra.mxu0 %v370_v13  ;;  %355 = vmatpush3.bf16.msra.mxu1 %v370_v13 }
  0x18   :  { %326 = vmatprep.subr.bf16.mxu0 %v371_v14  ;;  %348 = vmatprep.subr.bf16.mxu1 %v371_v14 }
  0x1b   :  { %327 = vmatpush3.bf16.msra.mxu0 %v372_v15  ;;  %356 = vmatpush3.bf16.msra.mxu1 %v372_v15 }
  0x1c   :  { %328 = vmatprep.subr.bf16.mxu0 %v373_v16  ;;  %349 = vmatprep.subr.bf16.mxu1 %v373_v16 }
  0x1f   :  { %329 = vmatpush3.bf16.msra.mxu0 %v374_v17  ;;  %357 = vmatpush3.bf16.msra.mxu1 %v374_v17 }
  0x22   :  { %213 = vmatmul.mubr.bf16.vlgmr.msra.gmra.mxu0 %v375_v18  ;;  %221 = vmatmul.mubr.bf16.vlgmr.msra.gmra.mxu1 %v378_v19 }
  0xe2   :  { %v330_v21 = vpop.f32.mrf.mxu0  ;;  %v336_v22 = vpop.f32.mrf.mxu1 }
  0xe4   :  { %v331_v24 = vpop.f32.mrf.mxu0  ;;  %v337_v26 = vpop.f32.mrf.mxu1 }
  0xe5   :  { %v332_v27 = vadd.f32 %v331_v24, %v330_v21  ;;  %v338_v28 = vadd.f32 %v337_v26, %v336_v22 }
  0xe6   :  { %v333_v29 = vpop.f32.mrf.mxu0  ;;  %v339_v30 = vpop.f32.mrf.mxu1 }
  0xe7   :  { %v229_v31 = vadd.f32 %v332_v27, %v24_v23  ;;  %v231_v32 = vadd.f32 %v338_v28, %v26_v25 }
  0xe8   :  { %v334_v34 = vpop.f32.mrf.mxu0  ;;  %v340_v36 = vpop.f32.mrf.mxu1 }
  0xe9   :  { %234 = vst.msk [vmem:[#allocation2] sm:$0xff] %vm19_vm0, %v229_v31  ;;  %236 = vst.msk [vmem:[#allocation2 + $0x10] sm:$0xff] %vm19_vm0, %v231_v32  ;;  %v335_v37 = vadd.f32 %v334_v34, %v333_v29  ;;  %v341_v38 = vadd.f32 %v340_v36, %v339_v30 }
  0xeb   :  { %v230_v39 = vadd.f32 %v335_v37, %v25_v33  ;;  %v232_v40 = vadd.f32 %v341_v38, %v27_v35 }
  0xed   :  { %235 = vst.msk [vmem:[#allocation2 + $0x8] sm:$0xff] %vm19_vm0, %v230_v39  ;;  %237 = vst.msk [vmem:[#allocation2 + $0x18] sm:$0xff] %vm19_vm0, %v232_v40 }
  0xf0   :  { %v241_v42 = vld [vmem:[#allocation2] sm:$0xff]  ;;  %v243_v43 = vld [vmem:[#allocation2 + $0x10] sm:$0xff] }
  0xf1   :  { %v252_v44 = vadd.f32 %v305_v41, %v241_v42  ;;  %v254_v45 = vadd.f32 %v305_v41, %v243_v43 }
  0xf3   :  { %v256_v46 = vmax.f32 %v252_v44, 0.0  ;;  %v258_v47 = vmax.f32 %v254_v45, 0.0 }
  0xf4   :  { %v242_v48 = vld [vmem:[#allocation2 + $0x8] sm:$0xff]  ;;  %v244_v49 = vld [vmem:[#allocation2 + $0x18] sm:$0xff] }
  0xf5   :  { %v310_v50 = vpack.c.bf16 %v256_v46, %v256_v46  ;;  %v312_v51 = vpack.c.bf16 %v258_v47, %v258_v47  ;;  %v253_v52 = vadd.f32 %v305_v41, %v242_v48  ;;  %v255_v53 = vadd.f32 %v305_v41, %v244_v49 }
  0xf7   :  { %277 = vst.msk [vmem:[%s488_s3] sm:$0xf] %vm276_vm1, %v310_v50  ;;  %279 = vst.msk [vmem:[%s488_s3 + $0x8] sm:$0xf] %vm276_vm1, %v312_v51  ;;  %v257_v54 = vmax.f32 %v253_v52, 0.0  ;;  %v259_v55 = vmax.f32 %v255_v53, 0.0 }
  0xf9   :  { %v311_v56 = vpack.c.bf16 %v257_v54, %v257_v54  ;;  %v313_v57 = vpack.c.bf16 %v259_v55, %v259_v55 }
  0xfb   :  { %278 = vst.msk [vmem:[%s488_s3 + $0x4] sm:$0xf] %vm276_vm1, %v311_v56  ;;  %280 = vst.msk [vmem:[%s488_s3 + $0xc] sm:$0xf] %vm276_vm1, %v313_v57 }

// kernel: _lambda_.54
= control target key start
LH: loop header
LB: loop body
LE: loop exit
PB: predicated region body
PF: predicated region fallthrough
CT: control target
= control target key end

     0   :  { %s477_s1 = inlined_call_operand.vmem [shape: bf16[256,128], index: 1, kind: input, shape index: {}]   ;;  %s478_s0 = inlined_call_operand.vmem [shape: bf16[32,256], index: 0, kind: input, shape index: {}]   ;;  %s479_s2 = inlined_call_operand.vmem [shape: f32[1,128], index: 2, kind: input, shape index: {}]   ;;  %s480_s3 = inlined_call_operand.vmem [shape: bf16[32,128], index: 3, kind: output, shape index: {}]  }
   0x1   :  { %v366_v0 = vld [vmem:[%s477_s1 + $0x78] sm:$0xff]   ;;  %v368_v2 = vld [vmem:[%s477_s1 + $0x70] sm:$0xff]   ;;  %v370_v4 = vld [vmem:[%s477_s1 + $0x68] sm:$0xff]  }
   0x2   :  { %v367_v1 = vld [vmem:[%s477_s1 + $0x38] sm:$0xff]   ;;  %322 = vmatprep.subr.bf16.mxu0 %v366_v0  ;;  %350 = vmatprep.subr.bf16.mxu1 %v366_v0  ;;  %v369_v3 = vld [vmem:[%s477_s1 + $0x30] sm:$0xff]   ;;  %v371_v5 = vld [vmem:[%s477_s1 + $0x28] sm:$0xff]  }
   0x3   :  { %323 = vmatpush3.bf16.msra.mxu0 %v367_v1  ;;  %358 = vmatpush3.bf16.msra.mxu1 %v367_v1  ;;  %v372_v6 = vld [vmem:[%s477_s1 + $0x60] sm:$0xff]   ;;  %v374_v8 = vld [vmem:[%s477_s1 + $0x58] sm:$0xff]   ;;  %v376_v10 = vld [vmem:[%s477_s1 + $0x50] sm:$0xff]  }
   0x4   :  { %324 = vmatprep.subr.bf16.mxu0 %v368_v2  ;;  %351 = vmatprep.subr.bf16.mxu1 %v368_v2  ;;  %v373_v7 = vld [vmem:[%s477_s1 + $0x20] sm:$0xff]   ;;  %v375_v9 = vld [vmem:[%s477_s1 + $0x18] sm:$0xff]   ;;  %v377_v13 = vld [vmem:[%s477_s1 + $0x10] sm:$0xff]  }
   0x5   :  { %v384_v11 = vld [vmem:[%s478_s0 + $0x4] ss:$8 sps:$4 sm:$0xff]   ;;  %v387_v12 = vld [vmem:[%s478_s0 + $0x14] ss:$8 sps:$4 sm:$0xff]   ;;  %v382_v18 = vld [vmem:[%s478_s0] ss:$8 sps:$4 sm:$0xff]  }
   0x6   :  { %v378_v14 = vld [vmem:[%s477_s1 + $0x48] sm:$0xff]   ;;  %211 = vmatprep.mubr.bf16.mxu0 %v384_v11  ;;  %219 = vmatprep.mubr.bf16.mxu1 %v387_v12  ;;  %v380_v16 = vld [vmem:[%s477_s1 + $0x40] sm:$0xff]   ;;  %v385_v19 = vld [vmem:[%s478_s0 + $0x10] ss:$8 sps:$4 sm:$0xff]  }
   0x7   :  { %325 = vmatpush3.bf16.msra.mxu0 %v369_v3  ;;  %359 = vmatpush3.bf16.msra.mxu1 %v369_v3  ;;  %v379_v15 = vld [vmem:[%s477_s1 + $0x8] sm:$0xff]   ;;  %v381_v17 = vld [vmem:[%s477_s1] sm:$0xff]  }
   0x8   :  { %326 = vmatprep.subr.bf16.mxu0 %v370_v4  ;;  %352 = vmatprep.subr.bf16.mxu1 %v370_v4  ;;  %v302_v26 = vld [vmem:[%s479_s2] ss:$0 sm:$0xff] }
   0xb   :  { %327 = vmatpush3.bf16.msra.mxu0 %v371_v5  ;;  %360 = vmatpush3.bf16.msra.mxu1 %v371_v5 }
   0xc   :  { %328 = vmatprep.subr.bf16.mxu0 %v372_v6  ;;  %353 = vmatprep.subr.bf16.mxu1 %v372_v6 }
   0xf   :  { %329 = vmatpush3.bf16.msra.mxu0 %v373_v7  ;;  %361 = vmatpush3.bf16.msra.mxu1 %v373_v7 }
  0x10   :  { %330 = vmatprep.subr.bf16.mxu0 %v374_v8  ;;  %354 = vmatprep.subr.bf16.mxu1 %v374_v8 }
  0x13   :  { %331 = vmatpush3.bf16.msra.mxu0 %v375_v9  ;;  %362 = vmatpush3.bf16.msra.mxu1 %v375_v9 }
  0x14   :  { %332 = vmatprep.subr.bf16.mxu0 %v376_v10  ;;  %355 = vmatprep.subr.bf16.mxu1 %v376_v10 }
  0x17   :  { %333 = vmatpush3.bf16.msra.mxu0 %v377_v13  ;;  %363 = vmatpush3.bf16.msra.mxu1 %v377_v13 }
  0x18   :  { %334 = vmatprep.subr.bf16.mxu0 %v378_v14  ;;  %356 = vmatprep.subr.bf16.mxu1 %v378_v14 }
  0x1b   :  { %335 = vmatpush3.bf16.msra.mxu0 %v379_v15  ;;  %364 = vmatpush3.bf16.msra.mxu1 %v379_v15 }
  0x1c   :  { %336 = vmatprep.subr.bf16.mxu0 %v380_v16  ;;  %357 = vmatprep.subr.bf16.mxu1 %v380_v16 }
  0x1f   :  { %337 = vmatpush3.bf16.msra.mxu0 %v381_v17  ;;  %365 = vmatpush3.bf16.msra.mxu1 %v381_v17 }
  0x22   :  { %212 = vmatmul.mubr.bf16.vlgmr.msra.gmra.mxu0 %v382_v18  ;;  %220 = vmatmul.mubr.bf16.vlgmr.msra.gmra.mxu1 %v385_v19 }
  0xe2   :  { %v338_v20 = vpop.f32.mrf.mxu0  ;;  %v344_v21 = vpop.f32.mrf.mxu1 }
  0xe4   :  { %v339_v22 = vpop.f32.mrf.mxu0  ;;  %v345_v23 = vpop.f32.mrf.mxu1 }
  0xe5   :  { %v340_v24 = vadd.f32 %v339_v22, %v338_v20  ;;  %v346_v25 = vadd.f32 %v345_v23, %v344_v21 }
  0xe6   :  { %v341_v27 = vpop.f32.mrf.mxu0  ;;  %v347_v28 = vpop.f32.mrf.mxu1 }
  0xe7   :  { %v250_v31 = vadd.f32 %v340_v24, %v302_v26  ;;  %v252_v32 = vadd.f32 %v346_v25, %v302_v26 }
  0xe8   :  { %v342_v29 = vpop.f32.mrf.mxu0  ;;  %v348_v30 = vpop.f32.mrf.mxu1 }
  0xe9   :  { %v343_v33 = vadd.f32 %v342_v29, %v341_v27  ;;  %v349_v34 = vadd.f32 %v348_v30, %v347_v28  ;;  %v254_v37 = vmax.f32 %v250_v31, 0.0  ;;  %v256_v38 = vmax.f32 %v252_v32, 0.0 }
  0xeb   :  { %v251_v35 = vadd.f32 %v343_v33, %v302_v26  ;;  %v253_v36 = vadd.f32 %v349_v34, %v302_v26 }
  0xed   :  { %v255_v39 = vmax.f32 %v251_v35, 0.0  ;;  %v257_v40 = vmax.f32 %v253_v36, 0.0 }
  0xef   :  { %v314_v41 = vpack.c.bf16 %v255_v39, %v254_v37  ;;  %v319_v42 = vpack.c.bf16 %v257_v40, %v256_v38 }
  0xf1   :  { %315 = vst [vmem:[%s480_s3] sm:$0xff] %v314_v41   ;;  %321 = vst [vmem:[%s480_s3 + $0x8] sm:$0xff] %v319_v42  }

// kernel: _lambda_.55
= control target key start
LH: loop header
LB: loop body
LE: loop exit
PB: predicated region body
PF: predicated region fallthrough
CT: control target
= control target key end

     0   :  { %s622_s12 = smov 0   ;;  %s624_s13 = smov 0   ;;  %s671_s0 = inlined_call_operand.vmem [shape: bf16[8,1152], index: 0, kind: input, shape index: {}]   ;;  %s672_s1 = inlined_call_operand.vmem [shape: bf16[1152,128], index: 1, kind: input, shape index: {}]   ;;  %s673_s2 = inlined_call_operand.vmem [shape: f32[1,128], index: 2, kind: input, shape index: {}]   ;;  %s674_s3 = inlined_call_operand.vmem [shape: bf16[8,128], index: 3, kind: output, shape index: {}]  }
   0x1   :  { %s626_s14 = smov 0  }
   0x2 LB: > { %s25_s15 = sadd.s32 1, %s593_s13  ;;  %p493_p0 = scmp.ge.s32.totalorder %s597_s14, 1  ;;  %s597_s14 = sphi %s626_s14, %s13_s14   ;;  %s593_s13 = sphi %s624_s13, %s676_s13   ;;  %s589_s12 = sphi %s622_s12, %s675_s12  }
   0x3   : > { %p26_p1 = scmp.ge.s32.totalorder %s25_s15, 9  ;;  %p187_p2 = scmp.lt.s32.totalorder %s597_s14, 10 }
   0x5   : > { %s678_s15 = smov (%p26_p1, %s25_s15), 0  ;;  %p188_p3 = pnand %p493_p0, %p187_p2 }
   0x6   : > { %p229_p4 = scmp.lt.s32.totalorder (!%p188_p3), %s589_s12, 8  ;;  %s495_s16 = sshll.u32 (!%p188_p3), %s589_s12, 4 }
   0x7   : > { %191 = sbr.rel (%p188_p3) target bundleno = 263 (0x107), region = 32  ;;  %p236_p5 = scmp.lt.s32.totalorder (!%p188_p3), %s495_s16, 143 }
   0x8   : > { %p497_p6 = scmp.ne.s32.totalorder (!%p188_p3), %s589_s12, 0 }
   0xc   : > { %s230_s17 = scalar_select %p229_p4, %s589_s12, 8 }
   0xd   : > { %s680_s16 = smov (!%p236_p5, %s495_s16), 143  ;;  %258 = sbr.rel (%p497_p6) target bundleno = 20 (0x14), region = 36 }
   0xe   : > { %s494_s18 = sshll.u32 %s230_s17, 2  ;;  %s496_s22 = sshll.u32 %s680_s16, 2 }
   0xf   : > { %s648_s21 = scalar_lea.vmem %s671_s0, %s494_s18  ;;  %s242_s25 = scalar_lea.vmem %s672_s1, %s496_s22 }
  0x12   : > { %v599_v0 = vmov 0.0  }
  0x13   : > { %259 = vst [vmem:[#allocation2] sm:$0xff] %v599_v0 }
  0x14 PF: > { %v567_v1 = vld [vmem:[%s242_s25 + $0x38] sm:$0xff]   ;;  %v600_v2 = vmov 0.0   ;;  %v568_v3 = vld [vmem:[%s242_s25 + $0x30] sm:$0xff]   ;;  %vm601_vm0 = vmmov 0   ;;  %v569_v4 = vld [vmem:[%s242_s25 + $0x28] sm:$0xff]   ;;  %p506_p7 = scmp.ne.s32.totalorder %s589_s12, 8 }
  0x15   : > { %520 = vmatprep.subr.bf16.mxu0 %v600_v2  ;;  %536 = vmatprep.mubr.msk.bf16.mxu0 %vm601_vm0, %v600_v2  ;;  %v570_v5 = vld [vmem:[%s242_s25 + $0x20] sm:$0xff]   ;;  %v571_v6 = vld [vmem:[%s242_s25 + $0x18] sm:$0xff]   ;;  %v572_v7 = vld [vmem:[%s242_s25 + $0x10] sm:$0xff]  }
  0x16   : > { %521 = vmatpush3.bf16.msra.mxu0 %v567_v1  ;;  %v573_v8 = vld [vmem:[%s242_s25 + $0x8] sm:$0xff]   ;;  %v574_v9 = vld [vmem:[%s242_s25] sm:$0xff]  }
  0x17   : > { %522 = vmatprep.subr.bf16.mxu0 %v600_v2  ;;  %v261_v10 = vld [vmem:[%s648_s21] sm:$0xf] }
  0x1a   : > { %523 = vmatpush3.bf16.msra.mxu0 %v568_v3  ;;  %v260_v11 = vld [vmem:[#allocation2] sm:$0xff] }
  0x1b   : > { %524 = vmatprep.subr.bf16.mxu0 %v600_v2 }
  0x1e   : > { %525 = vmatpush3.bf16.msra.mxu0 %v569_v4 }
  0x1f   : > { %526 = vmatprep.subr.bf16.mxu0 %v600_v2 }
  0x22   : > { %527 = vmatpush3.bf16.msra.mxu0 %v570_v5 }
  0x23   : > { %528 = vmatprep.subr.bf16.mxu0 %v600_v2 }
  0x26   : > { %529 = vmatpush3.bf16.msra.mxu0 %v571_v6 }
  0x27   : > { %530 = vmatprep.subr.bf16.mxu0 %v600_v2 }
  0x2a   : > { %531 = vmatpush3.bf16.msra.mxu0 %v572_v7 }
  0x2b   : > { %532 = vmatprep.subr.bf16.mxu0 %v600_v2 }
  0x2e   : > { %533 = vmatpush3.bf16.msra.mxu0 %v573_v8 }
  0x2f   : > { %534 = vmatprep.subr.bf16.mxu0 %v600_v2 }
  0x32   : > { %535 = vmatpush3.bf16.msra.mxu0 %v574_v9 }
  0x35   : > { %537 = vmatmul.mubr.bf16.vlgmr.msra.gmra.mxu0 %v261_v10 }
  0xf5   : > { %v360_v12 = vpop.f32.mrf.mxu0 }
  0xf6   : > { %v366_v13 = vadd.f32 %v360_v12, %v260_v11 }
  0xf7   : > { %v538_v14 = vpop.f32.mrf.mxu0  ;;  %371 = sbr.rel (%p506_p7) target bundleno = 263 (0x107), region = 40 }
  0xf8   : > { %367 = vst [vmem:[#allocation2] sm:$0xff] %v366_v13 }
  0xf9   : > { %v363_v15 = vpop.f32.mrf.mxu0 }
  0xfb   : > { %v539_v16 = vpop.f32.mrf.mxu0 }
  0xfc   : > { %v507_v18 = vld [vmem:[%s673_s2] ss:$0 sm:$0xff] }
  0xff   : > { %v372_v17 = vld [vmem:[#allocation2] sm:$0xff] }
 0x100   : > { %v380_v19 = vadd.f32 %v507_v18, %v372_v17 }
 0x102   : > { %v381_v20 = vmax.f32 %v380_v19, 0.0 }
 0x104   : > { %v382_v21 = vpack.c.bf16 %v381_v20, %v381_v20 }
 0x106   : > { %383 = vst [vmem:[%s674_s3] sm:$0xf] %v382_v21 }
 0x107 PF: > { %s13_s14 = sadd.s32 1, %s597_s14   ;;  %s675_s12 = smov %s593_s13 }
 0x108   : > { %p10_p8 = scmp.ge.s32.totalorder %s13_s14, 11   ;;  %s676_s13 = smov %s678_s15 }
 0x10a   :  { %12 = sbr.rel (!%p10_p8) target bundleno = 2 (0x2), region = 76 }

// kernel: _lambda_.56
= control target key start
LH: loop header
LB: loop body
LE: loop exit
PB: predicated region body
PF: predicated region fallthrough
CT: control target
= control target key end

     0   :  { %s955_s1 = inlined_call_operand.vmem [shape: bf16[256,512], index: 1, kind: input, shape index: {}]   ;;  %s956_s0 = inlined_call_operand.vmem [shape: bf16[8,256], index: 0, kind: input, shape index: {}]   ;;  %s957_s2 = inlined_call_operand.vmem [shape: f32[1,512], index: 2, kind: input, shape index: {}]   ;;  %s958_s3 = inlined_call_operand.vmem [shape: bf16[8,512], index: 3, kind: output, shape index: {}]  }
   0x1   :  { %v633_v0 = vld [vmem:[%s955_s1 + $0xe4] ss:$16 sps:$4 sm:$0xff]   ;;  %v635_v1 = vld [vmem:[%s955_s1 + $0xec] ss:$16 sps:$4 sm:$0xff]   ;;  %v637_v2 = vld [vmem:[%s955_s1 + $0xe0] ss:$16 sps:$4 sm:$0xff]  }
   0x2   :  { %418 = vmatprep.subr.bf16.mxu0 %v633_v0  ;;  %v638_v3 = vld [vmem:[%s955_s1 + $0xe8] ss:$16 sps:$4 sm:$0xff]   ;;  %459 = vmatprep.subr.bf16.mxu1 %v635_v1  ;;  %v639_v4 = vld [vmem:[%s955_s1 + $0xc4] ss:$16 sps:$4 sm:$0xff]   ;;  %v641_v5 = vld [vmem:[%s955_s1 + $0xcc] ss:$16 sps:$4 sm:$0xff]  }
   0x3   :  { %419 = vmatpush1.bf16.msra.mxu0 %v637_v2  ;;  %460 = vmatpush1.bf16.msra.mxu1 %v638_v3  ;;  %v643_v6 = vld [vmem:[%s955_s1 + $0xc0] ss:$16 sps:$4 sm:$0xff]   ;;  %v644_v7 = vld [vmem:[%s955_s1 + $0xc8] ss:$16 sps:$4 sm:$0xff]   ;;  %v645_v8 = vld [vmem:[%s955_s1 + $0xa4] ss:$16 sps:$4 sm:$0xff]   ;;  %v517_v3 = vlaneseq }
   0x4   :  { %420 = vmatprep.subr.bf16.mxu0 %v639_v4  ;;  %461 = vmatprep.subr.bf16.mxu1 %v641_v5  ;;  %v647_v9 = vld [vmem:[%s955_s1 + $0xac] ss:$16 sps:$4 sm:$0xff]   ;;  %v649_v10 = vld [vmem:[%s955_s1 + $0xa0] ss:$16 sps:$4 sm:$0xff]   ;;  %v650_v11 = vld [vmem:[%s955_s1 + $0xa8] ss:$16 sps:$4 sm:$0xff]  }
   0x5   :  { %v651_v12 = vld [vmem:[%s955_s1 + $0x84] ss:$16 sps:$4 sm:$0xff]   ;;  %v653_v13 = vld [vmem:[%s955_s1 + $0x8c] ss:$16 sps:$4 sm:$0xff]   ;;  %v655_v14 = vld [vmem:[%s955_s1 + $0x80] ss:$16 sps:$4 sm:$0xff]  }
   0x6   :  { %v656_v15 = vld [vmem:[%s955_s1 + $0x88] ss:$16 sps:$4 sm:$0xff]   ;;  %v657_v16 = vld [vmem:[%s955_s1 + $0x64] ss:$16 sps:$4 sm:$0xff]   ;;  %v659_v17 = vld [vmem:[%s955_s1 + $0x6c] ss:$16 sps:$4 sm:$0xff]  }
   0x7   :  { %421 = vmatpush1.bf16.msra.mxu0 %v643_v6  ;;  %462 = vmatpush1.bf16.msra.mxu1 %v644_v7  ;;  %v661_v18 = vld [vmem:[%s955_s1 + $0x60] ss:$16 sps:$4 sm:$0xff]   ;;  %v662_v19 = vld [vmem:[%s955_s1 + $0x68] ss:$16 sps:$4 sm:$0xff]   ;;  %v663_v20 = vld [vmem:[%s955_s1 + $0x44] ss:$16 sps:$4 sm:$0xff]  }
   0x8   :  { %422 = vmatprep.subr.bf16.mxu0 %v645_v8  ;;  %463 = vmatprep.subr.bf16.mxu1 %v647_v9  ;;  %v665_v21 = vld [vmem:[%s955_s1 + $0x4c] ss:$16 sps:$4 sm:$0xff]   ;;  %v667_v22 = vld [vmem:[%s955_s1 + $0x40] ss:$16 sps:$4 sm:$0xff]   ;;  %v668_v23 = vld [vmem:[%s955_s1 + $0x48] ss:$16 sps:$4 sm:$0xff]  }
   0x9   :  { %v669_v24 = vld [vmem:[%s955_s1 + $0x24] ss:$16 sps:$4 sm:$0xff]   ;;  %v671_v25 = vld [vmem:[%s955_s1 + $0x2c] ss:$16 sps:$4 sm:$0xff]   ;;  %v673_v26 = vld [vmem:[%s955_s1 + $0x20] ss:$16 sps:$4 sm:$0xff]  }
   0xa   :  { %v674_v27 = vld [vmem:[%s955_s1 + $0x28] ss:$16 sps:$4 sm:$0xff]   ;;  %v675_v28 = vld [vmem:[%s955_s1 + $0x4] ss:$16 sps:$4 sm:$0xff]   ;;  %v677_v29 = vld [vmem:[%s955_s1 + $0xc] ss:$16 sps:$4 sm:$0xff]  }
   0xb   :  { %423 = vmatpush1.bf16.msra.mxu0 %v649_v10  ;;  %464 = vmatpush1.bf16.msra.mxu1 %v650_v11  ;;  %v679_v30 = vld [vmem:[%s955_s1] ss:$16 sps:$4 sm:$0xff]   ;;  %v680_v31 = vld [vmem:[%s955_s1 + $0x8] ss:$16 sps:$4 sm:$0xff]   ;;  %v681_v32 = vld [vmem:[%s955_s1 + $0x1e4] ss:$16 sps:$4 sm:$0xff]  }
   0xc   :  { %424 = vmatprep.subr.bf16.mxu0 %v651_v12  ;;  %465 = vmatprep.subr.bf16.mxu1 %v653_v13  ;;  %v683_v33 = vld [vmem:[%s955_s1 + $0x1ec] ss:$16 sps:$4 sm:$0xff]   ;;  %v685_v34 = vld [vmem:[%s955_s1 + $0x1e0] ss:$16 sps:$4 sm:$0xff]   ;;  %v686_v35 = vld [vmem:[%s955_s1 + $0x1e8] ss:$16 sps:$4 sm:$0xff]  }
   0xd   :  { %v687_v36 = vld [vmem:[%s955_s1 + $0x1c4] ss:$16 sps:$4 sm:$0xff]   ;;  %v689_v37 = vld [vmem:[%s955_s1 + $0x1cc] ss:$16 sps:$4 sm:$0xff]   ;;  %v691_v38 = vld [vmem:[%s955_s1 + $0x1c0] ss:$16 sps:$4 sm:$0xff]  }
   0xe   :  { %v692_v39 = vld [vmem:[%s955_s1 + $0x1c8] ss:$16 sps:$4 sm:$0xff]   ;;  %v693_v40 = vld [vmem:[%s955_s1 + $0x1a4] ss:$16 sps:$4 sm:$0xff]   ;;  %v695_v41 = vld [vmem:[%s955_s1 + $0x1ac] ss:$16 sps:$4 sm:$0xff]  }
   0xf   :  { %425 = vmatpush1.bf16.msra.mxu0 %v655_v14  ;;  %466 = vmatpush1.bf16.msra.mxu1 %v656_v15  ;;  %v697_v42 = vld [vmem:[%s955_s1 + $0x1a0] ss:$16 sps:$4 sm:$0xff]   ;;  %v698_v43 = vld [vmem:[%s955_s1 + $0x1a8] ss:$16 sps:$4 sm:$0xff]   ;;  %v699_v44 = vld [vmem:[%s955_s1 + $0x184] ss:$16 sps:$4 sm:$0xff]  }
  0x10   :  { %426 = vmatprep.subr.bf16.mxu0 %v657_v16  ;;  %467 = vmatprep.subr.bf16.mxu1 %v659_v17  ;;  %v701_v45 = vld [vmem:[%s955_s1 + $0x18c] ss:$16 sps:$4 sm:$0xff]   ;;  %v26_v46 = vld [vmem:[%s956_s0] sm:$0xff]  ;;  %v704_v49 = vld [vmem:[%s955_s1 + $0x188] ss:$16 sps:$4 sm:$0xff]   ;;  %v518_v4 = vshrl.u32 %v517_v3, 7 }
  0x11   :  { %v564_v47 = vcombine.high %v26_v46, %v26_v46  ;;  %v703_v48 = vld [vmem:[%s955_s1 + $0x180] ss:$16 sps:$4 sm:$0xff]   ;;  %v705_v50 = vld [vmem:[%s955_s1 + $0x164] ss:$16 sps:$4 sm:$0xff]   ;;  %v707_v51 = vld [vmem:[%s955_s1 + $0x16c] ss:$16 sps:$4 sm:$0xff]   ;;  %v563_v2 = vcombine.low %v26_v46, %v26_v46 }
  0x12   :  { %v709_v52 = vld [vmem:[%s955_s1 + $0x160] ss:$16 sps:$4 sm:$0xff]   ;;  %v710_v53 = vld [vmem:[%s955_s1 + $0x168] ss:$16 sps:$4 sm:$0xff]   ;;  %v711_v54 = vld [vmem:[%s955_s1 + $0x144] ss:$16 sps:$4 sm:$0xff]  }
  0x13   :  { %427 = vmatpush1.bf16.msra.mxu0 %v661_v18  ;;  %468 = vmatpush1.bf16.msra.mxu1 %v662_v19  ;;  %v713_v55 = vld [vmem:[%s955_s1 + $0x14c] ss:$16 sps:$4 sm:$0xff]   ;;  %v715_v56 = vld [vmem:[%s955_s1 + $0x140] ss:$16 sps:$4 sm:$0xff]   ;;  %v716_v57 = vld [vmem:[%s955_s1 + $0x148] ss:$16 sps:$4 sm:$0xff]  }
  0x14   :  { %428 = vmatprep.subr.bf16.mxu0 %v663_v20  ;;  %469 = vmatprep.subr.bf16.mxu1 %v665_v21  ;;  %v717_v58 = vld [vmem:[%s955_s1 + $0x124] ss:$16 sps:$4 sm:$0xff]   ;;  %v719_v59 = vld [vmem:[%s955_s1 + $0x12c] ss:$16 sps:$4 sm:$0xff]   ;;  %v721_v60 = vld [vmem:[%s955_s1 + $0x120] ss:$16 sps:$4 sm:$0xff]  }
  0x15   :  { %450 = vmatprep.mubr.bf16.mxu0 %v564_v47  ;;  %491 = vmatprep.mubr.bf16.mxu1 %v564_v47  ;;  %v722_v61 = vld [vmem:[%s955_s1 + $0x128] ss:$16 sps:$4 sm:$0xff]   ;;  %v723_v62 = vld [vmem:[%s955_s1 + $0x104] ss:$16 sps:$4 sm:$0xff]   ;;  %v725_v63 = vld [vmem:[%s955_s1 + $0x10c] ss:$16 sps:$4 sm:$0xff]  }
  0x16   :  { %v727_v0 = vld [vmem:[%s955_s1 + $0x100] ss:$16 sps:$4 sm:$0xff]   ;;  %v728_v1 = vld [vmem:[%s955_s1 + $0x108] ss:$16 sps:$4 sm:$0xff]   ;;  %v519_v5 = vsub.s32 0, %v518_v4  ;;  %v527_v6 = vsub.s32 2, %v518_v4 }
  0x17   :  { %429 = vmatpush1.bf16.msra.mxu0 %v667_v22  ;;  %470 = vmatpush1.bf16.msra.mxu1 %v668_v23  ;;  %v523_v7 = vsub.s32 1, %v518_v4  ;;  %v531_v8 = vsub.s32 3, %v518_v4  ;;  %v515_v9 = vld [vmem:[%s957_s2] sm:$0xf] }
  0x18   :  { %430 = vmatprep.subr.bf16.mxu0 %v669_v24  ;;  %471 = vmatprep.subr.bf16.mxu1 %v671_v25  ;;  %v520_v10 = vrot.slane %v515_v9, %v519_v5  ;;  %v528_v11 = vrot.slane %v515_v9, %v527_v6 }
  0x19   :  { %v524_v12 = vrot.slane %v515_v9, %v523_v7  ;;  %v532_v13 = vrot.slane %v515_v9, %v531_v8 }
  0x1b   :  { %431 = vmatpush1.bf16.msra.mxu0 %v673_v26  ;;  %472 = vmatpush1.bf16.msra.mxu1 %v674_v27 }
  0x1c   :  { %432 = vmatprep.subr.bf16.mxu0 %v675_v28  ;;  %473 = vmatprep.subr.bf16.mxu1 %v677_v29 }
  0x1f   :  { %433 = vmatpush1.bf16.msra.mxu0 %v679_v30  ;;  %474 = vmatpush1.bf16.msra.mxu1 %v680_v31 }
  0x20   :  { %434 = vmatprep.subr.bf16.mxu0 %v681_v32  ;;  %475 = vmatprep.subr.bf16.mxu1 %v683_v33 }
  0x23   :  { %435 = vmatpush2.bf16.msra.mxu0 %v685_v34  ;;  %476 = vmatpush2.bf16.msra.mxu1 %v686_v35 }
  0x24   :  { %436 = vmatprep.subr.bf16.mxu0 %v687_v36  ;;  %477 = vmatprep.subr.bf16.mxu1 %v689_v37 }
  0x27   :  { %437 = vmatpush2.bf16.msra.mxu0 %v691_v38  ;;  %478 = vmatpush2.bf16.msra.mxu1 %v692_v39 }
  0x28   :  { %438 = vmatprep.subr.bf16.mxu0 %v693_v40  ;;  %479 = vmatprep.subr.bf16.mxu1 %v695_v41 }
  0x2b   :  { %439 = vmatpush2.bf16.msra.mxu0 %v697_v42  ;;  %480 = vmatpush2.bf16.msra.mxu1 %v698_v43 }
  0x2c   :  { %440 = vmatprep.subr.bf16.mxu0 %v699_v44  ;;  %481 = vmatprep.subr.bf16.mxu1 %v701_v45 }
  0x2f   :  { %441 = vmatpush2.bf16.msra.mxu0 %v703_v48  ;;  %482 = vmatpush2.bf16.msra.mxu1 %v704_v49 }
  0x30   :  { %442 = vmatprep.subr.bf16.mxu0 %v705_v50  ;;  %483 = vmatprep.subr.bf16.mxu1 %v707_v51 }
  0x33   :  { %443 = vmatpush2.bf16.msra.mxu0 %v709_v52  ;;  %484 = vmatpush2.bf16.msra.mxu1 %v710_v53 }
  0x34   :  { %444 = vmatprep.subr.bf16.mxu0 %v711_v54  ;;  %485 = vmatprep.subr.bf16.mxu1 %v713_v55 }
  0x37   :  { %445 = vmatpush2.bf16.msra.mxu0 %v715_v56  ;;  %486 = vmatpush2.bf16.msra.mxu1 %v716_v57 }
  0x38   :  { %446 = vmatprep.subr.bf16.mxu0 %v717_v58  ;;  %487 = vmatprep.subr.bf16.mxu1 %v719_v59 }
  0x3b   :  { %447 = vmatpush2.bf16.msra.mxu0 %v721_v60  ;;  %488 = vmatpush2.bf16.msra.mxu1 %v722_v61 }
  0x3c   :  { %448 = vmatprep.subr.bf16.mxu0 %v723_v62  ;;  %489 = vmatprep.subr.bf16.mxu1 %v725_v63 }
  0x3f   :  { %449 = vmatpush2.bf16.msra.mxu0 %v727_v0  ;;  %490 = vmatpush2.bf16.msra.mxu1 %v728_v1 }
  0x42   :  { %451 = vmatmul.mubr.bf16.vlgmr.msra.gmra.mxu0 %v563_v2  ;;  %492 = vmatmul.mubr.bf16.vlgmr.msra.gmra.mxu1 %v563_v2 }
 0x102   :  { %v452_v14 = vpop.f32.mrf.mxu0  ;;  %v493_v15 = vpop.f32.mrf.mxu1 }
 0x103   :  { %v537_v18 = vadd.f32 %v520_v10, %v452_v14  ;;  %v539_v19 = vadd.f32 %v528_v11, %v493_v15 }
 0x104   :  { %v454_v16 = vpop.f32.mrf.mxu0  ;;  %v495_v17 = vpop.f32.mrf.mxu1 }
 0x105   :  { %v538_v20 = vadd.f32 %v524_v12, %v454_v16  ;;  %v540_v21 = vadd.f32 %v532_v13, %v495_v17 }
 0x106   :  { %v456_v22 = vpop.f32.mrf.mxu0  ;;  %v497_v23 = vpop.f32.mrf.mxu1 }
 0x107   :  { %v631_v24 = vpack.c.bf16 %v538_v20, %v537_v18  ;;  %v632_v25 = vpack.c.bf16 %v540_v21, %v539_v19 }
 0x108   :  { %v457_v26 = vpop.f32.mrf.mxu0  ;;  %v498_v27 = vpop.f32.mrf.mxu1 }
 0x109   :  { %557 = vst [vmem:[%s958_s3] sm:$0xff] %v631_v24  ;;  %558 = vst [vmem:[%s958_s3 + $0x8] sm:$0xff] %v632_v25 }

// kernel: _lambda_.57
= control target key start
LH: loop header
LB: loop body
LE: loop exit
PB: predicated region body
PF: predicated region fallthrough
CT: control target
= control target key end

     0   :  { %v467_v1 = vmov 0   ;;  %v322_v34 = vlaneseq  ;;  %s607_s1 = inlined_call_operand.vmem [shape: bf16[128,512], index: 1, kind: input, shape index: {}]   ;;  %s608_s0 = inlined_call_operand.vmem [shape: bf16[8,128], index: 0, kind: input, shape index: {}]   ;;  %s609_s2 = inlined_call_operand.vmem [shape: f32[1,512], index: 2, kind: input, shape index: {}]   ;;  %s610_s3 = inlined_call_operand.vmem [shape: bf16[8,512], index: 3, kind: input, shape index: {}]   ;;  %s611_s4 = inlined_call_operand.vmem [shape: bf16[8,512], index: 4, kind: output, shape index: {}]  }
   0x1   :  { %v419_v0 = vld [vmem:[%s607_s1 + $0xe4] ss:$16 sps:$4 sm:$0xff]   ;;  %255 = vmatprep.mubr.bf16.mxu0 %v467_v1  ;;  %296 = vmatprep.mubr.bf16.mxu1 %v467_v1  ;;  %v421_v2 = vld [vmem:[%s607_s1 + $0xec] ss:$16 sps:$4 sm:$0xff]   ;;  %v423_v3 = vld [vmem:[%s607_s1 + $0xe0] ss:$16 sps:$4 sm:$0xff]  }
   0x2   :  { %223 = vmatprep.subr.bf16.mxu0 %v419_v0  ;;  %v424_v4 = vld [vmem:[%s607_s1 + $0xe8] ss:$16 sps:$4 sm:$0xff]   ;;  %264 = vmatprep.subr.bf16.mxu1 %v421_v2  ;;  %v425_v5 = vld [vmem:[%s607_s1 + $0xc4] ss:$16 sps:$4 sm:$0xff]   ;;  %v427_v6 = vld [vmem:[%s607_s1 + $0xcc] ss:$16 sps:$4 sm:$0xff]  }
   0x3   :  { %224 = vmatpush1.bf16.msra.mxu0 %v423_v3  ;;  %265 = vmatpush1.bf16.msra.mxu1 %v424_v4  ;;  %v429_v7 = vld [vmem:[%s607_s1 + $0xc0] ss:$16 sps:$4 sm:$0xff]   ;;  %v430_v8 = vld [vmem:[%s607_s1 + $0xc8] ss:$16 sps:$4 sm:$0xff]   ;;  %v431_v9 = vld [vmem:[%s607_s1 + $0xa4] ss:$16 sps:$4 sm:$0xff]  }
   0x4   :  { %225 = vmatprep.subr.bf16.mxu0 %v425_v5  ;;  %266 = vmatprep.subr.bf16.mxu1 %v427_v6  ;;  %v433_v10 = vld [vmem:[%s607_s1 + $0xac] ss:$16 sps:$4 sm:$0xff]   ;;  %v435_v11 = vld [vmem:[%s607_s1 + $0xa0] ss:$16 sps:$4 sm:$0xff]   ;;  %v436_v12 = vld [vmem:[%s607_s1 + $0xa8] ss:$16 sps:$4 sm:$0xff]  }
   0x5   :  { %v437_v13 = vld [vmem:[%s607_s1 + $0x84] ss:$16 sps:$4 sm:$0xff]   ;;  %v439_v14 = vld [vmem:[%s607_s1 + $0x8c] ss:$16 sps:$4 sm:$0xff]   ;;  %v441_v15 = vld [vmem:[%s607_s1 + $0x80] ss:$16 sps:$4 sm:$0xff]  }
   0x6   :  { %v442_v16 = vld [vmem:[%s607_s1 + $0x88] ss:$16 sps:$4 sm:$0xff]   ;;  %v443_v17 = vld [vmem:[%s607_s1 + $0x64] ss:$16 sps:$4 sm:$0xff]   ;;  %v445_v18 = vld [vmem:[%s607_s1 + $0x6c] ss:$16 sps:$4 sm:$0xff]  }
   0x7   :  { %226 = vmatpush1.bf16.msra.mxu0 %v429_v7  ;;  %267 = vmatpush1.bf16.msra.mxu1 %v430_v8  ;;  %v447_v19 = vld [vmem:[%s607_s1 + $0x60] ss:$16 sps:$4 sm:$0xff]   ;;  %v448_v20 = vld [vmem:[%s607_s1 + $0x68] ss:$16 sps:$4 sm:$0xff]   ;;  %v449_v21 = vld [vmem:[%s607_s1 + $0x44] ss:$16 sps:$4 sm:$0xff]  }
   0x8   :  { %227 = vmatprep.subr.bf16.mxu0 %v431_v9  ;;  %268 = vmatprep.subr.bf16.mxu1 %v433_v10  ;;  %v451_v22 = vld [vmem:[%s607_s1 + $0x4c] ss:$16 sps:$4 sm:$0xff]   ;;  %v453_v23 = vld [vmem:[%s607_s1 + $0x40] ss:$16 sps:$4 sm:$0xff]   ;;  %v454_v24 = vld [vmem:[%s607_s1 + $0x48] ss:$16 sps:$4 sm:$0xff]  }
   0x9   :  { %v455_v25 = vld [vmem:[%s607_s1 + $0x24] ss:$16 sps:$4 sm:$0xff]   ;;  %v457_v26 = vld [vmem:[%s607_s1 + $0x2c] ss:$16 sps:$4 sm:$0xff]   ;;  %v459_v27 = vld [vmem:[%s607_s1 + $0x20] ss:$16 sps:$4 sm:$0xff]  }
   0xa   :  { %v460_v28 = vld [vmem:[%s607_s1 + $0x28] ss:$16 sps:$4 sm:$0xff]   ;;  %v461_v29 = vld [vmem:[%s607_s1 + $0x4] ss:$16 sps:$4 sm:$0xff]   ;;  %v463_v30 = vld [vmem:[%s607_s1 + $0xc] ss:$16 sps:$4 sm:$0xff]  }
   0xb   :  { %228 = vmatpush1.bf16.msra.mxu0 %v435_v11  ;;  %269 = vmatpush1.bf16.msra.mxu1 %v436_v12  ;;  %v465_v31 = vld [vmem:[%s607_s1] ss:$16 sps:$4 sm:$0xff]   ;;  %v466_v32 = vld [vmem:[%s607_s1 + $0x8] ss:$16 sps:$4 sm:$0xff]   ;;  %v323_v35 = vshrl.u32 %v322_v34, 7 }
   0xc   :  { %229 = vmatprep.subr.bf16.mxu0 %v437_v13  ;;  %270 = vmatprep.subr.bf16.mxu1 %v439_v14  ;;  %v30_v33 = vld [vmem:[%s608_s0] sm:$0xf]  ;;  %v347_v42 = vld [vmem:[%s610_s3 + $0x8] sm:$0xff] }
   0xd   :  { %v324_v36 = vsub.s32 0, %v323_v35  ;;  %v332_v37 = vsub.s32 2, %v323_v35  ;;  %v320_v38 = vld [vmem:[%s609_s2] sm:$0xf]  ;;  %v328_v39 = vsub.s32 1, %v323_v35  ;;  %v336_v40 = vsub.s32 3, %v323_v35 }
   0xe   :  { %v346_v41 = vld [vmem:[%s610_s3] sm:$0xff]  ;;  %v350_v46 = vunpack.c.l.bf16 %v347_v42  ;;  %v351_v54 = vunpack.c.h.bf16 %v347_v42 }
   0xf   :  { %230 = vmatpush1.bf16.msra.mxu0 %v441_v15  ;;  %271 = vmatpush1.bf16.msra.mxu1 %v442_v16  ;;  %v325_v43 = vrot.slane %v320_v38, %v324_v36  ;;  %v333_v44 = vrot.slane %v320_v38, %v332_v37  ;;  %v348_v45 = vunpack.c.l.bf16 %v346_v41  ;;  %v329_v47 = vrot.slane %v320_v38, %v328_v39 }
  0x10   :  { %231 = vmatprep.subr.bf16.mxu0 %v443_v17  ;;  %272 = vmatprep.subr.bf16.mxu1 %v445_v18  ;;  %v337_v48 = vrot.slane %v320_v38, %v336_v40  ;;  %v349_v53 = vunpack.c.h.bf16 %v346_v41 }
  0x13   :  { %232 = vmatpush1.bf16.msra.mxu0 %v447_v19  ;;  %273 = vmatpush1.bf16.msra.mxu1 %v448_v20 }
  0x14   :  { %233 = vmatprep.subr.bf16.mxu0 %v449_v21  ;;  %274 = vmatprep.subr.bf16.mxu1 %v451_v22 }
  0x17   :  { %234 = vmatpush1.bf16.msra.mxu0 %v453_v23  ;;  %275 = vmatpush1.bf16.msra.mxu1 %v454_v24 }
  0x18   :  { %235 = vmatprep.subr.bf16.mxu0 %v455_v25  ;;  %276 = vmatprep.subr.bf16.mxu1 %v457_v26 }
  0x1b   :  { %236 = vmatpush1.bf16.msra.mxu0 %v459_v27  ;;  %277 = vmatpush1.bf16.msra.mxu1 %v460_v28 }
  0x1c   :  { %237 = vmatprep.subr.bf16.mxu0 %v461_v29  ;;  %278 = vmatprep.subr.bf16.mxu1 %v463_v30 }
  0x1f   :  { %238 = vmatpush1.bf16.msra.mxu0 %v465_v31  ;;  %279 = vmatpush1.bf16.msra.mxu1 %v466_v32 }
  0x22   :  { %256 = vmatmul.mubr.bf16.vlgmr.msra.gmra.mxu0 %v30_v33  ;;  %297 = vmatmul.mubr.bf16.vlgmr.msra.gmra.mxu1 %v30_v33 }
  0xe2   :  { %v257_v49 = vpop.f32.mrf.mxu0  ;;  %v298_v50 = vpop.f32.mrf.mxu1 }
  0xe3   :  { %v342_v51 = vadd.f32 %v325_v43, %v257_v49  ;;  %v344_v52 = vadd.f32 %v333_v44, %v298_v50 }
  0xe4   :  { %v259_v55 = vpop.f32.mrf.mxu0  ;;  %v300_v56 = vpop.f32.mrf.mxu1 }
  0xe5   :  { %v352_v57 = vadd.f32 %v348_v45, %v342_v51  ;;  %v354_v58 = vadd.f32 %v350_v46, %v344_v52  ;;  %v343_v59 = vadd.f32 %v329_v47, %v259_v55  ;;  %v345_v60 = vadd.f32 %v337_v48, %v300_v56 }
  0xe6   :  { %v261_v61 = vpop.f32.mrf.mxu0  ;;  %v302_v62 = vpop.f32.mrf.mxu1 }
  0xe7   :  { %v353_v63 = vadd.f32 %v349_v53, %v343_v59  ;;  %v355_v0 = vadd.f32 %v351_v54, %v345_v60  ;;  %v356_v3 = vmax.f32 %v352_v57, 0.0  ;;  %v358_v4 = vmax.f32 %v354_v58, 0.0 }
  0xe8   :  { %v262_v1 = vpop.f32.mrf.mxu0  ;;  %v303_v2 = vpop.f32.mrf.mxu1 }
  0xe9   :  { %v357_v5 = vmax.f32 %v353_v63, 0.0  ;;  %v359_v6 = vmax.f32 %v355_v0, 0.0 }
  0xeb   :  { %v416_v7 = vpack.c.bf16 %v357_v5, %v356_v3  ;;  %v417_v8 = vpack.c.bf16 %v359_v6, %v358_v4 }
  0xed   :  { %376 = vst [vmem:[%s611_s4] sm:$0xff] %v416_v7  ;;  %377 = vst [vmem:[%s611_s4 + $0x8] sm:$0xff] %v417_v8 }

// kernel: _lambda_.58
= control target key start
LH: loop header
LB: loop body
LE: loop exit
PB: predicated region body
PF: predicated region fallthrough
CT: control target
= control target key end

     0   :  { %s639_s1 = inlined_call_operand.vmem [shape: bf16[512,128], index: 1, kind: input, shape index: {}]   ;;  %s640_s0 = inlined_call_operand.vmem [shape: bf16[8,512], index: 0, kind: input, shape index: {}]   ;;  %s641_s2 = inlined_call_operand.vmem [shape: f32[1,128], index: 2, kind: input, shape index: {}]   ;;  %s642_s3 = inlined_call_operand.vmem [shape: bf16[8,128], index: 3, kind: output, shape index: {}]  }
   0x1   :  { %v475_v0 = vld [vmem:[%s639_s1 + $0x78] sm:$0xff]   ;;  %v479_v4 = vld [vmem:[%s639_s1 + $0x70] sm:$0xff]   ;;  %v483_v8 = vld [vmem:[%s639_s1 + $0x68] sm:$0xff]  }
   0x2   :  { %v476_v1 = vld [vmem:[%s639_s1 + $0xf8] sm:$0xff]   ;;  %431 = vmatprep.subr.bf16.mxu0 %v475_v0  ;;  %v480_v5 = vld [vmem:[%s639_s1 + $0xf0] sm:$0xff]   ;;  %v484_v9 = vld [vmem:[%s639_s1 + $0xe8] sm:$0xff]  }
   0x3   :  { %v477_v2 = vld [vmem:[%s639_s1 + $0x38] sm:$0xff]   ;;  %453 = vmatprep.subr.bf16.mxu1 %v476_v1  ;;  %v481_v6 = vld [vmem:[%s639_s1 + $0x30] sm:$0xff]   ;;  %v485_v10 = vld [vmem:[%s639_s1 + $0x28] sm:$0xff]  }
   0x4   :  { %v478_v3 = vld [vmem:[%s639_s1 + $0xb8] sm:$0xff]   ;;  %432 = vmatpush3.bf16.msra.mxu0 %v477_v2  ;;  %v482_v7 = vld [vmem:[%s639_s1 + $0xb0] sm:$0xff]   ;;  %v486_v11 = vld [vmem:[%s639_s1 + $0xa8] sm:$0xff]  }
   0x5   :  { %454 = vmatpush3.bf16.msra.mxu1 %v478_v3  ;;  %433 = vmatprep.subr.bf16.mxu0 %v479_v4  ;;  %v487_v12 = vld [vmem:[%s639_s1 + $0x60] sm:$0xff]   ;;  %v491_v16 = vld [vmem:[%s639_s1 + $0x58] sm:$0xff]   ;;  %v495_v20 = vld [vmem:[%s639_s1 + $0x50] sm:$0xff]  }
   0x6   :  { %455 = vmatprep.subr.bf16.mxu1 %v480_v5  ;;  %v488_v13 = vld [vmem:[%s639_s1 + $0xe0] sm:$0xff]   ;;  %v492_v17 = vld [vmem:[%s639_s1 + $0xd8] sm:$0xff]   ;;  %v496_v21 = vld [vmem:[%s639_s1 + $0xd0] sm:$0xff]  }
   0x7   :  { %v489_v14 = vld [vmem:[%s639_s1 + $0x20] sm:$0xff]   ;;  %v493_v18 = vld [vmem:[%s639_s1 + $0x18] sm:$0xff]   ;;  %v497_v22 = vld [vmem:[%s639_s1 + $0x10] sm:$0xff]  }
   0x8   :  { %434 = vmatpush3.bf16.msra.mxu0 %v481_v6  ;;  %v490_v15 = vld [vmem:[%s639_s1 + $0xa0] sm:$0xff]   ;;  %v494_v19 = vld [vmem:[%s639_s1 + $0x98] sm:$0xff]   ;;  %v498_v23 = vld [vmem:[%s639_s1 + $0x90] sm:$0xff]  }
   0x9   :  { %456 = vmatpush3.bf16.msra.mxu1 %v482_v7  ;;  %435 = vmatprep.subr.bf16.mxu0 %v483_v8  ;;  %v499_v24 = vld [vmem:[%s639_s1 + $0x48] sm:$0xff]   ;;  %v503_v28 = vld [vmem:[%s639_s1 + $0x40] sm:$0xff]  }
   0xa   :  { %457 = vmatprep.subr.bf16.mxu1 %v484_v9  ;;  %v500_v25 = vld [vmem:[%s639_s1 + $0xc8] sm:$0xff]   ;;  %v504_v29 = vld [vmem:[%s639_s1 + $0xc0] sm:$0xff]  }
   0xb   :  { %v501_v26 = vld [vmem:[%s639_s1 + $0x8] sm:$0xff]   ;;  %v505_v30 = vld [vmem:[%s639_s1] sm:$0xff]  }
   0xc   :  { %436 = vmatpush3.bf16.msra.mxu0 %v485_v10  ;;  %v502_v27 = vld [vmem:[%s639_s1 + $0x88] sm:$0xff]   ;;  %v506_v31 = vld [vmem:[%s639_s1 + $0x80] sm:$0xff]  }
   0xd   :  { %458 = vmatpush3.bf16.msra.mxu1 %v486_v11  ;;  %437 = vmatprep.subr.bf16.mxu0 %v487_v12  ;;  %v21_v32 = vld [vmem:[%s640_s0] sm:$0xff]  ;;  %v22_v33 = vld [vmem:[%s640_s0 + $0x8] sm:$0xff] }
   0xe   :  { %459 = vmatprep.subr.bf16.mxu1 %v488_v13  ;;  %v394_v34 = vcombine.low %v21_v32, %v21_v32  ;;  %v395_v35 = vcombine.high %v21_v32, %v21_v32  ;;  %v396_v36 = vcombine.low %v22_v33, %v22_v33  ;;  %v397_v37 = vcombine.high %v22_v33, %v22_v33  ;;  %v430_v44 = vld [vmem:[%s641_s2] ss:$0 sm:$0xff] }
  0x10   :  { %438 = vmatpush3.bf16.msra.mxu0 %v489_v14  ;;  %325 = vmatprep.mubr.bf16.mxu0 %v395_v35 }
  0x11   :  { %460 = vmatpush3.bf16.msra.mxu1 %v490_v15  ;;  %439 = vmatprep.subr.bf16.mxu0 %v491_v16 }
  0x12   :  { %461 = vmatprep.subr.bf16.mxu1 %v492_v17  ;;  %365 = vmatprep.mubr.bf16.mxu1 %v397_v37 }
  0x14   :  { %440 = vmatpush3.bf16.msra.mxu0 %v493_v18 }
  0x15   :  { %462 = vmatpush3.bf16.msra.mxu1 %v494_v19  ;;  %441 = vmatprep.subr.bf16.mxu0 %v495_v20 }
  0x16   :  { %463 = vmatprep.subr.bf16.mxu1 %v496_v21 }
  0x18   :  { %442 = vmatpush3.bf16.msra.mxu0 %v497_v22 }
  0x19   :  { %464 = vmatpush3.bf16.msra.mxu1 %v498_v23  ;;  %443 = vmatprep.subr.bf16.mxu0 %v499_v24 }
  0x1a   :  { %465 = vmatprep.subr.bf16.mxu1 %v500_v25 }
  0x1c   :  { %444 = vmatpush3.bf16.msra.mxu0 %v501_v26 }
  0x1d   :  { %466 = vmatpush3.bf16.msra.mxu1 %v502_v27  ;;  %445 = vmatprep.subr.bf16.mxu0 %v503_v28 }
  0x1e   :  { %467 = vmatprep.subr.bf16.mxu1 %v504_v29 }
  0x20   :  { %446 = vmatpush3.bf16.msra.mxu0 %v505_v30 }
  0x21   :  { %468 = vmatpush3.bf16.msra.mxu1 %v506_v31 }
  0x23   :  { %326 = vmatmul.mubr.bf16.vlgmr.msra.gmra.mxu0 %v394_v34 }
  0x24   :  { %366 = vmatmul.mubr.bf16.vlgmr.msra.gmra.mxu1 %v396_v36 }
  0xe3   :  { %v447_v38 = vpop.f32.mrf.mxu0 }
  0xe4   :  { %v469_v39 = vpop.f32.mrf.mxu1 }
  0xe5   :  { %v448_v40 = vpop.f32.mrf.mxu0 }
  0xe6   :  { %v470_v41 = vpop.f32.mrf.mxu1  ;;  %v449_v42 = vadd.f32 %v448_v40, %v447_v38 }
  0xe7   :  { %v471_v43 = vadd.f32 %v470_v41, %v469_v39  ;;  %v450_v45 = vpop.f32.mrf.mxu0 }
  0xe8   :  { %v472_v46 = vpop.f32.mrf.mxu1 }
  0xe9   :  { %v368_v47 = vadd.f32 %v471_v43, %v449_v42  ;;  %v451_v48 = vpop.f32.mrf.mxu0 }
  0xea   :  { %v473_v49 = vpop.f32.mrf.mxu1 }
  0xeb   :  { %v386_v50 = vadd.f32 %v430_v44, %v368_v47 }
  0xed   :  { %v387_v51 = vmax.f32 %v386_v50, 0.0 }
  0xef   :  { %v388_v52 = vpack.c.bf16 %v387_v51, %v387_v51 }
  0xf1   :  { %389 = vst [vmem:[%s642_s3] sm:$0xf] %v388_v52 }

// kernel: _lambda_.67
= control target key start
LH: loop header
LB: loop body
LE: loop exit
PB: predicated region body
PF: predicated region fallthrough
CT: control target
= control target key end

     0   :  { %s936_s1 = inlined_call_operand.vmem [shape: bf16[512,256], index: 1, kind: input, shape index: {}]   ;;  %s937_s0 = inlined_call_operand.vmem [shape: bf16[8,512], index: 0, kind: input, shape index: {}]   ;;  %s938_s2 = inlined_call_operand.vmem [shape: f32[1,256], index: 2, kind: input, shape index: {}]   ;;  %s939_s3 = inlined_call_operand.vmem [shape: bf16[8,256], index: 3, kind: output, shape index: {}]  }
   0x1   :  { %v612_v0 = vld [vmem:[%s936_s1 + $0x74] ss:$8 sps:$4 sm:$0xff]   ;;  %v616_v2 = vld [vmem:[%s936_s1 + $0x70] ss:$8 sps:$4 sm:$0xff]   ;;  %v618_v4 = vld [vmem:[%s936_s1 + $0x64] ss:$8 sps:$4 sm:$0xff]  }
   0x2   :  { %v614_v1 = vld [vmem:[%s936_s1 + $0x174] ss:$8 sps:$4 sm:$0xff]   ;;  %422 = vmatprep.subr.bf16.mxu0 %v612_v0  ;;  %v617_v3 = vld [vmem:[%s936_s1 + $0x170] ss:$8 sps:$4 sm:$0xff]   ;;  %v620_v5 = vld [vmem:[%s936_s1 + $0x164] ss:$8 sps:$4 sm:$0xff]  }
   0x3   :  { %463 = vmatprep.subr.bf16.mxu1 %v614_v1  ;;  %423 = vmatpush1.bf16.msra.mxu0 %v616_v2  ;;  %v622_v6 = vld [vmem:[%s936_s1 + $0x60] ss:$8 sps:$4 sm:$0xff]   ;;  %v624_v8 = vld [vmem:[%s936_s1 + $0x54] ss:$8 sps:$4 sm:$0xff]   ;;  %v628_v10 = vld [vmem:[%s936_s1 + $0x50] ss:$8 sps:$4 sm:$0xff]  }
   0x4   :  { %464 = vmatpush1.bf16.msra.mxu1 %v617_v3  ;;  %424 = vmatprep.subr.bf16.mxu0 %v618_v4  ;;  %v623_v7 = vld [vmem:[%s936_s1 + $0x160] ss:$8 sps:$4 sm:$0xff]   ;;  %v626_v9 = vld [vmem:[%s936_s1 + $0x154] ss:$8 sps:$4 sm:$0xff]   ;;  %v629_v11 = vld [vmem:[%s936_s1 + $0x150] ss:$8 sps:$4 sm:$0xff]  }
   0x5   :  { %465 = vmatprep.subr.bf16.mxu1 %v620_v5  ;;  %v630_v12 = vld [vmem:[%s936_s1 + $0x44] ss:$8 sps:$4 sm:$0xff]   ;;  %v634_v14 = vld [vmem:[%s936_s1 + $0x40] ss:$8 sps:$4 sm:$0xff]   ;;  %v636_v16 = vld [vmem:[%s936_s1 + $0x34] ss:$8 sps:$4 sm:$0xff]  }
   0x6   :  { %v632_v13 = vld [vmem:[%s936_s1 + $0x144] ss:$8 sps:$4 sm:$0xff]   ;;  %v635_v15 = vld [vmem:[%s936_s1 + $0x140] ss:$8 sps:$4 sm:$0xff]   ;;  %v638_v17 = vld [vmem:[%s936_s1 + $0x134] ss:$8 sps:$4 sm:$0xff]  }
   0x7   :  { %425 = vmatpush1.bf16.msra.mxu0 %v622_v6  ;;  %v640_v18 = vld [vmem:[%s936_s1 + $0x30] ss:$8 sps:$4 sm:$0xff]   ;;  %v642_v20 = vld [vmem:[%s936_s1 + $0x24] ss:$8 sps:$4 sm:$0xff]   ;;  %v646_v22 = vld [vmem:[%s936_s1 + $0x20] ss:$8 sps:$4 sm:$0xff]   ;;  %v515_v6 = vlaneseq }
   0x8   :  { %466 = vmatpush1.bf16.msra.mxu1 %v623_v7  ;;  %426 = vmatprep.subr.bf16.mxu0 %v624_v8  ;;  %v641_v19 = vld [vmem:[%s936_s1 + $0x130] ss:$8 sps:$4 sm:$0xff]   ;;  %v644_v21 = vld [vmem:[%s936_s1 + $0x124] ss:$8 sps:$4 sm:$0xff]   ;;  %v647_v23 = vld [vmem:[%s936_s1 + $0x120] ss:$8 sps:$4 sm:$0xff]  }
   0x9   :  { %467 = vmatprep.subr.bf16.mxu1 %v626_v9  ;;  %v648_v24 = vld [vmem:[%s936_s1 + $0x14] ss:$8 sps:$4 sm:$0xff]   ;;  %v652_v26 = vld [vmem:[%s936_s1 + $0x10] ss:$8 sps:$4 sm:$0xff]   ;;  %v654_v28 = vld [vmem:[%s936_s1 + $0x4] ss:$8 sps:$4 sm:$0xff]  }
   0xa   :  { %v650_v25 = vld [vmem:[%s936_s1 + $0x114] ss:$8 sps:$4 sm:$0xff]   ;;  %v653_v27 = vld [vmem:[%s936_s1 + $0x110] ss:$8 sps:$4 sm:$0xff]   ;;  %v656_v29 = vld [vmem:[%s936_s1 + $0x104] ss:$8 sps:$4 sm:$0xff]  }
   0xb   :  { %427 = vmatpush1.bf16.msra.mxu0 %v628_v10  ;;  %v658_v30 = vld [vmem:[%s936_s1] ss:$8 sps:$4 sm:$0xff]   ;;  %v660_v32 = vld [vmem:[%s936_s1 + $0xf4] ss:$8 sps:$4 sm:$0xff]   ;;  %v664_v34 = vld [vmem:[%s936_s1 + $0xf0] ss:$8 sps:$4 sm:$0xff]  }
   0xc   :  { %468 = vmatpush1.bf16.msra.mxu1 %v629_v11  ;;  %428 = vmatprep.subr.bf16.mxu0 %v630_v12  ;;  %v659_v31 = vld [vmem:[%s936_s1 + $0x100] ss:$8 sps:$4 sm:$0xff]   ;;  %v662_v33 = vld [vmem:[%s936_s1 + $0x1f4] ss:$8 sps:$4 sm:$0xff]   ;;  %v665_v35 = vld [vmem:[%s936_s1 + $0x1f0] ss:$8 sps:$4 sm:$0xff]  }
   0xd   :  { %469 = vmatprep.subr.bf16.mxu1 %v632_v13  ;;  %v666_v36 = vld [vmem:[%s936_s1 + $0xe4] ss:$8 sps:$4 sm:$0xff]   ;;  %v670_v38 = vld [vmem:[%s936_s1 + $0xe0] ss:$8 sps:$4 sm:$0xff]   ;;  %v672_v40 = vld [vmem:[%s936_s1 + $0xd4] ss:$8 sps:$4 sm:$0xff]  }
   0xe   :  { %v668_v37 = vld [vmem:[%s936_s1 + $0x1e4] ss:$8 sps:$4 sm:$0xff]   ;;  %v671_v39 = vld [vmem:[%s936_s1 + $0x1e0] ss:$8 sps:$4 sm:$0xff]   ;;  %v674_v41 = vld [vmem:[%s936_s1 + $0x1d4] ss:$8 sps:$4 sm:$0xff]  }
   0xf   :  { %429 = vmatpush1.bf16.msra.mxu0 %v634_v14  ;;  %v676_v42 = vld [vmem:[%s936_s1 + $0xd0] ss:$8 sps:$4 sm:$0xff]   ;;  %v678_v44 = vld [vmem:[%s936_s1 + $0xc4] ss:$8 sps:$4 sm:$0xff]   ;;  %v682_v49 = vld [vmem:[%s936_s1 + $0xc0] ss:$8 sps:$4 sm:$0xff]  }
  0x10   :  { %470 = vmatpush1.bf16.msra.mxu1 %v635_v15  ;;  %430 = vmatprep.subr.bf16.mxu0 %v636_v16  ;;  %v677_v43 = vld [vmem:[%s936_s1 + $0x1d0] ss:$8 sps:$4 sm:$0xff]   ;;  %v680_v45 = vld [vmem:[%s936_s1 + $0x1c4] ss:$8 sps:$4 sm:$0xff]   ;;  %v683_v50 = vld [vmem:[%s936_s1 + $0x1c0] ss:$8 sps:$4 sm:$0xff]  }
  0x11   :  { %471 = vmatprep.subr.bf16.mxu1 %v638_v17  ;;  %v22_v46 = vld [vmem:[%s937_s0] sm:$0xff]  ;;  %v23_v48 = vld [vmem:[%s937_s0 + $0x8] sm:$0xff]  ;;  %v684_v52 = vld [vmem:[%s936_s1 + $0xb4] ss:$8 sps:$4 sm:$0xff]   ;;  %v516_v7 = vshrl.u32 %v515_v6, 7 }
  0x12   :  { %v543_v47 = vcombine.high %v22_v46, %v22_v46  ;;  %v545_v51 = vcombine.high %v23_v48, %v23_v48  ;;  %v686_v53 = vld [vmem:[%s936_s1 + $0x1b4] ss:$8 sps:$4 sm:$0xff]   ;;  %v688_v54 = vld [vmem:[%s936_s1 + $0xb0] ss:$8 sps:$4 sm:$0xff]   ;;  %v690_v56 = vld [vmem:[%s936_s1 + $0xa4] ss:$8 sps:$4 sm:$0xff]   ;;  %v542_v4 = vcombine.low %v22_v46, %v22_v46  ;;  %v544_v5 = vcombine.low %v23_v48, %v23_v48 }
  0x13   :  { %431 = vmatpush1.bf16.msra.mxu0 %v640_v18  ;;  %v689_v55 = vld [vmem:[%s936_s1 + $0x1b0] ss:$8 sps:$4 sm:$0xff]   ;;  %v692_v57 = vld [vmem:[%s936_s1 + $0x1a4] ss:$8 sps:$4 sm:$0xff]   ;;  %v694_v58 = vld [vmem:[%s936_s1 + $0xa0] ss:$8 sps:$4 sm:$0xff]  }
  0x14   :  { %472 = vmatpush1.bf16.msra.mxu1 %v641_v19  ;;  %432 = vmatprep.subr.bf16.mxu0 %v642_v20  ;;  %v695_v59 = vld [vmem:[%s936_s1 + $0x1a0] ss:$8 sps:$4 sm:$0xff]   ;;  %v696_v60 = vld [vmem:[%s936_s1 + $0x94] ss:$8 sps:$4 sm:$0xff]   ;;  %v700_v62 = vld [vmem:[%s936_s1 + $0x90] ss:$8 sps:$4 sm:$0xff]  }
  0x15   :  { %473 = vmatprep.subr.bf16.mxu1 %v644_v21  ;;  %454 = vmatprep.mubr.bf16.mxu0 %v543_v47  ;;  %v698_v61 = vld [vmem:[%s936_s1 + $0x194] ss:$8 sps:$4 sm:$0xff]   ;;  %v701_v63 = vld [vmem:[%s936_s1 + $0x190] ss:$8 sps:$4 sm:$0xff]   ;;  %v702_v0 = vld [vmem:[%s936_s1 + $0x84] ss:$8 sps:$4 sm:$0xff]  }
  0x16   :  { %495 = vmatprep.mubr.bf16.mxu1 %v545_v51  ;;  %v704_v1 = vld [vmem:[%s936_s1 + $0x184] ss:$8 sps:$4 sm:$0xff]   ;;  %v706_v2 = vld [vmem:[%s936_s1 + $0x80] ss:$8 sps:$4 sm:$0xff]   ;;  %v517_v8 = vsub.s32 0, %v516_v7  ;;  %v521_v10 = vsub.s32 1, %v516_v7 }
  0x17   :  { %433 = vmatpush1.bf16.msra.mxu0 %v646_v22  ;;  %v707_v3 = vld [vmem:[%s936_s1 + $0x180] ss:$8 sps:$4 sm:$0xff]  }
  0x18   :  { %474 = vmatpush1.bf16.msra.mxu1 %v647_v23  ;;  %434 = vmatprep.subr.bf16.mxu0 %v648_v24  ;;  %v513_v9 = vld [vmem:[%s938_s2] sm:$0x3] }
  0x19   :  { %475 = vmatprep.subr.bf16.mxu1 %v650_v25  ;;  %v518_v11 = vrot.slane %v513_v9, %v517_v8  ;;  %v522_v15 = vrot.slane %v513_v9, %v521_v10 }
  0x1b   :  { %435 = vmatpush1.bf16.msra.mxu0 %v652_v26 }
  0x1c   :  { %476 = vmatpush1.bf16.msra.mxu1 %v653_v27  ;;  %436 = vmatprep.subr.bf16.mxu0 %v654_v28 }
  0x1d   :  { %477 = vmatprep.subr.bf16.mxu1 %v656_v29 }
  0x1f   :  { %437 = vmatpush1.bf16.msra.mxu0 %v658_v30 }
  0x20   :  { %478 = vmatpush1.bf16.msra.mxu1 %v659_v31  ;;  %438 = vmatprep.subr.bf16.mxu0 %v660_v32 }
  0x21   :  { %479 = vmatprep.subr.bf16.mxu1 %v662_v33 }
  0x23   :  { %439 = vmatpush2.bf16.msra.mxu0 %v664_v34 }
  0x24   :  { %480 = vmatpush2.bf16.msra.mxu1 %v665_v35  ;;  %440 = vmatprep.subr.bf16.mxu0 %v666_v36 }
  0x25   :  { %481 = vmatprep.subr.bf16.mxu1 %v668_v37 }
  0x27   :  { %441 = vmatpush2.bf16.msra.mxu0 %v670_v38 }
  0x28   :  { %482 = vmatpush2.bf16.msra.mxu1 %v671_v39  ;;  %442 = vmatprep.subr.bf16.mxu0 %v672_v40 }
  0x29   :  { %483 = vmatprep.subr.bf16.mxu1 %v674_v41 }
  0x2b   :  { %443 = vmatpush2.bf16.msra.mxu0 %v676_v42 }
  0x2c   :  { %484 = vmatpush2.bf16.msra.mxu1 %v677_v43  ;;  %444 = vmatprep.subr.bf16.mxu0 %v678_v44 }
  0x2d   :  { %485 = vmatprep.subr.bf16.mxu1 %v680_v45 }
  0x2f   :  { %445 = vmatpush2.bf16.msra.mxu0 %v682_v49 }
  0x30   :  { %486 = vmatpush2.bf16.msra.mxu1 %v683_v50  ;;  %446 = vmatprep.subr.bf16.mxu0 %v684_v52 }
  0x31   :  { %487 = vmatprep.subr.bf16.mxu1 %v686_v53 }
  0x33   :  { %447 = vmatpush2.bf16.msra.mxu0 %v688_v54 }
  0x34   :  { %488 = vmatpush2.bf16.msra.mxu1 %v689_v55  ;;  %448 = vmatprep.subr.bf16.mxu0 %v690_v56 }
  0x35   :  { %489 = vmatprep.subr.bf16.mxu1 %v692_v57 }
  0x37   :  { %449 = vmatpush2.bf16.msra.mxu0 %v694_v58 }
  0x38   :  { %490 = vmatpush2.bf16.msra.mxu1 %v695_v59  ;;  %450 = vmatprep.subr.bf16.mxu0 %v696_v60 }
  0x39   :  { %491 = vmatprep.subr.bf16.mxu1 %v698_v61 }
  0x3b   :  { %451 = vmatpush2.bf16.msra.mxu0 %v700_v62 }
  0x3c   :  { %492 = vmatpush2.bf16.msra.mxu1 %v701_v63  ;;  %452 = vmatprep.subr.bf16.mxu0 %v702_v0 }
  0x3d   :  { %493 = vmatprep.subr.bf16.mxu1 %v704_v1 }
  0x3f   :  { %453 = vmatpush2.bf16.msra.mxu0 %v706_v2 }
  0x40   :  { %494 = vmatpush2.bf16.msra.mxu1 %v707_v3 }
  0x42   :  { %455 = vmatmul.mubr.bf16.vlgmr.msra.gmra.mxu0 %v542_v4 }
  0x43   :  { %496 = vmatmul.mubr.bf16.vlgmr.msra.gmra.mxu1 %v544_v5 }
 0x102   :  { %v456_v12 = vpop.f32.mrf.mxu0 }
 0x103   :  { %v497_v13 = vpop.f32.mrf.mxu1 }
 0x104   :  { %v498_v14 = vadd.f32 %v497_v13, %v456_v12  ;;  %v458_v16 = vpop.f32.mrf.mxu0 }
 0x105   :  { %v499_v17 = vpop.f32.mrf.mxu1 }
 0x106   :  { %v525_v18 = vadd.f32 %v518_v11, %v498_v14  ;;  %v500_v19 = vadd.f32 %v499_v17, %v458_v16  ;;  %v460_v20 = vpop.f32.mrf.mxu0 }
 0x107   :  { %v501_v21 = vpop.f32.mrf.mxu1 }
 0x108   :  { %v526_v22 = vadd.f32 %v522_v15, %v500_v19  ;;  %v461_v23 = vpop.f32.mrf.mxu0  ;;  %v527_v25 = vmax.f32 %v525_v18, 0.0 }
 0x109   :  { %v502_v24 = vpop.f32.mrf.mxu1 }
 0x10a   :  { %v528_v26 = vmax.f32 %v526_v22, 0.0 }
 0x10c   :  { %v611_v27 = vpack.c.bf16 %v528_v26, %v527_v25 }
 0x10e   :  { %537 = vst [vmem:[%s939_s3] sm:$0xff] %v611_v27 }

// kernel: _lambda_.68
= control target key start
LH: loop header
LB: loop body
LE: loop exit
PB: predicated region body
PF: predicated region fallthrough
CT: control target
= control target key end

     0   :  { %s851_s12 = smov 0   ;;  %s853_s13 = smov 0   ;;  %s933_s0 = inlined_call_operand.vmem [shape: bf16[8,2304], index: 0, kind: input, shape index: {}]   ;;  %s934_s1 = inlined_call_operand.vmem [shape: bf16[2304,256], index: 1, kind: input, shape index: {}]   ;;  %s935_s2 = inlined_call_operand.vmem [shape: f32[1,256], index: 2, kind: input, shape index: {}]   ;;  %s936_s3 = inlined_call_operand.vmem [shape: bf16[8,256], index: 3, kind: output, shape index: {}]  }
   0x1   :  { %s855_s14 = smov 0  }
   0x2 LB: > { %s25_s15 = sadd.s32 1, %s824_s13  ;;  %p682_p0 = scmp.ge.s32.totalorder %s828_s14, 1  ;;  %s828_s14 = sphi %s855_s14, %s13_s14   ;;  %s824_s13 = sphi %s853_s13, %s938_s13   ;;  %s820_s12 = sphi %s851_s12, %s937_s12  }
   0x3   : > { %p26_p1 = scmp.ge.s32.totalorder %s25_s15, 9  ;;  %p194_p2 = scmp.lt.s32.totalorder %s828_s14, 10 }
   0x5   : > { %s940_s15 = smov (%p26_p1, %s25_s15), 0  ;;  %p195_p3 = pnand %p682_p0, %p194_p2 }
   0x6   : > { %s683_s16 = sshll.u32 (!%p195_p3), %s820_s12, 1  ;;  %s685_s17 = sshll.u32 (!%p195_p3), %s820_s12, 5 }
   0x7   : > { %198 = sbr.rel (%p195_p3) target bundleno = 301 (0x12d), region = 32  ;;  %p243_p4 = scmp.lt.s32.totalorder (!%p195_p3), %s683_s16, 17 }
   0x8   : > { %p252_p5 = scmp.lt.s32.totalorder (!%p195_p3), %s685_s17, 287  ;;  %p688_p6 = scmp.ne.s32.totalorder (!%p195_p3), %s820_s12, 0 }
   0xc   : > { %s942_s16 = smov (!%p243_p4, %s683_s16), 17  ;;  %s944_s17 = smov (!%p252_p5, %s685_s17), 287 }
   0xd   : > { %s684_s18 = sshll.u32 %s942_s16, 2  ;;  %s729_s22 = sshll.u32 %s944_s17, 3 }
   0xe   : > { %s876_s21 = scalar_lea.vmem %s933_s0, %s684_s18  ;;  %s881_s25 = scalar_lea.vmem %s934_s1, %s729_s22 }
   0xf   : > { %280 = sbr.rel (%p688_p6) target bundleno = 22 (0x16), region = 36 }
  0x14   : > { %v830_v0 = vmov 0.0  }
  0x15   : > { %281 = vst [vmem:[#allocation2] sm:$0xff] %v830_v0  ;;  %282 = vst [vmem:[#allocation2 + $0x8] sm:$0xff] %v830_v0 }
  0x16 PF: > { %v756_v1 = vld [vmem:[%s881_s25 + $0x74] ss:$8 sps:$4 sm:$0xff]   ;;  %v758_v2 = vld [vmem:[%s881_s25 + $0x70] ss:$8 sps:$4 sm:$0xff]   ;;  %v759_v3 = vld [vmem:[%s881_s25 + $0x64] ss:$8 sps:$4 sm:$0xff]  }
  0x17   : > { %485 = vmatprep.subr.bf16.mxu0 %v756_v1  ;;  %v761_v4 = vld [vmem:[%s881_s25 + $0x60] ss:$8 sps:$4 sm:$0xff]   ;;  %v762_v5 = vld [vmem:[%s881_s25 + $0x54] ss:$8 sps:$4 sm:$0xff]   ;;  %v764_v6 = vld [vmem:[%s881_s25 + $0x50] ss:$8 sps:$4 sm:$0xff]  }
  0x18   : > { %486 = vmatpush1.bf16.msra.mxu0 %v758_v2  ;;  %v765_v7 = vld [vmem:[%s881_s25 + $0x44] ss:$8 sps:$4 sm:$0xff]   ;;  %v767_v8 = vld [vmem:[%s881_s25 + $0x40] ss:$8 sps:$4 sm:$0xff]   ;;  %v768_v9 = vld [vmem:[%s881_s25 + $0x34] ss:$8 sps:$4 sm:$0xff]  }
  0x19   : > { %487 = vmatprep.subr.bf16.mxu0 %v759_v3  ;;  %v770_v10 = vld [vmem:[%s881_s25 + $0x30] ss:$8 sps:$4 sm:$0xff]   ;;  %v771_v11 = vld [vmem:[%s881_s25 + $0x24] ss:$8 sps:$4 sm:$0xff]   ;;  %v773_v12 = vld [vmem:[%s881_s25 + $0x20] ss:$8 sps:$4 sm:$0xff]  }
  0x1a   : > { %v774_v13 = vld [vmem:[%s881_s25 + $0x14] ss:$8 sps:$4 sm:$0xff]   ;;  %v285_v14 = vld [vmem:[%s876_s21] sm:$0xff]  ;;  %v776_v16 = vld [vmem:[%s881_s25 + $0x10] ss:$8 sps:$4 sm:$0xff]   ;;  %p723_p7 = scmp.ne.s32.totalorder %s820_s12, 8 }
  0x1b   : > { %v690_v15 = vcombine.high %v285_v14, %v285_v14  ;;  %v777_v17 = vld [vmem:[%s881_s25 + $0x4] ss:$8 sps:$4 sm:$0xff]   ;;  %v779_v18 = vld [vmem:[%s881_s25] ss:$8 sps:$4 sm:$0xff]   ;;  %v780_v19 = vld [vmem:[%s881_s25 + $0xf4] ss:$8 sps:$4 sm:$0xff]   ;;  %v689_v35 = vcombine.low %v285_v14, %v285_v14 }
  0x1c   : > { %488 = vmatpush1.bf16.msra.mxu0 %v761_v4  ;;  %v782_v20 = vld [vmem:[%s881_s25 + $0xf0] ss:$8 sps:$4 sm:$0xff]   ;;  %v783_v21 = vld [vmem:[%s881_s25 + $0xe4] ss:$8 sps:$4 sm:$0xff]   ;;  %v785_v22 = vld [vmem:[%s881_s25 + $0xe0] ss:$8 sps:$4 sm:$0xff]  }
  0x1d   : > { %489 = vmatprep.subr.bf16.mxu0 %v762_v5  ;;  %517 = vmatprep.mubr.bf16.mxu0 %v690_v15  ;;  %v786_v23 = vld [vmem:[%s881_s25 + $0xd4] ss:$8 sps:$4 sm:$0xff]   ;;  %v788_v24 = vld [vmem:[%s881_s25 + $0xd0] ss:$8 sps:$4 sm:$0xff]   ;;  %v789_v25 = vld [vmem:[%s881_s25 + $0xc4] ss:$8 sps:$4 sm:$0xff]  }
  0x1e   : > { %v791_v26 = vld [vmem:[%s881_s25 + $0xc0] ss:$8 sps:$4 sm:$0xff]   ;;  %v792_v27 = vld [vmem:[%s881_s25 + $0xb4] ss:$8 sps:$4 sm:$0xff]   ;;  %v794_v28 = vld [vmem:[%s881_s25 + $0xb0] ss:$8 sps:$4 sm:$0xff]  }
  0x1f   : > { %v795_v29 = vld [vmem:[%s881_s25 + $0xa4] ss:$8 sps:$4 sm:$0xff]   ;;  %v797_v30 = vld [vmem:[%s881_s25 + $0xa0] ss:$8 sps:$4 sm:$0xff]   ;;  %v798_v31 = vld [vmem:[%s881_s25 + $0x94] ss:$8 sps:$4 sm:$0xff]  }
  0x20   : > { %490 = vmatpush1.bf16.msra.mxu0 %v764_v6  ;;  %v800_v32 = vld [vmem:[%s881_s25 + $0x90] ss:$8 sps:$4 sm:$0xff]   ;;  %v801_v33 = vld [vmem:[%s881_s25 + $0x84] ss:$8 sps:$4 sm:$0xff]   ;;  %v803_v34 = vld [vmem:[%s881_s25 + $0x80] ss:$8 sps:$4 sm:$0xff]  }
  0x21   : > { %491 = vmatprep.subr.bf16.mxu0 %v765_v7  ;;  %v283_v36 = vld [vmem:[#allocation2] sm:$0xff]  ;;  %v284_v38 = vld [vmem:[#allocation2 + $0x8] sm:$0xff] }
  0x24   : > { %492 = vmatpush1.bf16.msra.mxu0 %v767_v8 }
  0x25   : > { %493 = vmatprep.subr.bf16.mxu0 %v768_v9 }
  0x28   : > { %494 = vmatpush1.bf16.msra.mxu0 %v770_v10 }
  0x29   : > { %495 = vmatprep.subr.bf16.mxu0 %v771_v11 }
  0x2c   : > { %496 = vmatpush1.bf16.msra.mxu0 %v773_v12 }
  0x2d   : > { %497 = vmatprep.subr.bf16.mxu0 %v774_v13 }
  0x30   : > { %498 = vmatpush1.bf16.msra.mxu0 %v776_v16 }
  0x31   : > { %499 = vmatprep.subr.bf16.mxu0 %v777_v17 }
  0x34   : > { %500 = vmatpush1.bf16.msra.mxu0 %v779_v18 }
  0x35   : > { %501 = vmatprep.subr.bf16.mxu0 %v780_v19 }
  0x38   : > { %502 = vmatpush2.bf16.msra.mxu0 %v782_v20 }
  0x39   : > { %503 = vmatprep.subr.bf16.mxu0 %v783_v21 }
  0x3c   : > { %504 = vmatpush2.bf16.msra.mxu0 %v785_v22 }
  0x3d   : > { %505 = vmatprep.subr.bf16.mxu0 %v786_v23 }
  0x40   : > { %506 = vmatpush2.bf16.msra.mxu0 %v788_v24 }
  0x41   : > { %507 = vmatprep.subr.bf16.mxu0 %v789_v25 }
  0x44   : > { %508 = vmatpush2.bf16.msra.mxu0 %v791_v26 }
  0x45   : > { %509 = vmatprep.subr.bf16.mxu0 %v792_v27 }
  0x48   : > { %510 = vmatpush2.bf16.msra.mxu0 %v794_v28 }
  0x49   : > { %511 = vmatprep.subr.bf16.mxu0 %v795_v29 }
  0x4c   : > { %512 = vmatpush2.bf16.msra.mxu0 %v797_v30 }
  0x4d   : > { %513 = vmatprep.subr.bf16.mxu0 %v798_v31 }
  0x50   : > { %514 = vmatpush2.bf16.msra.mxu0 %v800_v32 }
  0x51   : > { %515 = vmatprep.subr.bf16.mxu0 %v801_v33 }
  0x54   : > { %516 = vmatpush2.bf16.msra.mxu0 %v803_v34 }
  0x57   : > { %518 = vmatmul.mubr.bf16.vlgmr.msra.gmra.mxu0 %v689_v35 }
 0x117   : > { %v519_v37 = vpop.f32.mrf.mxu0 }
 0x118   : > { %v526_v39 = vadd.f32 %v519_v37, %v283_v36 }
 0x119   : > { %v521_v40 = vpop.f32.mrf.mxu0  ;;  %533 = sbr.rel (%p723_p7) target bundleno = 301 (0x12d), region = 40 }
 0x11a   : > { %528 = vst [vmem:[#allocation2] sm:$0xff] %v526_v39  ;;  %v527_v41 = vadd.f32 %v521_v40, %v284_v38 }
 0x11b   : > { %v523_v42 = vpop.f32.mrf.mxu0 }
 0x11c   : > { %529 = vst [vmem:[#allocation2 + $0x8] sm:$0xff] %v527_v41 }
 0x11d   : > { %v524_v43 = vpop.f32.mrf.mxu0 }
 0x11e   : > { %v538_v44 = vlaneseq  ;;  %v536_v46 = vld [vmem:[%s935_s2] sm:$0x3] }
 0x120   : > { %v539_v45 = vshrl.u32 %v538_v44, 7 }
 0x121   : > { %v534_v49 = vld [vmem:[#allocation2] sm:$0xff] }
 0x122   : > { %v540_v47 = vsub.s32 0, %v539_v45  ;;  %v544_v48 = vsub.s32 1, %v539_v45 }
 0x123   : > { %v535_v50 = vld [vmem:[#allocation2 + $0x8] sm:$0xff] }
 0x124   : > { %v541_v51 = vrot.slane %v536_v46, %v540_v47  ;;  %v545_v52 = vrot.slane %v536_v46, %v544_v48 }
 0x126   : > { %v548_v53 = vadd.f32 %v541_v51, %v534_v49  ;;  %v549_v54 = vadd.f32 %v545_v52, %v535_v50 }
 0x128   : > { %v550_v55 = vmax.f32 %v548_v53, 0.0  ;;  %v551_v56 = vmax.f32 %v549_v54, 0.0 }
 0x12a   : > { %v730_v57 = vpack.c.bf16 %v551_v56, %v550_v55 }
 0x12c   : > { %560 = vst [vmem:[%s936_s3] sm:$0xff] %v730_v57 }
 0x12d PF: > { %s13_s14 = sadd.s32 1, %s828_s14   ;;  %s937_s12 = smov %s824_s13 }
 0x12e   : > { %p10_p8 = scmp.ge.s32.totalorder %s13_s14, 11   ;;  %s938_s13 = smov %s940_s15 }
 0x130   :  { %12 = sbr.rel (!%p10_p8) target bundleno = 2 (0x2), region = 76 }

// kernel: _lambda_.69
= control target key start
LH: loop header
LB: loop body
LE: loop exit
PB: predicated region body
PF: predicated region fallthrough
CT: control target
= control target key end

     0   :  { %s2127_s12 = smov 0   ;;  %s2129_s13 = smov 0   ;;  %s2619_s0 = inlined_call_operand.vmem [shape: bf16[8,512], index: 0, kind: input, shape index: {}]   ;;  %s2620_s1 = inlined_call_operand.vmem [shape: bf16[512,1024], index: 1, kind: input, shape index: {}]   ;;  %s2621_s2 = inlined_call_operand.vmem [shape: f32[1,1024], index: 2, kind: input, shape index: {}]   ;;  %s2622_s3 = inlined_call_operand.vmem [shape: bf16[8,1024], index: 3, kind: output, shape index: {}]  }
   0x1   :  { %s2131_s14 = smov 0   ;;  %s2133_s15 = smov 0  }
   0x2   :  { %s2135_s16 = smov 0  }
   0x3 LB: > { %s28_s17 = sadd.s32 1, %s2101_s15  ;;  %p76_p1 = scmp.ne.s32.totalorder %s2093_s13, %s2089_s12  ;;  %s2105_s16 = sphi %s2135_s16, %s13_s16   ;;  %s2101_s15 = sphi %s2133_s15, %s2626_s15   ;;  %s2097_s14 = sphi %s2131_s14, %s2625_s14   ;;  %s2093_s13 = sphi %s2129_s13, %s2624_s13   ;;  %s2089_s12 = sphi %s2127_s12, %s2623_s12  }
   0x4   : > { %p30_p0 = scmp.ge.s32.totalorder %s28_s17, 2  ;;  %p77_p2 = scmp.eq.s32.totalorder %s2105_s16, 0 }
   0x5   : > { %s69_s19 = sadd.s32 1, %s2093_s13  ;;  %p1683_p5 = scmp.ge.s32.totalorder %s2105_s16, 2 }
   0x6   : > { %s2628_s17 = smov (%p30_p0, %s28_s17), 0  ;;  %p78_p3 = por %p77_p2, %p76_p1 }
   0x7   : > { %s65_s18 = ssub.s32 %s2101_s15, %s2628_s17  ;;  %169 = sbr.rel (%p1683_p5) target bundleno = 80 (0x50), region = 20 }
   0x8   : > { %p67_p4 = scmp.eq.s32.totalorder %s65_s18, 0 }
   0xa   : > { %s2162_s20 = scalar_select %p67_p4, %s2093_s13, %s69_s19  }
   0xc   : > { %172 = sbr.rel (!%p78_p3) target bundleno = 80 (0x50), region = 24  ;;  %s174_s21 = sand.u32 (%p78_p3), 1, %s2093_s13  }
   0xd   : > { %s1828_s22 = sshll.u32 (%p78_p3), %s2101_s15, 4  ;;  %s1684_s23 = sshll.u32 (%p78_p3), %s174_s21, 10 }
   0xe   : > { %s2170_s26 = scalar_lea.vmem (%p78_p3), %s2620_s1, %s1828_s22  ;;  %s2175_s27 = scalar_lea.vmem (%p78_p3), [#allocation3], %s1684_s23 }
   0xf   : > { %v195_v0 = vld [vmem:[%s2170_s26] sm:$0xff] (%p78_p3)  ;;  %v197_v1 = vld [vmem:[%s2170_s26 + $0x8] sm:$0xff] (%p78_p3) }
  0x10   : > { %v199_v2 = vld [vmem:[%s2170_s26 + $0x20] sm:$0xff] (%p78_p3)  ;;  %196 = vst [vmem:[%s2175_s27] sm:$0xff] (%p78_p3), %v195_v0  ;;  %198 = vst [vmem:[%s2175_s27 + $0x8] sm:$0xff] (%p78_p3), %v197_v1  ;;  %v201_v3 = vld [vmem:[%s2170_s26 + $0x28] sm:$0xff] (%p78_p3) }
  0x11   : > { %200 = vst [vmem:[%s2175_s27 + $0x10] sm:$0xff] %v199_v2  ;;  %v203_v4 = vld [vmem:[%s2170_s26 + $0x40] sm:$0xff]  ;;  %v205_v5 = vld [vmem:[%s2170_s26 + $0x48] sm:$0xff]  ;;  %202 = vst [vmem:[%s2175_s27 + $0x18] sm:$0xff] %v201_v3 }
  0x12   : > { %204 = vst [vmem:[%s2175_s27 + $0x20] sm:$0xff] %v203_v4  ;;  %206 = vst [vmem:[%s2175_s27 + $0x28] sm:$0xff] %v205_v5  ;;  %v207_v6 = vld [vmem:[%s2170_s26 + $0x60] sm:$0xff]  ;;  %v209_v7 = vld [vmem:[%s2170_s26 + $0x68] sm:$0xff] }
  0x13   : > { %v211_v8 = vld [vmem:[%s2170_s26 + $0x80] sm:$0xff]  ;;  %208 = vst [vmem:[%s2175_s27 + $0x30] sm:$0xff] %v207_v6  ;;  %210 = vst [vmem:[%s2175_s27 + $0x38] sm:$0xff] %v209_v7  ;;  %v213_v9 = vld [vmem:[%s2170_s26 + $0x88] sm:$0xff] }
  0x14   : > { %212 = vst [vmem:[%s2175_s27 + $0x40] sm:$0xff] %v211_v8  ;;  %v215_v10 = vld [vmem:[%s2170_s26 + $0xa0] sm:$0xff]  ;;  %v217_v11 = vld [vmem:[%s2170_s26 + $0xa8] sm:$0xff]  ;;  %214 = vst [vmem:[%s2175_s27 + $0x48] sm:$0xff] %v213_v9 }
  0x15   : > { %216 = vst [vmem:[%s2175_s27 + $0x50] sm:$0xff] %v215_v10  ;;  %218 = vst [vmem:[%s2175_s27 + $0x58] sm:$0xff] %v217_v11  ;;  %v219_v12 = vld [vmem:[%s2170_s26 + $0xc0] sm:$0xff]  ;;  %v221_v13 = vld [vmem:[%s2170_s26 + $0xc8] sm:$0xff] }
  0x16   : > { %v223_v14 = vld [vmem:[%s2170_s26 + $0xe0] sm:$0xff]  ;;  %220 = vst [vmem:[%s2175_s27 + $0x60] sm:$0xff] %v219_v12  ;;  %222 = vst [vmem:[%s2175_s27 + $0x68] sm:$0xff] %v221_v13  ;;  %v225_v15 = vld [vmem:[%s2170_s26 + $0xe8] sm:$0xff] }
  0x17   : > { %224 = vst [vmem:[%s2175_s27 + $0x70] sm:$0xff] %v223_v14  ;;  %v227_v16 = vld [vmem:[%s2170_s26 + $0x100] sm:$0xff]  ;;  %v229_v17 = vld [vmem:[%s2170_s26 + $0x108] sm:$0xff]  ;;  %226 = vst [vmem:[%s2175_s27 + $0x78] sm:$0xff] %v225_v15 }
  0x18   : > { %228 = vst [vmem:[%s2175_s27 + $0x80] sm:$0xff] %v227_v16  ;;  %230 = vst [vmem:[%s2175_s27 + $0x88] sm:$0xff] %v229_v17  ;;  %v231_v18 = vld [vmem:[%s2170_s26 + $0x120] sm:$0xff]  ;;  %v233_v19 = vld [vmem:[%s2170_s26 + $0x128] sm:$0xff] }
  0x19   : > { %v235_v20 = vld [vmem:[%s2170_s26 + $0x140] sm:$0xff]  ;;  %232 = vst [vmem:[%s2175_s27 + $0x90] sm:$0xff] %v231_v18  ;;  %234 = vst [vmem:[%s2175_s27 + $0x98] sm:$0xff] %v233_v19  ;;  %v237_v21 = vld [vmem:[%s2170_s26 + $0x148] sm:$0xff] }
  0x1a   : > { %236 = vst [vmem:[%s2175_s27 + $0xa0] sm:$0xff] %v235_v20  ;;  %v239_v22 = vld [vmem:[%s2170_s26 + $0x160] sm:$0xff]  ;;  %v241_v23 = vld [vmem:[%s2170_s26 + $0x168] sm:$0xff]  ;;  %238 = vst [vmem:[%s2175_s27 + $0xa8] sm:$0xff] %v237_v21 }
  0x1b   : > { %240 = vst [vmem:[%s2175_s27 + $0xb0] sm:$0xff] %v239_v22  ;;  %242 = vst [vmem:[%s2175_s27 + $0xb8] sm:$0xff] %v241_v23  ;;  %v243_v24 = vld [vmem:[%s2170_s26 + $0x180] sm:$0xff]  ;;  %v245_v25 = vld [vmem:[%s2170_s26 + $0x188] sm:$0xff] }
  0x1c   : > { %v247_v26 = vld [vmem:[%s2170_s26 + $0x1a0] sm:$0xff]  ;;  %244 = vst [vmem:[%s2175_s27 + $0xc0] sm:$0xff] %v243_v24  ;;  %246 = vst [vmem:[%s2175_s27 + $0xc8] sm:$0xff] %v245_v25  ;;  %v249_v27 = vld [vmem:[%s2170_s26 + $0x1a8] sm:$0xff] }
  0x1d   : > { %248 = vst [vmem:[%s2175_s27 + $0xd0] sm:$0xff] %v247_v26  ;;  %v251_v28 = vld [vmem:[%s2170_s26 + $0x1c0] sm:$0xff]  ;;  %v253_v29 = vld [vmem:[%s2170_s26 + $0x1c8] sm:$0xff]  ;;  %250 = vst [vmem:[%s2175_s27 + $0xd8] sm:$0xff] %v249_v27 }
  0x1e   : > { %252 = vst [vmem:[%s2175_s27 + $0xe0] sm:$0xff] %v251_v28  ;;  %254 = vst [vmem:[%s2175_s27 + $0xe8] sm:$0xff] %v253_v29  ;;  %v255_v30 = vld [vmem:[%s2170_s26 + $0x1e0] sm:$0xff]  ;;  %v257_v31 = vld [vmem:[%s2170_s26 + $0x1e8] sm:$0xff] }
  0x1f   : > { %v259_v32 = vld [vmem:[%s2170_s26 + $0x200] sm:$0xff]  ;;  %256 = vst [vmem:[%s2175_s27 + $0xf0] sm:$0xff] %v255_v30  ;;  %258 = vst [vmem:[%s2175_s27 + $0xf8] sm:$0xff] %v257_v31  ;;  %v261_v33 = vld [vmem:[%s2170_s26 + $0x208] sm:$0xff] }
  0x20   : > { %260 = vst [vmem:[%s2175_s27 + $0x100] sm:$0xff] %v259_v32  ;;  %v263_v34 = vld [vmem:[%s2170_s26 + $0x220] sm:$0xff]  ;;  %v265_v35 = vld [vmem:[%s2170_s26 + $0x228] sm:$0xff]  ;;  %262 = vst [vmem:[%s2175_s27 + $0x108] sm:$0xff] %v261_v33 }
  0x21   : > { %264 = vst [vmem:[%s2175_s27 + $0x110] sm:$0xff] %v263_v34  ;;  %266 = vst [vmem:[%s2175_s27 + $0x118] sm:$0xff] %v265_v35  ;;  %v267_v36 = vld [vmem:[%s2170_s26 + $0x240] sm:$0xff]  ;;  %v269_v37 = vld [vmem:[%s2170_s26 + $0x248] sm:$0xff] }
  0x22   : > { %v271_v38 = vld [vmem:[%s2170_s26 + $0x260] sm:$0xff]  ;;  %268 = vst [vmem:[%s2175_s27 + $0x120] sm:$0xff] %v267_v36  ;;  %270 = vst [vmem:[%s2175_s27 + $0x128] sm:$0xff] %v269_v37  ;;  %v273_v39 = vld [vmem:[%s2170_s26 + $0x268] sm:$0xff] }
  0x23   : > { %272 = vst [vmem:[%s2175_s27 + $0x130] sm:$0xff] %v271_v38  ;;  %v275_v40 = vld [vmem:[%s2170_s26 + $0x280] sm:$0xff]  ;;  %v277_v41 = vld [vmem:[%s2170_s26 + $0x288] sm:$0xff]  ;;  %274 = vst [vmem:[%s2175_s27 + $0x138] sm:$0xff] %v273_v39 }
  0x24   : > { %276 = vst [vmem:[%s2175_s27 + $0x140] sm:$0xff] %v275_v40  ;;  %278 = vst [vmem:[%s2175_s27 + $0x148] sm:$0xff] %v277_v41  ;;  %v279_v42 = vld [vmem:[%s2170_s26 + $0x2a0] sm:$0xff]  ;;  %v281_v43 = vld [vmem:[%s2170_s26 + $0x2a8] sm:$0xff] }
  0x25   : > { %v283_v44 = vld [vmem:[%s2170_s26 + $0x2c0] sm:$0xff]  ;;  %280 = vst [vmem:[%s2175_s27 + $0x150] sm:$0xff] %v279_v42  ;;  %282 = vst [vmem:[%s2175_s27 + $0x158] sm:$0xff] %v281_v43  ;;  %v285_v45 = vld [vmem:[%s2170_s26 + $0x2c8] sm:$0xff] }
  0x26   : > { %284 = vst [vmem:[%s2175_s27 + $0x160] sm:$0xff] %v283_v44  ;;  %v287_v46 = vld [vmem:[%s2170_s26 + $0x2e0] sm:$0xff]  ;;  %v289_v47 = vld [vmem:[%s2170_s26 + $0x2e8] sm:$0xff]  ;;  %286 = vst [vmem:[%s2175_s27 + $0x168] sm:$0xff] %v285_v45 }
  0x27   : > { %288 = vst [vmem:[%s2175_s27 + $0x170] sm:$0xff] %v287_v46  ;;  %290 = vst [vmem:[%s2175_s27 + $0x178] sm:$0xff] %v289_v47  ;;  %v291_v48 = vld [vmem:[%s2170_s26 + $0x300] sm:$0xff]  ;;  %v293_v49 = vld [vmem:[%s2170_s26 + $0x308] sm:$0xff] }
  0x28   : > { %v295_v50 = vld [vmem:[%s2170_s26 + $0x320] sm:$0xff]  ;;  %292 = vst [vmem:[%s2175_s27 + $0x180] sm:$0xff] %v291_v48  ;;  %294 = vst [vmem:[%s2175_s27 + $0x188] sm:$0xff] %v293_v49  ;;  %v297_v51 = vld [vmem:[%s2170_s26 + $0x328] sm:$0xff] }
  0x29   : > { %296 = vst [vmem:[%s2175_s27 + $0x190] sm:$0xff] %v295_v50  ;;  %v299_v52 = vld [vmem:[%s2170_s26 + $0x340] sm:$0xff]  ;;  %v301_v53 = vld [vmem:[%s2170_s26 + $0x348] sm:$0xff]  ;;  %298 = vst [vmem:[%s2175_s27 + $0x198] sm:$0xff] %v297_v51 }
  0x2a   : > { %300 = vst [vmem:[%s2175_s27 + $0x1a0] sm:$0xff] %v299_v52  ;;  %302 = vst [vmem:[%s2175_s27 + $0x1a8] sm:$0xff] %v301_v53  ;;  %v303_v54 = vld [vmem:[%s2170_s26 + $0x360] sm:$0xff]  ;;  %v305_v55 = vld [vmem:[%s2170_s26 + $0x368] sm:$0xff] }
  0x2b   : > { %v307_v56 = vld [vmem:[%s2170_s26 + $0x380] sm:$0xff]  ;;  %304 = vst [vmem:[%s2175_s27 + $0x1b0] sm:$0xff] %v303_v54  ;;  %306 = vst [vmem:[%s2175_s27 + $0x1b8] sm:$0xff] %v305_v55  ;;  %v309_v57 = vld [vmem:[%s2170_s26 + $0x388] sm:$0xff] }
  0x2c   : > { %308 = vst [vmem:[%s2175_s27 + $0x1c0] sm:$0xff] %v307_v56  ;;  %v311_v58 = vld [vmem:[%s2170_s26 + $0x3a0] sm:$0xff]  ;;  %v313_v59 = vld [vmem:[%s2170_s26 + $0x3a8] sm:$0xff]  ;;  %310 = vst [vmem:[%s2175_s27 + $0x1c8] sm:$0xff] %v309_v57 }
  0x2d   : > { %312 = vst [vmem:[%s2175_s27 + $0x1d0] sm:$0xff] %v311_v58  ;;  %314 = vst [vmem:[%s2175_s27 + $0x1d8] sm:$0xff] %v313_v59  ;;  %v315_v60 = vld [vmem:[%s2170_s26 + $0x3c0] sm:$0xff]  ;;  %v317_v61 = vld [vmem:[%s2170_s26 + $0x3c8] sm:$0xff] }
  0x2e   : > { %v319_v62 = vld [vmem:[%s2170_s26 + $0x3e0] sm:$0xff]  ;;  %316 = vst [vmem:[%s2175_s27 + $0x1e0] sm:$0xff] %v315_v60  ;;  %318 = vst [vmem:[%s2175_s27 + $0x1e8] sm:$0xff] %v317_v61  ;;  %v321_v63 = vld [vmem:[%s2170_s26 + $0x3e8] sm:$0xff] }
  0x2f   : > { %320 = vst [vmem:[%s2175_s27 + $0x1f0] sm:$0xff] %v319_v62  ;;  %v323_v0 = vld [vmem:[%s2170_s26 + $0x400] sm:$0xff]  ;;  %v325_v1 = vld [vmem:[%s2170_s26 + $0x408] sm:$0xff]  ;;  %322 = vst [vmem:[%s2175_s27 + $0x1f8] sm:$0xff] %v321_v63 }
  0x30   : > { %324 = vst [vmem:[%s2175_s27 + $0x200] sm:$0xff] %v323_v0  ;;  %326 = vst [vmem:[%s2175_s27 + $0x208] sm:$0xff] %v325_v1  ;;  %v327_v2 = vld [vmem:[%s2170_s26 + $0x420] sm:$0xff]  ;;  %v329_v3 = vld [vmem:[%s2170_s26 + $0x428] sm:$0xff] }
  0x31   : > { %v331_v4 = vld [vmem:[%s2170_s26 + $0x440] sm:$0xff]  ;;  %328 = vst [vmem:[%s2175_s27 + $0x210] sm:$0xff] %v327_v2  ;;  %330 = vst [vmem:[%s2175_s27 + $0x218] sm:$0xff] %v329_v3  ;;  %v333_v5 = vld [vmem:[%s2170_s26 + $0x448] sm:$0xff] }
  0x32   : > { %332 = vst [vmem:[%s2175_s27 + $0x220] sm:$0xff] %v331_v4  ;;  %v335_v6 = vld [vmem:[%s2170_s26 + $0x460] sm:$0xff]  ;;  %v337_v7 = vld [vmem:[%s2170_s26 + $0x468] sm:$0xff]  ;;  %334 = vst [vmem:[%s2175_s27 + $0x228] sm:$0xff] %v333_v5 }
  0x33   : > { %336 = vst [vmem:[%s2175_s27 + $0x230] sm:$0xff] %v335_v6  ;;  %338 = vst [vmem:[%s2175_s27 + $0x238] sm:$0xff] %v337_v7  ;;  %v339_v8 = vld [vmem:[%s2170_s26 + $0x480] sm:$0xff]  ;;  %v341_v9 = vld [vmem:[%s2170_s26 + $0x488] sm:$0xff] }
  0x34   : > { %v343_v10 = vld [vmem:[%s2170_s26 + $0x4a0] sm:$0xff]  ;;  %340 = vst [vmem:[%s2175_s27 + $0x240] sm:$0xff] %v339_v8  ;;  %342 = vst [vmem:[%s2175_s27 + $0x248] sm:$0xff] %v341_v9  ;;  %v345_v11 = vld [vmem:[%s2170_s26 + $0x4a8] sm:$0xff] }
  0x35   : > { %344 = vst [vmem:[%s2175_s27 + $0x250] sm:$0xff] %v343_v10  ;;  %v347_v12 = vld [vmem:[%s2170_s26 + $0x4c0] sm:$0xff]  ;;  %v349_v13 = vld [vmem:[%s2170_s26 + $0x4c8] sm:$0xff]  ;;  %346 = vst [vmem:[%s2175_s27 + $0x258] sm:$0xff] %v345_v11 }
  0x36   : > { %348 = vst [vmem:[%s2175_s27 + $0x260] sm:$0xff] %v347_v12  ;;  %350 = vst [vmem:[%s2175_s27 + $0x268] sm:$0xff] %v349_v13  ;;  %v351_v14 = vld [vmem:[%s2170_s26 + $0x4e0] sm:$0xff]  ;;  %v353_v15 = vld [vmem:[%s2170_s26 + $0x4e8] sm:$0xff] }
  0x37   : > { %v355_v16 = vld [vmem:[%s2170_s26 + $0x500] sm:$0xff]  ;;  %352 = vst [vmem:[%s2175_s27 + $0x270] sm:$0xff] %v351_v14  ;;  %354 = vst [vmem:[%s2175_s27 + $0x278] sm:$0xff] %v353_v15  ;;  %v357_v17 = vld [vmem:[%s2170_s26 + $0x508] sm:$0xff] }
  0x38   : > { %356 = vst [vmem:[%s2175_s27 + $0x280] sm:$0xff] %v355_v16  ;;  %v359_v18 = vld [vmem:[%s2170_s26 + $0x520] sm:$0xff]  ;;  %v361_v19 = vld [vmem:[%s2170_s26 + $0x528] sm:$0xff]  ;;  %358 = vst [vmem:[%s2175_s27 + $0x288] sm:$0xff] %v357_v17 }
  0x39   : > { %360 = vst [vmem:[%s2175_s27 + $0x290] sm:$0xff] %v359_v18  ;;  %362 = vst [vmem:[%s2175_s27 + $0x298] sm:$0xff] %v361_v19  ;;  %v363_v20 = vld [vmem:[%s2170_s26 + $0x540] sm:$0xff]  ;;  %v365_v21 = vld [vmem:[%s2170_s26 + $0x548] sm:$0xff] }
  0x3a   : > { %v367_v22 = vld [vmem:[%s2170_s26 + $0x560] sm:$0xff]  ;;  %364 = vst [vmem:[%s2175_s27 + $0x2a0] sm:$0xff] %v363_v20  ;;  %366 = vst [vmem:[%s2175_s27 + $0x2a8] sm:$0xff] %v365_v21  ;;  %v369_v23 = vld [vmem:[%s2170_s26 + $0x568] sm:$0xff] }
  0x3b   : > { %368 = vst [vmem:[%s2175_s27 + $0x2b0] sm:$0xff] %v367_v22  ;;  %v371_v24 = vld [vmem:[%s2170_s26 + $0x580] sm:$0xff]  ;;  %v373_v25 = vld [vmem:[%s2170_s26 + $0x588] sm:$0xff]  ;;  %370 = vst [vmem:[%s2175_s27 + $0x2b8] sm:$0xff] %v369_v23 }
  0x3c   : > { %372 = vst [vmem:[%s2175_s27 + $0x2c0] sm:$0xff] %v371_v24  ;;  %374 = vst [vmem:[%s2175_s27 + $0x2c8] sm:$0xff] %v373_v25  ;;  %v375_v26 = vld [vmem:[%s2170_s26 + $0x5a0] sm:$0xff]  ;;  %v377_v27 = vld [vmem:[%s2170_s26 + $0x5a8] sm:$0xff] }
  0x3d   : > { %v379_v28 = vld [vmem:[%s2170_s26 + $0x5c0] sm:$0xff]  ;;  %376 = vst [vmem:[%s2175_s27 + $0x2d0] sm:$0xff] %v375_v26  ;;  %378 = vst [vmem:[%s2175_s27 + $0x2d8] sm:$0xff] %v377_v27  ;;  %v381_v29 = vld [vmem:[%s2170_s26 + $0x5c8] sm:$0xff] }
  0x3e   : > { %380 = vst [vmem:[%s2175_s27 + $0x2e0] sm:$0xff] %v379_v28  ;;  %v383_v30 = vld [vmem:[%s2170_s26 + $0x5e0] sm:$0xff]  ;;  %v385_v31 = vld [vmem:[%s2170_s26 + $0x5e8] sm:$0xff]  ;;  %382 = vst [vmem:[%s2175_s27 + $0x2e8] sm:$0xff] %v381_v29 }
  0x3f   : > { %384 = vst [vmem:[%s2175_s27 + $0x2f0] sm:$0xff] %v383_v30  ;;  %386 = vst [vmem:[%s2175_s27 + $0x2f8] sm:$0xff] %v385_v31  ;;  %v387_v32 = vld [vmem:[%s2170_s26 + $0x600] sm:$0xff]  ;;  %v389_v33 = vld [vmem:[%s2170_s26 + $0x608] sm:$0xff] }
  0x40   : > { %v391_v34 = vld [vmem:[%s2170_s26 + $0x620] sm:$0xff]  ;;  %388 = vst [vmem:[%s2175_s27 + $0x300] sm:$0xff] %v387_v32  ;;  %390 = vst [vmem:[%s2175_s27 + $0x308] sm:$0xff] %v389_v33  ;;  %v393_v35 = vld [vmem:[%s2170_s26 + $0x628] sm:$0xff] }
  0x41   : > { %392 = vst [vmem:[%s2175_s27 + $0x310] sm:$0xff] %v391_v34  ;;  %v395_v36 = vld [vmem:[%s2170_s26 + $0x640] sm:$0xff]  ;;  %v397_v37 = vld [vmem:[%s2170_s26 + $0x648] sm:$0xff]  ;;  %394 = vst [vmem:[%s2175_s27 + $0x318] sm:$0xff] %v393_v35 }
  0x42   : > { %396 = vst [vmem:[%s2175_s27 + $0x320] sm:$0xff] %v395_v36  ;;  %398 = vst [vmem:[%s2175_s27 + $0x328] sm:$0xff] %v397_v37  ;;  %v399_v38 = vld [vmem:[%s2170_s26 + $0x660] sm:$0xff]  ;;  %v401_v39 = vld [vmem:[%s2170_s26 + $0x668] sm:$0xff] }
  0x43   : > { %v403_v40 = vld [vmem:[%s2170_s26 + $0x680] sm:$0xff]  ;;  %400 = vst [vmem:[%s2175_s27 + $0x330] sm:$0xff] %v399_v38  ;;  %402 = vst [vmem:[%s2175_s27 + $0x338] sm:$0xff] %v401_v39  ;;  %v405_v41 = vld [vmem:[%s2170_s26 + $0x688] sm:$0xff] }
  0x44   : > { %404 = vst [vmem:[%s2175_s27 + $0x340] sm:$0xff] %v403_v40  ;;  %v407_v42 = vld [vmem:[%s2170_s26 + $0x6a0] sm:$0xff]  ;;  %v409_v43 = vld [vmem:[%s2170_s26 + $0x6a8] sm:$0xff]  ;;  %406 = vst [vmem:[%s2175_s27 + $0x348] sm:$0xff] %v405_v41 }
  0x45   : > { %408 = vst [vmem:[%s2175_s27 + $0x350] sm:$0xff] %v407_v42  ;;  %410 = vst [vmem:[%s2175_s27 + $0x358] sm:$0xff] %v409_v43  ;;  %v411_v44 = vld [vmem:[%s2170_s26 + $0x6c0] sm:$0xff]  ;;  %v413_v45 = vld [vmem:[%s2170_s26 + $0x6c8] sm:$0xff] }
  0x46   : > { %v415_v46 = vld [vmem:[%s2170_s26 + $0x6e0] sm:$0xff]  ;;  %412 = vst [vmem:[%s2175_s27 + $0x360] sm:$0xff] %v411_v44  ;;  %414 = vst [vmem:[%s2175_s27 + $0x368] sm:$0xff] %v413_v45  ;;  %v417_v47 = vld [vmem:[%s2170_s26 + $0x6e8] sm:$0xff] }
  0x47   : > { %416 = vst [vmem:[%s2175_s27 + $0x370] sm:$0xff] %v415_v46  ;;  %v419_v48 = vld [vmem:[%s2170_s26 + $0x700] sm:$0xff]  ;;  %v421_v49 = vld [vmem:[%s2170_s26 + $0x708] sm:$0xff]  ;;  %418 = vst [vmem:[%s2175_s27 + $0x378] sm:$0xff] %v417_v47 }
  0x48   : > { %420 = vst [vmem:[%s2175_s27 + $0x380] sm:$0xff] %v419_v48  ;;  %422 = vst [vmem:[%s2175_s27 + $0x388] sm:$0xff] %v421_v49  ;;  %v423_v50 = vld [vmem:[%s2170_s26 + $0x720] sm:$0xff]  ;;  %v425_v51 = vld [vmem:[%s2170_s26 + $0x728] sm:$0xff] }
  0x49   : > { %v427_v52 = vld [vmem:[%s2170_s26 + $0x740] sm:$0xff]  ;;  %424 = vst [vmem:[%s2175_s27 + $0x390] sm:$0xff] %v423_v50  ;;  %426 = vst [vmem:[%s2175_s27 + $0x398] sm:$0xff] %v425_v51  ;;  %v429_v53 = vld [vmem:[%s2170_s26 + $0x748] sm:$0xff] }
  0x4a   : > { %428 = vst [vmem:[%s2175_s27 + $0x3a0] sm:$0xff] %v427_v52  ;;  %v431_v54 = vld [vmem:[%s2170_s26 + $0x760] sm:$0xff]  ;;  %v433_v55 = vld [vmem:[%s2170_s26 + $0x768] sm:$0xff]  ;;  %430 = vst [vmem:[%s2175_s27 + $0x3a8] sm:$0xff] %v429_v53 }
  0x4b   : > { %432 = vst [vmem:[%s2175_s27 + $0x3b0] sm:$0xff] %v431_v54  ;;  %434 = vst [vmem:[%s2175_s27 + $0x3b8] sm:$0xff] %v433_v55  ;;  %v435_v56 = vld [vmem:[%s2170_s26 + $0x780] sm:$0xff]  ;;  %v437_v57 = vld [vmem:[%s2170_s26 + $0x788] sm:$0xff] }
  0x4c   : > { %v439_v58 = vld [vmem:[%s2170_s26 + $0x7a0] sm:$0xff]  ;;  %436 = vst [vmem:[%s2175_s27 + $0x3c0] sm:$0xff] %v435_v56  ;;  %438 = vst [vmem:[%s2175_s27 + $0x3c8] sm:$0xff] %v437_v57  ;;  %v441_v59 = vld [vmem:[%s2170_s26 + $0x7a8] sm:$0xff] }
  0x4d   : > { %440 = vst [vmem:[%s2175_s27 + $0x3d0] sm:$0xff] %v439_v58  ;;  %v443_v60 = vld [vmem:[%s2170_s26 + $0x7c0] sm:$0xff]  ;;  %v445_v61 = vld [vmem:[%s2170_s26 + $0x7c8] sm:$0xff]  ;;  %442 = vst [vmem:[%s2175_s27 + $0x3d8] sm:$0xff] %v441_v59 }
  0x4e   : > { %444 = vst [vmem:[%s2175_s27 + $0x3e0] sm:$0xff] %v443_v60  ;;  %446 = vst [vmem:[%s2175_s27 + $0x3e8] sm:$0xff] %v445_v61  ;;  %v447_v62 = vld [vmem:[%s2170_s26 + $0x7e0] sm:$0xff]  ;;  %v449_v63 = vld [vmem:[%s2170_s26 + $0x7e8] sm:$0xff] }
  0x4f   : > { %448 = vst [vmem:[%s2175_s27 + $0x3f0] sm:$0xff] %v447_v62  ;;  %450 = vst [vmem:[%s2175_s27 + $0x3f8] sm:$0xff] %v449_v63 }
  0x50 PF: > { %p1687_p6 = scmp.ge.s32.totalorder %s2105_s16, 1  ;;  %p463_p7 = scmp.lt.s32.totalorder %s2105_s16, 3 }
  0x52   : > { %p464_p8 = pnand %p1687_p6, %p463_p7 }
  0x53   : > { %s470_s28 = sand.u32 (!%p464_p8), 1, %s2089_s12   ;;  %s1689_s8 = sshll.u32 (!%p464_p8), %s2097_s14, 2 }
  0x54   : > { %467 = sbr.rel (%p464_p8) target bundleno = 423 (0x1a7), region = 51  ;;  %s1688_s6 = sshll.u32 (!%p464_p8), %s470_s28, 10 }
  0x55   : > { %s2451_s7 = scalar_lea.vmem (!%p464_p8), [#allocation3], %s1688_s6  ;;  %p523_p9 = scmp.lt.s32.totalorder (!%p464_p8), %s1689_s8, 7 }
  0x59   : > { %v2436_v0 = vld [vmem:[%s2619_s0] sm:$0xff]  ;;  %v2441_v1 = vld [vmem:[%s2619_s0 + $0x8] sm:$0xff]  ;;  %s2630_s8 = smov (!%p523_p9, %s1689_s8), 7 }
  0x5a   : > { %v2445_v2 = vcombine.high %v2436_v0, %v2436_v0  ;;  %v2449_v3 = vcombine.high %v2441_v1, %v2441_v1  ;;  %v1871_v4 = vld [vmem:[%s2451_s7 + $0xe4] ss:$16 sps:$4 sm:$0xff]   ;;  %v1875_v6 = vld [vmem:[%s2451_s7 + $0xe0] ss:$16 sps:$4 sm:$0xff]   ;;  %s525_s11 = scalar_lea.vmem %s2621_s2, %s2630_s8  ;;  %s1691_s12 = sshll.u32 %s2630_s8, 2 }
  0x5b   : > { %v1873_v5 = vld [vmem:[%s2451_s7 + $0x2e4] ss:$16 sps:$4 sm:$0xff]   ;;  %1333 = vmatprep.subr.bf16.mxu0 %v1871_v4  ;;  %v1876_v7 = vld [vmem:[%s2451_s7 + $0x2e0] ss:$16 sps:$4 sm:$0xff]   ;;  %s535_s19 = scalar_lea.vmem %s2622_s3, %s1691_s12 }
  0x5c   : > { %1365 = vmatprep.mubr.bf16.mxu0 %v2445_v2  ;;  %1406 = vmatprep.mubr.bf16.mxu1 %v2449_v3  ;;  %v1877_v8 = vld [vmem:[%s2451_s7 + $0xc4] ss:$16 sps:$4 sm:$0xff]   ;;  %v1881_v10 = vld [vmem:[%s2451_s7 + $0xc0] ss:$16 sps:$4 sm:$0xff]  }
  0x5d   : > { %1374 = vmatprep.subr.bf16.mxu1 %v1873_v5  ;;  %1334 = vmatpush1.bf16.msra.mxu0 %v1875_v6  ;;  %v1879_v9 = vld [vmem:[%s2451_s7 + $0x2c4] ss:$16 sps:$4 sm:$0xff]   ;;  %v1882_v11 = vld [vmem:[%s2451_s7 + $0x2c0] ss:$16 sps:$4 sm:$0xff]  }
  0x5e   : > { %1375 = vmatpush1.bf16.msra.mxu1 %v1876_v7  ;;  %1335 = vmatprep.subr.bf16.mxu0 %v1877_v8  ;;  %v1883_v12 = vld [vmem:[%s2451_s7 + $0xa4] ss:$16 sps:$4 sm:$0xff]   ;;  %v1887_v14 = vld [vmem:[%s2451_s7 + $0xa0] ss:$16 sps:$4 sm:$0xff]   ;;  %v1973_v8 = vld [vmem:[%s2451_s7 + $0xec] ss:$16 sps:$4 sm:$0xff]  }
  0x5f   : > { %1376 = vmatprep.subr.bf16.mxu1 %v1879_v9  ;;  %v1885_v13 = vld [vmem:[%s2451_s7 + $0x2a4] ss:$16 sps:$4 sm:$0xff]   ;;  %v1888_v15 = vld [vmem:[%s2451_s7 + $0x2a0] ss:$16 sps:$4 sm:$0xff]   ;;  %v1976_v9 = vld [vmem:[%s2451_s7 + $0x2ec] ss:$16 sps:$4 sm:$0xff]  }
  0x60   : > { %v1889_v16 = vld [vmem:[%s2451_s7 + $0x84] ss:$16 sps:$4 sm:$0xff]   ;;  %v1893_v18 = vld [vmem:[%s2451_s7 + $0x80] ss:$16 sps:$4 sm:$0xff]  }
  0x61   : > { %1336 = vmatpush1.bf16.msra.mxu0 %v1881_v10  ;;  %v1891_v17 = vld [vmem:[%s2451_s7 + $0x284] ss:$16 sps:$4 sm:$0xff]   ;;  %v1894_v19 = vld [vmem:[%s2451_s7 + $0x280] ss:$16 sps:$4 sm:$0xff]   ;;  %v2523_v10 = vcombine.low %v2436_v0, %v2436_v0  ;;  %v1977_v0 = vld [vmem:[%s2451_s7 + $0xc8] ss:$16 sps:$4 sm:$0xff]  }
  0x62   : > { %1377 = vmatpush1.bf16.msra.mxu1 %v1882_v11  ;;  %1337 = vmatprep.subr.bf16.mxu0 %v1883_v12  ;;  %v1895_v20 = vld [vmem:[%s2451_s7 + $0x64] ss:$16 sps:$4 sm:$0xff]   ;;  %v1899_v22 = vld [vmem:[%s2451_s7 + $0x60] ss:$16 sps:$4 sm:$0xff]   ;;  %v2527_v11 = vcombine.low %v2441_v1, %v2441_v1  ;;  %v1971_v12 = vld [vmem:[%s2451_s7 + $0xe8] ss:$16 sps:$4 sm:$0xff]  }
  0x63   : > { %1378 = vmatprep.subr.bf16.mxu1 %v1885_v13  ;;  %v1897_v21 = vld [vmem:[%s2451_s7 + $0x264] ss:$16 sps:$4 sm:$0xff]   ;;  %v1900_v23 = vld [vmem:[%s2451_s7 + $0x260] ss:$16 sps:$4 sm:$0xff]   ;;  %v1974_v13 = vld [vmem:[%s2451_s7 + $0x2e8] ss:$16 sps:$4 sm:$0xff]  }
  0x64   : > { %v1901_v24 = vld [vmem:[%s2451_s7 + $0x44] ss:$16 sps:$4 sm:$0xff]   ;;  %v1905_v26 = vld [vmem:[%s2451_s7 + $0x40] ss:$16 sps:$4 sm:$0xff]   ;;  %v1985_v1 = vld [vmem:[%s2451_s7 + $0xac] ss:$16 sps:$4 sm:$0xff]  }
  0x65   : > { %1338 = vmatpush1.bf16.msra.mxu0 %v1887_v14  ;;  %v1903_v25 = vld [vmem:[%s2451_s7 + $0x244] ss:$16 sps:$4 sm:$0xff]   ;;  %v1906_v27 = vld [vmem:[%s2451_s7 + $0x240] ss:$16 sps:$4 sm:$0xff]   ;;  %v1979_v14 = vld [vmem:[%s2451_s7 + $0xcc] ss:$16 sps:$4 sm:$0xff]  }
  0x66   : > { %1379 = vmatpush1.bf16.msra.mxu1 %v1888_v15  ;;  %1339 = vmatprep.subr.bf16.mxu0 %v1889_v16  ;;  %v1907_v28 = vld [vmem:[%s2451_s7 + $0x24] ss:$16 sps:$4 sm:$0xff]   ;;  %v1911_v30 = vld [vmem:[%s2451_s7 + $0x20] ss:$16 sps:$4 sm:$0xff]   ;;  %v1982_v15 = vld [vmem:[%s2451_s7 + $0x2cc] ss:$16 sps:$4 sm:$0xff]  }
  0x67   : > { %1380 = vmatprep.subr.bf16.mxu1 %v1891_v17  ;;  %v1909_v29 = vld [vmem:[%s2451_s7 + $0x224] ss:$16 sps:$4 sm:$0xff]   ;;  %v1912_v31 = vld [vmem:[%s2451_s7 + $0x220] ss:$16 sps:$4 sm:$0xff]   ;;  %v1980_v16 = vld [vmem:[%s2451_s7 + $0x2c8] ss:$16 sps:$4 sm:$0xff]  }
  0x68   : > { %v1913_v32 = vld [vmem:[%s2451_s7 + $0x4] ss:$16 sps:$4 sm:$0xff]   ;;  %v1917_v34 = vld [vmem:[%s2451_s7] ss:$16 sps:$4 sm:$0xff]   ;;  %v1988_v17 = vld [vmem:[%s2451_s7 + $0x2ac] ss:$16 sps:$4 sm:$0xff]  }
  0x69   : > { %1340 = vmatpush1.bf16.msra.mxu0 %v1893_v18  ;;  %v1915_v33 = vld [vmem:[%s2451_s7 + $0x204] ss:$16 sps:$4 sm:$0xff]   ;;  %v1918_v35 = vld [vmem:[%s2451_s7 + $0x200] ss:$16 sps:$4 sm:$0xff]   ;;  %v1983_v18 = vld [vmem:[%s2451_s7 + $0xa8] ss:$16 sps:$4 sm:$0xff]  }
  0x6a   : > { %1381 = vmatpush1.bf16.msra.mxu1 %v1894_v19  ;;  %1341 = vmatprep.subr.bf16.mxu0 %v1895_v20  ;;  %v1919_v36 = vld [vmem:[%s2451_s7 + $0x1e4] ss:$16 sps:$4 sm:$0xff]   ;;  %v1923_v38 = vld [vmem:[%s2451_s7 + $0x1e0] ss:$16 sps:$4 sm:$0xff]   ;;  %v1986_v19 = vld [vmem:[%s2451_s7 + $0x2a8] ss:$16 sps:$4 sm:$0xff]  }
  0x6b   : > { %1382 = vmatprep.subr.bf16.mxu1 %v1897_v21  ;;  %v1921_v37 = vld [vmem:[%s2451_s7 + $0x3e4] ss:$16 sps:$4 sm:$0xff]   ;;  %v1924_v39 = vld [vmem:[%s2451_s7 + $0x3e0] ss:$16 sps:$4 sm:$0xff]   ;;  %v1991_v20 = vld [vmem:[%s2451_s7 + $0x8c] ss:$16 sps:$4 sm:$0xff]  }
  0x6c   : > { %v1925_v40 = vld [vmem:[%s2451_s7 + $0x1c4] ss:$16 sps:$4 sm:$0xff]   ;;  %v1929_v42 = vld [vmem:[%s2451_s7 + $0x1c0] ss:$16 sps:$4 sm:$0xff]   ;;  %v1994_v21 = vld [vmem:[%s2451_s7 + $0x28c] ss:$16 sps:$4 sm:$0xff]  }
  0x6d   : > { %1342 = vmatpush1.bf16.msra.mxu0 %v1899_v22  ;;  %v1927_v41 = vld [vmem:[%s2451_s7 + $0x3c4] ss:$16 sps:$4 sm:$0xff]   ;;  %v1930_v43 = vld [vmem:[%s2451_s7 + $0x3c0] ss:$16 sps:$4 sm:$0xff]   ;;  %v1989_v22 = vld [vmem:[%s2451_s7 + $0x88] ss:$16 sps:$4 sm:$0xff]  }
  0x6e   : > { %1383 = vmatpush1.bf16.msra.mxu1 %v1900_v23  ;;  %1343 = vmatprep.subr.bf16.mxu0 %v1901_v24  ;;  %v1931_v44 = vld [vmem:[%s2451_s7 + $0x1a4] ss:$16 sps:$4 sm:$0xff]   ;;  %v1935_v46 = vld [vmem:[%s2451_s7 + $0x1a0] ss:$16 sps:$4 sm:$0xff]   ;;  %v1992_v23 = vld [vmem:[%s2451_s7 + $0x288] ss:$16 sps:$4 sm:$0xff]  }
  0x6f   : > { %1384 = vmatprep.subr.bf16.mxu1 %v1903_v25  ;;  %v1933_v45 = vld [vmem:[%s2451_s7 + $0x3a4] ss:$16 sps:$4 sm:$0xff]   ;;  %v1936_v47 = vld [vmem:[%s2451_s7 + $0x3a0] ss:$16 sps:$4 sm:$0xff]   ;;  %v1995_v24 = vld [vmem:[%s2451_s7 + $0x68] ss:$16 sps:$4 sm:$0xff]  }
  0x70   : > { %v1937_v48 = vld [vmem:[%s2451_s7 + $0x184] ss:$16 sps:$4 sm:$0xff]   ;;  %v1941_v50 = vld [vmem:[%s2451_s7 + $0x180] ss:$16 sps:$4 sm:$0xff]   ;;  %v1998_v25 = vld [vmem:[%s2451_s7 + $0x268] ss:$16 sps:$4 sm:$0xff]  }
  0x71   : > { %1344 = vmatpush1.bf16.msra.mxu0 %v1905_v26  ;;  %v1939_v49 = vld [vmem:[%s2451_s7 + $0x384] ss:$16 sps:$4 sm:$0xff]   ;;  %v1942_v51 = vld [vmem:[%s2451_s7 + $0x380] ss:$16 sps:$4 sm:$0xff]   ;;  %v2003_v26 = vld [vmem:[%s2451_s7 + $0x4c] ss:$16 sps:$4 sm:$0xff]  }
  0x72   : > { %1385 = vmatpush1.bf16.msra.mxu1 %v1906_v27  ;;  %1345 = vmatprep.subr.bf16.mxu0 %v1907_v28  ;;  %v1943_v52 = vld [vmem:[%s2451_s7 + $0x164] ss:$16 sps:$4 sm:$0xff]   ;;  %v1947_v54 = vld [vmem:[%s2451_s7 + $0x160] ss:$16 sps:$4 sm:$0xff]   ;;  %v2006_v27 = vld [vmem:[%s2451_s7 + $0x24c] ss:$16 sps:$4 sm:$0xff]  }
  0x73   : > { %1386 = vmatprep.subr.bf16.mxu1 %v1909_v29  ;;  %v1945_v53 = vld [vmem:[%s2451_s7 + $0x364] ss:$16 sps:$4 sm:$0xff]   ;;  %v1948_v55 = vld [vmem:[%s2451_s7 + $0x360] ss:$16 sps:$4 sm:$0xff]   ;;  %v2001_v28 = vld [vmem:[%s2451_s7 + $0x48] ss:$16 sps:$4 sm:$0xff]  }
  0x74   : > { %v1949_v56 = vld [vmem:[%s2451_s7 + $0x144] ss:$16 sps:$4 sm:$0xff]   ;;  %v1953_v58 = vld [vmem:[%s2451_s7 + $0x140] ss:$16 sps:$4 sm:$0xff]   ;;  %v2004_v29 = vld [vmem:[%s2451_s7 + $0x248] ss:$16 sps:$4 sm:$0xff]  }
  0x75   : > { %1346 = vmatpush1.bf16.msra.mxu0 %v1911_v30  ;;  %v1951_v57 = vld [vmem:[%s2451_s7 + $0x344] ss:$16 sps:$4 sm:$0xff]   ;;  %v1954_v59 = vld [vmem:[%s2451_s7 + $0x340] ss:$16 sps:$4 sm:$0xff]   ;;  %v2009_v30 = vld [vmem:[%s2451_s7 + $0x2c] ss:$16 sps:$4 sm:$0xff]  }
  0x76   : > { %1387 = vmatpush1.bf16.msra.mxu1 %v1912_v31  ;;  %1347 = vmatprep.subr.bf16.mxu0 %v1913_v32  ;;  %v1955_v60 = vld [vmem:[%s2451_s7 + $0x124] ss:$16 sps:$4 sm:$0xff]   ;;  %v1959_v62 = vld [vmem:[%s2451_s7 + $0x120] ss:$16 sps:$4 sm:$0xff]   ;;  %v2012_v31 = vld [vmem:[%s2451_s7 + $0x22c] ss:$16 sps:$4 sm:$0xff]  }
  0x77   : > { %1388 = vmatprep.subr.bf16.mxu1 %v1915_v33  ;;  %v1957_v61 = vld [vmem:[%s2451_s7 + $0x324] ss:$16 sps:$4 sm:$0xff]   ;;  %v1960_v63 = vld [vmem:[%s2451_s7 + $0x320] ss:$16 sps:$4 sm:$0xff]   ;;  %v2007_v32 = vld [vmem:[%s2451_s7 + $0x28] ss:$16 sps:$4 sm:$0xff]  }
  0x78   : > { %v1961_v4 = vld [vmem:[%s2451_s7 + $0x104] ss:$16 sps:$4 sm:$0xff]   ;;  %v1965_v6 = vld [vmem:[%s2451_s7 + $0x100] ss:$16 sps:$4 sm:$0xff]   ;;  %v2010_v33 = vld [vmem:[%s2451_s7 + $0x228] ss:$16 sps:$4 sm:$0xff]  }
  0x79   : > { %1348 = vmatpush1.bf16.msra.mxu0 %v1917_v34  ;;  %v1963_v5 = vld [vmem:[%s2451_s7 + $0x304] ss:$16 sps:$4 sm:$0xff]   ;;  %v1966_v7 = vld [vmem:[%s2451_s7 + $0x300] ss:$16 sps:$4 sm:$0xff]   ;;  %v2015_v34 = vld [vmem:[%s2451_s7 + $0xc] ss:$16 sps:$4 sm:$0xff]  }
  0x7a   : > { %1389 = vmatpush1.bf16.msra.mxu1 %v1918_v35  ;;  %1349 = vmatprep.subr.bf16.mxu0 %v1919_v36  ;;  %v2018_v35 = vld [vmem:[%s2451_s7 + $0x20c] ss:$16 sps:$4 sm:$0xff]   ;;  %v2013_v36 = vld [vmem:[%s2451_s7 + $0x8] ss:$16 sps:$4 sm:$0xff]  }
  0x7b   : > { %1390 = vmatprep.subr.bf16.mxu1 %v1921_v37  ;;  %v2016_v37 = vld [vmem:[%s2451_s7 + $0x208] ss:$16 sps:$4 sm:$0xff]  }
  0x7d   : > { %1350 = vmatpush2.bf16.msra.mxu0 %v1923_v38  ;;  %v2021_v38 = vld [vmem:[%s2451_s7 + $0x1ec] ss:$16 sps:$4 sm:$0xff]  }
  0x7e   : > { %1391 = vmatpush2.bf16.msra.mxu1 %v1924_v39  ;;  %1351 = vmatprep.subr.bf16.mxu0 %v1925_v40  ;;  %v2024_v39 = vld [vmem:[%s2451_s7 + $0x3ec] ss:$16 sps:$4 sm:$0xff]   ;;  %v2019_v40 = vld [vmem:[%s2451_s7 + $0x1e8] ss:$16 sps:$4 sm:$0xff]  }
  0x7f   : > { %1392 = vmatprep.subr.bf16.mxu1 %v1927_v41  ;;  %v2022_v41 = vld [vmem:[%s2451_s7 + $0x3e8] ss:$16 sps:$4 sm:$0xff]  }
  0x81   : > { %1352 = vmatpush2.bf16.msra.mxu0 %v1929_v42  ;;  %v2027_v42 = vld [vmem:[%s2451_s7 + $0x1cc] ss:$16 sps:$4 sm:$0xff]  }
  0x82   : > { %1393 = vmatpush2.bf16.msra.mxu1 %v1930_v43  ;;  %1353 = vmatprep.subr.bf16.mxu0 %v1931_v44  ;;  %v2030_v43 = vld [vmem:[%s2451_s7 + $0x3cc] ss:$16 sps:$4 sm:$0xff]   ;;  %v2025_v44 = vld [vmem:[%s2451_s7 + $0x1c8] ss:$16 sps:$4 sm:$0xff]  }
  0x83   : > { %1394 = vmatprep.subr.bf16.mxu1 %v1933_v45  ;;  %v2028_v45 = vld [vmem:[%s2451_s7 + $0x3c8] ss:$16 sps:$4 sm:$0xff]  }
  0x85   : > { %1354 = vmatpush2.bf16.msra.mxu0 %v1935_v46  ;;  %v2033_v46 = vld [vmem:[%s2451_s7 + $0x1ac] ss:$16 sps:$4 sm:$0xff]  }
  0x86   : > { %1395 = vmatpush2.bf16.msra.mxu1 %v1936_v47  ;;  %1355 = vmatprep.subr.bf16.mxu0 %v1937_v48  ;;  %v2036_v47 = vld [vmem:[%s2451_s7 + $0x3ac] ss:$16 sps:$4 sm:$0xff]   ;;  %v2031_v48 = vld [vmem:[%s2451_s7 + $0x1a8] ss:$16 sps:$4 sm:$0xff]  }
  0x87   : > { %1396 = vmatprep.subr.bf16.mxu1 %v1939_v49  ;;  %v2034_v49 = vld [vmem:[%s2451_s7 + $0x3a8] ss:$16 sps:$4 sm:$0xff]  }
  0x89   : > { %1356 = vmatpush2.bf16.msra.mxu0 %v1941_v50  ;;  %v2039_v50 = vld [vmem:[%s2451_s7 + $0x18c] ss:$16 sps:$4 sm:$0xff]  }
  0x8a   : > { %1397 = vmatpush2.bf16.msra.mxu1 %v1942_v51  ;;  %1357 = vmatprep.subr.bf16.mxu0 %v1943_v52  ;;  %v2042_v51 = vld [vmem:[%s2451_s7 + $0x38c] ss:$16 sps:$4 sm:$0xff]   ;;  %v2037_v52 = vld [vmem:[%s2451_s7 + $0x188] ss:$16 sps:$4 sm:$0xff]  }
  0x8b   : > { %1398 = vmatprep.subr.bf16.mxu1 %v1945_v53  ;;  %v2040_v53 = vld [vmem:[%s2451_s7 + $0x388] ss:$16 sps:$4 sm:$0xff]  }
  0x8d   : > { %1358 = vmatpush2.bf16.msra.mxu0 %v1947_v54  ;;  %v2045_v54 = vld [vmem:[%s2451_s7 + $0x16c] ss:$16 sps:$4 sm:$0xff]  }
  0x8e   : > { %1399 = vmatpush2.bf16.msra.mxu1 %v1948_v55  ;;  %1359 = vmatprep.subr.bf16.mxu0 %v1949_v56  ;;  %v2048_v55 = vld [vmem:[%s2451_s7 + $0x36c] ss:$16 sps:$4 sm:$0xff]   ;;  %v2043_v56 = vld [vmem:[%s2451_s7 + $0x168] ss:$16 sps:$4 sm:$0xff]  }
  0x8f   : > { %1400 = vmatprep.subr.bf16.mxu1 %v1951_v57  ;;  %v2046_v57 = vld [vmem:[%s2451_s7 + $0x368] ss:$16 sps:$4 sm:$0xff]  }
  0x91   : > { %1360 = vmatpush2.bf16.msra.mxu0 %v1953_v58  ;;  %v2051_v58 = vld [vmem:[%s2451_s7 + $0x14c] ss:$16 sps:$4 sm:$0xff]  }
  0x92   : > { %1401 = vmatpush2.bf16.msra.mxu1 %v1954_v59  ;;  %1361 = vmatprep.subr.bf16.mxu0 %v1955_v60  ;;  %v2054_v59 = vld [vmem:[%s2451_s7 + $0x34c] ss:$16 sps:$4 sm:$0xff]   ;;  %v2049_v60 = vld [vmem:[%s2451_s7 + $0x148] ss:$16 sps:$4 sm:$0xff]  }
  0x93   : > { %1402 = vmatprep.subr.bf16.mxu1 %v1957_v61  ;;  %v2052_v61 = vld [vmem:[%s2451_s7 + $0x348] ss:$16 sps:$4 sm:$0xff]  }
  0x95   : > { %1362 = vmatpush2.bf16.msra.mxu0 %v1959_v62  ;;  %v2057_v62 = vld [vmem:[%s2451_s7 + $0x12c] ss:$16 sps:$4 sm:$0xff]  }
  0x96   : > { %1403 = vmatpush2.bf16.msra.mxu1 %v1960_v63  ;;  %1363 = vmatprep.subr.bf16.mxu0 %v1961_v4  ;;  %v2060_v63 = vld [vmem:[%s2451_s7 + $0x32c] ss:$16 sps:$4 sm:$0xff]   ;;  %v2055_v4 = vld [vmem:[%s2451_s7 + $0x128] ss:$16 sps:$4 sm:$0xff]  }
  0x97   : > { %1404 = vmatprep.subr.bf16.mxu1 %v1963_v5  ;;  %v2058_v5 = vld [vmem:[%s2451_s7 + $0x328] ss:$16 sps:$4 sm:$0xff]  }
  0x99   : > { %1364 = vmatpush2.bf16.msra.mxu0 %v1965_v6  ;;  %v2063_v6 = vld [vmem:[%s2451_s7 + $0x10c] ss:$16 sps:$4 sm:$0xff]  }
  0x9a   : > { %1405 = vmatpush2.bf16.msra.mxu1 %v1966_v7  ;;  %1415 = vmatprep.subr.bf16.mxu0 %v1973_v8  ;;  %v2066_v7 = vld [vmem:[%s2451_s7 + $0x30c] ss:$16 sps:$4 sm:$0xff]   ;;  %v2061_v8 = vld [vmem:[%s2451_s7 + $0x108] ss:$16 sps:$4 sm:$0xff]  }
  0x9b   : > { %1456 = vmatprep.subr.bf16.mxu1 %v1976_v9  ;;  %v2064_v9 = vld [vmem:[%s2451_s7 + $0x308] ss:$16 sps:$4 sm:$0xff]  }
  0x9c   : > { %1366 = vmatmul.mubr.bf16.vlgmr.msra.gmra.mxu0 %v2523_v10 }
  0x9d   : > { %1407 = vmatmul.mubr.bf16.vlgmr.msra.gmra.mxu1 %v2527_v11  ;;  %1416 = vmatpush1.bf16.msra.mxu0 %v1971_v12  ;;  %v1514_v12 = vlaneseq }
  0x9e   : > { %1457 = vmatpush1.bf16.msra.mxu1 %v1974_v13  ;;  %1417 = vmatprep.subr.bf16.mxu0 %v1979_v14 }
  0x9f   : > { %1458 = vmatprep.subr.bf16.mxu1 %v1982_v15  ;;  %1447 = vmatprep.mubr.bf16.mxu0 %v2445_v2  ;;  %v1997_v2 = vld [vmem:[%s2451_s7 + $0x6c] ss:$16 sps:$4 sm:$0xff]   ;;  %v1515_v13 = vshrl.u32 %v1514_v12, 7  ;;  %v1512_v15 = vld [vmem:[%s525_s11] sm:$0xf] }
  0xa0   : > { %1488 = vmatprep.mubr.bf16.mxu1 %v2449_v3  ;;  %v2000_v3 = vld [vmem:[%s2451_s7 + $0x26c] ss:$16 sps:$4 sm:$0xff]  }
  0xa1   : > { %1418 = vmatpush1.bf16.msra.mxu0 %v1977_v0  ;;  %v1524_v14 = vsub.s32 2, %v1515_v13 }
  0xa2   : > { %1459 = vmatpush1.bf16.msra.mxu1 %v1980_v16  ;;  %1419 = vmatprep.subr.bf16.mxu0 %v1985_v1  ;;  %v1528_v16 = vsub.s32 3, %v1515_v13 }
  0xa3   : > { %1460 = vmatprep.subr.bf16.mxu1 %v1988_v17  ;;  %v1525_v0 = vrot.slane %v1512_v15, %v1524_v14  ;;  %v1516_v17 = vsub.s32 0, %v1515_v13 }
  0xa4   : > { %v1529_v1 = vrot.slane %v1512_v15, %v1528_v16 }
  0xa5   : > { %1420 = vmatpush1.bf16.msra.mxu0 %v1983_v18  ;;  %v1520_v18 = vsub.s32 1, %v1515_v13 }
  0xa6   : > { %1461 = vmatpush1.bf16.msra.mxu1 %v1986_v19  ;;  %1421 = vmatprep.subr.bf16.mxu0 %v1991_v20  ;;  %v1517_v19 = vrot.slane %v1512_v15, %v1516_v17 }
  0xa7   : > { %1462 = vmatprep.subr.bf16.mxu1 %v1994_v21  ;;  %v1521_v21 = vrot.slane %v1512_v15, %v1520_v18 }
  0xa9   : > { %1422 = vmatpush1.bf16.msra.mxu0 %v1989_v22 }
  0xaa   : > { %1463 = vmatpush1.bf16.msra.mxu1 %v1992_v23  ;;  %1423 = vmatprep.subr.bf16.mxu0 %v1997_v2 }
  0xab   : > { %1464 = vmatprep.subr.bf16.mxu1 %v2000_v3 }
  0xad   : > { %1424 = vmatpush1.bf16.msra.mxu0 %v1995_v24 }
  0xae   : > { %1465 = vmatpush1.bf16.msra.mxu1 %v1998_v25  ;;  %1425 = vmatprep.subr.bf16.mxu0 %v2003_v26 }
  0xaf   : > { %1466 = vmatprep.subr.bf16.mxu1 %v2006_v27 }
  0xb1   : > { %1426 = vmatpush1.bf16.msra.mxu0 %v2001_v28 }
  0xb2   : > { %1467 = vmatpush1.bf16.msra.mxu1 %v2004_v29  ;;  %1427 = vmatprep.subr.bf16.mxu0 %v2009_v30 }
  0xb3   : > { %1468 = vmatprep.subr.bf16.mxu1 %v2012_v31 }
  0xb5   : > { %1428 = vmatpush1.bf16.msra.mxu0 %v2007_v32 }
  0xb6   : > { %1469 = vmatpush1.bf16.msra.mxu1 %v2010_v33  ;;  %1429 = vmatprep.subr.bf16.mxu0 %v2015_v34 }
  0xb7   : > { %1470 = vmatprep.subr.bf16.mxu1 %v2018_v35 }
  0xb9   : > { %1430 = vmatpush1.bf16.msra.mxu0 %v2013_v36 }
  0xba   : > { %1471 = vmatpush1.bf16.msra.mxu1 %v2016_v37  ;;  %1431 = vmatprep.subr.bf16.mxu0 %v2021_v38 }
  0xbb   : > { %1472 = vmatprep.subr.bf16.mxu1 %v2024_v39 }
  0xbd   : > { %1432 = vmatpush2.bf16.msra.mxu0 %v2019_v40 }
  0xbe   : > { %1473 = vmatpush2.bf16.msra.mxu1 %v2022_v41  ;;  %1433 = vmatprep.subr.bf16.mxu0 %v2027_v42 }
  0xbf   : > { %1474 = vmatprep.subr.bf16.mxu1 %v2030_v43 }
  0xc1   : > { %1434 = vmatpush2.bf16.msra.mxu0 %v2025_v44 }
  0xc2   : > { %1475 = vmatpush2.bf16.msra.mxu1 %v2028_v45  ;;  %1435 = vmatprep.subr.bf16.mxu0 %v2033_v46 }
  0xc3   : > { %1476 = vmatprep.subr.bf16.mxu1 %v2036_v47 }
  0xc5   : > { %1436 = vmatpush2.bf16.msra.mxu0 %v2031_v48 }
  0xc6   : > { %1477 = vmatpush2.bf16.msra.mxu1 %v2034_v49  ;;  %1437 = vmatprep.subr.bf16.mxu0 %v2039_v50 }
  0xc7   : > { %1478 = vmatprep.subr.bf16.mxu1 %v2042_v51 }
  0xc9   : > { %1438 = vmatpush2.bf16.msra.mxu0 %v2037_v52 }
  0xca   : > { %1479 = vmatpush2.bf16.msra.mxu1 %v2040_v53  ;;  %1439 = vmatprep.subr.bf16.mxu0 %v2045_v54 }
  0xcb   : > { %1480 = vmatprep.subr.bf16.mxu1 %v2048_v55 }
  0xcd   : > { %1440 = vmatpush2.bf16.msra.mxu0 %v2043_v56 }
  0xce   : > { %1481 = vmatpush2.bf16.msra.mxu1 %v2046_v57  ;;  %1441 = vmatprep.subr.bf16.mxu0 %v2051_v58 }
  0xcf   : > { %1482 = vmatprep.subr.bf16.mxu1 %v2054_v59 }
  0xd1   : > { %1442 = vmatpush2.bf16.msra.mxu0 %v2049_v60 }
  0xd2   : > { %1483 = vmatpush2.bf16.msra.mxu1 %v2052_v61  ;;  %1443 = vmatprep.subr.bf16.mxu0 %v2057_v62 }
  0xd3   : > { %1484 = vmatprep.subr.bf16.mxu1 %v2060_v63 }
  0xd5   : > { %1444 = vmatpush2.bf16.msra.mxu0 %v2055_v4 }
  0xd6   : > { %1485 = vmatpush2.bf16.msra.mxu1 %v2058_v5  ;;  %1445 = vmatprep.subr.bf16.mxu0 %v2063_v6 }
  0xd7   : > { %1486 = vmatprep.subr.bf16.mxu1 %v2066_v7 }
  0xd9   : > { %1446 = vmatpush2.bf16.msra.mxu0 %v2061_v8 }
  0xda   : > { %1487 = vmatpush2.bf16.msra.mxu1 %v2064_v9 }
  0xdc   : > { %1448 = vmatmul.mubr.bf16.vlgmr.msra.gmra.mxu0 %v2523_v10 }
  0xdd   : > { %1489 = vmatmul.mubr.bf16.vlgmr.msra.gmra.mxu1 %v2527_v11 }
 0x15c   : > { %v1367_v10 = vpop.f32.mrf.mxu0 }
 0x15d   : > { %v1408_v20 = vpop.f32.mrf.mxu1 }
 0x15e   : > { %v1409_v11 = vadd.f32 %v1408_v20, %v1367_v10  ;;  %v1369_v22 = vpop.f32.mrf.mxu0 }
 0x15f   : > { %v1410_v23 = vpop.f32.mrf.mxu1 }
 0x160   : > { %v1534_v2 = vadd.f32 %v1517_v19, %v1409_v11  ;;  %v1411_v3 = vadd.f32 %v1410_v23, %v1369_v22  ;;  %v1371_v24 = vpop.f32.mrf.mxu0 }
 0x161   : > { %v1412_v25 = vpop.f32.mrf.mxu1 }
 0x162   : > { %v1535_v26 = vadd.f32 %v1521_v21, %v1411_v3  ;;  %v1372_v27 = vpop.f32.mrf.mxu0 }
 0x163   : > { %v1413_v28 = vpop.f32.mrf.mxu1 }
 0x164   : > { %v1829_v29 = vpack.c.bf16 %v1535_v26, %v1534_v2 }
 0x166   : > { %1554 = vst [vmem:[%s535_s19] sm:$0xff] %v1829_v29 }
 0x19c   : > { %v1449_v30 = vpop.f32.mrf.mxu0 }
 0x19d   : > { %v1490_v31 = vpop.f32.mrf.mxu1 }
 0x19e   : > { %v1491_v32 = vadd.f32 %v1490_v31, %v1449_v30  ;;  %v1451_v33 = vpop.f32.mrf.mxu0 }
 0x19f   : > { %v1492_v34 = vpop.f32.mrf.mxu1 }
 0x1a0   : > { %v1493_v35 = vadd.f32 %v1492_v34, %v1451_v33  ;;  %v1453_v36 = vpop.f32.mrf.mxu0  ;;  %v1536_v38 = vadd.f32 %v1525_v0, %v1491_v32 }
 0x1a1   : > { %v1494_v37 = vpop.f32.mrf.mxu1 }
 0x1a2   : > { %v1537_v39 = vadd.f32 %v1529_v1, %v1493_v35  ;;  %v1454_v40 = vpop.f32.mrf.mxu0 }
 0x1a3   : > { %v1495_v41 = vpop.f32.mrf.mxu1 }
 0x1a4   : > { %v1830_v42 = vpack.c.bf16 %v1537_v39, %v1536_v38 }
 0x1a6   : > { %1555 = vst [vmem:[%s535_s19 + $0x8] sm:$0xff] %v1830_v42 }
 0x1a7 PF: > { %s13_s16 = sadd.s32 1, %s2105_s16   ;;  %s2623_s12 = smov %s2093_s13 }
 0x1a8   : > { %p10_p10 = scmp.ge.s32.totalorder %s13_s16, 4   ;;  %s2624_s13 = smov %s2162_s20 }
 0x1a9   : > { %s2625_s14 = smov %s2101_s15  ;;  %s2626_s15 = smov %s2628_s17 }
 0x1aa   :  { %12 = sbr.rel (!%p10_p10) target bundleno = 3 (0x3), region = 104 }

// kernel: _lambda_.70
= control target key start
LH: loop header
LB: loop body
LE: loop exit
PB: predicated region body
PF: predicated region fallthrough
CT: control target
= control target key end

     0   :  { %s1463_s15 = smov 0   ;;  %s1465_s16 = smov 0   ;;  %s1749_s0 = inlined_call_operand.vmem [shape: bf16[8,256], index: 0, kind: input, shape index: {}]   ;;  %s1750_s1 = inlined_call_operand.vmem [shape: bf16[256,1024], index: 1, kind: input, shape index: {}]   ;;  %s1751_s2 = inlined_call_operand.vmem [shape: f32[1,1024], index: 2, kind: input, shape index: {}]   ;;  %s1752_s3 = inlined_call_operand.vmem [shape: bf16[8,1024], index: 3, kind: input, shape index: {}]   ;;  %s1753_s4 = inlined_call_operand.vmem [shape: bf16[8,1024], index: 4, kind: output, shape index: {}]  }
   0x1   :  { %s1467_s17 = smov 0   ;;  %s1469_s18 = smov 0  }
   0x2   :  { %s1471_s19 = smov 0  }
   0x3 LB: > { %s29_s20 = sadd.s32 1, %s1432_s18  ;;  %p77_p1 = scmp.ne.s32.totalorder %s1424_s16, %s1420_s15  ;;  %s1436_s19 = sphi %s1471_s19, %s14_s19   ;;  %s1432_s18 = sphi %s1469_s18, %s1757_s18   ;;  %s1428_s17 = sphi %s1467_s17, %s1756_s17   ;;  %s1424_s16 = sphi %s1465_s16, %s1755_s16   ;;  %s1420_s15 = sphi %s1463_s15, %s1754_s15  }
   0x4   : > { %p31_p0 = scmp.ge.s32.totalorder %s29_s20, 2  ;;  %p78_p2 = scmp.eq.s32.totalorder %s1436_s19, 0 }
   0x5   : > { %s70_s22 = sadd.s32 1, %s1424_s16  ;;  %p1176_p5 = scmp.ge.s32.totalorder %s1436_s19, 2 }
   0x6   : > { %s1759_s20 = smov (%p31_p0, %s29_s20), 0  ;;  %p79_p3 = por %p78_p2, %p77_p1 }
   0x7   : > { %s66_s21 = ssub.s32 %s1432_s18, %s1759_s20  ;;  %198 = sbr.rel (%p1176_p5) target bundleno = 48 (0x30), region = 20 }
   0x8   : > { %p68_p4 = scmp.eq.s32.totalorder %s66_s21, 0 }
   0xa   : > { %s1498_s23 = scalar_select %p68_p4, %s1424_s16, %s70_s22  }
   0xc   : > { %201 = sbr.rel (!%p79_p3) target bundleno = 48 (0x30), region = 24  ;;  %s203_s24 = sand.u32 (%p79_p3), 1, %s1424_s16  }
   0xd   : > { %s1257_s25 = sshll.u32 (%p79_p3), %s1432_s18, 4  ;;  %s1177_s26 = sshll.u32 (%p79_p3), %s203_s24, 9 }
   0xe   : > { %s1506_s29 = scalar_lea.vmem (%p79_p3), %s1750_s1, %s1257_s25  ;;  %s1511_s30 = scalar_lea.vmem (%p79_p3), [#allocation3], %s1177_s26 }
   0xf   : > { %v224_v0 = vld [vmem:[%s1506_s29] sm:$0xff] (%p79_p3)  ;;  %v226_v1 = vld [vmem:[%s1506_s29 + $0x8] sm:$0xff] (%p79_p3) }
  0x10   : > { %v228_v2 = vld [vmem:[%s1506_s29 + $0x20] sm:$0xff] (%p79_p3)  ;;  %225 = vst [vmem:[%s1511_s30] sm:$0xff] (%p79_p3), %v224_v0  ;;  %227 = vst [vmem:[%s1511_s30 + $0x8] sm:$0xff] (%p79_p3), %v226_v1  ;;  %v230_v3 = vld [vmem:[%s1506_s29 + $0x28] sm:$0xff] (%p79_p3) }
  0x11   : > { %229 = vst [vmem:[%s1511_s30 + $0x10] sm:$0xff] %v228_v2  ;;  %v232_v4 = vld [vmem:[%s1506_s29 + $0x40] sm:$0xff]  ;;  %v234_v5 = vld [vmem:[%s1506_s29 + $0x48] sm:$0xff]  ;;  %231 = vst [vmem:[%s1511_s30 + $0x18] sm:$0xff] %v230_v3 }
  0x12   : > { %233 = vst [vmem:[%s1511_s30 + $0x20] sm:$0xff] %v232_v4  ;;  %235 = vst [vmem:[%s1511_s30 + $0x28] sm:$0xff] %v234_v5  ;;  %v236_v6 = vld [vmem:[%s1506_s29 + $0x60] sm:$0xff]  ;;  %v238_v7 = vld [vmem:[%s1506_s29 + $0x68] sm:$0xff] }
  0x13   : > { %v240_v8 = vld [vmem:[%s1506_s29 + $0x80] sm:$0xff]  ;;  %237 = vst [vmem:[%s1511_s30 + $0x30] sm:$0xff] %v236_v6  ;;  %239 = vst [vmem:[%s1511_s30 + $0x38] sm:$0xff] %v238_v7  ;;  %v242_v9 = vld [vmem:[%s1506_s29 + $0x88] sm:$0xff] }
  0x14   : > { %241 = vst [vmem:[%s1511_s30 + $0x40] sm:$0xff] %v240_v8  ;;  %v244_v10 = vld [vmem:[%s1506_s29 + $0xa0] sm:$0xff]  ;;  %v246_v11 = vld [vmem:[%s1506_s29 + $0xa8] sm:$0xff]  ;;  %243 = vst [vmem:[%s1511_s30 + $0x48] sm:$0xff] %v242_v9 }
  0x15   : > { %245 = vst [vmem:[%s1511_s30 + $0x50] sm:$0xff] %v244_v10  ;;  %247 = vst [vmem:[%s1511_s30 + $0x58] sm:$0xff] %v246_v11  ;;  %v248_v12 = vld [vmem:[%s1506_s29 + $0xc0] sm:$0xff]  ;;  %v250_v13 = vld [vmem:[%s1506_s29 + $0xc8] sm:$0xff] }
  0x16   : > { %v252_v14 = vld [vmem:[%s1506_s29 + $0xe0] sm:$0xff]  ;;  %249 = vst [vmem:[%s1511_s30 + $0x60] sm:$0xff] %v248_v12  ;;  %251 = vst [vmem:[%s1511_s30 + $0x68] sm:$0xff] %v250_v13  ;;  %v254_v15 = vld [vmem:[%s1506_s29 + $0xe8] sm:$0xff] }
  0x17   : > { %253 = vst [vmem:[%s1511_s30 + $0x70] sm:$0xff] %v252_v14  ;;  %v256_v16 = vld [vmem:[%s1506_s29 + $0x100] sm:$0xff]  ;;  %v258_v17 = vld [vmem:[%s1506_s29 + $0x108] sm:$0xff]  ;;  %255 = vst [vmem:[%s1511_s30 + $0x78] sm:$0xff] %v254_v15 }
  0x18   : > { %257 = vst [vmem:[%s1511_s30 + $0x80] sm:$0xff] %v256_v16  ;;  %259 = vst [vmem:[%s1511_s30 + $0x88] sm:$0xff] %v258_v17  ;;  %v260_v18 = vld [vmem:[%s1506_s29 + $0x120] sm:$0xff]  ;;  %v262_v19 = vld [vmem:[%s1506_s29 + $0x128] sm:$0xff] }
  0x19   : > { %v264_v20 = vld [vmem:[%s1506_s29 + $0x140] sm:$0xff]  ;;  %261 = vst [vmem:[%s1511_s30 + $0x90] sm:$0xff] %v260_v18  ;;  %263 = vst [vmem:[%s1511_s30 + $0x98] sm:$0xff] %v262_v19  ;;  %v266_v21 = vld [vmem:[%s1506_s29 + $0x148] sm:$0xff] }
  0x1a   : > { %265 = vst [vmem:[%s1511_s30 + $0xa0] sm:$0xff] %v264_v20  ;;  %v268_v22 = vld [vmem:[%s1506_s29 + $0x160] sm:$0xff]  ;;  %v270_v23 = vld [vmem:[%s1506_s29 + $0x168] sm:$0xff]  ;;  %267 = vst [vmem:[%s1511_s30 + $0xa8] sm:$0xff] %v266_v21 }
  0x1b   : > { %269 = vst [vmem:[%s1511_s30 + $0xb0] sm:$0xff] %v268_v22  ;;  %271 = vst [vmem:[%s1511_s30 + $0xb8] sm:$0xff] %v270_v23  ;;  %v272_v24 = vld [vmem:[%s1506_s29 + $0x180] sm:$0xff]  ;;  %v274_v25 = vld [vmem:[%s1506_s29 + $0x188] sm:$0xff] }
  0x1c   : > { %v276_v26 = vld [vmem:[%s1506_s29 + $0x1a0] sm:$0xff]  ;;  %273 = vst [vmem:[%s1511_s30 + $0xc0] sm:$0xff] %v272_v24  ;;  %275 = vst [vmem:[%s1511_s30 + $0xc8] sm:$0xff] %v274_v25  ;;  %v278_v27 = vld [vmem:[%s1506_s29 + $0x1a8] sm:$0xff] }
  0x1d   : > { %277 = vst [vmem:[%s1511_s30 + $0xd0] sm:$0xff] %v276_v26  ;;  %v280_v28 = vld [vmem:[%s1506_s29 + $0x1c0] sm:$0xff]  ;;  %v282_v29 = vld [vmem:[%s1506_s29 + $0x1c8] sm:$0xff]  ;;  %279 = vst [vmem:[%s1511_s30 + $0xd8] sm:$0xff] %v278_v27 }
  0x1e   : > { %281 = vst [vmem:[%s1511_s30 + $0xe0] sm:$0xff] %v280_v28  ;;  %283 = vst [vmem:[%s1511_s30 + $0xe8] sm:$0xff] %v282_v29  ;;  %v284_v30 = vld [vmem:[%s1506_s29 + $0x1e0] sm:$0xff]  ;;  %v286_v31 = vld [vmem:[%s1506_s29 + $0x1e8] sm:$0xff] }
  0x1f   : > { %v288_v32 = vld [vmem:[%s1506_s29 + $0x200] sm:$0xff]  ;;  %285 = vst [vmem:[%s1511_s30 + $0xf0] sm:$0xff] %v284_v30  ;;  %287 = vst [vmem:[%s1511_s30 + $0xf8] sm:$0xff] %v286_v31  ;;  %v290_v33 = vld [vmem:[%s1506_s29 + $0x208] sm:$0xff] }
  0x20   : > { %289 = vst [vmem:[%s1511_s30 + $0x100] sm:$0xff] %v288_v32  ;;  %v292_v34 = vld [vmem:[%s1506_s29 + $0x220] sm:$0xff]  ;;  %v294_v35 = vld [vmem:[%s1506_s29 + $0x228] sm:$0xff]  ;;  %291 = vst [vmem:[%s1511_s30 + $0x108] sm:$0xff] %v290_v33 }
  0x21   : > { %293 = vst [vmem:[%s1511_s30 + $0x110] sm:$0xff] %v292_v34  ;;  %295 = vst [vmem:[%s1511_s30 + $0x118] sm:$0xff] %v294_v35  ;;  %v296_v36 = vld [vmem:[%s1506_s29 + $0x240] sm:$0xff]  ;;  %v298_v37 = vld [vmem:[%s1506_s29 + $0x248] sm:$0xff] }
  0x22   : > { %v300_v38 = vld [vmem:[%s1506_s29 + $0x260] sm:$0xff]  ;;  %297 = vst [vmem:[%s1511_s30 + $0x120] sm:$0xff] %v296_v36  ;;  %299 = vst [vmem:[%s1511_s30 + $0x128] sm:$0xff] %v298_v37  ;;  %v302_v39 = vld [vmem:[%s1506_s29 + $0x268] sm:$0xff] }
  0x23   : > { %301 = vst [vmem:[%s1511_s30 + $0x130] sm:$0xff] %v300_v38  ;;  %v304_v40 = vld [vmem:[%s1506_s29 + $0x280] sm:$0xff]  ;;  %v306_v41 = vld [vmem:[%s1506_s29 + $0x288] sm:$0xff]  ;;  %303 = vst [vmem:[%s1511_s30 + $0x138] sm:$0xff] %v302_v39 }
  0x24   : > { %305 = vst [vmem:[%s1511_s30 + $0x140] sm:$0xff] %v304_v40  ;;  %307 = vst [vmem:[%s1511_s30 + $0x148] sm:$0xff] %v306_v41  ;;  %v308_v42 = vld [vmem:[%s1506_s29 + $0x2a0] sm:$0xff]  ;;  %v310_v43 = vld [vmem:[%s1506_s29 + $0x2a8] sm:$0xff] }
  0x25   : > { %v312_v44 = vld [vmem:[%s1506_s29 + $0x2c0] sm:$0xff]  ;;  %309 = vst [vmem:[%s1511_s30 + $0x150] sm:$0xff] %v308_v42  ;;  %311 = vst [vmem:[%s1511_s30 + $0x158] sm:$0xff] %v310_v43  ;;  %v314_v45 = vld [vmem:[%s1506_s29 + $0x2c8] sm:$0xff] }
  0x26   : > { %313 = vst [vmem:[%s1511_s30 + $0x160] sm:$0xff] %v312_v44  ;;  %v316_v46 = vld [vmem:[%s1506_s29 + $0x2e0] sm:$0xff]  ;;  %v318_v47 = vld [vmem:[%s1506_s29 + $0x2e8] sm:$0xff]  ;;  %315 = vst [vmem:[%s1511_s30 + $0x168] sm:$0xff] %v314_v45 }
  0x27   : > { %317 = vst [vmem:[%s1511_s30 + $0x170] sm:$0xff] %v316_v46  ;;  %319 = vst [vmem:[%s1511_s30 + $0x178] sm:$0xff] %v318_v47  ;;  %v320_v48 = vld [vmem:[%s1506_s29 + $0x300] sm:$0xff]  ;;  %v322_v49 = vld [vmem:[%s1506_s29 + $0x308] sm:$0xff] }
  0x28   : > { %v324_v50 = vld [vmem:[%s1506_s29 + $0x320] sm:$0xff]  ;;  %321 = vst [vmem:[%s1511_s30 + $0x180] sm:$0xff] %v320_v48  ;;  %323 = vst [vmem:[%s1511_s30 + $0x188] sm:$0xff] %v322_v49  ;;  %v326_v51 = vld [vmem:[%s1506_s29 + $0x328] sm:$0xff] }
  0x29   : > { %325 = vst [vmem:[%s1511_s30 + $0x190] sm:$0xff] %v324_v50  ;;  %v328_v52 = vld [vmem:[%s1506_s29 + $0x340] sm:$0xff]  ;;  %v330_v53 = vld [vmem:[%s1506_s29 + $0x348] sm:$0xff]  ;;  %327 = vst [vmem:[%s1511_s30 + $0x198] sm:$0xff] %v326_v51 }
  0x2a   : > { %329 = vst [vmem:[%s1511_s30 + $0x1a0] sm:$0xff] %v328_v52  ;;  %331 = vst [vmem:[%s1511_s30 + $0x1a8] sm:$0xff] %v330_v53  ;;  %v332_v54 = vld [vmem:[%s1506_s29 + $0x360] sm:$0xff]  ;;  %v334_v55 = vld [vmem:[%s1506_s29 + $0x368] sm:$0xff] }
  0x2b   : > { %v336_v56 = vld [vmem:[%s1506_s29 + $0x380] sm:$0xff]  ;;  %333 = vst [vmem:[%s1511_s30 + $0x1b0] sm:$0xff] %v332_v54  ;;  %335 = vst [vmem:[%s1511_s30 + $0x1b8] sm:$0xff] %v334_v55  ;;  %v338_v57 = vld [vmem:[%s1506_s29 + $0x388] sm:$0xff] }
  0x2c   : > { %337 = vst [vmem:[%s1511_s30 + $0x1c0] sm:$0xff] %v336_v56  ;;  %v340_v58 = vld [vmem:[%s1506_s29 + $0x3a0] sm:$0xff]  ;;  %v342_v59 = vld [vmem:[%s1506_s29 + $0x3a8] sm:$0xff]  ;;  %339 = vst [vmem:[%s1511_s30 + $0x1c8] sm:$0xff] %v338_v57 }
  0x2d   : > { %341 = vst [vmem:[%s1511_s30 + $0x1d0] sm:$0xff] %v340_v58  ;;  %343 = vst [vmem:[%s1511_s30 + $0x1d8] sm:$0xff] %v342_v59  ;;  %v344_v60 = vld [vmem:[%s1506_s29 + $0x3c0] sm:$0xff]  ;;  %v346_v61 = vld [vmem:[%s1506_s29 + $0x3c8] sm:$0xff] }
  0x2e   : > { %v348_v62 = vld [vmem:[%s1506_s29 + $0x3e0] sm:$0xff]  ;;  %345 = vst [vmem:[%s1511_s30 + $0x1e0] sm:$0xff] %v344_v60  ;;  %347 = vst [vmem:[%s1511_s30 + $0x1e8] sm:$0xff] %v346_v61  ;;  %v350_v63 = vld [vmem:[%s1506_s29 + $0x3e8] sm:$0xff] }
  0x2f   : > { %349 = vst [vmem:[%s1511_s30 + $0x1f0] sm:$0xff] %v348_v62  ;;  %351 = vst [vmem:[%s1511_s30 + $0x1f8] sm:$0xff] %v350_v63 }
  0x30 PF: > { %p1180_p6 = scmp.ge.s32.totalorder %s1436_s19, 1  ;;  %p377_p7 = scmp.lt.s32.totalorder %s1436_s19, 3 }
  0x32   : > { %p378_p8 = pnand %p1180_p6, %p377_p7 }
  0x33   : > { %s384_s5 = sand.u32 (!%p378_p8), 1, %s1420_s15   ;;  %s1182_s10 = sshll.u32 (!%p378_p8), %s1428_s17, 2 }
  0x34   : > { %381 = sbr.rel (%p378_p8) target bundleno = 328 (0x148), region = 55  ;;  %s1181_s8 = sshll.u32 (!%p378_p8), %s384_s5, 9 }
  0x35   : > { %s1648_s9 = scalar_lea.vmem (!%p378_p8), [#allocation3], %s1181_s8  ;;  %p448_p9 = scmp.lt.s32.totalorder (!%p378_p8), %s1182_s10, 7 }
  0x39   : > { %v1644_v0 = vld [vmem:[%s1749_s0] sm:$0xff]  ;;  %v1300_v2 = vld [vmem:[%s1648_s9 + $0xe4] ss:$16 sps:$4 sm:$0xff]   ;;  %v1304_v4 = vld [vmem:[%s1648_s9 + $0xe0] ss:$16 sps:$4 sm:$0xff]   ;;  %s1761_s10 = smov (!%p448_p9, %s1182_s10), 7 }
  0x3a   : > { %v1188_v1 = vcombine.high %v1644_v0, %v1644_v0  ;;  %v1302_v3 = vld [vmem:[%s1648_s9 + $0xec] ss:$16 sps:$4 sm:$0xff]   ;;  %876 = vmatprep.subr.bf16.mxu0 %v1300_v2  ;;  %v1305_v5 = vld [vmem:[%s1648_s9 + $0xe8] ss:$16 sps:$4 sm:$0xff]   ;;  %v1306_v6 = vld [vmem:[%s1648_s9 + $0xc4] ss:$16 sps:$4 sm:$0xff]   ;;  %s450_s14 = scalar_lea.vmem %s1751_s2, %s1761_s10 }
  0x3b   : > { %917 = vmatprep.subr.bf16.mxu1 %v1302_v3  ;;  %877 = vmatpush1.bf16.msra.mxu0 %v1304_v4  ;;  %v1308_v7 = vld [vmem:[%s1648_s9 + $0xcc] ss:$16 sps:$4 sm:$0xff]   ;;  %v1310_v8 = vld [vmem:[%s1648_s9 + $0xc0] ss:$16 sps:$4 sm:$0xff]   ;;  %v1311_v9 = vld [vmem:[%s1648_s9 + $0xc8] ss:$16 sps:$4 sm:$0xff]   ;;  %v1187_v3 = vcombine.low %v1644_v0, %v1644_v0  ;;  %v975_v4 = vlaneseq }
  0x3c   : > { %908 = vmatprep.mubr.bf16.mxu0 %v1188_v1  ;;  %949 = vmatprep.mubr.bf16.mxu1 %v1188_v1  ;;  %v1312_v10 = vld [vmem:[%s1648_s9 + $0xa4] ss:$16 sps:$4 sm:$0xff]   ;;  %v1314_v11 = vld [vmem:[%s1648_s9 + $0xac] ss:$16 sps:$4 sm:$0xff]   ;;  %v1316_v12 = vld [vmem:[%s1648_s9 + $0xa0] ss:$16 sps:$4 sm:$0xff]  }
  0x3d   : > { %918 = vmatpush1.bf16.msra.mxu1 %v1305_v5  ;;  %878 = vmatprep.subr.bf16.mxu0 %v1306_v6  ;;  %v1317_v13 = vld [vmem:[%s1648_s9 + $0xa8] ss:$16 sps:$4 sm:$0xff]   ;;  %v1318_v14 = vld [vmem:[%s1648_s9 + $0x84] ss:$16 sps:$4 sm:$0xff]   ;;  %v1320_v15 = vld [vmem:[%s1648_s9 + $0x8c] ss:$16 sps:$4 sm:$0xff]  }
  0x3e   : > { %919 = vmatprep.subr.bf16.mxu1 %v1308_v7  ;;  %v1322_v16 = vld [vmem:[%s1648_s9 + $0x80] ss:$16 sps:$4 sm:$0xff]   ;;  %v1323_v17 = vld [vmem:[%s1648_s9 + $0x88] ss:$16 sps:$4 sm:$0xff]   ;;  %v1324_v18 = vld [vmem:[%s1648_s9 + $0x64] ss:$16 sps:$4 sm:$0xff]  }
  0x3f   : > { %879 = vmatpush1.bf16.msra.mxu0 %v1310_v8  ;;  %v1326_v19 = vld [vmem:[%s1648_s9 + $0x6c] ss:$16 sps:$4 sm:$0xff]   ;;  %v1328_v20 = vld [vmem:[%s1648_s9 + $0x60] ss:$16 sps:$4 sm:$0xff]   ;;  %v1329_v21 = vld [vmem:[%s1648_s9 + $0x68] ss:$16 sps:$4 sm:$0xff]  }
  0x40   : > { %880 = vmatprep.subr.bf16.mxu0 %v1312_v10  ;;  %v1330_v22 = vld [vmem:[%s1648_s9 + $0x44] ss:$16 sps:$4 sm:$0xff]   ;;  %v1332_v23 = vld [vmem:[%s1648_s9 + $0x4c] ss:$16 sps:$4 sm:$0xff]   ;;  %v1334_v24 = vld [vmem:[%s1648_s9 + $0x40] ss:$16 sps:$4 sm:$0xff]  }
  0x41   : > { %920 = vmatpush1.bf16.msra.mxu1 %v1311_v9  ;;  %v1335_v25 = vld [vmem:[%s1648_s9 + $0x48] ss:$16 sps:$4 sm:$0xff]   ;;  %v1336_v26 = vld [vmem:[%s1648_s9 + $0x24] ss:$16 sps:$4 sm:$0xff]   ;;  %v1338_v27 = vld [vmem:[%s1648_s9 + $0x2c] ss:$16 sps:$4 sm:$0xff]  }
  0x42   : > { %921 = vmatprep.subr.bf16.mxu1 %v1314_v11  ;;  %v1340_v28 = vld [vmem:[%s1648_s9 + $0x20] ss:$16 sps:$4 sm:$0xff]   ;;  %v1341_v29 = vld [vmem:[%s1648_s9 + $0x28] ss:$16 sps:$4 sm:$0xff]   ;;  %v1342_v30 = vld [vmem:[%s1648_s9 + $0x4] ss:$16 sps:$4 sm:$0xff]  }
  0x43   : > { %881 = vmatpush1.bf16.msra.mxu0 %v1316_v12  ;;  %v1344_v31 = vld [vmem:[%s1648_s9 + $0xc] ss:$16 sps:$4 sm:$0xff]   ;;  %v1346_v32 = vld [vmem:[%s1648_s9] ss:$16 sps:$4 sm:$0xff]   ;;  %v1347_v33 = vld [vmem:[%s1648_s9 + $0x8] ss:$16 sps:$4 sm:$0xff]  }
  0x44   : > { %882 = vmatprep.subr.bf16.mxu0 %v1318_v14  ;;  %v1348_v34 = vld [vmem:[%s1648_s9 + $0x1e4] ss:$16 sps:$4 sm:$0xff]   ;;  %v1350_v35 = vld [vmem:[%s1648_s9 + $0x1ec] ss:$16 sps:$4 sm:$0xff]   ;;  %v1352_v36 = vld [vmem:[%s1648_s9 + $0x1e0] ss:$16 sps:$4 sm:$0xff]  }
  0x45   : > { %922 = vmatpush1.bf16.msra.mxu1 %v1317_v13  ;;  %v1353_v37 = vld [vmem:[%s1648_s9 + $0x1e8] ss:$16 sps:$4 sm:$0xff]   ;;  %v1354_v38 = vld [vmem:[%s1648_s9 + $0x1c4] ss:$16 sps:$4 sm:$0xff]   ;;  %v1356_v39 = vld [vmem:[%s1648_s9 + $0x1cc] ss:$16 sps:$4 sm:$0xff]  }
  0x46   : > { %923 = vmatprep.subr.bf16.mxu1 %v1320_v15  ;;  %v1358_v40 = vld [vmem:[%s1648_s9 + $0x1c0] ss:$16 sps:$4 sm:$0xff]   ;;  %v1359_v41 = vld [vmem:[%s1648_s9 + $0x1c8] ss:$16 sps:$4 sm:$0xff]   ;;  %v1360_v42 = vld [vmem:[%s1648_s9 + $0x1a4] ss:$16 sps:$4 sm:$0xff]  }
  0x47   : > { %883 = vmatpush1.bf16.msra.mxu0 %v1322_v16  ;;  %v1362_v43 = vld [vmem:[%s1648_s9 + $0x1ac] ss:$16 sps:$4 sm:$0xff]   ;;  %v1364_v44 = vld [vmem:[%s1648_s9 + $0x1a0] ss:$16 sps:$4 sm:$0xff]   ;;  %v1365_v45 = vld [vmem:[%s1648_s9 + $0x1a8] ss:$16 sps:$4 sm:$0xff]  }
  0x48   : > { %884 = vmatprep.subr.bf16.mxu0 %v1324_v18  ;;  %v1366_v46 = vld [vmem:[%s1648_s9 + $0x184] ss:$16 sps:$4 sm:$0xff]   ;;  %v1368_v47 = vld [vmem:[%s1648_s9 + $0x18c] ss:$16 sps:$4 sm:$0xff]   ;;  %v1370_v48 = vld [vmem:[%s1648_s9 + $0x180] ss:$16 sps:$4 sm:$0xff]  }
  0x49   : > { %924 = vmatpush1.bf16.msra.mxu1 %v1323_v17  ;;  %v1371_v49 = vld [vmem:[%s1648_s9 + $0x188] ss:$16 sps:$4 sm:$0xff]   ;;  %v1372_v50 = vld [vmem:[%s1648_s9 + $0x164] ss:$16 sps:$4 sm:$0xff]   ;;  %v1374_v51 = vld [vmem:[%s1648_s9 + $0x16c] ss:$16 sps:$4 sm:$0xff]  }
  0x4a   : > { %925 = vmatprep.subr.bf16.mxu1 %v1326_v19  ;;  %v1376_v52 = vld [vmem:[%s1648_s9 + $0x160] ss:$16 sps:$4 sm:$0xff]   ;;  %v1377_v53 = vld [vmem:[%s1648_s9 + $0x168] ss:$16 sps:$4 sm:$0xff]   ;;  %v1378_v54 = vld [vmem:[%s1648_s9 + $0x144] ss:$16 sps:$4 sm:$0xff]  }
  0x4b   : > { %885 = vmatpush1.bf16.msra.mxu0 %v1328_v20  ;;  %v1380_v55 = vld [vmem:[%s1648_s9 + $0x14c] ss:$16 sps:$4 sm:$0xff]   ;;  %v1382_v56 = vld [vmem:[%s1648_s9 + $0x140] ss:$16 sps:$4 sm:$0xff]   ;;  %v1383_v57 = vld [vmem:[%s1648_s9 + $0x148] ss:$16 sps:$4 sm:$0xff]  }
  0x4c   : > { %886 = vmatprep.subr.bf16.mxu0 %v1330_v22  ;;  %v1384_v58 = vld [vmem:[%s1648_s9 + $0x124] ss:$16 sps:$4 sm:$0xff]   ;;  %v1386_v59 = vld [vmem:[%s1648_s9 + $0x12c] ss:$16 sps:$4 sm:$0xff]   ;;  %v1388_v60 = vld [vmem:[%s1648_s9 + $0x120] ss:$16 sps:$4 sm:$0xff]  }
  0x4d   : > { %926 = vmatpush1.bf16.msra.mxu1 %v1329_v21  ;;  %v1389_v61 = vld [vmem:[%s1648_s9 + $0x128] ss:$16 sps:$4 sm:$0xff]   ;;  %v1390_v62 = vld [vmem:[%s1648_s9 + $0x104] ss:$16 sps:$4 sm:$0xff]   ;;  %v1392_v63 = vld [vmem:[%s1648_s9 + $0x10c] ss:$16 sps:$4 sm:$0xff]  }
  0x4e   : > { %927 = vmatprep.subr.bf16.mxu1 %v1332_v23  ;;  %v1394_v1 = vld [vmem:[%s1648_s9 + $0x100] ss:$16 sps:$4 sm:$0xff]   ;;  %v1395_v2 = vld [vmem:[%s1648_s9 + $0x108] ss:$16 sps:$4 sm:$0xff]   ;;  %v976_v5 = vshrl.u32 %v975_v4, 7  ;;  %s1184_s11 = sshll.u32 %s1761_s10, 2 }
  0x4f   : > { %887 = vmatpush1.bf16.msra.mxu0 %v1334_v24  ;;  %s460_s22 = scalar_lea.vmem %s1752_s3, %s1184_s11  ;;  %v973_v7 = vld [vmem:[%s450_s14] sm:$0xf]  ;;  %s470_s25 = scalar_lea.vmem %s1753_s4, %s1184_s11 }
  0x50   : > { %888 = vmatprep.subr.bf16.mxu0 %v1336_v26  ;;  %v977_v0 = vsub.s32 0, %v976_v5  ;;  %v985_v6 = vsub.s32 2, %v976_v5  ;;  %v981_v8 = vsub.s32 1, %v976_v5  ;;  %v989_v9 = vsub.s32 3, %v976_v5  ;;  %v999_v10 = vld [vmem:[%s460_s22] sm:$0xff]  ;;  %v1000_v11 = vld [vmem:[%s460_s22 + $0x8] sm:$0xff] }
  0x51   : > { %928 = vmatpush1.bf16.msra.mxu1 %v1335_v25  ;;  %v1001_v14 = vunpack.c.l.bf16 %v999_v10  ;;  %v1003_v15 = vunpack.c.l.bf16 %v1000_v11  ;;  %v1002_v22 = vunpack.c.h.bf16 %v999_v10  ;;  %v1004_v23 = vunpack.c.h.bf16 %v1000_v11 }
  0x52   : > { %929 = vmatprep.subr.bf16.mxu1 %v1338_v27  ;;  %v978_v12 = vrot.slane %v973_v7, %v977_v0  ;;  %v986_v13 = vrot.slane %v973_v7, %v985_v6  ;;  %v982_v16 = vrot.slane %v973_v7, %v981_v8  ;;  %v990_v17 = vrot.slane %v973_v7, %v989_v9 }
  0x53   : > { %889 = vmatpush1.bf16.msra.mxu0 %v1340_v28 }
  0x54   : > { %890 = vmatprep.subr.bf16.mxu0 %v1342_v30 }
  0x55   : > { %930 = vmatpush1.bf16.msra.mxu1 %v1341_v29 }
  0x56   : > { %931 = vmatprep.subr.bf16.mxu1 %v1344_v31 }
  0x57   : > { %891 = vmatpush1.bf16.msra.mxu0 %v1346_v32 }
  0x58   : > { %892 = vmatprep.subr.bf16.mxu0 %v1348_v34 }
  0x59   : > { %932 = vmatpush1.bf16.msra.mxu1 %v1347_v33 }
  0x5a   : > { %933 = vmatprep.subr.bf16.mxu1 %v1350_v35 }
  0x5b   : > { %893 = vmatpush2.bf16.msra.mxu0 %v1352_v36 }
  0x5c   : > { %894 = vmatprep.subr.bf16.mxu0 %v1354_v38 }
  0x5d   : > { %934 = vmatpush2.bf16.msra.mxu1 %v1353_v37 }
  0x5e   : > { %935 = vmatprep.subr.bf16.mxu1 %v1356_v39 }
  0x5f   : > { %895 = vmatpush2.bf16.msra.mxu0 %v1358_v40 }
  0x60   : > { %896 = vmatprep.subr.bf16.mxu0 %v1360_v42 }
  0x61   : > { %936 = vmatpush2.bf16.msra.mxu1 %v1359_v41 }
  0x62   : > { %937 = vmatprep.subr.bf16.mxu1 %v1362_v43 }
  0x63   : > { %897 = vmatpush2.bf16.msra.mxu0 %v1364_v44 }
  0x64   : > { %898 = vmatprep.subr.bf16.mxu0 %v1366_v46 }
  0x65   : > { %938 = vmatpush2.bf16.msra.mxu1 %v1365_v45 }
  0x66   : > { %939 = vmatprep.subr.bf16.mxu1 %v1368_v47 }
  0x67   : > { %899 = vmatpush2.bf16.msra.mxu0 %v1370_v48 }
  0x68   : > { %900 = vmatprep.subr.bf16.mxu0 %v1372_v50 }
  0x69   : > { %940 = vmatpush2.bf16.msra.mxu1 %v1371_v49 }
  0x6a   : > { %941 = vmatprep.subr.bf16.mxu1 %v1374_v51 }
  0x6b   : > { %901 = vmatpush2.bf16.msra.mxu0 %v1376_v52 }
  0x6c   : > { %902 = vmatprep.subr.bf16.mxu0 %v1378_v54 }
  0x6d   : > { %942 = vmatpush2.bf16.msra.mxu1 %v1377_v53 }
  0x6e   : > { %943 = vmatprep.subr.bf16.mxu1 %v1380_v55 }
  0x6f   : > { %903 = vmatpush2.bf16.msra.mxu0 %v1382_v56 }
  0x70   : > { %904 = vmatprep.subr.bf16.mxu0 %v1384_v58 }
  0x71   : > { %944 = vmatpush2.bf16.msra.mxu1 %v1383_v57 }
  0x72   : > { %945 = vmatprep.subr.bf16.mxu1 %v1386_v59 }
  0x73   : > { %905 = vmatpush2.bf16.msra.mxu0 %v1388_v60 }
  0x74   : > { %906 = vmatprep.subr.bf16.mxu0 %v1390_v62 }
  0x75   : > { %946 = vmatpush2.bf16.msra.mxu1 %v1389_v61 }
  0x76   : > { %947 = vmatprep.subr.bf16.mxu1 %v1392_v63 }
  0x77   : > { %907 = vmatpush2.bf16.msra.mxu0 %v1394_v1 }
  0x79   : > { %948 = vmatpush2.bf16.msra.mxu1 %v1395_v2 }
  0x7a   : > { %909 = vmatmul.mubr.bf16.vlgmr.msra.gmra.mxu0 %v1187_v3 }
  0x7c   : > { %950 = vmatmul.mubr.bf16.vlgmr.msra.gmra.mxu1 %v1187_v3 }
 0x13a   : > { %v910_v18 = vpop.f32.mrf.mxu0 }
 0x13b   : > { %v995_v20 = vadd.f32 %v978_v12, %v910_v18 }
 0x13c   : > { %v951_v19 = vpop.f32.mrf.mxu1  ;;  %v912_v24 = vpop.f32.mrf.mxu0 }
 0x13d   : > { %v997_v21 = vadd.f32 %v986_v13, %v951_v19  ;;  %v1005_v26 = vadd.f32 %v1001_v14, %v995_v20  ;;  %v996_v28 = vadd.f32 %v982_v16, %v912_v24 }
 0x13e   : > { %v953_v25 = vpop.f32.mrf.mxu1  ;;  %v914_v30 = vpop.f32.mrf.mxu0 }
 0x13f   : > { %v1007_v27 = vadd.f32 %v1003_v15, %v997_v21  ;;  %v998_v29 = vadd.f32 %v990_v17, %v953_v25  ;;  %v1006_v33 = vadd.f32 %v1002_v22, %v996_v28  ;;  %v1009_v37 = vmax.f32 %v1005_v26, 0.0 }
 0x140   : > { %v955_v31 = vpop.f32.mrf.mxu1  ;;  %v915_v35 = vpop.f32.mrf.mxu0 }
 0x141   : > { %v1011_v32 = vmax.f32 %v1007_v27, 0.0  ;;  %v1008_v34 = vadd.f32 %v1004_v23, %v998_v29  ;;  %v1010_v38 = vmax.f32 %v1006_v33, 0.0 }
 0x142   : > { %v956_v36 = vpop.f32.mrf.mxu1 }
 0x143   : > { %v1012_v39 = vmax.f32 %v1008_v34, 0.0  ;;  %v1258_v40 = vpack.c.bf16 %v1010_v38, %v1009_v37 }
 0x145   : > { %v1259_v41 = vpack.c.bf16 %v1012_v39, %v1011_v32  ;;  %1029 = vst [vmem:[%s470_s25] sm:$0xff] %v1258_v40 }
 0x147   : > { %1030 = vst [vmem:[%s470_s25 + $0x8] sm:$0xff] %v1259_v41 }
 0x148 PF: > { %s14_s19 = sadd.s32 1, %s1436_s19   ;;  %s1754_s15 = smov %s1424_s16 }
 0x149   : > { %p11_p10 = scmp.ge.s32.totalorder %s14_s19, 4   ;;  %s1755_s16 = smov %s1498_s23 }
 0x14a   : > { %s1756_s17 = smov %s1432_s18  ;;  %s1757_s18 = smov %s1759_s20 }
 0x14b   :  { %13 = sbr.rel (!%p11_p10) target bundleno = 3 (0x3), region = 111 }

// kernel: _lambda_.71
= control target key start
LH: loop header
LB: loop body
LE: loop exit
PB: predicated region body
PF: predicated region fallthrough
CT: control target
= control target key end

     0   :  { %s1176_s12 = smov 0   ;;  %s1178_s13 = smov 0   ;;  %s1291_s0 = inlined_call_operand.vmem [shape: bf16[8,1024], index: 0, kind: input, shape index: {}]   ;;  %s1292_s1 = inlined_call_operand.vmem [shape: bf16[1024,256], index: 1, kind: input, shape index: {}]   ;;  %s1293_s2 = inlined_call_operand.vmem [shape: f32[1,256], index: 2, kind: input, shape index: {}]   ;;  %s1294_s3 = inlined_call_operand.vmem [shape: bf16[8,256], index: 3, kind: output, shape index: {}]  }
   0x1   :  { %s1180_s14 = smov 0  }
   0x2 LB: > { %s25_s15 = sadd.s32 1, %s1149_s13  ;;  %p923_p0 = scmp.ge.s32.totalorder %s1153_s14, 1  ;;  %s1153_s14 = sphi %s1180_s14, %s13_s14   ;;  %s1149_s13 = sphi %s1178_s13, %s1296_s13   ;;  %s1145_s12 = sphi %s1176_s12, %s1295_s12  }
   0x3   : > { %p26_p1 = scmp.ge.s32.totalorder %s25_s15, 2  ;;  %p194_p2 = scmp.lt.s32.totalorder %s1153_s14, 3 }
   0x5   : > { %s1298_s15 = smov (%p26_p1, %s25_s15), 0  ;;  %p195_p3 = pnand %p923_p0, %p194_p2 }
   0x6   : > { %s924_s16 = sshll.u32 (!%p195_p3), %s1145_s12, 2  ;;  %s926_s17 = sshll.u32 (!%p195_p3), %s1145_s12, 6 }
   0x7   : > { %198 = sbr.rel (%p195_p3) target bundleno = 303 (0x12f), region = 32  ;;  %p243_p4 = scmp.lt.s32.totalorder (!%p195_p3), %s924_s16, 7 }
   0x8   : > { %p252_p5 = scmp.lt.s32.totalorder (!%p195_p3), %s926_s17, 127  ;;  %p929_p6 = scmp.ne.s32.totalorder (!%p195_p3), %s1145_s12, 0 }
   0xc   : > { %s1300_s16 = smov (!%p243_p4, %s924_s16), 7  ;;  %s1302_s17 = smov (!%p252_p5, %s926_s17), 127 }
   0xd   : > { %s925_s18 = sshll.u32 %s1300_s16, 2  ;;  %s1004_s22 = sshll.u32 %s1302_s17, 3 }
   0xe   : > { %s1201_s21 = scalar_lea.vmem %s1291_s0, %s925_s18  ;;  %s1206_s25 = scalar_lea.vmem %s1292_s1, %s1004_s22 }
   0xf   : > { %280 = sbr.rel (%p929_p6) target bundleno = 22 (0x16), region = 36 }
  0x14   : > { %v1155_v0 = vmov 0.0  }
  0x15   : > { %281 = vst [vmem:[#allocation2] sm:$0xff] %v1155_v0  ;;  %282 = vst [vmem:[#allocation2 + $0x8] sm:$0xff] %v1155_v0 }
  0x16 PF: > { %v1031_v1 = vld [vmem:[%s1206_s25 + $0x74] ss:$8 sps:$4 sm:$0xff]   ;;  %v1035_v3 = vld [vmem:[%s1206_s25 + $0x70] ss:$8 sps:$4 sm:$0xff]   ;;  %v1037_v5 = vld [vmem:[%s1206_s25 + $0x64] ss:$8 sps:$4 sm:$0xff]  }
  0x17   : > { %v1033_v2 = vld [vmem:[%s1206_s25 + $0x174] ss:$8 sps:$4 sm:$0xff]   ;;  %685 = vmatprep.subr.bf16.mxu0 %v1031_v1  ;;  %v1036_v4 = vld [vmem:[%s1206_s25 + $0x170] ss:$8 sps:$4 sm:$0xff]   ;;  %v1039_v6 = vld [vmem:[%s1206_s25 + $0x164] ss:$8 sps:$4 sm:$0xff]  }
  0x18   : > { %726 = vmatprep.subr.bf16.mxu1 %v1033_v2  ;;  %686 = vmatpush1.bf16.msra.mxu0 %v1035_v3  ;;  %v1041_v7 = vld [vmem:[%s1206_s25 + $0x60] ss:$8 sps:$4 sm:$0xff]   ;;  %v1043_v9 = vld [vmem:[%s1206_s25 + $0x54] ss:$8 sps:$4 sm:$0xff]   ;;  %v1047_v11 = vld [vmem:[%s1206_s25 + $0x50] ss:$8 sps:$4 sm:$0xff]  }
  0x19   : > { %727 = vmatpush1.bf16.msra.mxu1 %v1036_v4  ;;  %687 = vmatprep.subr.bf16.mxu0 %v1037_v5  ;;  %v1042_v8 = vld [vmem:[%s1206_s25 + $0x160] ss:$8 sps:$4 sm:$0xff]   ;;  %v1045_v10 = vld [vmem:[%s1206_s25 + $0x154] ss:$8 sps:$4 sm:$0xff]   ;;  %v1048_v12 = vld [vmem:[%s1206_s25 + $0x150] ss:$8 sps:$4 sm:$0xff]  }
  0x1a   : > { %728 = vmatprep.subr.bf16.mxu1 %v1039_v6  ;;  %v1049_v13 = vld [vmem:[%s1206_s25 + $0x44] ss:$8 sps:$4 sm:$0xff]   ;;  %v1053_v15 = vld [vmem:[%s1206_s25 + $0x40] ss:$8 sps:$4 sm:$0xff]   ;;  %v1055_v17 = vld [vmem:[%s1206_s25 + $0x34] ss:$8 sps:$4 sm:$0xff]  }
  0x1b   : > { %v1051_v14 = vld [vmem:[%s1206_s25 + $0x144] ss:$8 sps:$4 sm:$0xff]   ;;  %v1054_v16 = vld [vmem:[%s1206_s25 + $0x140] ss:$8 sps:$4 sm:$0xff]   ;;  %v1057_v18 = vld [vmem:[%s1206_s25 + $0x134] ss:$8 sps:$4 sm:$0xff]  }
  0x1c   : > { %688 = vmatpush1.bf16.msra.mxu0 %v1041_v7  ;;  %v1059_v19 = vld [vmem:[%s1206_s25 + $0x30] ss:$8 sps:$4 sm:$0xff]   ;;  %v1061_v21 = vld [vmem:[%s1206_s25 + $0x24] ss:$8 sps:$4 sm:$0xff]   ;;  %v1065_v23 = vld [vmem:[%s1206_s25 + $0x20] ss:$8 sps:$4 sm:$0xff]  }
  0x1d   : > { %729 = vmatpush1.bf16.msra.mxu1 %v1042_v8  ;;  %689 = vmatprep.subr.bf16.mxu0 %v1043_v9  ;;  %v1060_v20 = vld [vmem:[%s1206_s25 + $0x130] ss:$8 sps:$4 sm:$0xff]   ;;  %v1063_v22 = vld [vmem:[%s1206_s25 + $0x124] ss:$8 sps:$4 sm:$0xff]   ;;  %v1066_v24 = vld [vmem:[%s1206_s25 + $0x120] ss:$8 sps:$4 sm:$0xff]  }
  0x1e   : > { %730 = vmatprep.subr.bf16.mxu1 %v1045_v10  ;;  %v1067_v25 = vld [vmem:[%s1206_s25 + $0x14] ss:$8 sps:$4 sm:$0xff]   ;;  %v1071_v27 = vld [vmem:[%s1206_s25 + $0x10] ss:$8 sps:$4 sm:$0xff]   ;;  %v1073_v29 = vld [vmem:[%s1206_s25 + $0x4] ss:$8 sps:$4 sm:$0xff]  }
  0x1f   : > { %v1069_v26 = vld [vmem:[%s1206_s25 + $0x114] ss:$8 sps:$4 sm:$0xff]   ;;  %v1072_v28 = vld [vmem:[%s1206_s25 + $0x110] ss:$8 sps:$4 sm:$0xff]   ;;  %v1075_v30 = vld [vmem:[%s1206_s25 + $0x104] ss:$8 sps:$4 sm:$0xff]  }
  0x20   : > { %690 = vmatpush1.bf16.msra.mxu0 %v1047_v11  ;;  %v1077_v31 = vld [vmem:[%s1206_s25] ss:$8 sps:$4 sm:$0xff]   ;;  %v1079_v33 = vld [vmem:[%s1206_s25 + $0xf4] ss:$8 sps:$4 sm:$0xff]   ;;  %v1083_v35 = vld [vmem:[%s1206_s25 + $0xf0] ss:$8 sps:$4 sm:$0xff]  }
  0x21   : > { %731 = vmatpush1.bf16.msra.mxu1 %v1048_v12  ;;  %691 = vmatprep.subr.bf16.mxu0 %v1049_v13  ;;  %v1078_v32 = vld [vmem:[%s1206_s25 + $0x100] ss:$8 sps:$4 sm:$0xff]   ;;  %v1081_v34 = vld [vmem:[%s1206_s25 + $0x1f4] ss:$8 sps:$4 sm:$0xff]   ;;  %v1084_v36 = vld [vmem:[%s1206_s25 + $0x1f0] ss:$8 sps:$4 sm:$0xff]  }
  0x22   : > { %732 = vmatprep.subr.bf16.mxu1 %v1051_v14  ;;  %v1085_v37 = vld [vmem:[%s1206_s25 + $0xe4] ss:$8 sps:$4 sm:$0xff]   ;;  %v1089_v39 = vld [vmem:[%s1206_s25 + $0xe0] ss:$8 sps:$4 sm:$0xff]   ;;  %v1091_v41 = vld [vmem:[%s1206_s25 + $0xd4] ss:$8 sps:$4 sm:$0xff]  }
  0x23   : > { %v1087_v38 = vld [vmem:[%s1206_s25 + $0x1e4] ss:$8 sps:$4 sm:$0xff]   ;;  %v1090_v40 = vld [vmem:[%s1206_s25 + $0x1e0] ss:$8 sps:$4 sm:$0xff]   ;;  %v1093_v42 = vld [vmem:[%s1206_s25 + $0x1d4] ss:$8 sps:$4 sm:$0xff]  }
  0x24   : > { %692 = vmatpush1.bf16.msra.mxu0 %v1053_v15  ;;  %v1095_v43 = vld [vmem:[%s1206_s25 + $0xd0] ss:$8 sps:$4 sm:$0xff]   ;;  %v1097_v45 = vld [vmem:[%s1206_s25 + $0xc4] ss:$8 sps:$4 sm:$0xff]   ;;  %v1101_v50 = vld [vmem:[%s1206_s25 + $0xc0] ss:$8 sps:$4 sm:$0xff]  }
  0x25   : > { %733 = vmatpush1.bf16.msra.mxu1 %v1054_v16  ;;  %693 = vmatprep.subr.bf16.mxu0 %v1055_v17  ;;  %v1096_v44 = vld [vmem:[%s1206_s25 + $0x1d0] ss:$8 sps:$4 sm:$0xff]   ;;  %v1099_v46 = vld [vmem:[%s1206_s25 + $0x1c4] ss:$8 sps:$4 sm:$0xff]   ;;  %v1102_v51 = vld [vmem:[%s1206_s25 + $0x1c0] ss:$8 sps:$4 sm:$0xff]  }
  0x26   : > { %734 = vmatprep.subr.bf16.mxu1 %v1057_v18  ;;  %v285_v47 = vld [vmem:[%s1201_s21] sm:$0xff]  ;;  %v286_v49 = vld [vmem:[%s1201_s21 + $0x8] sm:$0xff]  ;;  %v1103_v53 = vld [vmem:[%s1206_s25 + $0xb4] ss:$8 sps:$4 sm:$0xff]   ;;  %p998_p7 = scmp.ne.s32.totalorder %s1145_s12, 1 }
  0x27   : > { %v931_v48 = vcombine.high %v285_v47, %v285_v47  ;;  %v933_v52 = vcombine.high %v286_v49, %v286_v49  ;;  %v1105_v54 = vld [vmem:[%s1206_s25 + $0x1b4] ss:$8 sps:$4 sm:$0xff]   ;;  %v1107_v55 = vld [vmem:[%s1206_s25 + $0xb0] ss:$8 sps:$4 sm:$0xff]   ;;  %v1109_v57 = vld [vmem:[%s1206_s25 + $0xa4] ss:$8 sps:$4 sm:$0xff]   ;;  %v930_v5 = vcombine.low %v285_v47, %v285_v47  ;;  %v932_v6 = vcombine.low %v286_v49, %v286_v49 }
  0x28   : > { %694 = vmatpush1.bf16.msra.mxu0 %v1059_v19  ;;  %v1108_v56 = vld [vmem:[%s1206_s25 + $0x1b0] ss:$8 sps:$4 sm:$0xff]   ;;  %v1111_v58 = vld [vmem:[%s1206_s25 + $0x1a4] ss:$8 sps:$4 sm:$0xff]   ;;  %v1113_v59 = vld [vmem:[%s1206_s25 + $0xa0] ss:$8 sps:$4 sm:$0xff]  }
  0x29   : > { %735 = vmatpush1.bf16.msra.mxu1 %v1060_v20  ;;  %695 = vmatprep.subr.bf16.mxu0 %v1061_v21  ;;  %v1114_v60 = vld [vmem:[%s1206_s25 + $0x1a0] ss:$8 sps:$4 sm:$0xff]   ;;  %v1115_v61 = vld [vmem:[%s1206_s25 + $0x94] ss:$8 sps:$4 sm:$0xff]   ;;  %v1119_v63 = vld [vmem:[%s1206_s25 + $0x90] ss:$8 sps:$4 sm:$0xff]  }
  0x2a   : > { %736 = vmatprep.subr.bf16.mxu1 %v1063_v22  ;;  %717 = vmatprep.mubr.bf16.mxu0 %v931_v48  ;;  %v1117_v62 = vld [vmem:[%s1206_s25 + $0x194] ss:$8 sps:$4 sm:$0xff]   ;;  %v1120_v0 = vld [vmem:[%s1206_s25 + $0x190] ss:$8 sps:$4 sm:$0xff]   ;;  %v1121_v1 = vld [vmem:[%s1206_s25 + $0x84] ss:$8 sps:$4 sm:$0xff]  }
  0x2b   : > { %758 = vmatprep.mubr.bf16.mxu1 %v933_v52  ;;  %v1123_v2 = vld [vmem:[%s1206_s25 + $0x184] ss:$8 sps:$4 sm:$0xff]   ;;  %v1125_v3 = vld [vmem:[%s1206_s25 + $0x80] ss:$8 sps:$4 sm:$0xff]   ;;  %v284_v12 = vld [vmem:[#allocation2 + $0x8] sm:$0xff] }
  0x2c   : > { %696 = vmatpush1.bf16.msra.mxu0 %v1065_v23  ;;  %v1126_v4 = vld [vmem:[%s1206_s25 + $0x180] ss:$8 sps:$4 sm:$0xff]  }
  0x2d   : > { %737 = vmatpush1.bf16.msra.mxu1 %v1066_v24  ;;  %697 = vmatprep.subr.bf16.mxu0 %v1067_v25  ;;  %v283_v8 = vld [vmem:[#allocation2] sm:$0xff] }
  0x2e   : > { %738 = vmatprep.subr.bf16.mxu1 %v1069_v26 }
  0x30   : > { %698 = vmatpush1.bf16.msra.mxu0 %v1071_v27 }
  0x31   : > { %739 = vmatpush1.bf16.msra.mxu1 %v1072_v28  ;;  %699 = vmatprep.subr.bf16.mxu0 %v1073_v29 }
  0x32   : > { %740 = vmatprep.subr.bf16.mxu1 %v1075_v30 }
  0x34   : > { %700 = vmatpush1.bf16.msra.mxu0 %v1077_v31 }
  0x35   : > { %741 = vmatpush1.bf16.msra.mxu1 %v1078_v32  ;;  %701 = vmatprep.subr.bf16.mxu0 %v1079_v33 }
  0x36   : > { %742 = vmatprep.subr.bf16.mxu1 %v1081_v34 }
  0x38   : > { %702 = vmatpush2.bf16.msra.mxu0 %v1083_v35 }
  0x39   : > { %743 = vmatpush2.bf16.msra.mxu1 %v1084_v36  ;;  %703 = vmatprep.subr.bf16.mxu0 %v1085_v37 }
  0x3a   : > { %744 = vmatprep.subr.bf16.mxu1 %v1087_v38 }
  0x3c   : > { %704 = vmatpush2.bf16.msra.mxu0 %v1089_v39 }
  0x3d   : > { %745 = vmatpush2.bf16.msra.mxu1 %v1090_v40  ;;  %705 = vmatprep.subr.bf16.mxu0 %v1091_v41 }
  0x3e   : > { %746 = vmatprep.subr.bf16.mxu1 %v1093_v42 }
  0x40   : > { %706 = vmatpush2.bf16.msra.mxu0 %v1095_v43 }
  0x41   : > { %747 = vmatpush2.bf16.msra.mxu1 %v1096_v44  ;;  %707 = vmatprep.subr.bf16.mxu0 %v1097_v45 }
  0x42   : > { %748 = vmatprep.subr.bf16.mxu1 %v1099_v46 }
  0x44   : > { %708 = vmatpush2.bf16.msra.mxu0 %v1101_v50 }
  0x45   : > { %749 = vmatpush2.bf16.msra.mxu1 %v1102_v51  ;;  %709 = vmatprep.subr.bf16.mxu0 %v1103_v53 }
  0x46   : > { %750 = vmatprep.subr.bf16.mxu1 %v1105_v54 }
  0x48   : > { %710 = vmatpush2.bf16.msra.mxu0 %v1107_v55 }
  0x49   : > { %751 = vmatpush2.bf16.msra.mxu1 %v1108_v56  ;;  %711 = vmatprep.subr.bf16.mxu0 %v1109_v57 }
  0x4a   : > { %752 = vmatprep.subr.bf16.mxu1 %v1111_v58 }
  0x4c   : > { %712 = vmatpush2.bf16.msra.mxu0 %v1113_v59 }
  0x4d   : > { %753 = vmatpush2.bf16.msra.mxu1 %v1114_v60  ;;  %713 = vmatprep.subr.bf16.mxu0 %v1115_v61 }
  0x4e   : > { %754 = vmatprep.subr.bf16.mxu1 %v1117_v62 }
  0x50   : > { %714 = vmatpush2.bf16.msra.mxu0 %v1119_v63 }
  0x51   : > { %755 = vmatpush2.bf16.msra.mxu1 %v1120_v0  ;;  %715 = vmatprep.subr.bf16.mxu0 %v1121_v1 }
  0x52   : > { %756 = vmatprep.subr.bf16.mxu1 %v1123_v2 }
  0x54   : > { %716 = vmatpush2.bf16.msra.mxu0 %v1125_v3 }
  0x55   : > { %757 = vmatpush2.bf16.msra.mxu1 %v1126_v4 }
  0x57   : > { %718 = vmatmul.mubr.bf16.vlgmr.msra.gmra.mxu0 %v930_v5 }
  0x58   : > { %759 = vmatmul.mubr.bf16.vlgmr.msra.gmra.mxu1 %v932_v6 }
 0x117   : > { %v719_v7 = vpop.f32.mrf.mxu0 }
 0x118   : > { %v760_v9 = vpop.f32.mrf.mxu1 }
 0x119   : > { %v761_v10 = vadd.f32 %v760_v9, %v719_v7  ;;  %v721_v11 = vpop.f32.mrf.mxu0 }
 0x11a   : > { %v762_v13 = vpop.f32.mrf.mxu1 }
 0x11b   : > { %v767_v14 = vadd.f32 %v761_v10, %v283_v8  ;;  %v763_v15 = vadd.f32 %v762_v13, %v721_v11  ;;  %v723_v16 = vpop.f32.mrf.mxu0  ;;  %774 = sbr.rel (%p998_p7) target bundleno = 303 (0x12f), region = 40 }
 0x11c   : > { %v764_v17 = vpop.f32.mrf.mxu1 }
 0x11d   : > { %769 = vst [vmem:[#allocation2] sm:$0xff] %v767_v14  ;;  %v768_v18 = vadd.f32 %v763_v15, %v284_v12  ;;  %v724_v19 = vpop.f32.mrf.mxu0 }
 0x11e   : > { %v765_v20 = vpop.f32.mrf.mxu1 }
 0x11f   : > { %770 = vst [vmem:[#allocation2 + $0x8] sm:$0xff] %v768_v18 }
 0x120   : > { %v779_v21 = vlaneseq  ;;  %v777_v23 = vld [vmem:[%s1293_s2] sm:$0x3] }
 0x122   : > { %v780_v22 = vshrl.u32 %v779_v21, 7 }
 0x124   : > { %v781_v24 = vsub.s32 0, %v780_v22  ;;  %v785_v25 = vsub.s32 1, %v780_v22  ;;  %v775_v26 = vld [vmem:[#allocation2] sm:$0xff] }
 0x126   : > { %v776_v27 = vld [vmem:[#allocation2 + $0x8] sm:$0xff]  ;;  %v782_v28 = vrot.slane %v777_v23, %v781_v24  ;;  %v786_v29 = vrot.slane %v777_v23, %v785_v25 }
 0x128   : > { %v789_v30 = vadd.f32 %v782_v28, %v775_v26  ;;  %v790_v31 = vadd.f32 %v786_v29, %v776_v27 }
 0x12a   : > { %v791_v32 = vmax.f32 %v789_v30, 0.0  ;;  %v792_v33 = vmax.f32 %v790_v31, 0.0 }
 0x12c   : > { %v1005_v34 = vpack.c.bf16 %v792_v33, %v791_v32 }
 0x12e   : > { %801 = vst [vmem:[%s1294_s3] sm:$0xff] %v1005_v34 }
 0x12f PF: > { %s13_s14 = sadd.s32 1, %s1153_s14   ;;  %s1295_s12 = smov %s1149_s13 }
 0x130   : > { %p10_p8 = scmp.ge.s32.totalorder %s13_s14, 4   ;;  %s1296_s13 = smov %s1298_s15 }
 0x132   :  { %12 = sbr.rel (!%p10_p8) target bundleno = 2 (0x2), region = 76 }

</bundles_post_ra>
